<compile_context>
chip_gen: v6e
topology: v6e:2x2x1
jax: 0.10.0
libtpu: 0.0.40
codegen_flags: <defaults>
</compile_context>

<pallas_src>
import jax
import jax.numpy as jnp
from jax import lax
from jax.experimental import pallas as pl
from jax.experimental.pallas import tpu as pltpu

_LANES = 128   # channel tile (lane width)
_PAD = 3       # halo of the folded 7x7 kernel
_STRIP = 8     # preferred row-strip height inside the kernel


def _ppeg_kernel(x_ref, w_ref, b_ref, o_ref, xs_ref):
    # x_ref : (H, W, tC)       unpadded image block (batch dim squeezed), caller dtype
    # w_ref : (49, tC)         folded 7x7 depthwise weights, row-major (dy, dx), f32
    # b_ref : (1, tC)          combined bias (b7 + b5 + b3), f32
    # o_ref : (H, W, tC)       output block, caller dtype
    # xs_ref: (H+6, W+6, tC)   f32 VMEM scratch holding the zero-padded image
    H, W, tC = o_ref.shape

    # Build the zero halo in VMEM (replaces a jnp.pad read+write pass over HBM).
    xs_ref[...] = jnp.zeros(xs_ref.shape, xs_ref.dtype)
    xs_ref[_PAD:_PAD + H, _PAD:_PAD + W, :] = x_ref[...].astype(jnp.float32)

    w = w_ref[...].astype(jnp.float32)                       # (49, tC)

    th = _STRIP if (H % _STRIP == 0) else H                  # static strip height
    n_strips = H // th

    # Hoisted bias broadcast: the initial value of every strip accumulator.
    bias_tile = jnp.broadcast_to(b_ref[...].astype(jnp.float32), (th, W, tC))

    def strip_body(s, carry):
        r0 = pl.multiple_of(s * th, th)
        acc = bias_tile                                      # (th, W, tC) f32
        for dy in range(7):
            # Load each tap-row slab once; dx shifts are cheap value slices of it.
            rows = xs_ref[pl.ds(r0 + dy, th), :, :]          # (th, W+6, tC) f32
            for dx in range(7):
                acc = acc + rows[:, dx:dx + W, :] * w[7 * dy + dx]
        o_ref[pl.ds(r0, th), :, :] = acc.astype(o_ref.dtype)
        return carry

    lax.fori_loop(0, n_strips, strip_body, 0)


def _fold_weights(w7, w5, w3, bias):
    """Fold conv7 + identity + conv5 + conv3 into one 7x7 depthwise kernel + one bias."""
    C = w7.shape[-1]
    w = w7.reshape(7, 7, C).astype(jnp.float32)
    w = w.at[1:6, 1:6, :].add(w5.reshape(5, 5, C).astype(jnp.float32))
    w = w.at[2:5, 2:5, :].add(w3.reshape(3, 3, C).astype(jnp.float32))
    w = w.at[3, 3, :].add(1.0)                                    # identity (the "+ cnn_feat")
    b = jnp.sum(bias.astype(jnp.float32), axis=0, keepdims=True)  # (1, C)
    return w.reshape(49, C), b


def ppeg_conv_pallas(img, w_folded, b_folded):
    """img: (B, H, W, C).  Returns the folded depthwise-conv output, same shape/dtype."""
    B, H, W, C = img.shape

    # Pad channels up to a multiple of 128 so stores are lane-dense. Padded channels carry
    # zero input/weights/bias -> their output is zero and is sliced off below.
    Cp = ((C + _LANES - 1) // _LANES) * _LANES
    if Cp != C:
        img = jnp.pad(img, ((0, 0), (0, 0), (0, 0), (0, Cp - C)))
        w_folded = jnp.pad(w_folded, ((0, 0), (0, Cp - C)))
        b_folded = jnp.pad(b_folded, ((0, 0), (0, Cp - C)))
    tC = _LANES
    n_ct = Cp // tC

    out = pl.pallas_call(
        _ppeg_kernel,
        out_shape=jax.ShapeDtypeStruct((B, H, W, Cp), img.dtype),
        grid_spec=pltpu.PrefetchScalarGridSpec(
            num_scalar_prefetch=0,
            grid=(B, n_ct),
            in_specs=[
                pl.BlockSpec((None, H, W, tC), lambda b, c: (b, 0, 0, c)),
                pl.BlockSpec((49, tC), lambda b, c: (0, c)),
                pl.BlockSpec((1, tC), lambda b, c: (0, c)),
            ],
            out_specs=pl.BlockSpec((None, H, W, tC), lambda b, c: (b, 0, 0, c)),
            scratch_shapes=[
                pltpu.VMEM((H + 2 * _PAD, W + 2 * _PAD, tC), jnp.float32),
            ],
        ),
        compiler_params=pltpu.CompilerParams(
            dimension_semantics=("parallel", "parallel")),
    )(img, w_folded, b_folded)

    return out[..., :C] if Cp != C else out


def ppeg_forward(x, H, W, params):
    """x: (B, N, C) with N = 1 + H*W.  Returns (B, N, C)."""
    B, N, C = x.shape
    cls_tok = x[:, :1, :]                       # (B, 1, C)
    img = x[:, 1:, :].reshape(B, H, W, C)       # NHWC (channels on the lane axis)
    w_folded, b_folded = _fold_weights(
        params["w7"], params["w5"], params["w3"], params["bias"])
    y = ppeg_conv_pallas(img, w_folded, b_folded)
    return jnp.concatenate([cls_tok, y.reshape(B, H * W, C)], axis=1)


# ---------------- pure-JAX reference (unfolded, for correctness check) ----------------
def _depthwise_conv_ref(img, w_kkc, b):
    K = w_kkc.shape[0]
    C = img.shape[-1]
    rhs = w_kkc.reshape(K, K, 1, C)
    out = lax.conv_general_dilated(
        img, rhs, window_strides=(1, 1), padding="SAME",
        dimension_numbers=("NHWC", "HWIO", "NHWC"),
        feature_group_count=C)
    return out + b


def ppeg_forward_ref(x, H, W, params):
    B, N, C = x.shape
    cls_tok = x[:, :1, :]
    img = x[:, 1:, :].reshape(B, H, W, C)
    y = (_depthwise_conv_ref(img, params["w7"].reshape(7, 7, C), params["bias"][0])
         + img
         + _depthwise_conv_ref(img, params["w5"].reshape(5, 5, C), params["bias"][1])
         + _depthwise_conv_ref(img, params["w3"].reshape(3, 3, C), params["bias"][2]))
    return jnp.concatenate([cls_tok, y.reshape(B, H * W, C)], axis=1)


if __name__ == "__main__":
    # C=128 keeps the channel axis lane-dense; H=16 exercises the 2-strip row loop.
    B, C, H, W = 2, 128, 16, 16
    N = 1 + H * W

    key = jax.random.PRNGKey(0)
    kx, k7, k5, k3, kb = jax.random.split(key, 5)

    x = jax.random.normal(kx, (B, N, C), dtype=jnp.float32)

    # Depthwise Conv2d(dim, dim, K, groups=dim) weights: PyTorch shape (C, 1, K, K),
    # stored here as (K*K, C) with row-major (ky, kx) kernel index.
    params = {
        "w7": 0.05 * jax.random.normal(k7, (49, C), dtype=jnp.float32),
        "w5": 0.05 * jax.random.normal(k5, (25, C), dtype=jnp.float32),
        "w3": 0.05 * jax.random.normal(k3, (9, C), dtype=jnp.float32),
        "bias": 0.05 * jax.random.normal(kb, (3, C), dtype=jnp.float32),
    }

    fwd = jax.jit(ppeg_forward, static_argnums=(1, 2))

    # f32 I/O: strict check against the unfolded pure-JAX reference.
    out = jax.block_until_ready(fwd(x, H, W, params))
    ref = jax.block_until_ready(ppeg_forward_ref(x, H, W, params))
    assert out.shape == (B, N, C), out.shape
    assert jnp.allclose(out, ref, atol=1e-4, rtol=1e-4), float(jnp.max(jnp.abs(out - ref)))

    # bf16 I/O (f32 accumulation inside the kernel): loose check.
    x_bf16 = x.astype(jnp.bfloat16)
    out_bf16 = jax.block_until_ready(fwd(x_bf16, H, W, params))
    ref_bf16 = ppeg_forward_ref(x_bf16.astype(jnp.float32), H, W, params)
    assert out_bf16.dtype == jnp.bfloat16
    assert jnp.allclose(out_bf16.astype(jnp.float32), ref_bf16, atol=5e-2, rtol=5e-2), \
        float(jnp.max(jnp.abs(out_bf16.astype(jnp.float32) - ref_bf16)))

    print("KERNEL_OK")
</pallas_src>

<mosaic_0001>
module attributes {stable_mosaic.version = 11 : i64} {
  func.func @_ppeg_kernel(%arg0: i32, %arg1: i32, %arg2: memref<1x16x16x128xf32, #tpu.memory_space<vmem>>, %arg3: memref<49x128xf32, #tpu.memory_space<vmem>>, %arg4: memref<1x128xf32, #tpu.memory_space<vmem>>, %arg5: memref<1x16x16x128xf32, #tpu.memory_space<vmem>>, %arg6: memref<22x22x128xf32, #tpu.memory_space<vmem>>) attributes {dimension_semantics = [#tpu.dimension_semantics<parallel>, #tpu.dimension_semantics<parallel>], iteration_bounds = array<i64: 2, 1>, scalar_prefetch = 0 : i64, scratch_operands = 1 : i64, tpu.core_type = #tpu.core_type<tc>, window_params = [{transform_indices = @transform_0, window_bounds = array<i64: 1, 16, 16, 128>}, {transform_indices = @transform_1, window_bounds = array<i64: 49, 128>}, {transform_indices = @transform_2, window_bounds = array<i64: 1, 128>}, {transform_indices = @transform_3, window_bounds = array<i64: 1, 16, 16, 128>}]} {
    %cst = arith.constant 0.000000e+00 : f32
    %0 = vector.broadcast %cst : f32 to vector<22x22x128xf32>
    %c0 = arith.constant 0 : index
    %c0_0 = arith.constant 0 : index
    %c0_1 = arith.constant 0 : index
    %1 = vector.load %arg6[%c0, %c0_0, %c0_1] : memref<22x22x128xf32, #tpu.memory_space<vmem>>, vector<22x22x128xf32>
    tpu.vector_store %arg6[%c0, %c0_0, %c0_1], %0 {strides = array<i32>} : memref<22x22x128xf32, #tpu.memory_space<vmem>>, vector<22x22x128xf32>,
    %c0_2 = arith.constant 0 : index
    %c0_3 = arith.constant 0 : index
    %c0_4 = arith.constant 0 : index
    %c0_5 = arith.constant 0 : index
    %2 = vector.load %arg2[%c0_2, %c0_3, %c0_4, %c0_5] : memref<1x16x16x128xf32, #tpu.memory_space<vmem>>, vector<1x16x16x128xf32>
    %3 = vector.shape_cast %2 : vector<1x16x16x128xf32> to vector<16x16x128xf32>
    %c3 = arith.constant 3 : index
    %c3_6 = arith.constant 3 : index
    %c0_7 = arith.constant 0 : index
    %4 = vector.load %arg6[%c3, %c3_6, %c0_7] : memref<22x22x128xf32, #tpu.memory_space<vmem>>, vector<16x16x128xf32>
    tpu.vector_store %arg6[%c3, %c3_6, %c0_7], %3 {strides = array<i32>} : memref<22x22x128xf32, #tpu.memory_space<vmem>>, vector<16x16x128xf32>,
    %c0_8 = arith.constant 0 : index
    %c0_9 = arith.constant 0 : index
    %5 = vector.load %arg3[%c0_8, %c0_9] : memref<49x128xf32, #tpu.memory_space<vmem>>, vector<49x128xf32>
    %c0_10 = arith.constant 0 : index
    %c0_11 = arith.constant 0 : index
    %6 = vector.load %arg4[%c0_10, %c0_11] : memref<1x128xf32, #tpu.memory_space<vmem>>, vector<1x128xf32>
    %7 = vector.shape_cast %6 : vector<1x128xf32> to vector<1x1x128xf32>
    %8 = vector.broadcast %7 : vector<1x1x128xf32> to vector<8x16x128xf32>
    %c0_i32 = arith.constant 0 : i32
    %c2_i32 = arith.constant 2 : i32
    %9 = arith.addi %c0_i32, %c2_i32 : i32
    %c1_i32 = arith.constant 1 : i32
    scf.for %arg7 = %c0_i32 to %9 step %c1_i32  : i32 {
      %c8_i32 = arith.constant 8 : i32
      %10 = arith.muli %arg7, %c8_i32 : i32
      %11 = tpu.assume_multiple %10, 8 : i32
      %c0_i32_13 = arith.constant 0 : i32
      %12 = arith.addi %11, %c0_i32_13 : i32
      %13 = arith.index_cast %12 : i32 to index
      %c0_14 = arith.constant 0 : index
      %c0_15 = arith.constant 0 : index
      %14 = vector.load %arg6[%13, %c0_14, %c0_15] : memref<22x22x128xf32, #tpu.memory_space<vmem>>, vector<8x22x128xf32>
      %15 = vector.extract_strided_slice %14 {offsets = [0, 0, 0], sizes = [8, 16, 128], strides = [1, 1, 1]} : vector<8x22x128xf32> to vector<8x16x128xf32>
      %16 = vector.extract_strided_slice %5 {offsets = [0, 0], sizes = [1, 128], strides = [1, 1]} : vector<49x128xf32> to vector<1x128xf32>
      %17 = vector.shape_cast %16 : vector<1x128xf32> to vector<128xf32>
      %18 = vector.shape_cast %17 : vector<128xf32> to vector<1x1x128xf32>
      %19 = vector.broadcast %18 : vector<1x1x128xf32> to vector<8x16x128xf32>
      %20 = arith.mulf %15, %19 : vector<8x16x128xf32>
      %21 = arith.addf %8, %20 : vector<8x16x128xf32>
      %22 = vector.extract_strided_slice %14 {offsets = [0, 1, 0], sizes = [8, 16, 128], strides = [1, 1, 1]} : vector<8x22x128xf32> to vector<8x16x128xf32>
      %23 = vector.extract_strided_slice %5 {offsets = [1, 0], sizes = [1, 128], strides = [1, 1]} : vector<49x128xf32> to vector<1x128xf32>
      %24 = vector.shape_cast %23 : vector<1x128xf32> to vector<128xf32>
      %25 = vector.shape_cast %24 : vector<128xf32> to vector<1x1x128xf32>
      %26 = vector.broadcast %25 : vector<1x1x128xf32> to vector<8x16x128xf32>
      %27 = arith.mulf %22, %26 : vector<8x16x128xf32>
      %28 = arith.addf %21, %27 : vector<8x16x128xf32>
      %29 = vector.extract_strided_slice %14 {offsets = [0, 2, 0], sizes = [8, 16, 128], strides = [1, 1, 1]} : vector<8x22x128xf32> to vector<8x16x128xf32>
      %30 = vector.extract_strided_slice %5 {offsets = [2, 0], sizes = [1, 128], strides = [1, 1]} : vector<49x128xf32> to vector<1x128xf32>
      %31 = vector.shape_cast %30 : vector<1x128xf32> to vector<128xf32>
      %32 = vector.shape_cast %31 : vector<128xf32> to vector<1x1x128xf32>
      %33 = vector.broadcast %32 : vector<1x1x128xf32> to vector<8x16x128xf32>
      %34 = arith.mulf %29, %33 : vector<8x16x128xf32>
      %35 = arith.addf %28, %34 : vector<8x16x128xf32>
      %36 = vector.extract_strided_slice %14 {offsets = [0, 3, 0], sizes = [8, 16, 128], strides = [1, 1, 1]} : vector<8x22x128xf32> to vector<8x16x128xf32>
      %37 = vector.extract_strided_slice %5 {offsets = [3, 0], sizes = [1, 128], strides = [1, 1]} : vector<49x128xf32> to vector<1x128xf32>
      %38 = vector.shape_cast %37 : vector<1x128xf32> to vector<128xf32>
      %39 = vector.shape_cast %38 : vector<128xf32> to vector<1x1x128xf32>
      %40 = vector.broadcast %39 : vector<1x1x128xf32> to vector<8x16x128xf32>
      %41 = arith.mulf %36, %40 : vector<8x16x128xf32>
      %42 = arith.addf %35, %41 : vector<8x16x128xf32>
      %43 = vector.extract_strided_slice %14 {offsets = [0, 4, 0], sizes = [8, 16, 128], strides = [1, 1, 1]} : vector<8x22x128xf32> to vector<8x16x128xf32>
      %44 = vector.extract_strided_slice %5 {offsets = [4, 0], sizes = [1, 128], strides = [1, 1]} : vector<49x128xf32> to vector<1x128xf32>
      %45 = vector.shape_cast %44 : vector<1x128xf32> to vector<128xf32>
      %46 = vector.shape_cast %45 : vector<128xf32> to vector<1x1x128xf32>
      %47 = vector.broadcast %46 : vector<1x1x128xf32> to vector<8x16x128xf32>
      %48 = arith.mulf %43, %47 : vector<8x16x128xf32>
      %49 = arith.addf %42, %48 : vector<8x16x128xf32>
      %50 = vector.extract_strided_slice %14 {offsets = [0, 5, 0], sizes = [8, 16, 128], strides = [1, 1, 1]} : vector<8x22x128xf32> to vector<8x16x128xf32>
      %51 = vector.extract_strided_slice %5 {offsets = [5, 0], sizes = [1, 128], strides = [1, 1]} : vector<49x128xf32> to vector<1x128xf32>
      %52 = vector.shape_cast %51 : vector<1x128xf32> to vector<128xf32>
      %53 = vector.shape_cast %52 : vector<128xf32> to vector<1x1x128xf32>
      %54 = vector.broadcast %53 : vector<1x1x128xf32> to vector<8x16x128xf32>
      %55 = arith.mulf %50, %54 : vector<8x16x128xf32>
      %56 = arith.addf %49, %55 : vector<8x16x128xf32>
      %57 = vector.extract_strided_slice %14 {offsets = [0, 6, 0], sizes = [8, 16, 128], strides = [1, 1, 1]} : vector<8x22x128xf32> to vector<8x16x128xf32>
      %58 = vector.extract_strided_slice %5 {offsets = [6, 0], sizes = [1, 128], strides = [1, 1]} : vector<49x128xf32> to vector<1x128xf32>
      %59 = vector.shape_cast %58 : vector<1x128xf32> to vector<128xf32>
      %60 = vector.shape_cast %59 : vector<128xf32> to vector<1x1x128xf32>
      %61 = vector.broadcast %60 : vector<1x1x128xf32> to vector<8x16x128xf32>
      %62 = arith.mulf %57, %61 : vector<8x16x128xf32>
      %63 = arith.addf %56, %62 : vector<8x16x128xf32>
      %c1_i32_16 = arith.constant 1 : i32
      %64 = arith.addi %11, %c1_i32_16 : i32
      %65 = arith.index_cast %64 : i32 to index
      %c0_17 = arith.constant 0 : index
      %c0_18 = arith.constant 0 : index
      %66 = vector.load %arg6[%65, %c0_17, %c0_18] : memref<22x22x128xf32, #tpu.memory_space<vmem>>, vector<8x22x128xf32>
      %67 = vector.extract_strided_slice %66 {offsets = [0, 0, 0], sizes = [8, 16, 128], strides = [1, 1, 1]} : vector<8x22x128xf32> to vector<8x16x128xf32>
      %68 = vector.extract_strided_slice %5 {offsets = [7, 0], sizes = [1, 128], strides = [1, 1]} : vector<49x128xf32> to vector<1x128xf32>
      %69 = vector.shape_cast %68 : vector<1x128xf32> to vector<128xf32>
      %70 = vector.shape_cast %69 : vector<128xf32> to vector<1x1x128xf32>
      %71 = vector.broadcast %70 : vector<1x1x128xf32> to vector<8x16x128xf32>
      %72 = arith.mulf %67, %71 : vector<8x16x128xf32>
      %73 = arith.addf %63, %72 : vector<8x16x128xf32>
      %74 = vector.extract_strided_slice %66 {offsets = [0, 1, 0], sizes = [8, 16, 128], strides = [1, 1, 1]} : vector<8x22x128xf32> to vector<8x16x128xf32>
      %75 = vector.extract_strided_slice %5 {offsets = [8, 0], sizes = [1, 128], strides = [1, 1]} : vector<49x128xf32> to vector<1x128xf32>
      %76 = vector.shape_cast %75 : vector<1x128xf32> to vector<128xf32>
      %77 = vector.shape_cast %76 : vector<128xf32> to vector<1x1x128xf32>
      %78 = vector.broadcast %77 : vector<1x1x128xf32> to vector<8x16x128xf32>
      %79 = arith.mulf %74, %78 : vector<8x16x128xf32>
      %80 = arith.addf %73, %79 : vector<8x16x128xf32>
      %81 = vector.extract_strided_slice %66 {offsets = [0, 2, 0], sizes = [8, 16, 128], strides = [1, 1, 1]} : vector<8x22x128xf32> to vector<8x16x128xf32>
      %82 = vector.extract_strided_slice %5 {offsets = [9, 0], sizes = [1, 128], strides = [1, 1]} : vector<49x128xf32> to vector<1x128xf32>
      %83 = vector.shape_cast %82 : vector<1x128xf32> to vector<128xf32>
      %84 = vector.shape_cast %83 : vector<128xf32> to vector<1x1x128xf32>
      %85 = vector.broadcast %84 : vector<1x1x128xf32> to vector<8x16x128xf32>
      %86 = arith.mulf %81, %85 : vector<8x16x128xf32>
      %87 = arith.addf %80, %86 : vector<8x16x128xf32>
      %88 = vector.extract_strided_slice %66 {offsets = [0, 3, 0], sizes = [8, 16, 128], strides = [1, 1, 1]} : vector<8x22x128xf32> to vector<8x16x128xf32>
      %89 = vector.extract_strided_slice %5 {offsets = [10, 0], sizes = [1, 128], strides = [1, 1]} : vector<49x128xf32> to vector<1x128xf32>
      %90 = vector.shape_cast %89 : vector<1x128xf32> to vector<128xf32>
      %91 = vector.shape_cast %90 : vector<128xf32> to vector<1x1x128xf32>
      %92 = vector.broadcast %91 : vector<1x1x128xf32> to vector<8x16x128xf32>
      %93 = arith.mulf %88, %92 : vector<8x16x128xf32>
      %94 = arith.addf %87, %93 : vector<8x16x128xf32>
      %95 = vector.extract_strided_slice %66 {offsets = [0, 4, 0], sizes = [8, 16, 128], strides = [1, 1, 1]} : vector<8x22x128xf32> to vector<8x16x128xf32>
      %96 = vector.extract_strided_slice %5 {offsets = [11, 0], sizes = [1, 128], strides = [1, 1]} : vector<49x128xf32> to vector<1x128xf32>
      %97 = vector.shape_cast %96 : vector<1x128xf32> to vector<128xf32>
      %98 = vector.shape_cast %97 : vector<128xf32> to vector<1x1x128xf32>
      %99 = vector.broadcast %98 : vector<1x1x128xf32> to vector<8x16x128xf32>
      %100 = arith.mulf %95, %99 : vector<8x16x128xf32>
      %101 = arith.addf %94, %100 : vector<8x16x128xf32>
      %102 = vector.extract_strided_slice %66 {offsets = [0, 5, 0], sizes = [8, 16, 128], strides = [1, 1, 1]} : vector<8x22x128xf32> to vector<8x16x128xf32>
      %103 = vector.extract_strided_slice %5 {offsets = [12, 0], sizes = [1, 128], strides = [1, 1]} : vector<49x128xf32> to vector<1x128xf32>
      %104 = vector.shape_cast %103 : vector<1x128xf32> to vector<128xf32>
      %105 = vector.shape_cast %104 : vector<128xf32> to vector<1x1x128xf32>
      %106 = vector.broadcast %105 : vector<1x1x128xf32> to vector<8x16x128xf32>
      %107 = arith.mulf %102, %106 : vector<8x16x128xf32>
      %108 = arith.addf %101, %107 : vector<8x16x128xf32>
      %109 = vector.extract_strided_slice %66 {offsets = [0, 6, 0], sizes = [8, 16, 128], strides = [1, 1, 1]} : vector<8x22x128xf32> to vector<8x16x128xf32>
      %110 = vector.extract_strided_slice %5 {offsets = [13, 0], sizes = [1, 128], strides = [1, 1]} : vector<49x128xf32> to vector<1x128xf32>
      %111 = vector.shape_cast %110 : vector<1x128xf32> to vector<128xf32>
      %112 = vector.shape_cast %111 : vector<128xf32> to vector<1x1x128xf32>
      %113 = vector.broadcast %112 : vector<1x1x128xf32> to vector<8x16x128xf32>
      %114 = arith.mulf %109, %113 : vector<8x16x128xf32>
      %115 = arith.addf %108, %114 : vector<8x16x128xf32>
      %c2_i32_19 = arith.constant 2 : i32
      %116 = arith.addi %11, %c2_i32_19 : i32
      %117 = arith.index_cast %116 : i32 to index
      %c0_20 = arith.constant 0 : index
      %c0_21 = arith.constant 0 : index
      %118 = vector.load %arg6[%117, %c0_20, %c0_21] : memref<22x22x128xf32, #tpu.memory_space<vmem>>, vector<8x22x128xf32>
      %119 = vector.extract_strided_slice %118 {offsets = [0, 0, 0], sizes = [8, 16, 128], strides = [1, 1, 1]} : vector<8x22x128xf32> to vector<8x16x128xf32>
      %120 = vector.extract_strided_slice %5 {offsets = [14, 0], sizes = [1, 128], strides = [1, 1]} : vector<49x128xf32> to vector<1x128xf32>
      %121 = vector.shape_cast %120 : vector<1x128xf32> to vector<128xf32>
      %122 = vector.shape_cast %121 : vector<128xf32> to vector<1x1x128xf32>
      %123 = vector.broadcast %122 : vector<1x1x128xf32> to vector<8x16x128xf32>
      %124 = arith.mulf %119, %123 : vector<8x16x128xf32>
      %125 = arith.addf %115, %124 : vector<8x16x128xf32>
      %126 = vector.extract_strided_slice %118 {offsets = [0, 1, 0], sizes = [8, 16, 128], strides = [1, 1, 1]} : vector<8x22x128xf32> to vector<8x16x128xf32>
      %127 = vector.extract_strided_slice %5 {offsets = [15, 0], sizes = [1, 128], strides = [1, 1]} : vector<49x128xf32> to vector<1x128xf32>
      %128 = vector.shape_cast %127 : vector<1x128xf32> to vector<128xf32>
      %129 = vector.shape_cast %128 : vector<128xf32> to vector<1x1x128xf32>
      %130 = vector.broadcast %129 : vector<1x1x128xf32> to vector<8x16x128xf32>
      %131 = arith.mulf %126, %130 : vector<8x16x128xf32>
      %132 = arith.addf %125, %131 : vector<8x16x128xf32>
      %133 = vector.extract_strided_slice %118 {offsets = [0, 2, 0], sizes = [8, 16, 128], strides = [1, 1, 1]} : vector<8x22x128xf32> to vector<8x16x128xf32>
      %134 = vector.extract_strided_slice %5 {offsets = [16, 0], sizes = [1, 128], strides = [1, 1]} : vector<49x128xf32> to vector<1x128xf32>
      %135 = vector.shape_cast %134 : vector<1x128xf32> to vector<128xf32>
      %136 = vector.shape_cast %135 : vector<128xf32> to vector<1x1x128xf32>
      %137 = vector.broadcast %136 : vector<1x1x128xf32> to vector<8x16x128xf32>
      %138 = arith.mulf %133, %137 : vector<8x16x128xf32>
      %139 = arith.addf %132, %138 : vector<8x16x128xf32>
      %140 = vector.extract_strided_slice %118 {offsets = [0, 3, 0], sizes = [8, 16, 128], strides = [1, 1, 1]} : vector<8x22x128xf32> to vector<8x16x128xf32>
      %141 = vector.extract_strided_slice %5 {offsets = [17, 0], sizes = [1, 128], strides = [1, 1]} : vector<49x128xf32> to vector<1x128xf32>
      %142 = vector.shape_cast %141 : vector<1x128xf32> to vector<128xf32>
      %143 = vector.shape_cast %142 : vector<128xf32> to vector<1x1x128xf32>
      %144 = vector.broadcast %143 : vector<1x1x128xf32> to vector<8x16x128xf32>
      %145 = arith.mulf %140, %144 : vector<8x16x128xf32>
      %146 = arith.addf %139, %145 : vector<8x16x128xf32>
      %147 = vector.extract_strided_slice %118 {offsets = [0, 4, 0], sizes = [8, 16, 128], strides = [1, 1, 1]} : vector<8x22x128xf32> to vector<8x16x128xf32>
      %148 = vector.extract_strided_slice %5 {offsets = [18, 0], sizes = [1, 128], strides = [1, 1]} : vector<49x128xf32> to vector<1x128xf32>
      %149 = vector.shape_cast %148 : vector<1x128xf32> to vector<128xf32>
      %150 = vector.shape_cast %149 : vector<128xf32> to vector<1x1x128xf32>
      %151 = vector.broadcast %150 : vector<1x1x128xf32> to vector<8x16x128xf32>
      %152 = arith.mulf %147, %151 : vector<8x16x128xf32>
      %153 = arith.addf %146, %152 : vector<8x16x128xf32>
      %154 = vector.extract_strided_slice %118 {offsets = [0, 5, 0], sizes = [8, 16, 128], strides = [1, 1, 1]} : vector<8x22x128xf32> to vector<8x16x128xf32>
      %155 = vector.extract_strided_slice %5 {offsets = [19, 0], sizes = [1, 128], strides = [1, 1]} : vector<49x128xf32> to vector<1x128xf32>
      %156 = vector.shape_cast %155 : vector<1x128xf32> to vector<128xf32>
      %157 = vector.shape_cast %156 : vector<128xf32> to vector<1x1x128xf32>
      %158 = vector.broadcast %157 : vector<1x1x128xf32> to vector<8x16x128xf32>
      %159 = arith.mulf %154, %158 : vector<8x16x128xf32>
      %160 = arith.addf %153, %159 : vector<8x16x128xf32>
      %161 = vector.extract_strided_slice %118 {offsets = [0, 6, 0], sizes = [8, 16, 128], strides = [1, 1, 1]} : vector<8x22x128xf32> to vector<8x16x128xf32>
      %162 = vector.extract_strided_slice %5 {offsets = [20, 0], sizes = [1, 128], strides = [1, 1]} : vector<49x128xf32> to vector<1x128xf32>
      %163 = vector.shape_cast %162 : vector<1x128xf32> to vector<128xf32>
      %164 = vector.shape_cast %163 : vector<128xf32> to vector<1x1x128xf32>
      %165 = vector.broadcast %164 : vector<1x1x128xf32> to vector<8x16x128xf32>
      %166 = arith.mulf %161, %165 : vector<8x16x128xf32>
      %167 = arith.addf %160, %166 : vector<8x16x128xf32>
      %c3_i32 = arith.constant 3 : i32
      %168 = arith.addi %11, %c3_i32 : i32
      %169 = arith.index_cast %168 : i32 to index
      %c0_22 = arith.constant 0 : index
      %c0_23 = arith.constant 0 : index
      %170 = vector.load %arg6[%169, %c0_22, %c0_23] : memref<22x22x128xf32, #tpu.memory_space<vmem>>, vector<8x22x128xf32>
      %171 = vector.extract_strided_slice %170 {offsets = [0, 0, 0], sizes = [8, 16, 128], strides = [1, 1, 1]} : vector<8x22x128xf32> to vector<8x16x128xf32>
      %172 = vector.extract_strided_slice %5 {offsets = [21, 0], sizes = [1, 128], strides = [1, 1]} : vector<49x128xf32> to vector<1x128xf32>
      %173 = vector.shape_cast %172 : vector<1x128xf32> to vector<128xf32>
      %174 = vector.shape_cast %173 : vector<128xf32> to vector<1x1x128xf32>
      %175 = vector.broadcast %174 : vector<1x1x128xf32> to vector<8x16x128xf32>
      %176 = arith.mulf %171, %175 : vector<8x16x128xf32>
      %177 = arith.addf %167, %176 : vector<8x16x128xf32>
      %178 = vector.extract_strided_slice %170 {offsets = [0, 1, 0], sizes = [8, 16, 128], strides = [1, 1, 1]} : vector<8x22x128xf32> to vector<8x16x128xf32>
      %179 = vector.extract_strided_slice %5 {offsets = [22, 0], sizes = [1, 128], strides = [1, 1]} : vector<49x128xf32> to vector<1x128xf32>
      %180 = vector.shape_cast %179 : vector<1x128xf32> to vector<128xf32>
      %181 = vector.shape_cast %180 : vector<128xf32> to vector<1x1x128xf32>
      %182 = vector.broadcast %181 : vector<1x1x128xf32> to vector<8x16x128xf32>
      %183 = arith.mulf %178, %182 : vector<8x16x128xf32>
      %184 = arith.addf %177, %183 : vector<8x16x128xf32>
      %185 = vector.extract_strided_slice %170 {offsets = [0, 2, 0], sizes = [8, 16, 128], strides = [1, 1, 1]} : vector<8x22x128xf32> to vector<8x16x128xf32>
      %186 = vector.extract_strided_slice %5 {offsets = [23, 0], sizes = [1, 128], strides = [1, 1]} : vector<49x128xf32> to vector<1x128xf32>
      %187 = vector.shape_cast %186 : vector<1x128xf32> to vector<128xf32>
      %188 = vector.shape_cast %187 : vector<128xf32> to vector<1x1x128xf32>
      %189 = vector.broadcast %188 : vector<1x1x128xf32> to vector<8x16x128xf32>
      %190 = arith.mulf %185, %189 : vector<8x16x128xf32>
      %191 = arith.addf %184, %190 : vector<8x16x128xf32>
      %192 = vector.extract_strided_slice %170 {offsets = [0, 3, 0], sizes = [8, 16, 128], strides = [1, 1, 1]} : vector<8x22x128xf32> to vector<8x16x128xf32>
      %193 = vector.extract_strided_slice %5 {offsets = [24, 0], sizes = [1, 128], strides = [1, 1]} : vector<49x128xf32> to vector<1x128xf32>
      %194 = vector.shape_cast %193 : vector<1x128xf32> to vector<128xf32>
      %195 = vector.shape_cast %194 : vector<128xf32> to vector<1x1x128xf32>
      %196 = vector.broadcast %195 : vector<1x1x128xf32> to vector<8x16x128xf32>
      %197 = arith.mulf %192, %196 : vector<8x16x128xf32>
      %198 = arith.addf %191, %197 : vector<8x16x128xf32>
      %199 = vector.extract_strided_slice %170 {offsets = [0, 4, 0], sizes = [8, 16, 128], strides = [1, 1, 1]} : vector<8x22x128xf32> to vector<8x16x128xf32>
      %200 = vector.extract_strided_slice %5 {offsets = [25, 0], sizes = [1, 128], strides = [1, 1]} : vector<49x128xf32> to vector<1x128xf32>
      %201 = vector.shape_cast %200 : vector<1x128xf32> to vector<128xf32>
      %202 = vector.shape_cast %201 : vector<128xf32> to vector<1x1x128xf32>
      %203 = vector.broadcast %202 : vector<1x1x128xf32> to vector<8x16x128xf32>
      %204 = arith.mulf %199, %203 : vector<8x16x128xf32>
      %205 = arith.addf %198, %204 : vector<8x16x128xf32>
      %206 = vector.extract_strided_slice %170 {offsets = [0, 5, 0], sizes = [8, 16, 128], strides = [1, 1, 1]} : vector<8x22x128xf32> to vector<8x16x128xf32>
      %207 = vector.extract_strided_slice %5 {offsets = [26, 0], sizes = [1, 128], strides = [1, 1]} : vector<49x128xf32> to vector<1x128xf32>
      %208 = vector.shape_cast %207 : vector<1x128xf32> to vector<128xf32>
      %209 = vector.shape_cast %208 : vector<128xf32> to vector<1x1x128xf32>
      %210 = vector.broadcast %209 : vector<1x1x128xf32> to vector<8x16x128xf32>
      %211 = arith.mulf %206, %210 : vector<8x16x128xf32>
      %212 = arith.addf %205, %211 : vector<8x16x128xf32>
      %213 = vector.extract_strided_slice %170 {offsets = [0, 6, 0], sizes = [8, 16, 128], strides = [1, 1, 1]} : vector<8x22x128xf32> to vector<8x16x128xf32>
      %214 = vector.extract_strided_slice %5 {offsets = [27, 0], sizes = [1, 128], strides = [1, 1]} : vector<49x128xf32> to vector<1x128xf32>
      %215 = vector.shape_cast %214 : vector<1x128xf32> to vector<128xf32>
      %216 = vector.shape_cast %215 : vector<128xf32> to vector<1x1x128xf32>
      %217 = vector.broadcast %216 : vector<1x1x128xf32> to vector<8x16x128xf32>
      %218 = arith.mulf %213, %217 : vector<8x16x128xf32>
      %219 = arith.addf %212, %218 : vector<8x16x128xf32>
      %c4_i32 = arith.constant 4 : i32
      %220 = arith.addi %11, %c4_i32 : i32
      %221 = arith.index_cast %220 : i32 to index
      %c0_24 = arith.constant 0 : index
      %c0_25 = arith.constant 0 : index
      %222 = vector.load %arg6[%221, %c0_24, %c0_25] : memref<22x22x128xf32, #tpu.memory_space<vmem>>, vector<8x22x128xf32>
      %223 = vector.extract_strided_slice %222 {offsets = [0, 0, 0], sizes = [8, 16, 128], strides = [1, 1, 1]} : vector<8x22x128xf32> to vector<8x16x128xf32>
      %224 = vector.extract_strided_slice %5 {offsets = [28, 0], sizes = [1, 128], strides = [1, 1]} : vector<49x128xf32> to vector<1x128xf32>
      %225 = vector.shape_cast %224 : vector<1x128xf32> to vector<128xf32>
      %226 = vector.shape_cast %225 : vector<128xf32> to vector<1x1x128xf32>
      %227 = vector.broadcast %226 : vector<1x1x128xf32> to vector<8x16x128xf32>
      %228 = arith.mulf %223, %227 : vector<8x16x128xf32>
      %229 = arith.addf %219, %228 : vector<8x16x128xf32>
      %230 = vector.extract_strided_slice %222 {offsets = [0, 1, 0], sizes = [8, 16, 128], strides = [1, 1, 1]} : vector<8x22x128xf32> to vector<8x16x128xf32>
      %231 = vector.extract_strided_slice %5 {offsets = [29, 0], sizes = [1, 128], strides = [1, 1]} : vector<49x128xf32> to vector<1x128xf32>
      %232 = vector.shape_cast %231 : vector<1x128xf32> to vector<128xf32>
      %233 = vector.shape_cast %232 : vector<128xf32> to vector<1x1x128xf32>
      %234 = vector.broadcast %233 : vector<1x1x128xf32> to vector<8x16x128xf32>
      %235 = arith.mulf %230, %234 : vector<8x16x128xf32>
      %236 = arith.addf %229, %235 : vector<8x16x128xf32>
      %237 = vector.extract_strided_slice %222 {offsets = [0, 2, 0], sizes = [8, 16, 128], strides = [1, 1, 1]} : vector<8x22x128xf32> to vector<8x16x128xf32>
      %238 = vector.extract_strided_slice %5 {offsets = [30, 0], sizes = [1, 128], strides = [1, 1]} : vector<49x128xf32> to vector<1x128xf32>
      %239 = vector.shape_cast %238 : vector<1x128xf32> to vector<128xf32>
      %240 = vector.shape_cast %239 : vector<128xf32> to vector<1x1x128xf32>
      %241 = vector.broadcast %240 : vector<1x1x128xf32> to vector<8x16x128xf32>
      %242 = arith.mulf %237, %241 : vector<8x16x128xf32>
      %243 = arith.addf %236, %242 : vector<8x16x128xf32>
      %244 = vector.extract_strided_slice %222 {offsets = [0, 3, 0], sizes = [8, 16, 128], strides = [1, 1, 1]} : vector<8x22x128xf32> to vector<8x16x128xf32>
      %245 = vector.extract_strided_slice %5 {offsets = [31, 0], sizes = [1, 128], strides = [1, 1]} : vector<49x128xf32> to vector<1x128xf32>
      %246 = vector.shape_cast %245 : vector<1x128xf32> to vector<128xf32>
      %247 = vector.shape_cast %246 : vector<128xf32> to vector<1x1x128xf32>
      %248 = vector.broadcast %247 : vector<1x1x128xf32> to vector<8x16x128xf32>
      %249 = arith.mulf %244, %248 : vector<8x16x128xf32>
      %250 = arith.addf %243, %249 : vector<8x16x128xf32>
      %251 = vector.extract_strided_slice %222 {offsets = [0, 4, 0], sizes = [8, 16, 128], strides = [1, 1, 1]} : vector<8x22x128xf32> to vector<8x16x128xf32>
      %252 = vector.extract_strided_slice %5 {offsets = [32, 0], sizes = [1, 128], strides = [1, 1]} : vector<49x128xf32> to vector<1x128xf32>
      %253 = vector.shape_cast %252 : vector<1x128xf32> to vector<128xf32>
      %254 = vector.shape_cast %253 : vector<128xf32> to vector<1x1x128xf32>
      %255 = vector.broadcast %254 : vector<1x1x128xf32> to vector<8x16x128xf32>
      %256 = arith.mulf %251, %255 : vector<8x16x128xf32>
      %257 = arith.addf %250, %256 : vector<8x16x128xf32>
      %258 = vector.extract_strided_slice %222 {offsets = [0, 5, 0], sizes = [8, 16, 128], strides = [1, 1, 1]} : vector<8x22x128xf32> to vector<8x16x128xf32>
      %259 = vector.extract_strided_slice %5 {offsets = [33, 0], sizes = [1, 128], strides = [1, 1]} : vector<49x128xf32> to vector<1x128xf32>
      %260 = vector.shape_cast %259 : vector<1x128xf32> to vector<128xf32>
      %261 = vector.shape_cast %260 : vector<128xf32> to vector<1x1x128xf32>
      %262 = vector.broadcast %261 : vector<1x1x128xf32> to vector<8x16x128xf32>
      %263 = arith.mulf %258, %262 : vector<8x16x128xf32>
      %264 = arith.addf %257, %263 : vector<8x16x128xf32>
      %265 = vector.extract_strided_slice %222 {offsets = [0, 6, 0], sizes = [8, 16, 128], strides = [1, 1, 1]} : vector<8x22x128xf32> to vector<8x16x128xf32>
      %266 = vector.extract_strided_slice %5 {offsets = [34, 0], sizes = [1, 128], strides = [1, 1]} : vector<49x128xf32> to vector<1x128xf32>
      %267 = vector.shape_cast %266 : vector<1x128xf32> to vector<128xf32>
      %268 = vector.shape_cast %267 : vector<128xf32> to vector<1x1x128xf32>
      %269 = vector.broadcast %268 : vector<1x1x128xf32> to vector<8x16x128xf32>
      %270 = arith.mulf %265, %269 : vector<8x16x128xf32>
      %271 = arith.addf %264, %270 : vector<8x16x128xf32>
      %c5_i32 = arith.constant 5 : i32
      %272 = arith.addi %11, %c5_i32 : i32
      %273 = arith.index_cast %272 : i32 to index
      %c0_26 = arith.constant 0 : index
      %c0_27 = arith.constant 0 : index
      %274 = vector.load %arg6[%273, %c0_26, %c0_27] : memref<22x22x128xf32, #tpu.memory_space<vmem>>, vector<8x22x128xf32>
      %275 = vector.extract_strided_slice %274 {offsets = [0, 0, 0], sizes = [8, 16, 128], strides = [1, 1, 1]} : vector<8x22x128xf32> to vector<8x16x128xf32>
      %276 = vector.extract_strided_slice %5 {offsets = [35, 0], sizes = [1, 128], strides = [1, 1]} : vector<49x128xf32> to vector<1x128xf32>
      %277 = vector.shape_cast %276 : vector<1x128xf32> to vector<128xf32>
      %278 = vector.shape_cast %277 : vector<128xf32> to vector<1x1x128xf32>
      %279 = vector.broadcast %278 : vector<1x1x128xf32> to vector<8x16x128xf32>
      %280 = arith.mulf %275, %279 : vector<8x16x128xf32>
      %281 = arith.addf %271, %280 : vector<8x16x128xf32>
      %282 = vector.extract_strided_slice %274 {offsets = [0, 1, 0], sizes = [8, 16, 128], strides = [1, 1, 1]} : vector<8x22x128xf32> to vector<8x16x128xf32>
      %283 = vector.extract_strided_slice %5 {offsets = [36, 0], sizes = [1, 128], strides = [1, 1]} : vector<49x128xf32> to vector<1x128xf32>
      %284 = vector.shape_cast %283 : vector<1x128xf32> to vector<128xf32>
      %285 = vector.shape_cast %284 : vector<128xf32> to vector<1x1x128xf32>
      %286 = vector.broadcast %285 : vector<1x1x128xf32> to vector<8x16x128xf32>
      %287 = arith.mulf %282, %286 : vector<8x16x128xf32>
      %288 = arith.addf %281, %287 : vector<8x16x128xf32>
      %289 = vector.extract_strided_slice %274 {offsets = [0, 2, 0], sizes = [8, 16, 128], strides = [1, 1, 1]} : vector<8x22x128xf32> to vector<8x16x128xf32>
      %290 = vector.extract_strided_slice %5 {offsets = [37, 0], sizes = [1, 128], strides = [1, 1]} : vector<49x128xf32> to vector<1x128xf32>
      %291 = vector.shape_cast %290 : vector<1x128xf32> to vector<128xf32>
      %292 = vector.shape_cast %291 : vector<128xf32> to vector<1x1x128xf32>
      %293 = vector.broadcast %292 : vector<1x1x128xf32> to vector<8x16x128xf32>
      %294 = arith.mulf %289, %293 : vector<8x16x128xf32>
      %295 = arith.addf %288, %294 : vector<8x16x128xf32>
      %296 = vector.extract_strided_slice %274 {offsets = [0, 3, 0], sizes = [8, 16, 128], strides = [1, 1, 1]} : vector<8x22x128xf32> to vector<8x16x128xf32>
      %297 = vector.extract_strided_slice %5 {offsets = [38, 0], sizes = [1, 128], strides = [1, 1]} : vector<49x128xf32> to vector<1x128xf32>
      %298 = vector.shape_cast %297 : vector<1x128xf32> to vector<128xf32>
      %299 = vector.shape_cast %298 : vector<128xf32> to vector<1x1x128xf32>
      %300 = vector.broadcast %299 : vector<1x1x128xf32> to vector<8x16x128xf32>
      %301 = arith.mulf %296, %300 : vector<8x16x128xf32>
      %302 = arith.addf %295, %301 : vector<8x16x128xf32>
      %303 = vector.extract_strided_slice %274 {offsets = [0, 4, 0], sizes = [8, 16, 128], strides = [1, 1, 1]} : vector<8x22x128xf32> to vector<8x16x128xf32>
      %304 = vector.extract_strided_slice %5 {offsets = [39, 0], sizes = [1, 128], strides = [1, 1]} : vector<49x128xf32> to vector<1x128xf32>
      %305 = vector.shape_cast %304 : vector<1x128xf32> to vector<128xf32>
      %306 = vector.shape_cast %305 : vector<128xf32> to vector<1x1x128xf32>
      %307 = vector.broadcast %306 : vector<1x1x128xf32> to vector<8x16x128xf32>
      %308 = arith.mulf %303, %307 : vector<8x16x128xf32>
      %309 = arith.addf %302, %308 : vector<8x16x128xf32>
      %310 = vector.extract_strided_slice %274 {offsets = [0, 5, 0], sizes = [8, 16, 128], strides = [1, 1, 1]} : vector<8x22x128xf32> to vector<8x16x128xf32>
      %311 = vector.extract_strided_slice %5 {offsets = [40, 0], sizes = [1, 128], strides = [1, 1]} : vector<49x128xf32> to vector<1x128xf32>
      %312 = vector.shape_cast %311 : vector<1x128xf32> to vector<128xf32>
      %313 = vector.shape_cast %312 : vector<128xf32> to vector<1x1x128xf32>
      %314 = vector.broadcast %313 : vector<1x1x128xf32> to vector<8x16x128xf32>
      %315 = arith.mulf %310, %314 : vector<8x16x128xf32>
      %316 = arith.addf %309, %315 : vector<8x16x128xf32>
      %317 = vector.extract_strided_slice %274 {offsets = [0, 6, 0], sizes = [8, 16, 128], strides = [1, 1, 1]} : vector<8x22x128xf32> to vector<8x16x128xf32>
      %318 = vector.extract_strided_slice %5 {offsets = [41, 0], sizes = [1, 128], strides = [1, 1]} : vector<49x128xf32> to vector<1x128xf32>
      %319 = vector.shape_cast %318 : vector<1x128xf32> to vector<128xf32>
      %320 = vector.shape_cast %319 : vector<128xf32> to vector<1x1x128xf32>
      %321 = vector.broadcast %320 : vector<1x1x128xf32> to vector<8x16x128xf32>
      %322 = arith.mulf %317, %321 : vector<8x16x128xf32>
      %323 = arith.addf %316, %322 : vector<8x16x128xf32>
      %c6_i32 = arith.constant 6 : i32
      %324 = arith.addi %11, %c6_i32 : i32
      %325 = arith.index_cast %324 : i32 to index
      %c0_28 = arith.constant 0 : index
      %c0_29 = arith.constant 0 : index
      %326 = vector.load %arg6[%325, %c0_28, %c0_29] : memref<22x22x128xf32, #tpu.memory_space<vmem>>, vector<8x22x128xf32>
      %327 = vector.extract_strided_slice %326 {offsets = [0, 0, 0], sizes = [8, 16, 128], strides = [1, 1, 1]} : vector<8x22x128xf32> to vector<8x16x128xf32>
      %328 = vector.extract_strided_slice %5 {offsets = [42, 0], sizes = [1, 128], strides = [1, 1]} : vector<49x128xf32> to vector<1x128xf32>
      %329 = vector.shape_cast %328 : vector<1x128xf32> to vector<128xf32>
      %330 = vector.shape_cast %329 : vector<128xf32> to vector<1x1x128xf32>
      %331 = vector.broadcast %330 : vector<1x1x128xf32> to vector<8x16x128xf32>
      %332 = arith.mulf %327, %331 : vector<8x16x128xf32>
      %333 = arith.addf %323, %332 : vector<8x16x128xf32>
      %334 = vector.extract_strided_slice %326 {offsets = [0, 1, 0], sizes = [8, 16, 128], strides = [1, 1, 1]} : vector<8x22x128xf32> to vector<8x16x128xf32>
      %335 = vector.extract_strided_slice %5 {offsets = [43, 0], sizes = [1, 128], strides = [1, 1]} : vector<49x128xf32> to vector<1x128xf32>
      %336 = vector.shape_cast %335 : vector<1x128xf32> to vector<128xf32>
      %337 = vector.shape_cast %336 : vector<128xf32> to vector<1x1x128xf32>
      %338 = vector.broadcast %337 : vector<1x1x128xf32> to vector<8x16x128xf32>
      %339 = arith.mulf %334, %338 : vector<8x16x128xf32>
      %340 = arith.addf %333, %339 : vector<8x16x128xf32>
      %341 = vector.extract_strided_slice %326 {offsets = [0, 2, 0], sizes = [8, 16, 128], strides = [1, 1, 1]} : vector<8x22x128xf32> to vector<8x16x128xf32>
      %342 = vector.extract_strided_slice %5 {offsets = [44, 0], sizes = [1, 128], strides = [1, 1]} : vector<49x128xf32> to vector<1x128xf32>
      %343 = vector.shape_cast %342 : vector<1x128xf32> to vector<128xf32>
      %344 = vector.shape_cast %343 : vector<128xf32> to vector<1x1x128xf32>
      %345 = vector.broadcast %344 : vector<1x1x128xf32> to vector<8x16x128xf32>
      %346 = arith.mulf %341, %345 : vector<8x16x128xf32>
      %347 = arith.addf %340, %346 : vector<8x16x128xf32>
      %348 = vector.extract_strided_slice %326 {offsets = [0, 3, 0], sizes = [8, 16, 128], strides = [1, 1, 1]} : vector<8x22x128xf32> to vector<8x16x128xf32>
      %349 = vector.extract_strided_slice %5 {offsets = [45, 0], sizes = [1, 128], strides = [1, 1]} : vector<49x128xf32> to vector<1x128xf32>
      %350 = vector.shape_cast %349 : vector<1x128xf32> to vector<128xf32>
      %351 = vector.shape_cast %350 : vector<128xf32> to vector<1x1x128xf32>
      %352 = vector.broadcast %351 : vector<1x1x128xf32> to vector<8x16x128xf32>
      %353 = arith.mulf %348, %352 : vector<8x16x128xf32>
      %354 = arith.addf %347, %353 : vector<8x16x128xf32>
      %355 = vector.extract_strided_slice %326 {offsets = [0, 4, 0], sizes = [8, 16, 128], strides = [1, 1, 1]} : vector<8x22x128xf32> to vector<8x16x128xf32>
      %356 = vector.extract_strided_slice %5 {offsets = [46, 0], sizes = [1, 128], strides = [1, 1]} : vector<49x128xf32> to vector<1x128xf32>
      %357 = vector.shape_cast %356 : vector<1x128xf32> to vector<128xf32>
      %358 = vector.shape_cast %357 : vector<128xf32> to vector<1x1x128xf32>
      %359 = vector.broadcast %358 : vector<1x1x128xf32> to vector<8x16x128xf32>
      %360 = arith.mulf %355, %359 : vector<8x16x128xf32>
      %361 = arith.addf %354, %360 : vector<8x16x128xf32>
      %362 = vector.extract_strided_slice %326 {offsets = [0, 5, 0], sizes = [8, 16, 128], strides = [1, 1, 1]} : vector<8x22x128xf32> to vector<8x16x128xf32>
      %363 = vector.extract_strided_slice %5 {offsets = [47, 0], sizes = [1, 128], strides = [1, 1]} : vector<49x128xf32> to vector<1x128xf32>
      %364 = vector.shape_cast %363 : vector<1x128xf32> to vector<128xf32>
      %365 = vector.shape_cast %364 : vector<128xf32> to vector<1x1x128xf32>
      %366 = vector.broadcast %365 : vector<1x1x128xf32> to vector<8x16x128xf32>
      %367 = arith.mulf %362, %366 : vector<8x16x128xf32>
      %368 = arith.addf %361, %367 : vector<8x16x128xf32>
      %369 = vector.extract_strided_slice %326 {offsets = [0, 6, 0], sizes = [8, 16, 128], strides = [1, 1, 1]} : vector<8x22x128xf32> to vector<8x16x128xf32>
      %370 = vector.extract_strided_slice %5 {offsets = [48, 0], sizes = [1, 128], strides = [1, 1]} : vector<49x128xf32> to vector<1x128xf32>
      %371 = vector.shape_cast %370 : vector<1x128xf32> to vector<128xf32>
      %372 = vector.shape_cast %371 : vector<128xf32> to vector<1x1x128xf32>
      %373 = vector.broadcast %372 : vector<1x1x128xf32> to vector<8x16x128xf32>
      %374 = arith.mulf %369, %373 : vector<8x16x128xf32>
      %375 = arith.addf %368, %374 : vector<8x16x128xf32>
      %c0_30 = arith.constant 0 : index
      %376 = arith.index_cast %11 : i32 to index
      %c0_31 = arith.constant 0 : index
      %c0_32 = arith.constant 0 : index
      %377 = vector.load %arg5[%c0_30, %376, %c0_31, %c0_32] : memref<1x16x16x128xf32, #tpu.memory_space<vmem>>, vector<1x8x16x128xf32>
      %378 = vector.shape_cast %377 : vector<1x8x16x128xf32> to vector<8x16x128xf32>
      %379 = vector.shape_cast %375 : vector<8x16x128xf32> to vector<1x8x16x128xf32>
      tpu.vector_store %arg5[%c0_30, %376, %c0_31, %c0_32], %379 {strides = array<i32>} : memref<1x16x16x128xf32, #tpu.memory_space<vmem>>, vector<1x8x16x128xf32>,
    }
    %c2_i32_12 = arith.constant 2 : i32
    return
  }
  func.func @transform_0(%arg0: i32, %arg1: i32) -> (i32, i32, i32, i32) {
    %c0_i32 = arith.constant 0 : i32
    %c0_i32_0 = arith.constant 0 : i32
    %c0_i32_1 = arith.constant 0 : i32
    return %arg0, %c0_i32, %c0_i32_0, %arg1 : i32, i32, i32, i32
  }
  func.func @transform_1(%arg0: i32, %arg1: i32) -> (i32, i32) {
    %c0_i32 = arith.constant 0 : i32
    %c0_i32_0 = arith.constant 0 : i32
    return %c0_i32, %arg1 : i32, i32
  }
  func.func @transform_2(%arg0: i32, %arg1: i32) -> (i32, i32) {
    %c0_i32 = arith.constant 0 : i32
    %c0_i32_0 = arith.constant 0 : i32
    return %c0_i32, %arg1 : i32, i32
  }
  func.func @transform_3(%arg0: i32, %arg1: i32) -> (i32, i32, i32, i32) {
    %c0_i32 = arith.constant 0 : i32
    %c0_i32_0 = arith.constant 0 : i32
    %c0_i32_1 = arith.constant 0 : i32
    return %arg0, %c0_i32, %c0_i32_0, %arg1 : i32, i32, i32, i32
  }
}

</mosaic_0001>

<bundles_post_ra>
// kernel: ppeg_forward.1
= control target key start
LH: loop header
LB: loop body
LE: loop exit
PB: predicated region body
PF: predicated region fallthrough
CT: control target
= control target key end

     0   :  { %s6464_s12 = smov 0   ;;  %s6466_s13 = smov 0   ;;  %s12184_s0 = inlined_call_operand.vmem [shape: f32[2,16,16,128], index: 0, kind: input, shape index: {}]   ;;  %s12185_s1 = inlined_call_operand.vmem [shape: f32[49,128], index: 1, kind: input, shape index: {}]   ;;  %s12186_s2 = inlined_call_operand.vmem [shape: f32[1,128], index: 2, kind: input, shape index: {}]   ;;  %s12187_s3 = inlined_call_operand.vmem [shape: f32[2,16,16,128], index: 3, kind: output, shape index: {}]  }
   0x1   :  { %s6468_s14 = smov 0  }
   0x2 LB: > { %s25_s15 = sadd.s32 1, %s6433_s13  ;;  %p6207_p0 = scmp.ge.s32.totalorder %s6437_s14, 1  ;;  %s6437_s14 = sphi %s6468_s14, %s13_s14   ;;  %s6433_s13 = sphi %s6466_s13, %s13260_s13   ;;  %s6429_s12 = sphi %s6464_s12, %s13259_s12  }
   0x3   : > { %p27_p1 = scmp.ge.s32.totalorder %s25_s15, 2  ;;  %p173_p2 = scmp.lt.s32.totalorder %s6437_s14, 3 }
   0x5   : > { %s13262_s15 = smov (%p27_p1, %s25_s15), 0  ;;  %p174_p3 = pnand %p6207_p0, %p173_p2 }
   0x6   : > { %p210_p4 = scmp.lt.s32.totalorder (!%p174_p3), %s6429_s12, 1 }
   0x7   : > { %177 = sbr.rel (%p174_p3) target bundleno = 994 (0x3e2), region = 32 }
   0xc   : > { %v6487_v0 = vld [vmem:[%s12185_s1] sm:$0xff]  ;;  %v6492_v1 = vld [vmem:[%s12185_s1 + $0x8] sm:$0xff]  ;;  %v6497_v2 = vld [vmem:[%s12185_s1 + $0x10] sm:$0xff]  ;;  %v6443_v3 = vmov 0.0   ;;  %s13264_s12 = smov (!%p210_p4, %s6429_s12), 1 }
   0xd   : > { %12476 = vst [vmem:[#allocation3_spill] sm:$0xff] %v6487_v0  ;;  %12477 = vst [vmem:[#allocation4_spill] sm:$0xff] %v6492_v1  ;;  %v6569_v4 = vld [vmem:[%s12185_s1 + $0x18] sm:$0xff]  ;;  %v6574_v5 = vld [vmem:[%s12185_s1 + $0x20] sm:$0xff]  ;;  %s6375_s5 = sshll.u32 %s13264_s12, 8  ;;  %s6636_s12 = smov 0  }
   0xe   : > { %12478 = vst [vmem:[#allocation5_spill] sm:$0xff] %v6497_v2  ;;  %242 = vst [vmem:[#allocation2 + $0x48] sm:$0xff] %v6443_v3  ;;  %v6579_v6 = vld [vmem:[%s12185_s1 + $0x28] sm:$0xff]  ;;  %v6584_v7 = vld [vmem:[%s12185_s1 + $0x30] ss:$0 sm:$0xff]  ;;  %s6597_s8 = scalar_lea.vmem %s12184_s0, %s6375_s5  ;;  %s6602_s11 = scalar_lea.vmem %s12187_s3, %s6375_s5 }
   0xf   : > { %233 = vst [vmem:[#allocation2] sm:$0xff] %v6443_v3  ;;  %234 = vst [vmem:[#allocation2 + $0x8] sm:$0xff] %v6443_v3  ;;  %v6589_v8 = vld [vmem:[%s12186_s2] ss:$0 sm:$0xff]  ;;  %v300_v10 = vld [vmem:[%s6597_s8 + $0x8] sm:$0xff] }
  0x10   : > { %235 = vst [vmem:[#allocation2 + $0x10] sm:$0x3f] %v6443_v3  ;;  %236 = vst [vmem:[#allocation2 + $0x18] sm:$0xff] %v6443_v3  ;;  %v299_v9 = vld [vmem:[%s6597_s8] sm:$0xff]  ;;  %v301_v11 = vld [vmem:[%s6597_s8 + $0x10] sm:$0xff] }
  0x11   : > { %237 = vst [vmem:[#allocation2 + $0x20] sm:$0xff] %v6443_v3  ;;  %238 = vst [vmem:[#allocation2 + $0x28] sm:$0x3f] %v6443_v3  ;;  %v302_v12 = vld [vmem:[%s6597_s8 + $0x18] sm:$0xff]  ;;  %v303_v13 = vld [vmem:[%s6597_s8 + $0x20] sm:$0xff] }
  0x12   : > { %239 = vst [vmem:[#allocation2 + $0x30] sm:$0xff] %v6443_v3  ;;  %240 = vst [vmem:[#allocation2 + $0x38] sm:$0xff] %v6443_v3  ;;  %v304_v14 = vld [vmem:[%s6597_s8 + $0x28] sm:$0xff]  ;;  %v305_v15 = vld [vmem:[%s6597_s8 + $0x30] sm:$0xff] }
  0x13   : > { %241 = vst [vmem:[#allocation2 + $0x40] sm:$0x3f] %v6443_v3  ;;  %243 = vst [vmem:[#allocation2 + $0x50] sm:$0xff] %v6443_v3  ;;  %v306_v16 = vld [vmem:[%s6597_s8 + $0x38] sm:$0xff]  ;;  %v307_v17 = vld [vmem:[%s6597_s8 + $0x40] sm:$0xff] }
  0x14   : > { %244 = vst [vmem:[#allocation2 + $0x58] sm:$0x3f] %v6443_v3  ;;  %245 = vst [vmem:[#allocation2 + $0x60] sm:$0xff] %v6443_v3  ;;  %v308_v18 = vld [vmem:[%s6597_s8 + $0x48] sm:$0xff]  ;;  %v309_v19 = vld [vmem:[%s6597_s8 + $0x50] sm:$0xff] }
  0x15   : > { %246 = vst [vmem:[#allocation2 + $0x68] sm:$0xff] %v6443_v3  ;;  %247 = vst [vmem:[#allocation2 + $0x70] sm:$0x3f] %v6443_v3  ;;  %v310_v20 = vld [vmem:[%s6597_s8 + $0x58] sm:$0xff]  ;;  %v311_v21 = vld [vmem:[%s6597_s8 + $0x60] sm:$0xff] }
  0x16   : > { %248 = vst [vmem:[#allocation2 + $0x78] sm:$0xff] %v6443_v3  ;;  %249 = vst [vmem:[#allocation2 + $0x80] sm:$0xff] %v6443_v3  ;;  %v312_v22 = vld [vmem:[%s6597_s8 + $0x68] sm:$0xff]  ;;  %v313_v23 = vld [vmem:[%s6597_s8 + $0x70] sm:$0xff] }
  0x17   : > { %250 = vst [vmem:[#allocation2 + $0x88] sm:$0x3f] %v6443_v3  ;;  %251 = vst [vmem:[#allocation2 + $0x90] sm:$0xff] %v6443_v3  ;;  %v314_v24 = vld [vmem:[%s6597_s8 + $0x78] sm:$0xff]  ;;  %v315_v25 = vld [vmem:[%s6597_s8 + $0x80] sm:$0xff] }
  0x18   : > { %252 = vst [vmem:[#allocation2 + $0x98] sm:$0xff] %v6443_v3  ;;  %253 = vst [vmem:[#allocation2 + $0xa0] sm:$0x3f] %v6443_v3  ;;  %v316_v26 = vld [vmem:[%s6597_s8 + $0x88] sm:$0xff]  ;;  %v317_v27 = vld [vmem:[%s6597_s8 + $0x90] sm:$0xff] }
  0x19   : > { %254 = vst [vmem:[#allocation2 + $0xa8] sm:$0xff] %v6443_v3  ;;  %255 = vst [vmem:[#allocation2 + $0xb0] sm:$0xff] %v6443_v3  ;;  %v318_v28 = vld [vmem:[%s6597_s8 + $0x98] sm:$0xff]  ;;  %v319_v29 = vld [vmem:[%s6597_s8 + $0xa0] sm:$0xff] }
  0x1a   : > { %256 = vst [vmem:[#allocation2 + $0xb8] sm:$0x3f] %v6443_v3  ;;  %257 = vst [vmem:[#allocation2 + $0xc0] sm:$0xff] %v6443_v3  ;;  %v320_v30 = vld [vmem:[%s6597_s8 + $0xa8] sm:$0xff]  ;;  %v321_v31 = vld [vmem:[%s6597_s8 + $0xb0] sm:$0xff] }
  0x1b   : > { %258 = vst [vmem:[#allocation2 + $0xc8] sm:$0xff] %v6443_v3  ;;  %259 = vst [vmem:[#allocation2 + $0xd0] sm:$0x3f] %v6443_v3  ;;  %v322_v32 = vld [vmem:[%s6597_s8 + $0xb8] sm:$0xff]  ;;  %v323_v33 = vld [vmem:[%s6597_s8 + $0xc0] sm:$0xff] }
  0x1c   : > { %260 = vst [vmem:[#allocation2 + $0xd8] sm:$0xff] %v6443_v3  ;;  %261 = vst [vmem:[#allocation2 + $0xe0] sm:$0xff] %v6443_v3  ;;  %v324_v34 = vld [vmem:[%s6597_s8 + $0xc8] sm:$0xff]  ;;  %v325_v35 = vld [vmem:[%s6597_s8 + $0xd0] sm:$0xff] }
  0x1d   : > { %262 = vst [vmem:[#allocation2 + $0xe8] sm:$0x3f] %v6443_v3  ;;  %263 = vst [vmem:[#allocation2 + $0xf0] sm:$0xff] %v6443_v3  ;;  %v326_v36 = vld [vmem:[%s6597_s8 + $0xd8] sm:$0xff]  ;;  %v327_v37 = vld [vmem:[%s6597_s8 + $0xe0] sm:$0xff] }
  0x1e   : > { %264 = vst [vmem:[#allocation2 + $0xf8] sm:$0xff] %v6443_v3  ;;  %265 = vst [vmem:[#allocation2 + $0x100] sm:$0x3f] %v6443_v3  ;;  %v328_v38 = vld [vmem:[%s6597_s8 + $0xe8] sm:$0xff]  ;;  %v329_v39 = vld [vmem:[%s6597_s8 + $0xf0] sm:$0xff] }
  0x1f   : > { %266 = vst [vmem:[#allocation2 + $0x108] sm:$0xff] %v6443_v3  ;;  %267 = vst [vmem:[#allocation2 + $0x110] sm:$0xff] %v6443_v3  ;;  %v330_v40 = vld [vmem:[%s6597_s8 + $0xf8] sm:$0xff] }
  0x20   : > { %268 = vst [vmem:[#allocation2 + $0x118] sm:$0x3f] %v6443_v3  ;;  %269 = vst [vmem:[#allocation2 + $0x120] sm:$0xff] %v6443_v3 }
  0x21   : > { %270 = vst [vmem:[#allocation2 + $0x128] sm:$0xff] %v6443_v3  ;;  %271 = vst [vmem:[#allocation2 + $0x130] sm:$0x3f] %v6443_v3 }
  0x22   : > { %272 = vst [vmem:[#allocation2 + $0x138] sm:$0xff] %v6443_v3  ;;  %273 = vst [vmem:[#allocation2 + $0x140] sm:$0xff] %v6443_v3 }
  0x23   : > { %274 = vst [vmem:[#allocation2 + $0x148] sm:$0x3f] %v6443_v3  ;;  %275 = vst [vmem:[#allocation2 + $0x150] sm:$0xff] %v6443_v3 }
  0x24   : > { %276 = vst [vmem:[#allocation2 + $0x158] sm:$0xff] %v6443_v3  ;;  %277 = vst [vmem:[#allocation2 + $0x160] sm:$0x3f] %v6443_v3 }
  0x25   : > { %278 = vst [vmem:[#allocation2 + $0x168] sm:$0xff] %v6443_v3  ;;  %279 = vst [vmem:[#allocation2 + $0x170] sm:$0xff] %v6443_v3 }
  0x26   : > { %280 = vst [vmem:[#allocation2 + $0x178] sm:$0x3f] %v6443_v3  ;;  %281 = vst [vmem:[#allocation2 + $0x180] sm:$0xff] %v6443_v3 }
  0x27   : > { %282 = vst [vmem:[#allocation2 + $0x188] sm:$0xff] %v6443_v3  ;;  %283 = vst [vmem:[#allocation2 + $0x190] sm:$0x3f] %v6443_v3 }
  0x28   : > { %284 = vst [vmem:[#allocation2 + $0x198] sm:$0xff] %v6443_v3  ;;  %285 = vst [vmem:[#allocation2 + $0x1a0] sm:$0xff] %v6443_v3 }
  0x29   : > { %286 = vst [vmem:[#allocation2 + $0x1a8] sm:$0x3f] %v6443_v3  ;;  %287 = vst [vmem:[#allocation2 + $0x1b0] sm:$0xff] %v6443_v3 }
  0x2a   : > { %288 = vst [vmem:[#allocation2 + $0x1b8] sm:$0xff] %v6443_v3  ;;  %289 = vst [vmem:[#allocation2 + $0x1c0] sm:$0x3f] %v6443_v3 }
  0x2b   : > { %290 = vst [vmem:[#allocation2 + $0x1c8] sm:$0xff] %v6443_v3  ;;  %291 = vst [vmem:[#allocation2 + $0x1d0] sm:$0xff] %v6443_v3 }
  0x2c   : > { %292 = vst [vmem:[#allocation2 + $0x1d8] sm:$0x3f] %v6443_v3  ;;  %293 = vst [vmem:[#allocation2 + $0x1e0] sm:$0xff] %v6443_v3 }
  0x2d   : > { %294 = vst [vmem:[#allocation2 + $0x1e8] sm:$0xff] %v6443_v3  ;;  %295 = vst [vmem:[#allocation2 + $0x1f0] sm:$0x3f] %v6443_v3 }
  0x2e   : > { %296 = vst [vmem:[#allocation2 + $0x1f8] sm:$0xff] %v6443_v3  ;;  %297 = vst [vmem:[#allocation2 + $0x200] sm:$0xff] %v6443_v3 }
  0x2f   : > { %298 = vst [vmem:[#allocation2 + $0x208] sm:$0x3f] %v6443_v3  ;;  %12479 = vst [vmem:[#allocation6_spill] sm:$0xff] %v6569_v4 }
  0x30   : > { %12480 = vst [vmem:[#allocation7_spill] sm:$0xff] %v6574_v5  ;;  %12481 = vst [vmem:[#allocation8_spill] sm:$0xff] %v6579_v6 }
  0x31   : > { %12482 = vst [vmem:[#allocation9_spill] sm:$0xff] %v6584_v7  ;;  %12483 = vst [vmem:[#allocation10_spill] sm:$0xff] %v6589_v8 }
  0x32   : > { %332 = vst [vmem:[#allocation2 + $0x4b] sm:$0xff] %v299_v9  ;;  %333 = vst [vmem:[#allocation2 + $0x53] sm:$0xff] %v300_v10 }
  0x33   : > { %334 = vst [vmem:[#allocation2 + $0x63] sm:$0xff] %v301_v11  ;;  %335 = vst [vmem:[#allocation2 + $0x6b] sm:$0xff] %v302_v12 }
  0x34   : > { %336 = vst [vmem:[#allocation2 + $0x7b] sm:$0xff] %v303_v13  ;;  %337 = vst [vmem:[#allocation2 + $0x83] sm:$0xff] %v304_v14 }
  0x35   : > { %338 = vst [vmem:[#allocation2 + $0x93] sm:$0xff] %v305_v15  ;;  %339 = vst [vmem:[#allocation2 + $0x9b] sm:$0xff] %v306_v16 }
  0x36   : > { %340 = vst [vmem:[#allocation2 + $0xab] sm:$0xff] %v307_v17  ;;  %341 = vst [vmem:[#allocation2 + $0xb3] sm:$0xff] %v308_v18 }
  0x37   : > { %342 = vst [vmem:[#allocation2 + $0xc3] sm:$0xff] %v309_v19  ;;  %343 = vst [vmem:[#allocation2 + $0xcb] sm:$0xff] %v310_v20 }
  0x38   : > { %344 = vst [vmem:[#allocation2 + $0xdb] sm:$0xff] %v311_v21  ;;  %345 = vst [vmem:[#allocation2 + $0xe3] sm:$0xff] %v312_v22 }
  0x39   : > { %346 = vst [vmem:[#allocation2 + $0xf3] sm:$0xff] %v313_v23  ;;  %347 = vst [vmem:[#allocation2 + $0xfb] sm:$0xff] %v314_v24 }
  0x3a   : > { %348 = vst [vmem:[#allocation2 + $0x10b] sm:$0xff] %v315_v25  ;;  %349 = vst [vmem:[#allocation2 + $0x113] sm:$0xff] %v316_v26 }
  0x3b   : > { %350 = vst [vmem:[#allocation2 + $0x123] sm:$0xff] %v317_v27  ;;  %351 = vst [vmem:[#allocation2 + $0x12b] sm:$0xff] %v318_v28 }
  0x3c   : > { %352 = vst [vmem:[#allocation2 + $0x13b] sm:$0xff] %v319_v29  ;;  %353 = vst [vmem:[#allocation2 + $0x143] sm:$0xff] %v320_v30 }
  0x3d   : > { %354 = vst [vmem:[#allocation2 + $0x153] sm:$0xff] %v321_v31  ;;  %355 = vst [vmem:[#allocation2 + $0x15b] sm:$0xff] %v322_v32 }
  0x3e   : > { %356 = vst [vmem:[#allocation2 + $0x16b] sm:$0xff] %v323_v33  ;;  %357 = vst [vmem:[#allocation2 + $0x173] sm:$0xff] %v324_v34 }
  0x3f   : > { %358 = vst [vmem:[#allocation2 + $0x183] sm:$0xff] %v325_v35  ;;  %359 = vst [vmem:[#allocation2 + $0x18b] sm:$0xff] %v326_v36 }
  0x40   : > { %360 = vst [vmem:[#allocation2 + $0x19b] sm:$0xff] %v327_v37  ;;  %361 = vst [vmem:[#allocation2 + $0x1a3] sm:$0xff] %v328_v38 }
  0x41   : > { %362 = vst [vmem:[#allocation2 + $0x1b3] sm:$0xff] %v329_v39  ;;  %363 = vst [vmem:[#allocation2 + $0x1bb] sm:$0xff] %v330_v40 }
  0x42 LB: >> { %v12484_v0 = vld [vmem:[#allocation3_spill] sm:$0xff]  ;;  %v12485_v8 = vld [vmem:[#allocation10_spill] sm:$0xff]  ;;  %v411_v41 = vlaneseq  ;;  %s6214_s16 = smul.u32 192, %s6441_s12  ;;  %vm499_vm0 = vcmask 1046528   ;;  %vm624_vm1 = vcmask 1045504   ;;  %vm749_vm2 = vcmask 1044480   ;;  %s6441_s12 = sphi %s6636_s12, %s383_s12  }
  0x43   : >> { %vm874_vm3 = vcmask 1043456   ;;  %vm999_vm4 = vcmask 1042432   ;;  %vm1124_vm5 = vcmask 1041408   ;;  %s6377_s18 = sshll.u32 %s6441_s12, 7  ;;  %s383_s12 = sadd.s32 1, %s6441_s12  }
  0x44   : >> { %v412_v42 = vshrl.u32 %v411_v41, 7  ;;  %s6650_s17 = scalar_lea.vmem [#allocation2], %s6214_s16  ;;  %s12134_s19 = scalar_lea.vmem %s6602_s11, %s6377_s18 }
  0x45   : >> { %p380_p5 = scmp.ge.s32.totalorder %s383_s12, 2  }
  0x46   : >> { %v6642_v43 = vsub.s32 0, %v412_v42  ;;  %v6644_v44 = vsub.s32 1, %v412_v42  ;;  %v6646_v45 = vsub.s32 2, %v412_v42  ;;  %v6648_v46 = vsub.s32 3, %v412_v42 }
  0x47   : >> { %v6658_v49 = vsub.s32 4, %v412_v42  ;;  %v6660_v50 = vsub.s32 5, %v412_v42  ;;  %v6696_v61 = vsub.s32 6, %v412_v42  ;;  %v6698_v62 = vsub.s32 7, %v412_v42 }
  0x48   : >> { %12486 = vst [vmem:[#allocation11_spill] sm:$0xff] %v6642_v43  ;;  %12487 = vst [vmem:[#allocation12_spill] sm:$0xff] %v6644_v44  ;;  %v6653_v47 = vld [vmem:[%s6650_s17] sm:$0xff]  ;;  %v6656_v48 = vld [vmem:[%s6650_s17 + $0x8] sm:$0xff]  ;;  %v414_v53 = vrot.slane %v12484_v0, %v6642_v43  ;;  %v6672_v54 = vrot.slane %v12484_v0, %v6644_v44  ;;  %v6676_v55 = vrot.slane %v12484_v0, %v6646_v45 }
  0x49   : >> { %12488 = vst [vmem:[#allocation13_spill] sm:$0xff] %v6646_v45  ;;  %12489 = vst [vmem:[#allocation14_spill] sm:$0xff] %v6648_v46  ;;  %v6663_v51 = vld [vmem:[%s6650_s17 + $0x18] sm:$0xff]  ;;  %v6666_v52 = vld [vmem:[%s6650_s17 + $0x20] sm:$0xff]  ;;  %v6680_v56 = vrot.slane %v12484_v0, %v6648_v46  ;;  %v6690_v59 = vrot.slane %v12484_v0, %v6658_v49  ;;  %v6694_v60 = vrot.slane %v12484_v0, %v6660_v50 }
  0x4a   : >> { %12490 = vst [vmem:[#allocation15_spill] sm:$0xff] %v6658_v49  ;;  %12491 = vst [vmem:[#allocation16_spill] sm:$0xff] %v6660_v50  ;;  %v6683_v57 = vld [vmem:[%s6650_s17 + $0x30] sm:$0xff]  ;;  %v6686_v58 = vld [vmem:[%s6650_s17 + $0x38] sm:$0xff]  ;;  %v415_v9 = vmul.f32 %v414_v53, %v6653_v47  ;;  %v416_v10 = vmul.f32 %v414_v53, %v6656_v48  ;;  %v417_v11 = vmul.f32 %v414_v53, %v6663_v51 }
  0x4b   : >> { %12492 = vst [vmem:[#allocation17_spill] sm:$0xff] %v6680_v56  ;;  %12493 = vst [vmem:[#allocation18_spill] sm:$0xff] %v6686_v58  ;;  %v6701_v63 = vld [vmem:[%s6650_s17 + $0x48] sm:$0xff]  ;;  %v6704_v3 = vld [vmem:[%s6650_s17 + $0x50] sm:$0xff]  ;;  %v418_v12 = vmul.f32 %v414_v53, %v6666_v52  ;;  %v419_v15 = vmul.f32 %v414_v53, %v6683_v57  ;;  %v420_v16 = vmul.f32 %v414_v53, %v6686_v58 }
  0x4c   : >> { %12494 = vst [vmem:[#allocation19_spill] sm:$0xff] %v6690_v59  ;;  %12495 = vst [vmem:[#allocation20_spill] sm:$0xff] %v6694_v60  ;;  %v6711_v13 = vld [vmem:[%s6650_s17 + $0x60] sm:$0xff]  ;;  %v6714_v14 = vld [vmem:[%s6650_s17 + $0x68] sm:$0xff]  ;;  %v421_v17 = vmul.f32 %v414_v53, %v6701_v63  ;;  %v422_v18 = vmul.f32 %v414_v53, %v6704_v3  ;;  %v6729_v23 = vadd.f32 %v12485_v8, %v415_v9 }
  0x4d   : >> { %12496 = vst [vmem:[#allocation21_spill] sm:$0xff] %v6696_v61  ;;  %12497 = vst [vmem:[#allocation22_spill] sm:$0xff] %v6698_v62  ;;  %v6721_v19 = vld [vmem:[%s6650_s17 + $0x78] sm:$0xff]  ;;  %v6724_v20 = vld [vmem:[%s6650_s17 + $0x80] sm:$0xff]  ;;  %v423_v21 = vmul.f32 %v414_v53, %v6711_v13  ;;  %v424_v22 = vmul.f32 %v414_v53, %v6714_v14  ;;  %v6732_v24 = vadd.f32 %v12485_v8, %v416_v10 }
  0x4e   : >> { %12498 = vst [vmem:[#allocation23_spill] sm:$0xff] %v6701_v63  ;;  %12499 = vst [vmem:[#allocation24_spill] sm:$0xff] %v6704_v3  ;;  %v6735_v25 = vld [vmem:[%s6650_s17 + $0x90] sm:$0xff]  ;;  %v6738_v26 = vld [vmem:[%s6650_s17 + $0x98] sm:$0xff]  ;;  %v425_v27 = vmul.f32 %v414_v53, %v6721_v19  ;;  %v426_v28 = vmul.f32 %v414_v53, %v6724_v20  ;;  %v6743_v29 = vadd.f32 %v12485_v8, %v417_v11 }
  0x4f   : >> { %12500 = vst [vmem:[#allocation25_spill] sm:$0xff] %v6711_v13  ;;  %12501 = vst [vmem:[#allocation26_spill] sm:$0xff] %v6714_v14  ;;  %v6746_v30 = vadd.f32 %v12485_v8, %v418_v12  ;;  %v6749_v31 = vld [vmem:[%s6650_s17 + $0xa8] sm:$0xff]  ;;  %v6752_v32 = vld [vmem:[%s6650_s17 + $0xb0] sm:$0xff]  ;;  %v427_v33 = vmul.f32 %v414_v53, %v6735_v25  ;;  %v428_v34 = vmul.f32 %v414_v53, %v6738_v26 }
  0x50   : >> { %12502 = vst [vmem:[#allocation27_spill] sm:$0xff] %v6721_v19  ;;  %12503 = vst [vmem:[#allocation28_spill] sm:$0xff] %v6724_v20  ;;  %v6757_v35 = vadd.f32 %v12485_v8, %v419_v15  ;;  %v6760_v36 = vadd.f32 %v12485_v8, %v420_v16  ;;  %v6763_v37 = vld [vmem:[%s6650_s17 + $0x10] sm:$0x3f]  ;;  %v429_v38 = vmul.f32 %v414_v53, %v6749_v31  ;;  %v6774_v42 = vld [vmem:[%s6650_s17 + $0x28] sm:$0x3f] }
  0x51   : >> { %12504 = vst [vmem:[#allocation29_spill] sm:$0xff] %v6735_v25  ;;  %12505 = vst [vmem:[#allocation30_spill] sm:$0xff] %v6738_v26  ;;  %v430_v39 = vmul.f32 %v414_v53, %v6752_v32  ;;  %v6768_v40 = vadd.f32 %v12485_v8, %v421_v17  ;;  %v6771_v41 = vadd.f32 %v12485_v8, %v422_v18  ;;  %v6789_v12 = vld [vmem:[%s6650_s17 + $0x40] sm:$0x3f]  ;;  %v6792_v15 = vld [vmem:[%s6650_s17 + $0x58] sm:$0x3f] }
  0x52   : >> { %12506 = vst [vmem:[#allocation31_spill] sm:$0xff] %v6749_v31  ;;  %12507 = vst [vmem:[#allocation32_spill] sm:$0xff] %v6752_v32  ;;  %v6777_v9 = vadd.f32 %v12485_v8, %v423_v21  ;;  %v6780_v10 = vadd.f32 %v12485_v8, %v424_v22  ;;  %v6783_v11 = vadd.f32 %v12485_v8, %v425_v27  ;;  %v6807_v22 = vld [vmem:[%s6650_s17 + $0x70] sm:$0x3f]  ;;  %v6818_v7 = vld [vmem:[%s6650_s17 + $0x88] sm:$0x3f] }
  0x53   : >> { %v6786_v53 = vadd.f32 %v12485_v8, %v426_v28  ;;  %12508 = vst [vmem:[#allocation33_spill] sm:$0xff] %v6789_v12  ;;  %12509 = vst [vmem:[#allocation34_spill] sm:$0xff] %v6792_v15  ;;  %v6795_v16 = vadd.f32 %v12485_v8, %v427_v33  ;;  %v6798_v17 = vadd.f32 %v12485_v8, %v428_v34  ;;  %v6829_v5 = vld [vmem:[%s6650_s17 + $0xa0] sm:$0x3f]  ;;  %v6832_v4 = vld [vmem:[%s6650_s17 + $0xb8] sm:$0x3f] }
  0x54   : >> { %v6801_v18 = vadd.f32 %v12485_v8, %v429_v38  ;;  %v6804_v21 = vadd.f32 %v12485_v8, %v430_v39  ;;  %12510 = vst [vmem:[#allocation35_spill] sm:$0xff] %v6807_v22  ;;  %v451_v27 = vmul.f32 %v6672_v54, %v6653_v47  ;;  %v452_v28 = vmul.f32 %v6672_v54, %v6656_v48 }
  0x55   : >> { %v453_v33 = vmul.f32 %v6672_v54, %v6763_v37  ;;  %v454_v34 = vmul.f32 %v6672_v54, %v6663_v51  ;;  %12511 = vst [vmem:[#allocation36_spill] sm:$0xff] %v6818_v7  ;;  %v455_v38 = vmul.f32 %v6672_v54, %v6666_v52  ;;  %v456_v39 = vmul.f32 %v6672_v54, %v6774_v42 }
  0x56   : >> { %v457_v8 = vmul.f32 %v6672_v54, %v6683_v57  ;;  %v458_v6 = vmul.f32 %v6672_v54, %v6686_v58  ;;  %12512 = vst [vmem:[#allocation37_spill] sm:$0xff] %v6829_v5  ;;  %v459_v2 = vmul.f32 %v6672_v54, %v6789_v12  ;;  %v460_v50 = vmul.f32 %v6672_v54, %v6701_v63 }
  0x57   : >> { %v461_v49 = vmul.f32 %v6672_v54, %v6704_v3  ;;  %v462_v46 = vmul.f32 %v6672_v54, %v6792_v15  ;;  %v463_v45 = vmul.f32 %v6672_v54, %v6711_v13  ;;  %v464_v44 = vmul.f32 %v6672_v54, %v6714_v14 }
  0x58   : >> { %v465_v1 = vmul.f32 %v6672_v54, %v6807_v22  ;;  %v466_v43 = vmul.f32 %v6672_v54, %v6721_v19  ;;  %v467_v62 = vmul.f32 %v6672_v54, %v6724_v20  ;;  %v468_v0 = vmul.f32 %v6672_v54, %v6818_v7 }
  0x59   : >> { %v469_v61 = vmul.f32 %v6672_v54, %v6735_v25  ;;  %v470_v60 = vmul.f32 %v6672_v54, %v6738_v26  ;;  %v471_v59 = vmul.f32 %v6672_v54, %v6829_v5  ;;  %v472_v56 = vmul.f32 %v6672_v54, %v6749_v31 }
  0x5a   : >> { %v473_v19 = vmul.f32 %v6672_v54, %v6752_v32  ;;  %v474_v20 = vmul.f32 %v6672_v54, %v6832_v4  ;;  %v500_v22 = vrot.slane %v451_v27, 1  ;;  %v501_v7 = vrot.slane %v452_v28, 1 }
  0x5b   : >> { %v503_v14 = vrot.slane %v453_v33, 1  ;;  %v505_v13 = vrot.slane %v454_v34, 1  ;;  %v506_v25 = vrot.slane %v455_v38, 1  ;;  %v508_v15 = vrot.slane %v456_v39, 1 }
  0x5c   : >> { %v510_v3 = vrot.slane %v457_v8, 1  ;;  %v511_v26 = vrot.slane %v458_v6, 1  ;;  %v502_v63 = vsel %vm499_vm0, %v500_v22, %v501_v7  ;;  %v513_v12 = vrot.slane %v459_v2, 1 }
  0x5d   : >> { %v504_v5 = vsel %vm499_vm0, %v501_v7, %v503_v14  ;;  %v515_v31 = vrot.slane %v460_v50, 1  ;;  %v507_v58 = vsel %vm499_vm0, %v505_v13, %v506_v25  ;;  %v509_v32 = vsel %vm499_vm0, %v506_v25, %v508_v15 }
  0x5e   : >> { %v512_v54 = vsel %vm499_vm0, %v510_v3, %v511_v26  ;;  %v516_v27 = vrot.slane %v461_v49, 1  ;;  %v514_v28 = vsel %vm499_vm0, %v511_v26, %v513_v12  ;;  %v518_v33 = vrot.slane %v462_v46, 1  ;;  %v12513_v12 = vld [vmem:[#allocation18_spill] sm:$0xff] }
  0x5f   : >> { %v520_v34 = vrot.slane %v463_v45, 1  ;;  %v521_v38 = vrot.slane %v464_v44, 1  ;;  %v523_v8 = vrot.slane %v465_v1, 1  ;;  %v525_v22 = vrot.slane %v466_v43, 1 }
  0x60   : >> { %v517_v6 = vsel %vm499_vm0, %v515_v31, %v516_v27  ;;  %v526_v39 = vrot.slane %v467_v62, 1  ;;  %v519_v2 = vsel %vm499_vm0, %v516_v27, %v518_v33  ;;  %v528_v50 = vrot.slane %v468_v0, 1 }
  0x61   : >> { %v522_v7 = vsel %vm499_vm0, %v520_v34, %v521_v38  ;;  %v530_v13 = vrot.slane %v469_v61, 1  ;;  %v524_v14 = vsel %vm499_vm0, %v521_v38, %v523_v8  ;;  %v531_v3 = vrot.slane %v470_v60, 1  ;;  %v12518_v34 = vld [vmem:[#allocation25_spill] sm:$0xff] }
  0x62   : >> { %v527_v49 = vsel %vm499_vm0, %v525_v22, %v526_v39  ;;  %v533_v25 = vrot.slane %v471_v59, 1  ;;  %v529_v45 = vsel %vm499_vm0, %v526_v39, %v528_v50  ;;  %v535_v44 = vrot.slane %v472_v56, 1  ;;  %v12520_v22 = vld [vmem:[#allocation35_spill] sm:$0xff]  ;;  %v12522_v50 = vld [vmem:[#allocation28_spill] sm:$0xff] }
  0x63   : >> { %v536_v46 = vrot.slane %v473_v19, 1  ;;  %v538_v26 = vrot.slane %v474_v20, 1  ;;  %v532_v1 = vsel %vm499_vm0, %v530_v13, %v531_v3  ;;  %v6881_v62 = vadd.f32 %v502_v63, %v6729_v23 }
  0x64   : >> { %v534_v43 = vsel %vm499_vm0, %v531_v3, %v533_v25  ;;  %v6884_v0 = vadd.f32 %v504_v5, %v6732_v24  ;;  %v6889_v59 = vadd.f32 %v507_v58, %v6743_v29  ;;  %v6892_v56 = vadd.f32 %v509_v32, %v6746_v30  ;;  %v12524_v3 = vld [vmem:[#allocation29_spill] sm:$0xff] }
  0x65   : >> { %v537_v61 = vsel %vm499_vm0, %v535_v44, %v536_v46  ;;  %v539_v60 = vsel %vm499_vm0, %v536_v46, %v538_v26  ;;  %v6895_v19 = vadd.f32 %v512_v54, %v6757_v35  ;;  %v6898_v20 = vadd.f32 %v514_v28, %v6760_v36  ;;  %v12516_v54 = vld [vmem:[#allocation24_spill] sm:$0xff]  ;;  %v12517_v28 = vld [vmem:[#allocation34_spill] sm:$0xff]  ;;  %v12526_v46 = vld [vmem:[#allocation37_spill] sm:$0xff] }
  0x66   : >> { %v6901_v63 = vadd.f32 %v517_v6, %v6768_v40  ;;  %v6904_v5 = vadd.f32 %v519_v2, %v6771_v41  ;;  %v6907_v23 = vadd.f32 %v522_v7, %v6777_v9  ;;  %v6910_v58 = vadd.f32 %v524_v14, %v6780_v10  ;;  %v12519_v6 = vld [vmem:[#allocation26_spill] sm:$0xff]  ;;  %v12521_v2 = vld [vmem:[#allocation27_spill] sm:$0xff]  ;;  %v12523_v14 = vld [vmem:[#allocation36_spill] sm:$0xff] }
  0x67   : >> { %v6913_v24 = vadd.f32 %v527_v49, %v6783_v11  ;;  %v6916_v29 = vadd.f32 %v529_v45, %v6786_v53  ;;  %v6919_v30 = vadd.f32 %v532_v1, %v6795_v16  ;;  %v6922_v31 = vadd.f32 %v534_v43, %v6798_v17  ;;  %v12514_v16 = vld [vmem:[#allocation33_spill] sm:$0xff]  ;;  %v12525_v45 = vld [vmem:[#allocation30_spill] sm:$0xff]  ;;  %v12527_v1 = vld [vmem:[#allocation31_spill] sm:$0xff] }
  0x68   : >> { %v6925_v32 = vadd.f32 %v537_v61, %v6801_v18  ;;  %v6928_v35 = vadd.f32 %v539_v60, %v6804_v21  ;;  %v576_v36 = vmul.f32 %v6676_v55, %v6653_v47  ;;  %v577_v40 = vmul.f32 %v6676_v55, %v6656_v48  ;;  %v12515_v18 = vld [vmem:[#allocation23_spill] sm:$0xff]  ;;  %v12528_v61 = vld [vmem:[#allocation32_spill] sm:$0xff] }
  0x69   : >> { %v578_v41 = vmul.f32 %v6676_v55, %v6763_v37  ;;  %v579_v9 = vmul.f32 %v6676_v55, %v6663_v51  ;;  %v580_v10 = vmul.f32 %v6676_v55, %v6666_v52  ;;  %v581_v11 = vmul.f32 %v6676_v55, %v6774_v42 }
  0x6a   : >> { %v582_v53 = vmul.f32 %v6676_v55, %v6683_v57  ;;  %v583_v15 = vmul.f32 %v6676_v55, %v12513_v12  ;;  %v584_v17 = vmul.f32 %v6676_v55, %v12514_v16  ;;  %v585_v21 = vmul.f32 %v6676_v55, %v12515_v18 }
  0x6b   : >> { %v586_v27 = vmul.f32 %v6676_v55, %v12516_v54  ;;  %v587_v33 = vmul.f32 %v6676_v55, %v12517_v28  ;;  %v588_v38 = vmul.f32 %v6676_v55, %v12518_v34  ;;  %v589_v8 = vmul.f32 %v6676_v55, %v12519_v6 }
  0x6c   : >> { %v590_v39 = vmul.f32 %v6676_v55, %v12520_v22  ;;  %v591_v7 = vmul.f32 %v6676_v55, %v12521_v2  ;;  %v592_v13 = vmul.f32 %v6676_v55, %v12522_v50  ;;  %v593_v49 = vmul.f32 %v6676_v55, %v12523_v14 }
  0x6d   : >> { %v594_v25 = vmul.f32 %v6676_v55, %v12524_v3  ;;  %v595_v44 = vmul.f32 %v6676_v55, %v12525_v45  ;;  %v596_v26 = vmul.f32 %v6676_v55, %v12526_v46  ;;  %v597_v43 = vmul.f32 %v6676_v55, %v12527_v1 }
  0x6e   : >> { %v598_v60 = vmul.f32 %v6676_v55, %v12528_v61  ;;  %v599_v50 = vmul.f32 %v6676_v55, %v6832_v4  ;;  %v625_v2 = vrot.slane %v576_v36, 2  ;;  %v626_v14 = vrot.slane %v577_v40, 2 }
  0x6f   : >> { %v628_v22 = vrot.slane %v578_v41, 2  ;;  %v630_v6 = vrot.slane %v579_v9, 2  ;;  %v631_v3 = vrot.slane %v580_v10, 2  ;;  %v633_v34 = vrot.slane %v581_v11, 2 }
  0x70   : >> { %v635_v28 = vrot.slane %v582_v53, 2  ;;  %v636_v45 = vrot.slane %v583_v15, 2  ;;  %v627_v54 = vsel %vm624_vm1, %v625_v2, %v626_v14  ;;  %v638_v18 = vrot.slane %v584_v17, 2 }
  0x71   : >> { %v629_v46 = vsel %vm624_vm1, %v626_v14, %v628_v22  ;;  %v640_v1 = vrot.slane %v585_v21, 2  ;;  %v632_v16 = vsel %vm624_vm1, %v630_v6, %v631_v3  ;;  %v634_v61 = vsel %vm624_vm1, %v631_v3, %v633_v34 }
  0x72   : >> { %v637_v55 = vsel %vm624_vm1, %v635_v28, %v636_v45  ;;  %v641_v36 = vrot.slane %v586_v27, 2  ;;  %v639_v40 = vsel %vm624_vm1, %v636_v45, %v638_v18  ;;  %v643_v41 = vrot.slane %v587_v33, 2 }
  0x73   : >> { %v645_v9 = vrot.slane %v588_v38, 2  ;;  %v646_v10 = vrot.slane %v589_v8, 2  ;;  %v648_v53 = vrot.slane %v590_v39, 2  ;;  %v650_v15 = vrot.slane %v591_v7, 2 }
  0x74   : >> { %v642_v11 = vsel %vm624_vm1, %v640_v1, %v641_v36  ;;  %v651_v2 = vrot.slane %v592_v13, 2  ;;  %v644_v17 = vsel %vm624_vm1, %v641_v36, %v643_v41  ;;  %v653_v6 = vrot.slane %v593_v49, 2  ;;  %v12530_v1 = vld [vmem:[#allocation33_spill] sm:$0xff] }
  0x75   : >> { %v647_v21 = vsel %vm624_vm1, %v645_v9, %v646_v10  ;;  %v655_v22 = vrot.slane %v594_v25, 2  ;;  %v649_v34 = vsel %vm624_vm1, %v646_v10, %v648_v53  ;;  %v656_v28 = vrot.slane %v595_v44, 2  ;;  %v12534_v9 = vld [vmem:[#allocation25_spill] sm:$0xff] }
  0x76   : >> { %v652_v27 = vsel %vm624_vm1, %v650_v15, %v651_v2  ;;  %v658_v18 = vrot.slane %v596_v26, 2  ;;  %v654_v33 = vsel %vm624_vm1, %v651_v2, %v653_v6  ;;  %v660_v38 = vrot.slane %v597_v43, 2  ;;  %v12536_v15 = vld [vmem:[#allocation35_spill] sm:$0xff]  ;;  %v12538_v6 = vld [vmem:[#allocation28_spill] sm:$0xff] }
  0x77   : >> { %v661_v8 = vrot.slane %v598_v60, 2  ;;  %v663_v14 = vrot.slane %v599_v50, 2  ;;  %v657_v39 = vsel %vm624_vm1, %v655_v22, %v656_v28  ;;  %v6993_v13 = vadd.f32 %v627_v54, %v6881_v62 }
  0x78   : >> { %v659_v7 = vsel %vm624_vm1, %v656_v28, %v658_v18  ;;  %v6996_v49 = vadd.f32 %v629_v46, %v6884_v0  ;;  %v7001_v45 = vadd.f32 %v632_v16, %v6889_v59  ;;  %v7004_v44 = vadd.f32 %v634_v61, %v6892_v56  ;;  %v12531_v61 = vld [vmem:[#allocation23_spill] sm:$0xff]  ;;  %v12540_v28 = vld [vmem:[#allocation29_spill] sm:$0xff] }
  0x79   : >> { %v662_v3 = vsel %vm624_vm1, %v660_v38, %v661_v8  ;;  %v664_v25 = vsel %vm624_vm1, %v661_v8, %v663_v14  ;;  %v7007_v50 = vadd.f32 %v637_v55, %v6895_v19  ;;  %v7010_v26 = vadd.f32 %v639_v40, %v6898_v20  ;;  %v12532_v55 = vld [vmem:[#allocation24_spill] sm:$0xff]  ;;  %v12533_v40 = vld [vmem:[#allocation34_spill] sm:$0xff]  ;;  %v12542_v8 = vld [vmem:[#allocation37_spill] sm:$0xff] }
  0x7a   : >> { %v7013_v62 = vadd.f32 %v642_v11, %v6901_v63  ;;  %v7016_v0 = vadd.f32 %v644_v17, %v6904_v5  ;;  %v7019_v54 = vadd.f32 %v647_v21, %v6907_v23  ;;  %v7022_v59 = vadd.f32 %v649_v34, %v6910_v58  ;;  %v12529_v58 = vld [vmem:[#allocation17_spill] sm:$0xff]  ;;  %v12535_v11 = vld [vmem:[#allocation26_spill] sm:$0xff]  ;;  %v12537_v17 = vld [vmem:[#allocation27_spill] sm:$0xff] }
  0x7b   : >> { %v7025_v56 = vadd.f32 %v652_v27, %v6913_v24  ;;  %v7028_v19 = vadd.f32 %v654_v33, %v6916_v29  ;;  %v7031_v20 = vadd.f32 %v657_v39, %v6919_v30  ;;  %v7034_v63 = vadd.f32 %v659_v7, %v6922_v31  ;;  %v12539_v34 = vld [vmem:[#allocation36_spill] sm:$0xff]  ;;  %v12541_v33 = vld [vmem:[#allocation30_spill] sm:$0xff]  ;;  %v12543_v39 = vld [vmem:[#allocation31_spill] sm:$0xff] }
  0x7c   : >> { %v7037_v5 = vadd.f32 %v662_v3, %v6925_v32  ;;  %v7040_v23 = vadd.f32 %v664_v25, %v6928_v35  ;;  %v701_v16 = vmul.f32 %v12529_v58, %v6653_v47  ;;  %v702_v24 = vmul.f32 %v12529_v58, %v6656_v48  ;;  %v12544_v3 = vld [vmem:[#allocation32_spill] sm:$0xff] }
  0x7d   : >> { %v703_v29 = vmul.f32 %v12529_v58, %v6763_v37  ;;  %v704_v30 = vmul.f32 %v12529_v58, %v6663_v51  ;;  %v705_v31 = vmul.f32 %v12529_v58, %v6666_v52  ;;  %v706_v32 = vmul.f32 %v12529_v58, %v6774_v42 }
  0x7e   : >> { %v707_v35 = vmul.f32 %v12529_v58, %v6683_v57  ;;  %v708_v46 = vmul.f32 %v12529_v58, %v12513_v12  ;;  %v709_v43 = vmul.f32 %v12529_v58, %v12530_v1  ;;  %v710_v60 = vmul.f32 %v12529_v58, %v12531_v61 }
  0x7f   : >> { %v711_v36 = vmul.f32 %v12529_v58, %v12532_v55  ;;  %v712_v41 = vmul.f32 %v12529_v58, %v12533_v40  ;;  %v713_v10 = vmul.f32 %v12529_v58, %v12534_v9  ;;  %v714_v53 = vmul.f32 %v12529_v58, %v12535_v11 }
  0x80   : >> { %v715_v2 = vmul.f32 %v12529_v58, %v12536_v15  ;;  %v716_v21 = vmul.f32 %v12529_v58, %v12537_v17  ;;  %v717_v22 = vmul.f32 %v12529_v58, %v12538_v6  ;;  %v718_v27 = vmul.f32 %v12529_v58, %v12539_v34 }
  0x81   : >> { %v719_v18 = vmul.f32 %v12529_v58, %v12540_v28  ;;  %v720_v38 = vmul.f32 %v12529_v58, %v12541_v33  ;;  %v721_v14 = vmul.f32 %v12529_v58, %v12542_v8  ;;  %v722_v7 = vmul.f32 %v12529_v58, %v12543_v39 }
  0x82   : >> { %v723_v25 = vmul.f32 %v12529_v58, %v12544_v3  ;;  %v724_v6 = vmul.f32 %v12529_v58, %v6832_v4  ;;  %v750_v17 = vrot.slane %v701_v16, 3  ;;  %v751_v34 = vrot.slane %v702_v24, 3 }
  0x83   : >> { %v753_v15 = vrot.slane %v703_v29, 3  ;;  %v755_v11 = vrot.slane %v704_v30, 3  ;;  %v756_v28 = vrot.slane %v705_v31, 3  ;;  %v758_v9 = vrot.slane %v706_v32, 3 }
  0x84   : >> { %v760_v40 = vrot.slane %v707_v35, 3  ;;  %v761_v33 = vrot.slane %v708_v46, 3  ;;  %v752_v55 = vsel %vm749_vm2, %v750_v17, %v751_v34  ;;  %v763_v61 = vrot.slane %v709_v43, 3 }
  0x85   : >> { %v754_v8 = vsel %vm749_vm2, %v751_v34, %v753_v15  ;;  %v765_v39 = vrot.slane %v710_v60, 3  ;;  %v757_v1 = vsel %vm749_vm2, %v755_v11, %v756_v28  ;;  %v759_v3 = vsel %vm749_vm2, %v756_v28, %v758_v9 }
  0x86   : >> { %v762_v58 = vsel %vm749_vm2, %v760_v40, %v761_v33  ;;  %v766_v16 = vrot.slane %v711_v36, 3  ;;  %v764_v24 = vsel %vm749_vm2, %v761_v33, %v763_v61  ;;  %v768_v29 = vrot.slane %v712_v41, 3 }
  0x87   : >> { %v770_v30 = vrot.slane %v713_v10, 3  ;;  %v771_v31 = vrot.slane %v714_v53, 3  ;;  %v773_v35 = vrot.slane %v715_v2, 3  ;;  %v775_v46 = vrot.slane %v716_v21, 3 }
  0x88   : >> { %v767_v32 = vsel %vm749_vm2, %v765_v39, %v766_v16  ;;  %v776_v17 = vrot.slane %v717_v22, 3  ;;  %v769_v43 = vsel %vm749_vm2, %v766_v16, %v768_v29  ;;  %v778_v11 = vrot.slane %v718_v27, 3  ;;  %v12546_v39 = vld [vmem:[#allocation33_spill] sm:$0xff] }
  0x89   : >> { %v772_v60 = vsel %vm749_vm2, %v770_v30, %v771_v31  ;;  %v780_v15 = vrot.slane %v719_v18, 3  ;;  %v774_v9 = vsel %vm749_vm2, %v771_v31, %v773_v35  ;;  %v781_v40 = vrot.slane %v720_v38, 3  ;;  %v12550_v30 = vld [vmem:[#allocation25_spill] sm:$0xff] }
  0x8a   : >> { %v777_v36 = vsel %vm749_vm2, %v775_v46, %v776_v17  ;;  %v783_v61 = vrot.slane %v721_v14, 3  ;;  %v779_v41 = vsel %vm749_vm2, %v776_v17, %v778_v11  ;;  %v785_v10 = vrot.slane %v722_v7, 3  ;;  %v12552_v46 = vld [vmem:[#allocation35_spill] sm:$0xff]  ;;  %v12554_v11 = vld [vmem:[#allocation28_spill] sm:$0xff] }
  0x8b   : >> { %v786_v53 = vrot.slane %v723_v25, 3  ;;  %v788_v34 = vrot.slane %v724_v6, 3  ;;  %v782_v2 = vsel %vm749_vm2, %v780_v15, %v781_v40  ;;  %v7105_v22 = vadd.f32 %v752_v55, %v6993_v13 }
  0x8c   : >> { %v784_v21 = vsel %vm749_vm2, %v781_v40, %v783_v61  ;;  %v7108_v27 = vadd.f32 %v754_v8, %v6996_v49  ;;  %v7113_v33 = vadd.f32 %v757_v1, %v7001_v45  ;;  %v7116_v38 = vadd.f32 %v759_v3, %v7004_v44  ;;  %v12547_v3 = vld [vmem:[#allocation23_spill] sm:$0xff]  ;;  %v12556_v40 = vld [vmem:[#allocation29_spill] sm:$0xff] }
  0x8d   : >> { %v787_v28 = vsel %vm749_vm2, %v785_v10, %v786_v53  ;;  %v789_v18 = vsel %vm749_vm2, %v786_v53, %v788_v34  ;;  %v7119_v6 = vadd.f32 %v762_v58, %v7007_v50  ;;  %v7122_v14 = vadd.f32 %v764_v24, %v7010_v26  ;;  %v12548_v58 = vld [vmem:[#allocation24_spill] sm:$0xff]  ;;  %v12549_v24 = vld [vmem:[#allocation34_spill] sm:$0xff]  ;;  %v12558_v53 = vld [vmem:[#allocation37_spill] sm:$0xff] }
  0x8e   : >> { %v7125_v13 = vadd.f32 %v767_v32, %v7013_v62  ;;  %v7128_v49 = vadd.f32 %v769_v43, %v7016_v0  ;;  %v7131_v55 = vadd.f32 %v772_v60, %v7019_v54  ;;  %v7134_v45 = vadd.f32 %v774_v9, %v7022_v59  ;;  %v12545_v59 = vld [vmem:[#allocation19_spill] sm:$0xff]  ;;  %v12551_v32 = vld [vmem:[#allocation26_spill] sm:$0xff]  ;;  %v12555_v9 = vld [vmem:[#allocation36_spill] sm:$0xff] }
  0x8f   : >> { %v7137_v44 = vadd.f32 %v777_v36, %v7025_v56  ;;  %v7140_v50 = vadd.f32 %v779_v41, %v7028_v19  ;;  %v7143_v26 = vadd.f32 %v782_v2, %v7031_v20  ;;  %v7146_v62 = vadd.f32 %v784_v21, %v7034_v63  ;;  %v12553_v43 = vld [vmem:[#allocation27_spill] sm:$0xff]  ;;  %v12557_v41 = vld [vmem:[#allocation30_spill] sm:$0xff] }
  0x90   : >> { %v7149_v0 = vadd.f32 %v787_v28, %v7037_v5  ;;  %v7152_v54 = vadd.f32 %v789_v18, %v7040_v23  ;;  %v826_v1 = vmul.f32 %v12545_v59, %v6653_v47  ;;  %v827_v56 = vmul.f32 %v12545_v59, %v6656_v48  ;;  %v12559_v2 = vld [vmem:[#allocation31_spill] sm:$0xff]  ;;  %v12560_v28 = vld [vmem:[#allocation32_spill] sm:$0xff] }
  0x91   : >> { %v828_v19 = vmul.f32 %v12545_v59, %v6763_v37  ;;  %v829_v20 = vmul.f32 %v12545_v59, %v6663_v51  ;;  %v830_v63 = vmul.f32 %v12545_v59, %v6666_v52  ;;  %v831_v5 = vmul.f32 %v12545_v59, %v6774_v42 }
  0x92   : >> { %v832_v23 = vmul.f32 %v12545_v59, %v6683_v57  ;;  %v833_v8 = vmul.f32 %v12545_v59, %v12513_v12  ;;  %v834_v7 = vmul.f32 %v12545_v59, %v12546_v39  ;;  %v835_v25 = vmul.f32 %v12545_v59, %v12547_v3 }
  0x93   : >> { %v836_v16 = vmul.f32 %v12545_v59, %v12548_v58  ;;  %v837_v29 = vmul.f32 %v12545_v59, %v12549_v24  ;;  %v838_v31 = vmul.f32 %v12545_v59, %v12550_v30  ;;  %v839_v35 = vmul.f32 %v12545_v59, %v12551_v32 }
  0x94   : >> { %v840_v17 = vmul.f32 %v12545_v59, %v12552_v46  ;;  %v841_v60 = vmul.f32 %v12545_v59, %v12553_v43  ;;  %v842_v15 = vmul.f32 %v12545_v59, %v12554_v11  ;;  %v843_v36 = vmul.f32 %v12545_v59, %v12555_v9 }
  0x95   : >> { %v844_v61 = vmul.f32 %v12545_v59, %v12556_v40  ;;  %v845_v10 = vmul.f32 %v12545_v59, %v12557_v41  ;;  %v846_v34 = vmul.f32 %v12545_v59, %v12558_v53  ;;  %v847_v21 = vmul.f32 %v12545_v59, %v12559_v2 }
  0x96   : >> { %v848_v18 = vmul.f32 %v12545_v59, %v12560_v28  ;;  %v849_v11 = vmul.f32 %v12545_v59, %v6832_v4  ;;  %v875_v43 = vrot.slane %v826_v1, 4  ;;  %v876_v9 = vrot.slane %v827_v56, 4 }
  0x97   : >> { %v878_v46 = vrot.slane %v828_v19, 4  ;;  %v880_v32 = vrot.slane %v829_v20, 4  ;;  %v881_v40 = vrot.slane %v830_v63, 4  ;;  %v883_v30 = vrot.slane %v831_v5, 4 }
  0x98   : >> { %v885_v24 = vrot.slane %v832_v23, 4  ;;  %v886_v41 = vrot.slane %v833_v8, 4  ;;  %v877_v58 = vsel %vm874_vm3, %v875_v43, %v876_v9  ;;  %v888_v3 = vrot.slane %v834_v7, 4 }
  0x99   : >> { %v879_v53 = vsel %vm874_vm3, %v876_v9, %v878_v46  ;;  %v890_v2 = vrot.slane %v835_v25, 4  ;;  %v882_v39 = vsel %vm874_vm3, %v880_v32, %v881_v40  ;;  %v884_v28 = vsel %vm874_vm3, %v881_v40, %v883_v30 }
  0x9a   : >> { %v887_v59 = vsel %vm874_vm3, %v885_v24, %v886_v41  ;;  %v891_v1 = vrot.slane %v836_v16, 4  ;;  %v889_v56 = vsel %vm874_vm3, %v886_v41, %v888_v3  ;;  %v893_v19 = vrot.slane %v837_v29, 4 }
  0x9b   : >> { %v895_v20 = vrot.slane %v838_v31, 4  ;;  %v896_v63 = vrot.slane %v839_v35, 4  ;;  %v898_v23 = vrot.slane %v840_v17, 4  ;;  %v900_v8 = vrot.slane %v841_v60, 4 }
  0x9c   : >> { %v892_v5 = vsel %vm874_vm3, %v890_v2, %v891_v1  ;;  %v901_v43 = vrot.slane %v842_v15, 4  ;;  %v894_v7 = vsel %vm874_vm3, %v891_v1, %v893_v19  ;;  %v903_v32 = vrot.slane %v843_v36, 4  ;;  %v12562_v2 = vld [vmem:[#allocation33_spill] sm:$0xff] }
  0x9d   : >> { %v897_v25 = vsel %vm874_vm3, %v895_v20, %v896_v63  ;;  %v905_v46 = vrot.slane %v844_v61, 4  ;;  %v899_v30 = vsel %vm874_vm3, %v896_v63, %v898_v23  ;;  %v906_v24 = vrot.slane %v845_v10, 4  ;;  %v12566_v20 = vld [vmem:[#allocation25_spill] sm:$0xff] }
  0x9e   : >> { %v902_v16 = vsel %vm874_vm3, %v900_v8, %v901_v43  ;;  %v908_v3 = vrot.slane %v846_v34, 4  ;;  %v904_v29 = vsel %vm874_vm3, %v901_v43, %v903_v32  ;;  %v910_v31 = vrot.slane %v847_v21, 4  ;;  %v12568_v8 = vld [vmem:[#allocation35_spill] sm:$0xff]  ;;  %v12570_v32 = vld [vmem:[#allocation28_spill] sm:$0xff] }
  0x9f   : >> { %v911_v35 = vrot.slane %v848_v18, 4  ;;  %v913_v9 = vrot.slane %v849_v11, 4  ;;  %v907_v17 = vsel %vm874_vm3, %v905_v46, %v906_v24  ;;  %v7217_v15 = vadd.f32 %v877_v58, %v7105_v22 }
  0xa0   : >> { %v909_v60 = vsel %vm874_vm3, %v906_v24, %v908_v3  ;;  %v7220_v36 = vadd.f32 %v879_v53, %v7108_v27  ;;  %v7225_v41 = vadd.f32 %v882_v39, %v7113_v33  ;;  %v7228_v10 = vadd.f32 %v884_v28, %v7116_v38  ;;  %v12563_v28 = vld [vmem:[#allocation23_spill] sm:$0xff]  ;;  %v12572_v24 = vld [vmem:[#allocation29_spill] sm:$0xff] }
  0xa1   : >> { %v912_v40 = vsel %vm874_vm3, %v910_v31, %v911_v35  ;;  %v914_v61 = vsel %vm874_vm3, %v911_v35, %v913_v9  ;;  %v7231_v11 = vadd.f32 %v887_v59, %v7119_v6  ;;  %v7234_v34 = vadd.f32 %v889_v56, %v7122_v14  ;;  %v12564_v59 = vld [vmem:[#allocation24_spill] sm:$0xff]  ;;  %v12565_v56 = vld [vmem:[#allocation34_spill] sm:$0xff]  ;;  %v12574_v35 = vld [vmem:[#allocation37_spill] sm:$0xff] }
  0xa2   : >> { %v7237_v22 = vadd.f32 %v892_v5, %v7125_v13  ;;  %v7240_v27 = vadd.f32 %v894_v7, %v7128_v49  ;;  %v7243_v58 = vadd.f32 %v897_v25, %v7131_v55  ;;  %v7246_v33 = vadd.f32 %v899_v30, %v7134_v45  ;;  %v12561_v45 = vld [vmem:[#allocation20_spill] sm:$0xff]  ;;  %v12567_v5 = vld [vmem:[#allocation26_spill] sm:$0xff]  ;;  %v12569_v7 = vld [vmem:[#allocation27_spill] sm:$0xff] }
  0xa3   : >> { %v7249_v38 = vadd.f32 %v902_v16, %v7137_v44  ;;  %v7252_v6 = vadd.f32 %v904_v29, %v7140_v50  ;;  %v7255_v14 = vadd.f32 %v907_v17, %v7143_v26  ;;  %v7258_v13 = vadd.f32 %v909_v60, %v7146_v62  ;;  %v12571_v30 = vld [vmem:[#allocation36_spill] sm:$0xff]  ;;  %v12573_v29 = vld [vmem:[#allocation30_spill] sm:$0xff]  ;;  %v12575_v17 = vld [vmem:[#allocation31_spill] sm:$0xff] }
  0xa4   : >> { %v7261_v49 = vadd.f32 %v912_v40, %v7149_v0  ;;  %v7264_v55 = vadd.f32 %v914_v61, %v7152_v54  ;;  %v951_v39 = vmul.f32 %v12561_v45, %v6653_v47  ;;  %v952_v44 = vmul.f32 %v12561_v45, %v6656_v48  ;;  %v12576_v40 = vld [vmem:[#allocation32_spill] sm:$0xff] }
  0xa5   : >> { %v953_v50 = vmul.f32 %v12561_v45, %v6763_v37  ;;  %v954_v26 = vmul.f32 %v12561_v45, %v6663_v51  ;;  %v955_v62 = vmul.f32 %v12561_v45, %v6666_v52  ;;  %v956_v0 = vmul.f32 %v12561_v45, %v6774_v42 }
  0xa6   : >> { %v957_v54 = vmul.f32 %v12561_v45, %v6683_v57  ;;  %v958_v53 = vmul.f32 %v12561_v45, %v12513_v12  ;;  %v959_v21 = vmul.f32 %v12561_v45, %v12562_v2  ;;  %v960_v18 = vmul.f32 %v12561_v45, %v12563_v28 }
  0xa7   : >> { %v961_v1 = vmul.f32 %v12561_v45, %v12564_v59  ;;  %v962_v19 = vmul.f32 %v12561_v45, %v12565_v56  ;;  %v963_v63 = vmul.f32 %v12561_v45, %v12566_v20  ;;  %v964_v23 = vmul.f32 %v12561_v45, %v12567_v5 }
  0xa8   : >> { %v965_v43 = vmul.f32 %v12561_v45, %v12568_v8  ;;  %v966_v25 = vmul.f32 %v12561_v45, %v12569_v7  ;;  %v967_v46 = vmul.f32 %v12561_v45, %v12570_v32  ;;  %v968_v16 = vmul.f32 %v12561_v45, %v12571_v30 }
  0xa9   : >> { %v969_v3 = vmul.f32 %v12561_v45, %v12572_v24  ;;  %v970_v31 = vmul.f32 %v12561_v45, %v12573_v29  ;;  %v971_v9 = vmul.f32 %v12561_v45, %v12574_v35  ;;  %v972_v60 = vmul.f32 %v12561_v45, %v12575_v17 }
  0xaa   : >> { %v973_v61 = vmul.f32 %v12561_v45, %v12576_v40  ;;  %v974_v32 = vmul.f32 %v12561_v45, %v6832_v4  ;;  %v1000_v7 = vrot.slane %v951_v39, 5  ;;  %v1001_v30 = vrot.slane %v952_v44, 5 }
  0xab   : >> { %v1003_v8 = vrot.slane %v953_v50, 5  ;;  %v1005_v5 = vrot.slane %v954_v26, 5  ;;  %v1006_v24 = vrot.slane %v955_v62, 5  ;;  %v1008_v20 = vrot.slane %v956_v0, 5 }
  0xac   : >> { %v1010_v56 = vrot.slane %v957_v54, 5  ;;  %v1011_v29 = vrot.slane %v958_v53, 5  ;;  %v1002_v59 = vsel %vm999_vm4, %v1000_v7, %v1001_v30  ;;  %v1013_v28 = vrot.slane %v959_v21, 5 }
  0xad   : >> { %v1004_v35 = vsel %vm999_vm4, %v1001_v30, %v1003_v8  ;;  %v1015_v17 = vrot.slane %v960_v18, 5  ;;  %v1007_v2 = vsel %vm999_vm4, %v1005_v5, %v1006_v24  ;;  %v1009_v40 = vsel %vm999_vm4, %v1006_v24, %v1008_v20 }
  0xae   : >> { %v1012_v45 = vsel %vm999_vm4, %v1010_v56, %v1011_v29  ;;  %v1016_v39 = vrot.slane %v961_v1, 5  ;;  %v1014_v44 = vsel %vm999_vm4, %v1011_v29, %v1013_v28  ;;  %v1018_v50 = vrot.slane %v962_v19, 5 }
  0xaf   : >> { %v1020_v26 = vrot.slane %v963_v63, 5  ;;  %v1021_v62 = vrot.slane %v964_v23, 5  ;;  %v1023_v54 = vrot.slane %v965_v43, 5  ;;  %v1025_v53 = vrot.slane %v966_v25, 5 }
  0xb0   : >> { %v1017_v0 = vsel %vm999_vm4, %v1015_v17, %v1016_v39  ;;  %v1026_v7 = vrot.slane %v967_v46, 5  ;;  %v1019_v21 = vsel %vm999_vm4, %v1016_v39, %v1018_v50  ;;  %v1028_v5 = vrot.slane %v968_v16, 5  ;;  %v12580_v17 = vld [vmem:[#allocation11_spill] sm:$0xff]  ;;  %v12589_v50 = vld [vmem:[#allocation16_spill] sm:$0xff] }
  0xb1   : >> { %v1022_v18 = vsel %vm999_vm4, %v1020_v26, %v1021_v62  ;;  %v1030_v8 = vrot.slane %v969_v3, 5  ;;  %v1024_v20 = vsel %vm999_vm4, %v1021_v62, %v1023_v54  ;;  %v1031_v56 = vrot.slane %v970_v31, 5  ;;  %v12587_v39 = vld [vmem:[#allocation15_spill] sm:$0xff] }
  0xb2   : >> { %v1027_v1 = vsel %vm999_vm4, %v1025_v53, %v1026_v7  ;;  %v1033_v28 = vrot.slane %v971_v9, 5  ;;  %v1029_v19 = vsel %vm999_vm4, %v1026_v7, %v1028_v5  ;;  %v1035_v63 = vrot.slane %v972_v60, 5 }
  0xb3   : >> { %v1036_v23 = vrot.slane %v973_v61, 5  ;;  %v1038_v30 = vrot.slane %v974_v32, 5  ;;  %v1032_v43 = vsel %vm999_vm4, %v1030_v8, %v1031_v56  ;;  %v7329_v46 = vadd.f32 %v1002_v59, %v7217_v15  ;;  %v12585_v61 = vld [vmem:[#allocation14_spill] sm:$0xff]  ;;  %v12591_v8 = vld [vmem:[#allocation33_spill] sm:$0xff] }
  0xb4   : >> { %v1034_v25 = vsel %vm999_vm4, %v1031_v56, %v1033_v28  ;;  %v7332_v16 = vadd.f32 %v1004_v35, %v7220_v36  ;;  %v7337_v29 = vadd.f32 %v1007_v2, %v7225_v41  ;;  %v7340_v31 = vadd.f32 %v1009_v40, %v7228_v10  ;;  %v12578_v2 = vld [vmem:[#allocation3_spill] sm:$0xff]  ;;  %v12579_v35 = vld [vmem:[#allocation22_spill] sm:$0xff]  ;;  %v12593_v28 = vld [vmem:[#allocation24_spill] sm:$0xff] }
  0xb5   : >> { %v1037_v24 = vsel %vm999_vm4, %v1035_v63, %v1036_v23  ;;  %v1039_v3 = vsel %vm999_vm4, %v1036_v23, %v1038_v30  ;;  %v7343_v32 = vadd.f32 %v1012_v45, %v7231_v11  ;;  %v7346_v9 = vadd.f32 %v1014_v44, %v7234_v34  ;;  %v12595_v63 = vld [vmem:[#allocation25_spill] sm:$0xff]  ;;  %v12596_v23 = vld [vmem:[#allocation26_spill] sm:$0xff]  ;;  %v12597_v30 = vld [vmem:[#allocation35_spill] sm:$0xff] }
  0xb6   : >> { %v7349_v15 = vadd.f32 %v1017_v0, %v7237_v22  ;;  %v7352_v36 = vadd.f32 %v1019_v21, %v7240_v27  ;;  %v7355_v59 = vadd.f32 %v1022_v18, %v7243_v58  ;;  %v7358_v41 = vadd.f32 %v1024_v20, %v7246_v33  ;;  %v12577_v33 = vld [vmem:[#allocation21_spill] sm:$0xff] }
  0xb7   : >> { %v7361_v10 = vadd.f32 %v1027_v1, %v7249_v38  ;;  %v7364_v11 = vadd.f32 %v1029_v19, %v7252_v6  ;;  %v7367_v34 = vadd.f32 %v1032_v43, %v7255_v14  ;;  %v7370_v22 = vadd.f32 %v1034_v25, %v7258_v13  ;;  %v12581_v14 = vld [vmem:[#allocation4_spill] sm:$0xff]  ;;  %v12592_v1 = vld [vmem:[#allocation23_spill] sm:$0xff]  ;;  %v12594_v19 = vld [vmem:[#allocation34_spill] sm:$0xff] }
  0xb8   : >> { %v7373_v27 = vadd.f32 %v1037_v24, %v7261_v49  ;;  %v7376_v58 = vadd.f32 %v1039_v3, %v7264_v55  ;;  %v1075_v38 = vrot.slane %v12578_v2, %v12577_v33  ;;  %v7382_v6 = vrot.slane %v12578_v2, %v12579_v35  ;;  %v12582_v13 = vld [vmem:[#allocation12_spill] sm:$0xff]  ;;  %v12583_v49 = vld [vmem:[#allocation13_spill] sm:$0xff]  ;;  %v12598_v43 = vld [vmem:[#allocation27_spill] sm:$0xff] }
  0xb9   : >> { %v7386_v60 = vrot.slane %v12581_v14, %v12580_v17  ;;  %v7390_v40 = vrot.slane %v12581_v14, %v12582_v13  ;;  %v7394_v55 = vrot.slane %v12581_v14, %v12583_v49  ;;  %v7398_v45 = vrot.slane %v12581_v14, %v12585_v61  ;;  %v12599_v25 = vld [vmem:[#allocation28_spill] sm:$0xff]  ;;  %v12601_v3 = vld [vmem:[#allocation29_spill] sm:$0xff] }
  0xba   : >> { %v7402_v44 = vrot.slane %v12581_v14, %v12587_v39  ;;  %v7406_v26 = vrot.slane %v12581_v14, %v12589_v50  ;;  %v1076_v62 = vmul.f32 %v1075_v38, %v6653_v47  ;;  %v1077_v0 = vmul.f32 %v1075_v38, %v6656_v48  ;;  %v12600_v24 = vld [vmem:[#allocation36_spill] sm:$0xff]  ;;  %v12603_v50 = vld [vmem:[#allocation37_spill] sm:$0xff]  ;;  %v12604_v39 = vld [vmem:[#allocation31_spill] sm:$0xff] }
  0xbb   : >> { %12584 = vst [vmem:[#allocation18_spill] sm:$0xff] %v7394_v55  ;;  %12586 = vst [vmem:[#allocation17_spill] sm:$0xff] %v7398_v45  ;;  %v1078_v54 = vmul.f32 %v1075_v38, %v6763_v37  ;;  %v1079_v53 = vmul.f32 %v1075_v38, %v6663_v51  ;;  %v1080_v7 = vmul.f32 %v1075_v38, %v6666_v52  ;;  %v12605_v61 = vld [vmem:[#allocation32_spill] sm:$0xff] }
  0xbc   : >> { %12588 = vst [vmem:[#allocation19_spill] sm:$0xff] %v7402_v44  ;;  %12590 = vst [vmem:[#allocation20_spill] sm:$0xff] %v7406_v26  ;;  %v1081_v21 = vmul.f32 %v1075_v38, %v6774_v42  ;;  %v1082_v18 = vmul.f32 %v1075_v38, %v6683_v57  ;;  %v1083_v5 = vmul.f32 %v1075_v38, %v12513_v12  ;;  %v1125_v49 = vrot.slane %v1076_v62, 6 }
  0xbd   : >> { %v1084_v20 = vmul.f32 %v1075_v38, %v12591_v8  ;;  %v1085_v56 = vmul.f32 %v1075_v38, %v12592_v1  ;;  %v1086_v47 = vmul.f32 %v1075_v38, %v12593_v28  ;;  %v1087_v48 = vmul.f32 %v1075_v38, %v12594_v19  ;;  %v12602_v8 = vld [vmem:[#allocation30_spill] sm:$0xff] }
  0xbe   : >> { %v1088_v37 = vmul.f32 %v1075_v38, %v12595_v63  ;;  %v1089_v51 = vmul.f32 %v1075_v38, %v12596_v23  ;;  %v1090_v52 = vmul.f32 %v1075_v38, %v12597_v30  ;;  %v1091_v42 = vmul.f32 %v1075_v38, %v12598_v43 }
  0xbf   : >> { %v1092_v57 = vmul.f32 %v1075_v38, %v12599_v25  ;;  %v1093_v12 = vmul.f32 %v1075_v38, %v12600_v24  ;;  %v1094_v2 = vmul.f32 %v1075_v38, %v12601_v3  ;;  %v1095_v1 = vmul.f32 %v1075_v38, %v12602_v8 }
  0xc0   : >> { %v1096_v28 = vmul.f32 %v1075_v38, %v12603_v50  ;;  %v1097_v19 = vmul.f32 %v1075_v38, %v12604_v39  ;;  %v1098_v63 = vmul.f32 %v1075_v38, %v12605_v61  ;;  %v1099_v23 = vmul.f32 %v1075_v38, %v6832_v4 }
  0xc1   : >> { %v1126_v30 = vrot.slane %v1077_v0, 6  ;;  %v1128_v13 = vrot.slane %v1078_v54, 6  ;;  %v1130_v43 = vrot.slane %v1079_v53, 6  ;;  %v1131_v17 = vrot.slane %v1080_v7, 6 }
  0xc2   : >> { %v1133_v25 = vrot.slane %v1081_v21, 6  ;;  %v1135_v35 = vrot.slane %v1082_v18, 6  ;;  %v1136_v24 = vrot.slane %v1083_v5, 6  ;;  %v1138_v14 = vrot.slane %v1084_v20, 6 }
  0xc3   : >> { %v1127_v3 = vsel %vm1124_vm5, %v1125_v49, %v1126_v30  ;;  %v1129_v8 = vsel %vm1124_vm5, %v1126_v30, %v1128_v13  ;;  %v1140_v50 = vrot.slane %v1085_v56, 6  ;;  %v1132_v39 = vsel %vm1124_vm5, %v1130_v43, %v1131_v17  ;;  %v7459_v43 = vld [vmem:[%s6650_s17 + $0x30] sm:$0xff] }
  0xc4   : >> { %v1134_v61 = vsel %vm1124_vm5, %v1131_v17, %v1133_v25  ;;  %v1137_v4 = vsel %vm1124_vm5, %v1135_v35, %v1136_v24  ;;  %v1141_v38 = vrot.slane %v1086_v47, 6  ;;  %v1139_v62 = vsel %vm1124_vm5, %v1136_v24, %v1138_v14 }
  0xc5   : >> { %v1143_v0 = vrot.slane %v1087_v48, 6  ;;  %v1145_v54 = vrot.slane %v1088_v37, 6  ;;  %v1146_v53 = vrot.slane %v1089_v51, 6  ;;  %v1148_v21 = vrot.slane %v1090_v52, 6 }
  0xc6   : >> { %v1142_v7 = vsel %vm1124_vm5, %v1140_v50, %v1141_v38  ;;  %v1150_v49 = vrot.slane %v1091_v42, 6  ;;  %v1151_v18 = vrot.slane %v1092_v57, 6  ;;  %v1153_v20 = vrot.slane %v1093_v12, 6 }
  0xc7   : >> { %v1144_v13 = vsel %vm1124_vm5, %v1141_v38, %v1143_v0  ;;  %v1147_v5 = vsel %vm1124_vm5, %v1145_v54, %v1146_v53  ;;  %v1155_v17 = vrot.slane %v1094_v2, 6  ;;  %v1149_v35 = vsel %vm1124_vm5, %v1146_v53, %v1148_v21  ;;  %v7495_v0 = vld [vmem:[%s6650_s17 + $0x90] sm:$0xff]  ;;  %v7507_v54 = vld [vmem:[%s6650_s17 + $0xc0] sm:$0xff]  ;;  %v7510_v53 = vld [vmem:[%s6650_s17 + $0xc8] sm:$0xff] }
  0xc8   : >> { %v1152_v56 = vsel %vm1124_vm5, %v1150_v49, %v1151_v18  ;;  %v1156_v14 = vrot.slane %v1095_v1, 6  ;;  %v1158_v47 = vrot.slane %v1096_v28, 6  ;;  %v1154_v48 = vsel %vm1124_vm5, %v1151_v18, %v1153_v20  ;;  %v7449_v1 = vld [vmem:[%s6650_s17 + $0x18] sm:$0xff]  ;;  %12611 = vst [vmem:[#allocation26_spill] sm:$0xff] %v7495_v0  ;;  %12615 = vst [vmem:[#allocation36_spill] sm:$0xff] %v7507_v54 }
  0xc9   : >> { %v1160_v37 = vrot.slane %v1097_v19, 6  ;;  %v1161_v51 = vrot.slane %v1098_v63, 6  ;;  %v1163_v52 = vrot.slane %v1099_v23, 6  ;;  %v1181_v12 = vadd.f32 %v1127_v3, %v7329_v46  ;;  %v7456_v23 = vld [vmem:[%s6650_s17 + $0x20] sm:$0xff]  ;;  %v7462_v46 = vld [vmem:[%s6650_s17 + $0x38] sm:$0xff]  ;;  %v7469_v3 = vld [vmem:[%s6650_s17 + $0x48] sm:$0xff] }
  0xca   : >> { %v1157_v42 = vsel %vm1124_vm5, %v1155_v17, %v1156_v14  ;;  %v1159_v57 = vsel %vm1124_vm5, %v1156_v14, %v1158_v47  ;;  %v1182_v2 = vadd.f32 %v1129_v8, %v7332_v16  ;;  %v1183_v19 = vadd.f32 %v1132_v39, %v7337_v29  ;;  %v7475_v8 = vld [vmem:[%s6650_s17 + $0x60] sm:$0xff]  ;;  %v7485_v39 = vld [vmem:[%s6650_s17 + $0x78] sm:$0xff]  ;;  %12616 = vst [vmem:[#allocation29_spill] sm:$0xff] %v7510_v53 }
  0xcb   : >> { %v1162_v28 = vsel %vm1124_vm5, %v1160_v37, %v1161_v51  ;;  %v1164_v30 = vsel %vm1124_vm5, %v1161_v51, %v1163_v52  ;;  %v1184_v63 = vadd.f32 %v1134_v61, %v7340_v31  ;;  %v1185_v16 = vadd.f32 %v1137_v4, %v7343_v32  ;;  %v7472_v31 = vld [vmem:[%s6650_s17 + $0x50] sm:$0xff]  ;;  %12607 = vst [vmem:[#allocation23_spill] sm:$0xff] %v7475_v8  ;;  %v7488_v61 = vld [vmem:[%s6650_s17 + $0x80] sm:$0xff] }
  0xcc   : >> { %v1186_v25 = vadd.f32 %v1139_v62, %v7346_v9  ;;  %v1187_v24 = vadd.f32 %v1142_v7, %v7349_v15  ;;  %v1188_v29 = vadd.f32 %v1144_v13, %v7352_v36  ;;  %12606 = vst [vmem:[#allocation33_spill] sm:$0xff] %v7472_v31  ;;  %v1189_v50 = vadd.f32 %v1147_v5, %v7355_v59  ;;  %v7482_v36 = vld [vmem:[%s6650_s17 + $0x68] sm:$0xff] }
  0xcd   : >> { %v1190_v32 = vadd.f32 %v1149_v35, %v7358_v41  ;;  %v1191_v9 = vadd.f32 %v1152_v56, %v7361_v10  ;;  %v1192_v15 = vadd.f32 %v1154_v48, %v7364_v11  ;;  %12608 = vst [vmem:[#allocation24_spill] sm:$0xff] %v7482_v36  ;;  %12609 = vst [vmem:[#allocation34_spill] sm:$0xff] %v7485_v39  ;;  %v7498_v41 = vld [vmem:[%s6650_s17 + $0x98] sm:$0xff]  ;;  %v7501_v10 = vld [vmem:[%s6650_s17 + $0xa8] sm:$0xff] }
  0xce   : >> { %12610 = vst [vmem:[#allocation25_spill] sm:$0xff] %v7488_v61  ;;  %v1193_v4 = vadd.f32 %v1157_v42, %v7367_v34  ;;  %v1194_v38 = vadd.f32 %v1159_v57, %v7370_v22  ;;  %v1195_v62 = vadd.f32 %v1162_v28, %v7373_v27  ;;  %v1196_v59 = vadd.f32 %v1164_v30, %v7376_v58  ;;  %v7504_v11 = vld [vmem:[%s6650_s17 + $0xb0] sm:$0xff]  ;;  %v7553_v42 = vld [vmem:[%s6650_s17 + $0x28] sm:$0x3f] }
  0xcf   : >> { %12612 = vst [vmem:[#allocation35_spill] sm:$0xff] %v7498_v41  ;;  %12613 = vst [vmem:[#allocation27_spill] sm:$0xff] %v7501_v10  ;;  %v1228_v34 = vmul.f32 %v7449_v1, %v7382_v6  ;;  %v1229_v22 = vmul.f32 %v7456_v23, %v7382_v6  ;;  %v1230_v27 = vmul.f32 %v7459_v43, %v7382_v6 }
  0xd0   : >> { %12614 = vst [vmem:[#allocation28_spill] sm:$0xff] %v7504_v11  ;;  %v1231_v58 = vmul.f32 %v7462_v46, %v7382_v6  ;;  %v1232_v7 = vmul.f32 %v7469_v3, %v7382_v6  ;;  %v1233_v21 = vmul.f32 %v7472_v31, %v7382_v6  ;;  %v1234_v49 = vmul.f32 %v7475_v8, %v7382_v6 }
  0xd1   : >> { %v1235_v18 = vmul.f32 %v7482_v36, %v7382_v6  ;;  %v1236_v13 = vmul.f32 %v7485_v39, %v7382_v6  ;;  %v1237_v5 = vmul.f32 %v7488_v61, %v7382_v6  ;;  %v1238_v20 = vmul.f32 %v7495_v0, %v7382_v6 }
  0xd2   : >> { %v1239_v17 = vmul.f32 %v7498_v41, %v7382_v6  ;;  %v1240_v35 = vmul.f32 %v7501_v10, %v7382_v6  ;;  %v1241_v56 = vmul.f32 %v7504_v11, %v7382_v6  ;;  %v1242_v14 = vmul.f32 %v7507_v54, %v7382_v6 }
  0xd3   : >> { %v1243_v47 = vmul.f32 %v7510_v53, %v7382_v6  ;;  %v7544_v48 = vadd.f32 %v1228_v34, %v1181_v12  ;;  %v7546_v37 = vadd.f32 %v1229_v22, %v1182_v2  ;;  %v7548_v51 = vadd.f32 %v1230_v27, %v1183_v19  ;;  %v7564_v6 = vld [vmem:[%s6650_s17 + $0x40] sm:$0x3f]  ;;  %v7575_v34 = vld [vmem:[%s6650_s17 + $0x58] sm:$0x3f] }
  0xd4   : >> { %v7550_v52 = vadd.f32 %v1231_v58, %v1184_v63  ;;  %v7555_v57 = vadd.f32 %v1232_v7, %v1185_v16  ;;  %v7557_v28 = vadd.f32 %v1233_v21, %v1186_v25  ;;  %v7559_v30 = vadd.f32 %v1234_v49, %v1187_v24  ;;  %12617 = vst [vmem:[#allocation30_spill] sm:$0xff] %v7575_v34  ;;  %v7578_v16 = vld [vmem:[%s6650_s17 + $0x70] sm:$0x3f]  ;;  %v7611_v7 = vld [vmem:[%s6650_s17 + $0xb8] sm:$0x3f] }
  0xd5   : >> { %v7561_v33 = vadd.f32 %v1235_v18, %v1188_v29  ;;  %v7566_v12 = vadd.f32 %v1236_v13, %v1189_v50  ;;  %v7568_v2 = vadd.f32 %v1237_v5, %v1190_v32  ;;  %v7570_v19 = vadd.f32 %v1238_v20, %v1191_v9  ;;  %12618 = vst [vmem:[#allocation37_spill] sm:$0xff] %v7578_v16  ;;  %v7589_v32 = vld [vmem:[%s6650_s17 + $0x88] sm:$0x3f]  ;;  %v7614_v21 = vld [vmem:[%s6650_s17 + $0xd0] sm:$0x3f] }
  0xd6   : >> { %v7572_v63 = vadd.f32 %v1239_v17, %v1192_v15  ;;  %v7580_v25 = vadd.f32 %v1240_v35, %v1193_v4  ;;  %v7582_v24 = vadd.f32 %v1241_v56, %v1194_v38  ;;  %v7584_v29 = vadd.f32 %v1242_v14, %v1195_v62  ;;  %12619 = vst [vmem:[#allocation31_spill] sm:$0xff] %v7589_v32  ;;  %v7600_v38 = vld [vmem:[%s6650_s17 + $0xa0] sm:$0x3f] }
  0xd7   : >> { %v7586_v50 = vadd.f32 %v1243_v47, %v1196_v59  ;;  %v1264_v9 = vmul.f32 %v7449_v1, %v7386_v60  ;;  %v1265_v15 = vmul.f32 %v7456_v23, %v7386_v60  ;;  %v1266_v22 = vmul.f32 %v7553_v42, %v7386_v60  ;;  %12620 = vst [vmem:[#allocation32_spill] sm:$0xff] %v7600_v38 }
  0xd8   : >> { %v1267_v4 = vmul.f32 %v7459_v43, %v7386_v60  ;;  %v1268_v62 = vmul.f32 %v7462_v46, %v7386_v60  ;;  %v1269_v59 = vmul.f32 %v7564_v6, %v7386_v60  ;;  %v1270_v27 = vmul.f32 %v7469_v3, %v7386_v60  ;;  %12621 = vst [vmem:[#allocation38_spill] sm:$0xff] %v7611_v7 }
  0xd9   : >> { %v1271_v58 = vmul.f32 %v7472_v31, %v7386_v60  ;;  %v1272_v49 = vmul.f32 %v7575_v34, %v7386_v60  ;;  %v1273_v18 = vmul.f32 %v7475_v8, %v7386_v60  ;;  %v1274_v13 = vmul.f32 %v7482_v36, %v7386_v60 }
  0xda   : >> { %v1275_v5 = vmul.f32 %v7578_v16, %v7386_v60  ;;  %v1276_v20 = vmul.f32 %v7485_v39, %v7386_v60  ;;  %v1277_v17 = vmul.f32 %v7488_v61, %v7386_v60  ;;  %v1278_v35 = vmul.f32 %v7589_v32, %v7386_v60 }
  0xdb   : >> { %v1279_v56 = vmul.f32 %v7495_v0, %v7386_v60  ;;  %v1280_v14 = vmul.f32 %v7498_v41, %v7386_v60  ;;  %v1281_v47 = vmul.f32 %v7600_v38, %v7386_v60  ;;  %v1282_v26 = vmul.f32 %v7501_v10, %v7386_v60 }
  0xdc   : >> { %v1283_v44 = vmul.f32 %v7504_v11, %v7386_v60  ;;  %v1284_v45 = vmul.f32 %v7611_v7, %v7386_v60  ;;  %v1285_v55 = vmul.f32 %v7507_v54, %v7386_v60  ;;  %v1286_v0 = vmul.f32 %v7510_v53, %v7386_v60 }
  0xdd   : >> { %v1287_v41 = vmul.f32 %v7614_v21, %v7386_v60  ;;  %v1312_v32 = vrot.slane %v1264_v9, 1  ;;  %v1313_v38 = vrot.slane %v1265_v15, 1  ;;  %v1315_v61 = vrot.slane %v1266_v22, 1 }
  0xde   : >> { %v1317_v39 = vrot.slane %v1267_v4, 1  ;;  %v1318_v10 = vrot.slane %v1268_v62, 1  ;;  %v1320_v16 = vrot.slane %v1269_v59, 1  ;;  %v1322_v36 = vrot.slane %v1270_v27, 1 }
  0xdf   : >> { %v1323_v11 = vrot.slane %v1271_v58, 1  ;;  %v1314_v8 = vsel %vm499_vm0, %v1312_v32, %v1313_v38  ;;  %v1316_v7 = vsel %vm499_vm0, %v1313_v38, %v1315_v61  ;;  %v1325_v34 = vrot.slane %v1272_v49, 1 }
  0xe0   : >> { %v1327_v54 = vrot.slane %v1273_v18, 1  ;;  %v1319_v31 = vsel %vm499_vm0, %v1317_v39, %v1318_v10  ;;  %v1321_v53 = vsel %vm499_vm0, %v1318_v10, %v1320_v16  ;;  %v1328_v9 = vrot.slane %v1274_v13, 1 }
  0xe1   : >> { %v1324_v60 = vsel %vm499_vm0, %v1322_v36, %v1323_v11  ;;  %v1326_v15 = vsel %vm499_vm0, %v1323_v11, %v1325_v34  ;;  %v1330_v22 = vrot.slane %v1275_v5, 1  ;;  %v1332_v4 = vrot.slane %v1276_v20, 1 }
  0xe2   : >> { %v1333_v62 = vrot.slane %v1277_v17, 1  ;;  %v1329_v59 = vsel %vm499_vm0, %v1327_v54, %v1328_v9  ;;  %v1335_v27 = vrot.slane %v1278_v35, 1  ;;  %v1337_v32 = vrot.slane %v1279_v56, 1 }
  0xe3   : >> { %v1338_v58 = vrot.slane %v1280_v14, 1  ;;  %v1331_v61 = vsel %vm499_vm0, %v1328_v9, %v1330_v22  ;;  %v1340_v39 = vrot.slane %v1281_v47, 1  ;;  %v1342_v49 = vrot.slane %v1282_v26, 1  ;;  %v12624_v14 = vld [vmem:[#allocation23_spill] sm:$0xff] }
  0xe4   : >> { %v1334_v38 = vsel %vm499_vm0, %v1332_v4, %v1333_v62  ;;  %v1336_v10 = vsel %vm499_vm0, %v1333_v62, %v1335_v27  ;;  %v1343_v16 = vrot.slane %v1283_v44, 1  ;;  %v1345_v11 = vrot.slane %v1284_v45, 1  ;;  %v12627_v4 = vld [vmem:[#allocation34_spill] sm:$0xff] }
  0xe5   : >> { %v1339_v36 = vsel %vm499_vm0, %v1337_v32, %v1338_v58  ;;  %v1341_v34 = vsel %vm499_vm0, %v1338_v58, %v1340_v39  ;;  %v1347_v18 = vrot.slane %v1285_v55, 1  ;;  %v1348_v13 = vrot.slane %v1286_v0, 1  ;;  %v12629_v32 = vld [vmem:[#allocation31_spill] sm:$0xff] }
  0xe6   : >> { %v1350_v54 = vrot.slane %v1287_v41, 1  ;;  %v1344_v5 = vsel %vm499_vm0, %v1342_v49, %v1343_v16  ;;  %v1346_v20 = vsel %vm499_vm0, %v1343_v16, %v1345_v11  ;;  %v7663_v17 = vadd.f32 %v1314_v8, %v7544_v48  ;;  %v12631_v39 = vld [vmem:[#allocation35_spill] sm:$0xff] }
  0xe7   : >> { %v7666_v26 = vadd.f32 %v1316_v7, %v7546_v37  ;;  %v1349_v35 = vsel %vm499_vm0, %v1347_v18, %v1348_v13  ;;  %v7671_v45 = vadd.f32 %v1319_v31, %v7548_v51  ;;  %v7674_v55 = vadd.f32 %v1321_v53, %v7550_v52  ;;  %v12623_v7 = vld [vmem:[#allocation30_spill] sm:$0xff]  ;;  %v12633_v16 = vld [vmem:[#allocation27_spill] sm:$0xff] }
  0xe8   : >> { %v1351_v44 = vsel %vm499_vm0, %v1348_v13, %v1350_v54  ;;  %v7677_v0 = vadd.f32 %v1324_v60, %v7555_v57  ;;  %v7680_v41 = vadd.f32 %v1326_v15, %v7557_v28  ;;  %v7683_v8 = vadd.f32 %v1329_v59, %v7559_v30  ;;  %v12625_v60 = vld [vmem:[#allocation24_spill] sm:$0xff]  ;;  %v12626_v15 = vld [vmem:[#allocation37_spill] sm:$0xff]  ;;  %v12635_v13 = vld [vmem:[#allocation38_spill] sm:$0xff] }
  0xe9   : >> { %v7686_v48 = vadd.f32 %v1331_v61, %v7561_v33  ;;  %v7689_v37 = vadd.f32 %v1334_v38, %v7566_v12  ;;  %v7692_v31 = vadd.f32 %v1336_v10, %v7568_v2  ;;  %v7695_v53 = vadd.f32 %v1339_v36, %v7570_v19  ;;  %v12628_v59 = vld [vmem:[#allocation25_spill] sm:$0xff]  ;;  %v12630_v61 = vld [vmem:[#allocation26_spill] sm:$0xff]  ;;  %v12632_v10 = vld [vmem:[#allocation32_spill] sm:$0xff] }
  0xea   : >> { %v7698_v51 = vadd.f32 %v1341_v34, %v7572_v63  ;;  %v7701_v52 = vadd.f32 %v1344_v5, %v7580_v25  ;;  %v7704_v57 = vadd.f32 %v1346_v20, %v7582_v24  ;;  %v7707_v33 = vadd.f32 %v1349_v35, %v7584_v29  ;;  %v12622_v29 = vld [vmem:[#allocation33_spill] sm:$0xff]  ;;  %v12634_v34 = vld [vmem:[#allocation28_spill] sm:$0xff] }
  0xeb   : >> { %v7710_v28 = vadd.f32 %v1351_v44, %v7586_v50  ;;  %v1388_v30 = vmul.f32 %v7449_v1, %v7390_v40  ;;  %v1389_v12 = vmul.f32 %v7456_v23, %v7390_v40  ;;  %v1390_v2 = vmul.f32 %v7553_v42, %v7390_v40  ;;  %v12636_v5 = vld [vmem:[#allocation36_spill] sm:$0xff]  ;;  %v12637_v35 = vld [vmem:[#allocation29_spill] sm:$0xff] }
  0xec   : >> { %v1391_v19 = vmul.f32 %v7459_v43, %v7390_v40  ;;  %v1392_v63 = vmul.f32 %v7462_v46, %v7390_v40  ;;  %v1393_v25 = vmul.f32 %v7564_v6, %v7390_v40  ;;  %v1394_v24 = vmul.f32 %v7469_v3, %v7390_v40 }
  0xed   : >> { %v1395_v50 = vmul.f32 %v12622_v29, %v7390_v40  ;;  %v1396_v56 = vmul.f32 %v12623_v7, %v7390_v40  ;;  %v1397_v47 = vmul.f32 %v12624_v14, %v7390_v40  ;;  %v1398_v9 = vmul.f32 %v12625_v60, %v7390_v40 }
  0xee   : >> { %v1399_v22 = vmul.f32 %v12626_v15, %v7390_v40  ;;  %v1400_v62 = vmul.f32 %v12627_v4, %v7390_v40  ;;  %v1401_v27 = vmul.f32 %v12628_v59, %v7390_v40  ;;  %v1402_v58 = vmul.f32 %v12629_v32, %v7390_v40 }
  0xef   : >> { %v1403_v38 = vmul.f32 %v12630_v61, %v7390_v40  ;;  %v1404_v49 = vmul.f32 %v12631_v39, %v7390_v40  ;;  %v1405_v36 = vmul.f32 %v12632_v10, %v7390_v40  ;;  %v1406_v11 = vmul.f32 %v12633_v16, %v7390_v40 }
  0xf0   : >> { %v1407_v18 = vmul.f32 %v12634_v34, %v7390_v40  ;;  %v1408_v54 = vmul.f32 %v12635_v13, %v7390_v40  ;;  %v1409_v20 = vmul.f32 %v12636_v5, %v7390_v40  ;;  %v1410_v44 = vmul.f32 %v12637_v35, %v7390_v40 }
  0xf1   : >> { %v1411_v39 = vmul.f32 %v7614_v21, %v7390_v40  ;;  %v1436_v61 = vrot.slane %v1388_v30, 2  ;;  %v1437_v10 = vrot.slane %v1389_v12, 2  ;;  %v1439_v32 = vrot.slane %v1390_v2, 2 }
  0xf2   : >> { %v1441_v59 = vrot.slane %v1391_v19, 2  ;;  %v1442_v16 = vrot.slane %v1392_v63, 2  ;;  %v1444_v4 = vrot.slane %v1393_v25, 2  ;;  %v1446_v15 = vrot.slane %v1394_v24, 2 }
  0xf3   : >> { %v1447_v34 = vrot.slane %v1395_v50, 2  ;;  %v1438_v60 = vsel %vm624_vm1, %v1436_v61, %v1437_v10  ;;  %v1440_v13 = vsel %vm624_vm1, %v1437_v10, %v1439_v32  ;;  %v1449_v14 = vrot.slane %v1396_v56, 2 }
  0xf4   : >> { %v1451_v5 = vrot.slane %v1397_v47, 2  ;;  %v1443_v7 = vsel %vm624_vm1, %v1441_v59, %v1442_v16  ;;  %v1445_v35 = vsel %vm624_vm1, %v1442_v16, %v1444_v4  ;;  %v1452_v30 = vrot.slane %v1398_v9, 2 }
  0xf5   : >> { %v1448_v40 = vsel %vm624_vm1, %v1446_v15, %v1447_v34  ;;  %v1450_v12 = vsel %vm624_vm1, %v1447_v34, %v1449_v14  ;;  %v1454_v2 = vrot.slane %v1399_v22, 2  ;;  %v1456_v19 = vrot.slane %v1400_v62, 2 }
  0xf6   : >> { %v1457_v63 = vrot.slane %v1401_v27, 2  ;;  %v1453_v25 = vsel %vm624_vm1, %v1451_v5, %v1452_v30  ;;  %v1459_v24 = vrot.slane %v1402_v58, 2  ;;  %v1461_v50 = vrot.slane %v1403_v38, 2  ;;  %v12639_v5 = vld [vmem:[#allocation30_spill] sm:$0xff] }
  0xf7   : >> { %v1462_v61 = vrot.slane %v1404_v49, 2  ;;  %v1455_v56 = vsel %vm624_vm1, %v1452_v30, %v1454_v2  ;;  %v1464_v59 = vrot.slane %v1405_v36, 2  ;;  %v1466_v32 = vrot.slane %v1406_v11, 2 }
  0xf8   : >> { %v1458_v47 = vsel %vm624_vm1, %v1456_v19, %v1457_v63  ;;  %v1460_v4 = vsel %vm624_vm1, %v1457_v63, %v1459_v24  ;;  %v1467_v15 = vrot.slane %v1407_v18, 2  ;;  %v1469_v14 = vrot.slane %v1408_v54, 2  ;;  %v12643_v19 = vld [vmem:[#allocation34_spill] sm:$0xff] }
  0xf9   : >> { %v1463_v9 = vsel %vm624_vm1, %v1461_v50, %v1462_v61  ;;  %v1465_v22 = vsel %vm624_vm1, %v1462_v61, %v1464_v59  ;;  %v1471_v62 = vrot.slane %v1409_v20, 2  ;;  %v1472_v27 = vrot.slane %v1410_v44, 2  ;;  %v12645_v50 = vld [vmem:[#allocation31_spill] sm:$0xff] }
  0xfa   : >> { %v1474_v10 = vrot.slane %v1411_v39, 2  ;;  %v1468_v58 = vsel %vm624_vm1, %v1466_v32, %v1467_v15  ;;  %v1470_v38 = vsel %vm624_vm1, %v1467_v15, %v1469_v14  ;;  %v7775_v49 = vadd.f32 %v1438_v60, %v7663_v17  ;;  %v12647_v59 = vld [vmem:[#allocation35_spill] sm:$0xff] }
  0xfb   : >> { %v7778_v36 = vadd.f32 %v1440_v13, %v7666_v26  ;;  %v1473_v16 = vsel %vm624_vm1, %v1471_v62, %v1472_v27  ;;  %v7783_v34 = vadd.f32 %v1443_v7, %v7671_v45  ;;  %v7786_v18 = vadd.f32 %v1445_v35, %v7674_v55  ;;  %v12640_v35 = vld [vmem:[#allocation23_spill] sm:$0xff] }
  0xfc   : >> { %v1475_v11 = vsel %vm624_vm1, %v1472_v27, %v1474_v10  ;;  %v7789_v39 = vadd.f32 %v1448_v40, %v7677_v0  ;;  %v7792_v54 = vadd.f32 %v1450_v12, %v7680_v41  ;;  %v7795_v17 = vadd.f32 %v1453_v25, %v7683_v8  ;;  %v12641_v40 = vld [vmem:[#allocation24_spill] sm:$0xff]  ;;  %v12642_v12 = vld [vmem:[#allocation37_spill] sm:$0xff]  ;;  %v12649_v15 = vld [vmem:[#allocation27_spill] sm:$0xff] }
  0xfd   : >> { %v7798_v26 = vadd.f32 %v1455_v56, %v7686_v48  ;;  %v7801_v60 = vadd.f32 %v1458_v47, %v7689_v37  ;;  %v7804_v45 = vadd.f32 %v1460_v4, %v7692_v31  ;;  %v7807_v55 = vadd.f32 %v1463_v9, %v7695_v53  ;;  %v12638_v31 = vld [vmem:[#allocation18_spill] sm:$0xff]  ;;  %v12644_v25 = vld [vmem:[#allocation25_spill] sm:$0xff]  ;;  %v12648_v4 = vld [vmem:[#allocation32_spill] sm:$0xff] }
  0xfe   : >> { %v7810_v0 = vadd.f32 %v1465_v22, %v7698_v51  ;;  %v7813_v41 = vadd.f32 %v1468_v58, %v7701_v52  ;;  %v7816_v8 = vadd.f32 %v1470_v38, %v7704_v57  ;;  %v7819_v48 = vadd.f32 %v1473_v16, %v7707_v33  ;;  %v12646_v56 = vld [vmem:[#allocation26_spill] sm:$0xff]  ;;  %v12650_v22 = vld [vmem:[#allocation28_spill] sm:$0xff]  ;;  %v12653_v16 = vld [vmem:[#allocation29_spill] sm:$0xff] }
  0xff   : >> { %v7822_v37 = vadd.f32 %v1475_v11, %v7710_v28  ;;  %v1512_v7 = vmul.f32 %v7449_v1, %v12638_v31  ;;  %v1513_v53 = vmul.f32 %v7456_v23, %v12638_v31  ;;  %v1514_v51 = vmul.f32 %v7553_v42, %v12638_v31  ;;  %v12651_v27 = vld [vmem:[#allocation38_spill] sm:$0xff]  ;;  %v12652_v58 = vld [vmem:[#allocation36_spill] sm:$0xff] }
 0x100   : >> { %v1515_v52 = vmul.f32 %v7459_v43, %v12638_v31  ;;  %v1516_v57 = vmul.f32 %v7462_v46, %v12638_v31  ;;  %v1517_v33 = vmul.f32 %v7564_v6, %v12638_v31  ;;  %v1518_v28 = vmul.f32 %v7469_v3, %v12638_v31 }
 0x101   : >> { %v1519_v13 = vmul.f32 %v12622_v29, %v12638_v31  ;;  %v1520_v20 = vmul.f32 %v12639_v5, %v12638_v31  ;;  %v1521_v44 = vmul.f32 %v12640_v35, %v12638_v31  ;;  %v1522_v30 = vmul.f32 %v12641_v40, %v12638_v31 }
 0x102   : >> { %v1523_v2 = vmul.f32 %v12642_v12, %v12638_v31  ;;  %v1524_v63 = vmul.f32 %v12643_v19, %v12638_v31  ;;  %v1525_v24 = vmul.f32 %v12644_v25, %v12638_v31  ;;  %v1526_v61 = vmul.f32 %v12645_v50, %v12638_v31 }
 0x103   : >> { %v1527_v47 = vmul.f32 %v12646_v56, %v12638_v31  ;;  %v1528_v32 = vmul.f32 %v12647_v59, %v12638_v31  ;;  %v1529_v9 = vmul.f32 %v12648_v4, %v12638_v31  ;;  %v1530_v14 = vmul.f32 %v12649_v15, %v12638_v31 }
 0x104   : >> { %v1531_v62 = vmul.f32 %v12650_v22, %v12638_v31  ;;  %v1532_v10 = vmul.f32 %v12651_v27, %v12638_v31  ;;  %v1533_v38 = vmul.f32 %v12652_v58, %v12638_v31  ;;  %v1534_v11 = vmul.f32 %v12653_v16, %v12638_v31 }
 0x105   : >> { %v1535_v59 = vmul.f32 %v7614_v21, %v12638_v31  ;;  %v1560_v56 = vrot.slane %v1512_v7, 3  ;;  %v1561_v4 = vrot.slane %v1513_v53, 3  ;;  %v1563_v50 = vrot.slane %v1514_v51, 3 }
 0x106   : >> { %v1565_v25 = vrot.slane %v1515_v52, 3  ;;  %v1566_v15 = vrot.slane %v1516_v57, 3  ;;  %v1568_v19 = vrot.slane %v1517_v33, 3  ;;  %v1570_v12 = vrot.slane %v1518_v28, 3 }
 0x107   : >> { %v1571_v22 = vrot.slane %v1519_v13, 3  ;;  %v1562_v40 = vsel %vm749_vm2, %v1560_v56, %v1561_v4  ;;  %v1564_v27 = vsel %vm749_vm2, %v1561_v4, %v1563_v50  ;;  %v1573_v35 = vrot.slane %v1520_v20, 3 }
 0x108   : >> { %v1575_v58 = vrot.slane %v1521_v44, 3  ;;  %v1567_v5 = vsel %vm749_vm2, %v1565_v25, %v1566_v15  ;;  %v1569_v16 = vsel %vm749_vm2, %v1566_v15, %v1568_v19  ;;  %v1576_v7 = vrot.slane %v1522_v30, 3 }
 0x109   : >> { %v1572_v31 = vsel %vm749_vm2, %v1570_v12, %v1571_v22  ;;  %v1574_v53 = vsel %vm749_vm2, %v1571_v22, %v1573_v35  ;;  %v1578_v51 = vrot.slane %v1523_v2, 3  ;;  %v1580_v52 = vrot.slane %v1524_v63, 3 }
 0x10a   : >> { %v1581_v57 = vrot.slane %v1525_v24, 3  ;;  %v1577_v33 = vsel %vm749_vm2, %v1575_v58, %v1576_v7  ;;  %v1583_v28 = vrot.slane %v1526_v61, 3  ;;  %v1585_v13 = vrot.slane %v1527_v47, 3  ;;  %v12655_v58 = vld [vmem:[#allocation30_spill] sm:$0xff] }
 0x10b   : >> { %v1586_v56 = vrot.slane %v1528_v32, 3  ;;  %v1579_v20 = vsel %vm749_vm2, %v1576_v7, %v1578_v51  ;;  %v1588_v25 = vrot.slane %v1529_v9, 3  ;;  %v1590_v50 = vrot.slane %v1530_v14, 3 }
 0x10c   : >> { %v1582_v44 = vsel %vm749_vm2, %v1580_v52, %v1581_v57  ;;  %v1584_v19 = vsel %vm749_vm2, %v1581_v57, %v1583_v28  ;;  %v1591_v12 = vrot.slane %v1531_v62, 3  ;;  %v1593_v35 = vrot.slane %v1532_v10, 3  ;;  %v12659_v52 = vld [vmem:[#allocation34_spill] sm:$0xff] }
 0x10d   : >> { %v1587_v30 = vsel %vm749_vm2, %v1585_v13, %v1586_v56  ;;  %v1589_v2 = vsel %vm749_vm2, %v1586_v56, %v1588_v25  ;;  %v1595_v63 = vrot.slane %v1533_v38, 3  ;;  %v1596_v24 = vrot.slane %v1534_v11, 3  ;;  %v12661_v13 = vld [vmem:[#allocation31_spill] sm:$0xff] }
 0x10e   : >> { %v1598_v4 = vrot.slane %v1535_v59, 3  ;;  %v1592_v61 = vsel %vm749_vm2, %v1590_v50, %v1591_v12  ;;  %v1594_v47 = vsel %vm749_vm2, %v1591_v12, %v1593_v35  ;;  %v7887_v32 = vadd.f32 %v1562_v40, %v7775_v49  ;;  %v12663_v25 = vld [vmem:[#allocation35_spill] sm:$0xff] }
 0x10f   : >> { %v7890_v9 = vadd.f32 %v1564_v27, %v7778_v36  ;;  %v1597_v15 = vsel %vm749_vm2, %v1595_v63, %v1596_v24  ;;  %v7895_v22 = vadd.f32 %v1567_v5, %v7783_v34  ;;  %v7898_v62 = vadd.f32 %v1569_v16, %v7786_v18  ;;  %v12656_v16 = vld [vmem:[#allocation23_spill] sm:$0xff] }
 0x110   : >> { %v1599_v14 = vsel %vm749_vm2, %v1596_v24, %v1598_v4  ;;  %v7901_v59 = vadd.f32 %v1572_v31, %v7789_v39  ;;  %v7904_v10 = vadd.f32 %v1574_v53, %v7792_v54  ;;  %v7907_v49 = vadd.f32 %v1577_v33, %v7795_v17  ;;  %v12657_v31 = vld [vmem:[#allocation24_spill] sm:$0xff]  ;;  %v12658_v53 = vld [vmem:[#allocation37_spill] sm:$0xff]  ;;  %v12665_v12 = vld [vmem:[#allocation27_spill] sm:$0xff] }
 0x111   : >> { %v7910_v36 = vadd.f32 %v1579_v20, %v7798_v26  ;;  %v7913_v40 = vadd.f32 %v1582_v44, %v7801_v60  ;;  %v7916_v34 = vadd.f32 %v1584_v19, %v7804_v45  ;;  %v7919_v18 = vadd.f32 %v1587_v30, %v7807_v55  ;;  %v12654_v45 = vld [vmem:[#allocation17_spill] sm:$0xff]  ;;  %v12662_v20 = vld [vmem:[#allocation26_spill] sm:$0xff]  ;;  %v12664_v19 = vld [vmem:[#allocation32_spill] sm:$0xff] }
 0x112   : >> { %v7922_v39 = vadd.f32 %v1589_v2, %v7810_v0  ;;  %v7925_v54 = vadd.f32 %v1592_v61, %v7813_v41  ;;  %v7928_v17 = vadd.f32 %v1594_v47, %v7816_v8  ;;  %v7931_v26 = vadd.f32 %v1597_v15, %v7819_v48  ;;  %v12660_v33 = vld [vmem:[#allocation25_spill] sm:$0xff]  ;;  %v12666_v2 = vld [vmem:[#allocation28_spill] sm:$0xff]  ;;  %v12667_v24 = vld [vmem:[#allocation38_spill] sm:$0xff] }
 0x113   : >> { %v7934_v60 = vadd.f32 %v1599_v14, %v7822_v37  ;;  %v1636_v5 = vmul.f32 %v7449_v1, %v12654_v45  ;;  %v1637_v55 = vmul.f32 %v7456_v23, %v12654_v45  ;;  %v1638_v0 = vmul.f32 %v7553_v42, %v12654_v45  ;;  %v12668_v61 = vld [vmem:[#allocation36_spill] sm:$0xff]  ;;  %v12669_v15 = vld [vmem:[#allocation29_spill] sm:$0xff] }
 0x114   : >> { %v1639_v41 = vmul.f32 %v7459_v43, %v12654_v45  ;;  %v1640_v8 = vmul.f32 %v7462_v46, %v12654_v45  ;;  %v1641_v48 = vmul.f32 %v7564_v6, %v12654_v45  ;;  %v1642_v37 = vmul.f32 %v7469_v3, %v12654_v45 }
 0x115   : >> { %v1643_v27 = vmul.f32 %v12622_v29, %v12654_v45  ;;  %v1644_v38 = vmul.f32 %v12655_v58, %v12654_v45  ;;  %v1645_v11 = vmul.f32 %v12656_v16, %v12654_v45  ;;  %v1646_v7 = vmul.f32 %v12657_v31, %v12654_v45 }
 0x116   : >> { %v1647_v51 = vmul.f32 %v12658_v53, %v12654_v45  ;;  %v1648_v57 = vmul.f32 %v12659_v52, %v12654_v45  ;;  %v1649_v28 = vmul.f32 %v12660_v33, %v12654_v45  ;;  %v1650_v56 = vmul.f32 %v12661_v13, %v12654_v45 }
 0x117   : >> { %v1651_v44 = vmul.f32 %v12662_v20, %v12654_v45  ;;  %v1652_v50 = vmul.f32 %v12663_v25, %v12654_v45  ;;  %v1653_v30 = vmul.f32 %v12664_v19, %v12654_v45  ;;  %v1654_v35 = vmul.f32 %v12665_v12, %v12654_v45 }
 0x118   : >> { %v1655_v63 = vmul.f32 %v12666_v2, %v12654_v45  ;;  %v1656_v4 = vmul.f32 %v12667_v24, %v12654_v45  ;;  %v1657_v47 = vmul.f32 %v12668_v61, %v12654_v45  ;;  %v1658_v14 = vmul.f32 %v12669_v15, %v12654_v45 }
 0x119   : >> { %v1659_v25 = vmul.f32 %v7614_v21, %v12654_v45  ;;  %v1684_v20 = vrot.slane %v1636_v5, 4  ;;  %v1685_v19 = vrot.slane %v1637_v55, 4  ;;  %v1687_v13 = vrot.slane %v1638_v0, 4 }
 0x11a   : >> { %v1689_v33 = vrot.slane %v1639_v41, 4  ;;  %v1690_v12 = vrot.slane %v1640_v8, 4  ;;  %v1692_v52 = vrot.slane %v1641_v48, 4  ;;  %v1694_v53 = vrot.slane %v1642_v37, 4 }
 0x11b   : >> { %v1695_v2 = vrot.slane %v1643_v27, 4  ;;  %v1686_v31 = vsel %vm874_vm3, %v1684_v20, %v1685_v19  ;;  %v1688_v24 = vsel %vm874_vm3, %v1685_v19, %v1687_v13  ;;  %v1697_v16 = vrot.slane %v1644_v38, 4 }
 0x11c   : >> { %v1699_v61 = vrot.slane %v1645_v11, 4  ;;  %v1691_v58 = vsel %vm874_vm3, %v1689_v33, %v1690_v12  ;;  %v1693_v15 = vsel %vm874_vm3, %v1690_v12, %v1692_v52  ;;  %v1700_v5 = vrot.slane %v1646_v7, 4 }
 0x11d   : >> { %v1696_v45 = vsel %vm874_vm3, %v1694_v53, %v1695_v2  ;;  %v1698_v55 = vsel %vm874_vm3, %v1695_v2, %v1697_v16  ;;  %v1702_v0 = vrot.slane %v1647_v51, 4  ;;  %v1704_v41 = vrot.slane %v1648_v57, 4 }
 0x11e   : >> { %v1705_v8 = vrot.slane %v1649_v28, 4  ;;  %v1701_v48 = vsel %vm874_vm3, %v1699_v61, %v1700_v5  ;;  %v1707_v37 = vrot.slane %v1650_v56, 4  ;;  %v1709_v27 = vrot.slane %v1651_v44, 4  ;;  %v12671_v61 = vld [vmem:[#allocation30_spill] sm:$0xff] }
 0x11f   : >> { %v1710_v20 = vrot.slane %v1652_v50, 4  ;;  %v1703_v38 = vsel %vm874_vm3, %v1700_v5, %v1702_v0  ;;  %v1712_v33 = vrot.slane %v1653_v30, 4  ;;  %v1714_v13 = vrot.slane %v1654_v35, 4 }
 0x120   : >> { %v1706_v11 = vsel %vm874_vm3, %v1704_v41, %v1705_v8  ;;  %v1708_v52 = vsel %vm874_vm3, %v1705_v8, %v1707_v37  ;;  %v1715_v53 = vrot.slane %v1655_v63, 4  ;;  %v1717_v16 = vrot.slane %v1656_v4, 4  ;;  %v12675_v41 = vld [vmem:[#allocation34_spill] sm:$0xff] }
 0x121   : >> { %v1711_v7 = vsel %vm874_vm3, %v1709_v27, %v1710_v20  ;;  %v1713_v51 = vsel %vm874_vm3, %v1710_v20, %v1712_v33  ;;  %v1719_v57 = vrot.slane %v1657_v47, 4  ;;  %v1720_v28 = vrot.slane %v1658_v14, 4  ;;  %v12677_v27 = vld [vmem:[#allocation31_spill] sm:$0xff] }
 0x122   : >> { %v1722_v19 = vrot.slane %v1659_v25, 4  ;;  %v1716_v56 = vsel %vm874_vm3, %v1714_v13, %v1715_v53  ;;  %v1718_v44 = vsel %vm874_vm3, %v1715_v53, %v1717_v16  ;;  %v7999_v50 = vadd.f32 %v1686_v31, %v7887_v32  ;;  %v12679_v33 = vld [vmem:[#allocation35_spill] sm:$0xff] }
 0x123   : >> { %v8002_v30 = vadd.f32 %v1688_v24, %v7890_v9  ;;  %v1721_v12 = vsel %vm874_vm3, %v1719_v57, %v1720_v28  ;;  %v8007_v2 = vadd.f32 %v1691_v58, %v7895_v22  ;;  %v8010_v63 = vadd.f32 %v1693_v15, %v7898_v62  ;;  %v12672_v15 = vld [vmem:[#allocation23_spill] sm:$0xff] }
 0x124   : >> { %v1723_v35 = vsel %vm874_vm3, %v1720_v28, %v1722_v19  ;;  %v8013_v25 = vadd.f32 %v1696_v45, %v7901_v59  ;;  %v8016_v4 = vadd.f32 %v1698_v55, %v7904_v10  ;;  %v8019_v32 = vadd.f32 %v1701_v48, %v7907_v49  ;;  %v12673_v45 = vld [vmem:[#allocation24_spill] sm:$0xff]  ;;  %v12674_v55 = vld [vmem:[#allocation37_spill] sm:$0xff]  ;;  %v12681_v53 = vld [vmem:[#allocation27_spill] sm:$0xff] }
 0x125   : >> { %v8022_v9 = vadd.f32 %v1703_v38, %v7910_v36  ;;  %v8025_v31 = vadd.f32 %v1706_v11, %v7913_v40  ;;  %v8028_v22 = vadd.f32 %v1708_v52, %v7916_v34  ;;  %v8031_v62 = vadd.f32 %v1711_v7, %v7919_v18  ;;  %v12670_v34 = vld [vmem:[#allocation19_spill] sm:$0xff]  ;;  %v12676_v48 = vld [vmem:[#allocation25_spill] sm:$0xff]  ;;  %v12678_v38 = vld [vmem:[#allocation26_spill] sm:$0xff] }
 0x126   : >> { %v8034_v59 = vadd.f32 %v1713_v51, %v7922_v39  ;;  %v8037_v10 = vadd.f32 %v1716_v56, %v7925_v54  ;;  %v8040_v49 = vadd.f32 %v1718_v44, %v7928_v17  ;;  %v8043_v36 = vadd.f32 %v1721_v12, %v7931_v26  ;;  %v12680_v52 = vld [vmem:[#allocation32_spill] sm:$0xff]  ;;  %v12683_v28 = vld [vmem:[#allocation38_spill] sm:$0xff]  ;;  %v12685_v12 = vld [vmem:[#allocation29_spill] sm:$0xff] }
 0x127   : >> { %v8046_v40 = vadd.f32 %v1723_v35, %v7934_v60  ;;  %v1760_v58 = vmul.f32 %v7449_v1, %v12670_v34  ;;  %v1761_v18 = vmul.f32 %v7456_v23, %v12670_v34  ;;  %v1762_v39 = vmul.f32 %v7553_v42, %v12670_v34  ;;  %v12682_v51 = vld [vmem:[#allocation28_spill] sm:$0xff] }
 0x128   : >> { %v1763_v54 = vmul.f32 %v7459_v43, %v12670_v34  ;;  %v1764_v17 = vmul.f32 %v7462_v46, %v12670_v34  ;;  %v1765_v26 = vmul.f32 %v7564_v6, %v12670_v34  ;;  %v1766_v60 = vmul.f32 %v7469_v3, %v12670_v34  ;;  %v12684_v56 = vld [vmem:[#allocation36_spill] sm:$0xff] }
 0x129   : >> { %v1767_v24 = vmul.f32 %v12622_v29, %v12670_v34  ;;  %v1768_v47 = vmul.f32 %v12671_v61, %v12670_v34  ;;  %v1769_v14 = vmul.f32 %v12672_v15, %v12670_v34  ;;  %v1770_v5 = vmul.f32 %v12673_v45, %v12670_v34 }
 0x12a   : >> { %v1771_v0 = vmul.f32 %v12674_v55, %v12670_v34  ;;  %v1772_v8 = vmul.f32 %v12675_v41, %v12670_v34  ;;  %v1773_v37 = vmul.f32 %v12676_v48, %v12670_v34  ;;  %v1774_v20 = vmul.f32 %v12677_v27, %v12670_v34 }
 0x12b   : >> { %v1775_v11 = vmul.f32 %v12678_v38, %v12670_v34  ;;  %v1776_v13 = vmul.f32 %v12679_v33, %v12670_v34  ;;  %v1777_v7 = vmul.f32 %v12680_v52, %v12670_v34  ;;  %v1778_v16 = vmul.f32 %v12681_v53, %v12670_v34 }
 0x12c   : >> { %v1779_v57 = vmul.f32 %v12682_v51, %v12670_v34  ;;  %v1780_v19 = vmul.f32 %v12683_v28, %v12670_v34  ;;  %v1781_v44 = vmul.f32 %v12684_v56, %v12670_v34  ;;  %v1782_v35 = vmul.f32 %v12685_v12, %v12670_v34 }
 0x12d   : >> { %v1783_v33 = vmul.f32 %v7614_v21, %v12670_v34  ;;  %v1808_v38 = vrot.slane %v1760_v58, 5  ;;  %v1809_v52 = vrot.slane %v1761_v18, 5  ;;  %v1811_v27 = vrot.slane %v1762_v39, 5 }
 0x12e   : >> { %v1813_v48 = vrot.slane %v1763_v54, 5  ;;  %v1814_v53 = vrot.slane %v1764_v17, 5  ;;  %v1816_v41 = vrot.slane %v1765_v26, 5  ;;  %v1818_v55 = vrot.slane %v1766_v60, 5 }
 0x12f   : >> { %v1819_v51 = vrot.slane %v1767_v24, 5  ;;  %v1810_v45 = vsel %vm999_vm4, %v1808_v38, %v1809_v52  ;;  %v1812_v28 = vsel %vm999_vm4, %v1809_v52, %v1811_v27  ;;  %v1821_v15 = vrot.slane %v1768_v47, 5 }
 0x130   : >> { %v1823_v56 = vrot.slane %v1769_v14, 5  ;;  %v1815_v61 = vsel %vm999_vm4, %v1813_v48, %v1814_v53  ;;  %v1817_v12 = vsel %vm999_vm4, %v1814_v53, %v1816_v41  ;;  %v1824_v58 = vrot.slane %v1770_v5, 5 }
 0x131   : >> { %v1820_v34 = vsel %vm999_vm4, %v1818_v55, %v1819_v51  ;;  %v1822_v18 = vsel %vm999_vm4, %v1819_v51, %v1821_v15  ;;  %v1826_v39 = vrot.slane %v1771_v0, 5  ;;  %v1828_v54 = vrot.slane %v1772_v8, 5 }
 0x132   : >> { %v1829_v17 = vrot.slane %v1773_v37, 5  ;;  %v1825_v26 = vsel %vm999_vm4, %v1823_v56, %v1824_v58  ;;  %v1831_v60 = vrot.slane %v1774_v20, 5  ;;  %v1833_v24 = vrot.slane %v1775_v11, 5 }
 0x133   : >> { %v1834_v38 = vrot.slane %v1776_v13, 5  ;;  %v1827_v47 = vsel %vm999_vm4, %v1824_v58, %v1826_v39  ;;  %v1836_v48 = vrot.slane %v1777_v7, 5  ;;  %v1838_v27 = vrot.slane %v1778_v16, 5 }
 0x134   : >> { %v1830_v14 = vsel %vm999_vm4, %v1828_v54, %v1829_v17  ;;  %v1832_v41 = vsel %vm999_vm4, %v1829_v17, %v1831_v60  ;;  %v1839_v55 = vrot.slane %v1779_v57, 5  ;;  %v1841_v15 = vrot.slane %v1780_v19, 5  ;;  %v12695_v54 = vld [vmem:[#allocation35_spill] sm:$0xff] }
 0x135   : >> { %v1835_v5 = vsel %vm999_vm4, %v1833_v24, %v1834_v38  ;;  %v1837_v0 = vsel %vm999_vm4, %v1834_v38, %v1836_v48  ;;  %v1843_v8 = vrot.slane %v1781_v44, 5  ;;  %v1844_v37 = vrot.slane %v1782_v35, 5  ;;  %v12697_v24 = vld [vmem:[#allocation27_spill] sm:$0xff]  ;;  %v12699_v48 = vld [vmem:[#allocation38_spill] sm:$0xff] }
 0x136   : >> { %v1846_v52 = vrot.slane %v1783_v33, 5  ;;  %v1840_v20 = vsel %vm999_vm4, %v1838_v27, %v1839_v55  ;;  %v1842_v11 = vsel %vm999_vm4, %v1839_v55, %v1841_v15  ;;  %v8111_v13 = vadd.f32 %v1810_v45, %v7999_v50  ;;  %v12701_v55 = vld [vmem:[#allocation29_spill] sm:$0xff] }
 0x137   : >> { %v8114_v7 = vadd.f32 %v1812_v28, %v8002_v30  ;;  %v1845_v53 = vsel %vm999_vm4, %v1843_v8, %v1844_v37  ;;  %v8119_v51 = vadd.f32 %v1815_v61, %v8007_v2  ;;  %v8122_v57 = vadd.f32 %v1817_v12, %v8010_v63 }
 0x138   : >> { %v1847_v16 = vsel %vm999_vm4, %v1844_v37, %v1846_v52  ;;  %v8125_v33 = vadd.f32 %v1820_v34, %v8013_v25  ;;  %v8128_v19 = vadd.f32 %v1822_v18, %v8016_v4  ;;  %v8131_v50 = vadd.f32 %v1825_v26, %v8019_v32  ;;  %v12694_v18 = vld [vmem:[#allocation26_spill] sm:$0xff]  ;;  %v12696_v26 = vld [vmem:[#allocation32_spill] sm:$0xff] }
 0x139   : >> { %v8134_v30 = vadd.f32 %v1827_v47, %v8022_v9  ;;  %v8137_v45 = vadd.f32 %v1830_v14, %v8025_v31  ;;  %v8140_v2 = vadd.f32 %v1832_v41, %v8028_v22  ;;  %v8143_v63 = vadd.f32 %v1835_v5, %v8031_v62  ;;  %v12686_v22 = vld [vmem:[#allocation20_spill] sm:$0xff] }
 0x13a   : >> { %v8146_v25 = vadd.f32 %v1837_v0, %v8034_v59  ;;  %v8149_v4 = vadd.f32 %v1840_v20, %v8037_v10  ;;  %v8152_v32 = vadd.f32 %v1842_v11, %v8040_v49  ;;  %v8155_v9 = vadd.f32 %v1845_v53, %v8043_v36  ;;  %v12698_v47 = vld [vmem:[#allocation28_spill] sm:$0xff] }
 0x13b   : >> { %v8158_v31 = vadd.f32 %v1847_v16, %v8046_v40  ;;  %v1884_v61 = vmul.f32 %v7449_v1, %v12686_v22  ;;  %v1885_v62 = vmul.f32 %v7456_v23, %v12686_v22  ;;  %v1886_v59 = vmul.f32 %v7553_v42, %v12686_v22  ;;  %v12687_v23 = vld [vmem:[#allocation30_spill] sm:$0xff]  ;;  %v12688_v42 = vld [vmem:[#allocation23_spill] sm:$0xff]  ;;  %v12700_v41 = vld [vmem:[#allocation36_spill] sm:$0xff] }
 0x13c   : >> { %v1887_v10 = vmul.f32 %v7459_v43, %v12686_v22  ;;  %v1888_v49 = vmul.f32 %v7462_v46, %v12686_v22  ;;  %v1889_v36 = vmul.f32 %v7564_v6, %v12686_v22  ;;  %v1890_v40 = vmul.f32 %v7469_v3, %v12686_v22  ;;  %v12689_v43 = vld [vmem:[#allocation24_spill] sm:$0xff]  ;;  %v12690_v46 = vld [vmem:[#allocation37_spill] sm:$0xff]  ;;  %v12691_v6 = vld [vmem:[#allocation34_spill] sm:$0xff] }
 0x13d   : >> { %v1891_v1 = vmul.f32 %v12622_v29, %v12686_v22  ;;  %v1892_v28 = vmul.f32 %v12687_v23, %v12686_v22  ;;  %v1893_v56 = vmul.f32 %v12688_v42, %v12686_v22  ;;  %v1894_v44 = vmul.f32 %v12689_v43, %v12686_v22  ;;  %v12692_v3 = vld [vmem:[#allocation25_spill] sm:$0xff]  ;;  %v12693_v29 = vld [vmem:[#allocation31_spill] sm:$0xff] }
 0x13e   : >> { %v1895_v12 = vmul.f32 %v12690_v46, %v12686_v22  ;;  %v1896_v35 = vmul.f32 %v12691_v6, %v12686_v22  ;;  %v1897_v34 = vmul.f32 %v12692_v3, %v12686_v22  ;;  %v1898_v58 = vmul.f32 %v12693_v29, %v12686_v22 }
 0x13f   : >> { %v1899_v39 = vmul.f32 %v12694_v18, %v12686_v22  ;;  %v1900_v17 = vmul.f32 %v12695_v54, %v12686_v22  ;;  %v1901_v60 = vmul.f32 %v12696_v26, %v12686_v22  ;;  %v1902_v38 = vmul.f32 %v12697_v24, %v12686_v22 }
 0x140   : >> { %v1903_v14 = vmul.f32 %v12698_v47, %v12686_v22  ;;  %v1904_v27 = vmul.f32 %v12699_v48, %v12686_v22  ;;  %v1905_v5 = vmul.f32 %v12700_v41, %v12686_v22  ;;  %v1906_v15 = vmul.f32 %v12701_v55, %v12686_v22 }
 0x141   : >> { %v1907_v0 = vmul.f32 %v7614_v21, %v12686_v22  ;;  %v1932_v8 = vrot.slane %v1884_v61, 6  ;;  %v1933_v37 = vrot.slane %v1885_v62, 6  ;;  %v1935_v52 = vrot.slane %v1886_v59, 6 }
 0x142   : >> { %v1937_v20 = vrot.slane %v1887_v10, 6  ;;  %v1938_v11 = vrot.slane %v1888_v49, 6  ;;  %v1940_v53 = vrot.slane %v1889_v36, 6  ;;  %v1942_v16 = vrot.slane %v1890_v40, 6 }
 0x143   : >> { %v1943_v23 = vrot.slane %v1891_v1, 6  ;;  %v1934_v42 = vsel %vm1124_vm5, %v1932_v8, %v1933_v37  ;;  %v1936_v43 = vsel %vm1124_vm5, %v1933_v37, %v1935_v52  ;;  %v1945_v46 = vrot.slane %v1892_v28, 6  ;;  %v8243_v8 = vld [vmem:[%s6650_s17 + $0x48] sm:$0xff]  ;;  %v8259_v52 = vld [vmem:[%s6650_s17 + $0x78] sm:$0xff] }
 0x144   : >> { %v1947_v6 = vrot.slane %v1893_v56, 6  ;;  %v1939_v3 = vsel %vm1124_vm5, %v1937_v20, %v1938_v11  ;;  %v1941_v29 = vsel %vm1124_vm5, %v1938_v11, %v1940_v53  ;;  %v1948_v22 = vrot.slane %v1894_v44, 6  ;;  %12703 = vst [vmem:[#allocation18_spill] sm:$0xff] %v8259_v52  ;;  %v8262_v20 = vld [vmem:[%s6650_s17 + $0x80] sm:$0xff]  ;;  %v8265_v11 = vld [vmem:[%s6650_s17 + $0x90] sm:$0xff]  ;;  %v12708_v53 = vld [vmem:[#allocation4_spill] sm:$0xff] }
 0x145   : >> { %v1944_v21 = vsel %vm1124_vm5, %v1942_v16, %v1943_v23  ;;  %v1946_v61 = vsel %vm1124_vm5, %v1943_v23, %v1945_v46  ;;  %v1950_v62 = vrot.slane %v1895_v12, 6  ;;  %v1952_v59 = vrot.slane %v1896_v35, 6  ;;  %12704 = vst [vmem:[#allocation17_spill] sm:$0xff] %v8262_v20  ;;  %12705 = vst [vmem:[#allocation19_spill] sm:$0xff] %v8265_v11  ;;  %v12709_v16 = vld [vmem:[#allocation22_spill] sm:$0xff]  ;;  %v12710_v23 = vld [vmem:[#allocation11_spill] sm:$0xff] }
 0x146   : >> { %v1953_v10 = vrot.slane %v1897_v34, 6  ;;  %v1949_v49 = vsel %vm1124_vm5, %v1947_v6, %v1948_v22  ;;  %v1955_v36 = vrot.slane %v1898_v58, 6  ;;  %v1957_v40 = vrot.slane %v1899_v39, 6  ;;  %v12712_v46 = vld [vmem:[#allocation12_spill] sm:$0xff] }
 0x147   : >> { %v1958_v1 = vrot.slane %v1900_v17, 6  ;;  %v1951_v28 = vsel %vm1124_vm5, %v1948_v22, %v1950_v62  ;;  %v1960_v18 = vrot.slane %v1901_v60, 6  ;;  %v1962_v54 = vrot.slane %v1902_v38, 6  ;;  %v12717_v22 = vld [vmem:[#allocation13_spill] sm:$0xff]  ;;  %v12719_v62 = vld [vmem:[#allocation14_spill] sm:$0xff] }
 0x148   : >> { %v1954_v56 = vsel %vm1124_vm5, %v1952_v59, %v1953_v10  ;;  %v1956_v26 = vsel %vm1124_vm5, %v1953_v10, %v1955_v36  ;;  %v1963_v24 = vrot.slane %v1903_v14, 6  ;;  %v1965_v47 = vrot.slane %v1904_v27, 6  ;;  %v12721_v10 = vld [vmem:[#allocation15_spill] sm:$0xff]  ;;  %v12723_v36 = vld [vmem:[#allocation16_spill] sm:$0xff] }
 0x149   : >> { %v1959_v44 = vsel %vm1124_vm5, %v1957_v40, %v1958_v1  ;;  %v1961_v12 = vsel %vm1124_vm5, %v1958_v1, %v1960_v18  ;;  %v1967_v35 = vrot.slane %v1905_v5, 6  ;;  %v1968_v34 = vrot.slane %v1906_v15, 6  ;;  %v8233_v15 = vld [vmem:[%s6650_s17 + $0x30] sm:$0xff]  ;;  %v8310_v1 = vld [vmem:[%s6650_s17 + $0xc8] sm:$0xff] }
 0x14a   : >> { %v1970_v58 = vrot.slane %v1907_v0, 6  ;;  %v1964_v39 = vsel %vm1124_vm5, %v1962_v54, %v1963_v24  ;;  %v1966_v17 = vsel %vm1124_vm5, %v1963_v24, %v1965_v47  ;;  %v1988_v60 = vadd.f32 %v1934_v42, %v8111_v13  ;;  %v12711_v42 = vld [vmem:[#allocation5_spill] sm:$0xff]  ;;  %12725 = vst [vmem:[#allocation35_spill] sm:$0xff] %v8310_v1 }
 0x14b   : >> { %v1989_v38 = vadd.f32 %v1936_v43, %v8114_v7  ;;  %v1969_v14 = vsel %vm1124_vm5, %v1967_v35, %v1968_v34  ;;  %v1990_v27 = vadd.f32 %v1939_v3, %v8119_v51  ;;  %v1991_v41 = vadd.f32 %v1941_v29, %v8122_v57  ;;  %v8285_v3 = vld [vmem:[%s6650_s17 + $0xa8] sm:$0xff]  ;;  %v8288_v29 = vld [vmem:[%s6650_s17 + $0xb0] sm:$0xff] }
 0x14c   : >> { %v1971_v48 = vsel %vm1124_vm5, %v1968_v34, %v1970_v58  ;;  %v1992_v5 = vadd.f32 %v1944_v21, %v8125_v33  ;;  %v1993_v55 = vadd.f32 %v1946_v61, %v8128_v19  ;;  %v1994_v13 = vadd.f32 %v1949_v49, %v8131_v50  ;;  %v8240_v19 = vld [vmem:[%s6650_s17 + $0x38] sm:$0xff]  ;;  %v8246_v50 = vld [vmem:[%s6650_s17 + $0x50] sm:$0xff]  ;;  %12714 = vst [vmem:[#allocation23_spill] sm:$0xff] %v8285_v3  ;;  %v8291_v21 = vld [vmem:[%s6650_s17 + $0xc0] sm:$0xff] }
 0x14d   : >> { %v1995_v7 = vadd.f32 %v1951_v28, %v8134_v30  ;;  %v1996_v0 = vadd.f32 %v1954_v56, %v8137_v45  ;;  %v1997_v51 = vadd.f32 %v1956_v26, %v8140_v2  ;;  %v1998_v57 = vadd.f32 %v1959_v44, %v8143_v63  ;;  %v8253_v63 = vld [vmem:[%s6650_s17 + $0x60] sm:$0xff]  ;;  %12715 = vst [vmem:[#allocation24_spill] sm:$0xff] %v8288_v29  ;;  %v8313_v28 = vld [vmem:[%s6650_s17 + $0xd8] sm:$0xff] }
 0x14e   : >> { %v1999_v33 = vadd.f32 %v1961_v12, %v8146_v25  ;;  %v2000_v30 = vadd.f32 %v1964_v39, %v8149_v4  ;;  %v2001_v45 = vadd.f32 %v1966_v17, %v8152_v32  ;;  %v2002_v37 = vadd.f32 %v1969_v14, %v8155_v9  ;;  %v8256_v25 = vld [vmem:[%s6650_s17 + $0x68] sm:$0xff]  ;;  %v8268_v4 = vld [vmem:[%s6650_s17 + $0x98] sm:$0xff]  ;;  %v12707_v32 = vld [vmem:[#allocation21_spill] sm:$0xff]  ;;  %12716 = vst [vmem:[#allocation37_spill] sm:$0xff] %v8291_v21 }
 0x14f   : >> { %v2003_v2 = vadd.f32 %v1971_v48, %v8158_v31  ;;  %12702 = vst [vmem:[#allocation33_spill] sm:$0xff] %v8256_v25  ;;  %12706 = vst [vmem:[#allocation20_spill] sm:$0xff] %v8268_v4  ;;  %v2034_v9 = vrot.slane %v12708_v53, %v12707_v32  ;;  %v8274_v31 = vrot.slane %v12708_v53, %v12709_v16  ;;  %v8316_v56 = vld [vmem:[%s6650_s17 + $0xe0] sm:$0xff] }
 0x150   : >> { %v8278_v43 = vrot.slane %v12711_v42, %v12710_v23  ;;  %v8282_v6 = vrot.slane %v12711_v42, %v12712_v46  ;;  %v8295_v61 = vrot.slane %v12711_v42, %v12717_v22  ;;  %v8299_v59 = vrot.slane %v12711_v42, %v12719_v62  ;;  %12726 = vst [vmem:[#allocation32_spill] sm:$0xff] %v8313_v28  ;;  %v8343_v23 = vld [vmem:[%s6650_s17 + $0x40] sm:$0x3f] }
 0x151   : >> { %v8303_v49 = vrot.slane %v12711_v42, %v12721_v10  ;;  %v8307_v40 = vrot.slane %v12711_v42, %v12723_v36  ;;  %12727 = vst [vmem:[#allocation27_spill] sm:$0xff] %v8316_v56  ;;  %v2035_v18 = vmul.f32 %v8233_v15, %v2034_v9  ;;  %v2036_v54 = vmul.f32 %v8240_v19, %v2034_v9 }
 0x152   : >> { %12713 = vst [vmem:[#allocation30_spill] sm:$0xff] %v8282_v6  ;;  %12718 = vst [vmem:[#allocation34_spill] sm:$0xff] %v8295_v61  ;;  %v2037_v26 = vmul.f32 %v8243_v8, %v2034_v9  ;;  %v2038_v44 = vmul.f32 %v8246_v50, %v2034_v9  ;;  %v2039_v24 = vmul.f32 %v8253_v63, %v2034_v9 }
 0x153   : >> { %12720 = vst [vmem:[#allocation25_spill] sm:$0xff] %v8299_v59  ;;  %12722 = vst [vmem:[#allocation31_spill] sm:$0xff] %v8303_v49  ;;  %v2040_v47 = vmul.f32 %v8256_v25, %v2034_v9  ;;  %v2041_v12 = vmul.f32 %v8259_v52, %v2034_v9  ;;  %v2042_v35 = vmul.f32 %v8262_v20, %v2034_v9 }
 0x154   : >> { %12724 = vst [vmem:[#allocation26_spill] sm:$0xff] %v8307_v40  ;;  %v2043_v34 = vmul.f32 %v8265_v11, %v2034_v9  ;;  %v2044_v58 = vmul.f32 %v8268_v4, %v2034_v9  ;;  %v2045_v39 = vmul.f32 %v8285_v3, %v2034_v9  ;;  %v2046_v17 = vmul.f32 %v8288_v29, %v2034_v9 }
 0x155   : >> { %v2047_v14 = vmul.f32 %v8291_v21, %v2034_v9  ;;  %v2048_v48 = vmul.f32 %v8310_v1, %v2034_v9  ;;  %v2049_v53 = vmul.f32 %v8313_v28, %v2034_v9  ;;  %v2050_v36 = vmul.f32 %v8316_v56, %v2034_v9  ;;  %v8354_v9 = vld [vmem:[%s6650_s17 + $0x58] sm:$0x3f] }
 0x156   : >> { %v8334_v10 = vadd.f32 %v2035_v18, %v1988_v60  ;;  %v8336_v62 = vadd.f32 %v2036_v54, %v1989_v38  ;;  %v8338_v22 = vadd.f32 %v2037_v26, %v1990_v27  ;;  %v8340_v46 = vadd.f32 %v2038_v44, %v1991_v41  ;;  %v8365_v18 = vld [vmem:[%s6650_s17 + $0x70] sm:$0x3f]  ;;  %v8404_v44 = vld [vmem:[%s6650_s17 + $0xe8] sm:$0x3f] }
 0x157   : >> { %v8345_v16 = vadd.f32 %v2039_v24, %v1992_v5  ;;  %v8347_v42 = vadd.f32 %v2040_v47, %v1993_v55  ;;  %v8349_v32 = vadd.f32 %v2041_v12, %v1994_v13  ;;  %v8351_v40 = vadd.f32 %v2042_v35, %v1995_v7  ;;  %12728 = vst [vmem:[#allocation28_spill] sm:$0xff] %v8365_v18  ;;  %v8368_v5 = vld [vmem:[%s6650_s17 + $0x88] sm:$0x3f]  ;;  %v8401_v26 = vld [vmem:[%s6650_s17 + $0xd0] sm:$0x3f] }
 0x158   : >> { %v8356_v60 = vadd.f32 %v2043_v34, %v1996_v0  ;;  %v8358_v38 = vadd.f32 %v2044_v58, %v1997_v51  ;;  %v8360_v27 = vadd.f32 %v2045_v39, %v1998_v57  ;;  %v8362_v41 = vadd.f32 %v2046_v17, %v1999_v33  ;;  %12729 = vst [vmem:[#allocation38_spill] sm:$0xff] %v8368_v5  ;;  %v8379_v51 = vld [vmem:[%s6650_s17 + $0xa0] sm:$0x3f] }
 0x159   : >> { %v8370_v55 = vadd.f32 %v2047_v14, %v2000_v30  ;;  %v8372_v13 = vadd.f32 %v2048_v48, %v2001_v45  ;;  %v8374_v7 = vadd.f32 %v2049_v53, %v2002_v37  ;;  %v8376_v0 = vadd.f32 %v2050_v36, %v2003_v2  ;;  %12730 = vst [vmem:[#allocation36_spill] sm:$0xff] %v8379_v51  ;;  %v8390_v45 = vld [vmem:[%s6650_s17 + $0xb8] sm:$0x3f] }
 0x15a   : >> { %v2071_v57 = vmul.f32 %v8233_v15, %v8274_v31  ;;  %v2072_v33 = vmul.f32 %v8240_v19, %v8274_v31  ;;  %v2073_v54 = vmul.f32 %v8343_v23, %v8274_v31  ;;  %v2074_v30 = vmul.f32 %v8243_v8, %v8274_v31  ;;  %12731 = vst [vmem:[#allocation29_spill] sm:$0xff] %v8390_v45 }
 0x15b   : >> { %v2075_v37 = vmul.f32 %v8246_v50, %v8274_v31  ;;  %v2076_v2 = vmul.f32 %v8354_v9, %v8274_v31  ;;  %v2077_v53 = vmul.f32 %v8253_v63, %v8274_v31  ;;  %v2078_v36 = vmul.f32 %v8256_v25, %v8274_v31  ;;  %12732 = vst [vmem:[#allocation39_spill] sm:$0xff] %v8401_v26 }
 0x15c   : >> { %v2079_v24 = vmul.f32 %v8365_v18, %v8274_v31  ;;  %v2080_v47 = vmul.f32 %v8259_v52, %v8274_v31  ;;  %v2081_v12 = vmul.f32 %v8262_v20, %v8274_v31  ;;  %v2082_v35 = vmul.f32 %v8368_v5, %v8274_v31 }
 0x15d   : >> { %v2083_v34 = vmul.f32 %v8265_v11, %v8274_v31  ;;  %v2084_v58 = vmul.f32 %v8268_v4, %v8274_v31  ;;  %v2085_v39 = vmul.f32 %v8379_v51, %v8274_v31  ;;  %v2086_v17 = vmul.f32 %v8285_v3, %v8274_v31 }
 0x15e   : >> { %v2087_v14 = vmul.f32 %v8288_v29, %v8274_v31  ;;  %v2088_v48 = vmul.f32 %v8390_v45, %v8274_v31  ;;  %v2089_v49 = vmul.f32 %v8291_v21, %v8274_v31  ;;  %v2090_v59 = vmul.f32 %v8310_v1, %v8274_v31 }
 0x15f   : >> { %v2091_v61 = vmul.f32 %v8401_v26, %v8274_v31  ;;  %v2092_v6 = vmul.f32 %v8313_v28, %v8274_v31  ;;  %v2093_v3 = vmul.f32 %v8316_v56, %v8274_v31  ;;  %v2094_v29 = vmul.f32 %v8404_v44, %v8274_v31 }
 0x160   : >> { %v2119_v51 = vrot.slane %v2071_v57, 1  ;;  %v2120_v45 = vrot.slane %v2072_v33, 1  ;;  %v2122_v4 = vrot.slane %v2073_v54, 1  ;;  %v2124_v11 = vrot.slane %v2074_v30, 1 }
 0x161   : >> { %v2125_v21 = vrot.slane %v2075_v37, 1  ;;  %v2127_v5 = vrot.slane %v2076_v2, 1  ;;  %v2129_v20 = vrot.slane %v2077_v53, 1  ;;  %v2130_v1 = vrot.slane %v2078_v36, 1 }
 0x162   : >> { %v2121_v52 = vsel %vm499_vm0, %v2119_v51, %v2120_v45  ;;  %v2123_v26 = vsel %vm499_vm0, %v2120_v45, %v2122_v4  ;;  %v2132_v18 = vrot.slane %v2079_v24, 1  ;;  %v2134_v28 = vrot.slane %v2080_v47, 1 }
 0x163   : >> { %v2126_v25 = vsel %vm499_vm0, %v2124_v11, %v2125_v21  ;;  %v2128_v56 = vsel %vm499_vm0, %v2125_v21, %v2127_v5  ;;  %v2131_v31 = vsel %vm499_vm0, %v2129_v20, %v2130_v1  ;;  %v2135_v57 = vrot.slane %v2081_v12, 1 }
 0x164   : >> { %v2133_v33 = vsel %vm499_vm0, %v2130_v1, %v2132_v18  ;;  %v2137_v54 = vrot.slane %v2082_v35, 1  ;;  %v2139_v30 = vrot.slane %v2083_v34, 1  ;;  %v2140_v37 = vrot.slane %v2084_v58, 1 }
 0x165   : >> { %v2136_v2 = vsel %vm499_vm0, %v2134_v28, %v2135_v57  ;;  %v2142_v53 = vrot.slane %v2085_v39, 1  ;;  %v2144_v51 = vrot.slane %v2086_v17, 1  ;;  %v2145_v36 = vrot.slane %v2087_v14, 1  ;;  %v12735_v14 = vld [vmem:[#allocation18_spill] sm:$0xff] }
 0x166   : >> { %v2138_v4 = vsel %vm499_vm0, %v2135_v57, %v2137_v54  ;;  %v2141_v45 = vsel %vm499_vm0, %v2139_v30, %v2140_v37  ;;  %v2147_v11 = vrot.slane %v2088_v48, 1  ;;  %v2149_v24 = vrot.slane %v2089_v49, 1  ;;  %v12738_v30 = vld [vmem:[#allocation19_spill] sm:$0xff] }
 0x167   : >> { %v2143_v21 = vsel %vm499_vm0, %v2140_v37, %v2142_v53  ;;  %v2146_v20 = vsel %vm499_vm0, %v2144_v51, %v2145_v36  ;;  %v2150_v5 = vrot.slane %v2090_v59, 1  ;;  %v2152_v1 = vrot.slane %v2091_v61, 1  ;;  %v12740_v51 = vld [vmem:[#allocation36_spill] sm:$0xff] }
 0x168   : >> { %v2148_v18 = vsel %vm499_vm0, %v2145_v36, %v2147_v11  ;;  %v2154_v47 = vrot.slane %v2092_v6, 1  ;;  %v2155_v12 = vrot.slane %v2093_v3, 1  ;;  %v2157_v28 = vrot.slane %v2094_v29, 1  ;;  %v12742_v11 = vld [vmem:[#allocation24_spill] sm:$0xff] }
 0x169   : >> { %v2151_v35 = vsel %vm499_vm0, %v2149_v24, %v2150_v5  ;;  %v2153_v34 = vsel %vm499_vm0, %v2150_v5, %v2152_v1  ;;  %v8453_v58 = vadd.f32 %v2121_v52, %v8334_v10  ;;  %v8456_v49 = vadd.f32 %v2123_v26, %v8336_v62  ;;  %v12734_v26 = vld [vmem:[#allocation28_spill] sm:$0xff]  ;;  %v12744_v5 = vld [vmem:[#allocation37_spill] sm:$0xff] }
 0x16a   : >> { %v2156_v39 = vsel %vm499_vm0, %v2154_v47, %v2155_v12  ;;  %v2158_v59 = vsel %vm499_vm0, %v2155_v12, %v2157_v28  ;;  %v8461_v61 = vadd.f32 %v2126_v25, %v8338_v22  ;;  %v8464_v6 = vadd.f32 %v2128_v56, %v8340_v46  ;;  %v12746_v12 = vld [vmem:[#allocation39_spill] sm:$0xff] }
 0x16b   : >> { %v8467_v3 = vadd.f32 %v2131_v31, %v8345_v16  ;;  %v8470_v29 = vadd.f32 %v2133_v33, %v8347_v42  ;;  %v8473_v52 = vadd.f32 %v2136_v2, %v8349_v32  ;;  %v8476_v62 = vadd.f32 %v2138_v4, %v8351_v40  ;;  %v12736_v31 = vld [vmem:[#allocation17_spill] sm:$0xff]  ;;  %v12737_v33 = vld [vmem:[#allocation38_spill] sm:$0xff]  ;;  %v12739_v2 = vld [vmem:[#allocation20_spill] sm:$0xff] }
 0x16c   : >> { %v8479_v10 = vadd.f32 %v2141_v45, %v8356_v60  ;;  %v8482_v25 = vadd.f32 %v2143_v21, %v8358_v38  ;;  %v8485_v46 = vadd.f32 %v2146_v20, %v8360_v27  ;;  %v8488_v16 = vadd.f32 %v2148_v18, %v8362_v41  ;;  %v12741_v4 = vld [vmem:[#allocation23_spill] sm:$0xff]  ;;  %v12743_v21 = vld [vmem:[#allocation29_spill] sm:$0xff] }
 0x16d   : >> { %v8491_v42 = vadd.f32 %v2151_v35, %v8370_v55  ;;  %v8494_v32 = vadd.f32 %v2153_v34, %v8372_v13  ;;  %v8497_v22 = vadd.f32 %v2156_v39, %v8374_v7  ;;  %v8500_v40 = vadd.f32 %v2158_v59, %v8376_v0  ;;  %v12733_v7 = vld [vmem:[#allocation33_spill] sm:$0xff]  ;;  %v12745_v18 = vld [vmem:[#allocation35_spill] sm:$0xff]  ;;  %v12747_v35 = vld [vmem:[#allocation32_spill] sm:$0xff] }
 0x16e   : >> { %v2195_v56 = vmul.f32 %v8233_v15, %v8278_v43  ;;  %v2196_v60 = vmul.f32 %v8240_v19, %v8278_v43  ;;  %v2197_v38 = vmul.f32 %v8343_v23, %v8278_v43  ;;  %v2198_v27 = vmul.f32 %v8243_v8, %v8278_v43  ;;  %v12748_v39 = vld [vmem:[#allocation27_spill] sm:$0xff] }
 0x16f   : >> { %v2199_v41 = vmul.f32 %v8246_v50, %v8278_v43  ;;  %v2200_v55 = vmul.f32 %v8354_v9, %v8278_v43  ;;  %v2201_v13 = vmul.f32 %v8253_v63, %v8278_v43  ;;  %v2202_v0 = vmul.f32 %v12733_v7, %v8278_v43 }
 0x170   : >> { %v2203_v17 = vmul.f32 %v12734_v26, %v8278_v43  ;;  %v2204_v48 = vmul.f32 %v12735_v14, %v8278_v43  ;;  %v2205_v57 = vmul.f32 %v12736_v31, %v8278_v43  ;;  %v2206_v54 = vmul.f32 %v12737_v33, %v8278_v43 }
 0x171   : >> { %v2207_v37 = vmul.f32 %v12738_v30, %v8278_v43  ;;  %v2208_v53 = vmul.f32 %v12739_v2, %v8278_v43  ;;  %v2209_v36 = vmul.f32 %v12740_v51, %v8278_v43  ;;  %v2210_v45 = vmul.f32 %v12741_v4, %v8278_v43 }
 0x172   : >> { %v2211_v24 = vmul.f32 %v12742_v11, %v8278_v43  ;;  %v2212_v20 = vmul.f32 %v12743_v21, %v8278_v43  ;;  %v2213_v1 = vmul.f32 %v12744_v5, %v8278_v43  ;;  %v2214_v47 = vmul.f32 %v12745_v18, %v8278_v43 }
 0x173   : >> { %v2215_v28 = vmul.f32 %v12746_v12, %v8278_v43  ;;  %v2216_v34 = vmul.f32 %v12747_v35, %v8278_v43  ;;  %v2217_v59 = vmul.f32 %v12748_v39, %v8278_v43  ;;  %v2218_v11 = vmul.f32 %v8404_v44, %v8278_v43 }
 0x174   : >> { %v2243_v4 = vrot.slane %v2195_v56, 2  ;;  %v2244_v21 = vrot.slane %v2196_v60, 2  ;;  %v2246_v51 = vrot.slane %v2197_v38, 2  ;;  %v2248_v2 = vrot.slane %v2198_v27, 2 }
 0x175   : >> { %v2249_v5 = vrot.slane %v2199_v41, 2  ;;  %v2251_v30 = vrot.slane %v2200_v55, 2  ;;  %v2253_v33 = vrot.slane %v2201_v13, 2  ;;  %v2254_v18 = vrot.slane %v2202_v0, 2 }
 0x176   : >> { %v2245_v31 = vsel %vm624_vm1, %v2243_v4, %v2244_v21  ;;  %v2247_v12 = vsel %vm624_vm1, %v2244_v21, %v2246_v51  ;;  %v2256_v14 = vrot.slane %v2203_v17, 2  ;;  %v2258_v35 = vrot.slane %v2204_v48, 2 }
 0x177   : >> { %v2250_v26 = vsel %vm624_vm1, %v2248_v2, %v2249_v5  ;;  %v2252_v39 = vsel %vm624_vm1, %v2249_v5, %v2251_v30  ;;  %v2255_v43 = vsel %vm624_vm1, %v2253_v33, %v2254_v18  ;;  %v2259_v56 = vrot.slane %v2205_v57, 2 }
 0x178   : >> { %v2257_v60 = vsel %vm624_vm1, %v2254_v18, %v2256_v14  ;;  %v2261_v38 = vrot.slane %v2206_v54, 2  ;;  %v2263_v27 = vrot.slane %v2207_v37, 2  ;;  %v2264_v41 = vrot.slane %v2208_v53, 2 }
 0x179   : >> { %v2260_v55 = vsel %vm624_vm1, %v2258_v35, %v2259_v56  ;;  %v2266_v13 = vrot.slane %v2209_v36, 2  ;;  %v2268_v0 = vrot.slane %v2210_v45, 2  ;;  %v2269_v4 = vrot.slane %v2211_v24, 2  ;;  %v12750_v35 = vld [vmem:[#allocation28_spill] sm:$0xff] }
 0x17a   : >> { %v2262_v17 = vsel %vm624_vm1, %v2259_v56, %v2261_v38  ;;  %v2265_v48 = vsel %vm624_vm1, %v2263_v27, %v2264_v41  ;;  %v2271_v2 = vrot.slane %v2212_v20, 2  ;;  %v2273_v51 = vrot.slane %v2213_v1, 2  ;;  %v12754_v27 = vld [vmem:[#allocation19_spill] sm:$0xff] }
 0x17b   : >> { %v2267_v30 = vsel %vm624_vm1, %v2264_v41, %v2266_v13  ;;  %v2270_v57 = vsel %vm624_vm1, %v2268_v0, %v2269_v4  ;;  %v2274_v33 = vrot.slane %v2214_v47, 2  ;;  %v2276_v14 = vrot.slane %v2215_v28, 2  ;;  %v12756_v0 = vld [vmem:[#allocation36_spill] sm:$0xff] }
 0x17c   : >> { %v2272_v54 = vsel %vm624_vm1, %v2269_v4, %v2271_v2  ;;  %v2278_v37 = vrot.slane %v2216_v34, 2  ;;  %v2279_v53 = vrot.slane %v2217_v59, 2  ;;  %v2281_v21 = vrot.slane %v2218_v11, 2  ;;  %v12758_v2 = vld [vmem:[#allocation24_spill] sm:$0xff] }
 0x17d   : >> { %v2275_v36 = vsel %vm624_vm1, %v2273_v51, %v2274_v33  ;;  %v2277_v45 = vsel %vm624_vm1, %v2274_v33, %v2276_v14  ;;  %v8565_v24 = vadd.f32 %v2245_v31, %v8453_v58  ;;  %v8568_v20 = vadd.f32 %v2247_v12, %v8456_v49  ;;  %v12760_v33 = vld [vmem:[#allocation37_spill] sm:$0xff] }
 0x17e   : >> { %v2280_v5 = vsel %vm624_vm1, %v2278_v37, %v2279_v53  ;;  %v2282_v1 = vsel %vm624_vm1, %v2279_v53, %v2281_v21  ;;  %v8573_v18 = vadd.f32 %v2250_v26, %v8461_v61  ;;  %v8576_v47 = vadd.f32 %v2252_v39, %v8464_v6  ;;  %v12751_v39 = vld [vmem:[#allocation18_spill] sm:$0xff]  ;;  %v12762_v53 = vld [vmem:[#allocation39_spill] sm:$0xff] }
 0x17f   : >> { %v8579_v11 = vadd.f32 %v2255_v43, %v8467_v3  ;;  %v8582_v28 = vadd.f32 %v2257_v60, %v8470_v29  ;;  %v8585_v58 = vadd.f32 %v2260_v55, %v8473_v52  ;;  %v8588_v49 = vadd.f32 %v2262_v17, %v8476_v62  ;;  %v12752_v43 = vld [vmem:[#allocation17_spill] sm:$0xff]  ;;  %v12753_v60 = vld [vmem:[#allocation38_spill] sm:$0xff]  ;;  %v12755_v55 = vld [vmem:[#allocation20_spill] sm:$0xff] }
 0x180   : >> { %v8591_v31 = vadd.f32 %v2265_v48, %v8479_v10  ;;  %v8594_v61 = vadd.f32 %v2267_v30, %v8482_v25  ;;  %v8597_v6 = vadd.f32 %v2270_v57, %v8485_v46  ;;  %v8600_v3 = vadd.f32 %v2272_v54, %v8488_v16  ;;  %v12749_v25 = vld [vmem:[#allocation30_spill] sm:$0xff]  ;;  %v12757_v17 = vld [vmem:[#allocation23_spill] sm:$0xff]  ;;  %v12759_v30 = vld [vmem:[#allocation29_spill] sm:$0xff] }
 0x181   : >> { %v8603_v29 = vadd.f32 %v2275_v36, %v8491_v42  ;;  %v8606_v52 = vadd.f32 %v2277_v45, %v8494_v32  ;;  %v8609_v62 = vadd.f32 %v2280_v5, %v8497_v22  ;;  %v8612_v10 = vadd.f32 %v2282_v1, %v8500_v40  ;;  %v12761_v54 = vld [vmem:[#allocation35_spill] sm:$0xff]  ;;  %v12763_v36 = vld [vmem:[#allocation32_spill] sm:$0xff] }
 0x182   : >> { %v2319_v26 = vmul.f32 %v8233_v15, %v12749_v25  ;;  %v2320_v46 = vmul.f32 %v8240_v19, %v12749_v25  ;;  %v2321_v16 = vmul.f32 %v8343_v23, %v12749_v25  ;;  %v2322_v42 = vmul.f32 %v8243_v8, %v12749_v25  ;;  %v12764_v5 = vld [vmem:[#allocation27_spill] sm:$0xff] }
 0x183   : >> { %v2323_v32 = vmul.f32 %v8246_v50, %v12749_v25  ;;  %v2324_v22 = vmul.f32 %v8354_v9, %v12749_v25  ;;  %v2325_v40 = vmul.f32 %v8253_v63, %v12749_v25  ;;  %v2326_v12 = vmul.f32 %v12733_v7, %v12749_v25 }
 0x184   : >> { %v2327_v34 = vmul.f32 %v12750_v35, %v12749_v25  ;;  %v2328_v59 = vmul.f32 %v12751_v39, %v12749_v25  ;;  %v2329_v56 = vmul.f32 %v12752_v43, %v12749_v25  ;;  %v2330_v38 = vmul.f32 %v12753_v60, %v12749_v25 }
 0x185   : >> { %v2331_v41 = vmul.f32 %v12754_v27, %v12749_v25  ;;  %v2332_v13 = vmul.f32 %v12755_v55, %v12749_v25  ;;  %v2333_v4 = vmul.f32 %v12756_v0, %v12749_v25  ;;  %v2334_v48 = vmul.f32 %v12757_v17, %v12749_v25 }
 0x186   : >> { %v2335_v51 = vmul.f32 %v12758_v2, %v12749_v25  ;;  %v2336_v57 = vmul.f32 %v12759_v30, %v12749_v25  ;;  %v2337_v14 = vmul.f32 %v12760_v33, %v12749_v25  ;;  %v2338_v37 = vmul.f32 %v12761_v54, %v12749_v25 }
 0x187   : >> { %v2339_v21 = vmul.f32 %v12762_v53, %v12749_v25  ;;  %v2340_v45 = vmul.f32 %v12763_v36, %v12749_v25  ;;  %v2341_v1 = vmul.f32 %v12764_v5, %v12749_v25  ;;  %v2342_v2 = vmul.f32 %v8404_v44, %v12749_v25 }
 0x188   : >> { %v2367_v17 = vrot.slane %v2319_v26, 3  ;;  %v2368_v30 = vrot.slane %v2320_v46, 3  ;;  %v2370_v0 = vrot.slane %v2321_v16, 3  ;;  %v2372_v55 = vrot.slane %v2322_v42, 3 }
 0x189   : >> { %v2373_v33 = vrot.slane %v2323_v32, 3  ;;  %v2375_v27 = vrot.slane %v2324_v22, 3  ;;  %v2377_v60 = vrot.slane %v2325_v40, 3  ;;  %v2378_v54 = vrot.slane %v2326_v12, 3 }
 0x18a   : >> { %v2369_v43 = vsel %vm749_vm2, %v2367_v17, %v2368_v30  ;;  %v2371_v53 = vsel %vm749_vm2, %v2368_v30, %v2370_v0  ;;  %v2380_v39 = vrot.slane %v2327_v34, 3  ;;  %v2382_v36 = vrot.slane %v2328_v59, 3 }
 0x18b   : >> { %v2374_v35 = vsel %vm749_vm2, %v2372_v55, %v2373_v33  ;;  %v2376_v5 = vsel %vm749_vm2, %v2373_v33, %v2375_v27  ;;  %v2379_v25 = vsel %vm749_vm2, %v2377_v60, %v2378_v54  ;;  %v2383_v26 = vrot.slane %v2329_v56, 3 }
 0x18c   : >> { %v2381_v46 = vsel %vm749_vm2, %v2378_v54, %v2380_v39  ;;  %v2385_v16 = vrot.slane %v2330_v38, 3  ;;  %v2387_v42 = vrot.slane %v2331_v41, 3  ;;  %v2388_v32 = vrot.slane %v2332_v13, 3 }
 0x18d   : >> { %v2384_v22 = vsel %vm749_vm2, %v2382_v36, %v2383_v26  ;;  %v2390_v40 = vrot.slane %v2333_v4, 3  ;;  %v2392_v12 = vrot.slane %v2334_v48, 3  ;;  %v2393_v17 = vrot.slane %v2335_v51, 3  ;;  %v12766_v36 = vld [vmem:[#allocation28_spill] sm:$0xff] }
 0x18e   : >> { %v2386_v34 = vsel %vm749_vm2, %v2383_v26, %v2385_v16  ;;  %v2389_v59 = vsel %vm749_vm2, %v2387_v42, %v2388_v32  ;;  %v2395_v55 = vrot.slane %v2336_v57, 3  ;;  %v2397_v0 = vrot.slane %v2337_v14, 3  ;;  %v12770_v42 = vld [vmem:[#allocation19_spill] sm:$0xff] }
 0x18f   : >> { %v2391_v27 = vsel %vm749_vm2, %v2388_v32, %v2390_v40  ;;  %v2394_v56 = vsel %vm749_vm2, %v2392_v12, %v2393_v17  ;;  %v2398_v60 = vrot.slane %v2338_v37, 3  ;;  %v2400_v39 = vrot.slane %v2339_v21, 3  ;;  %v12772_v12 = vld [vmem:[#allocation36_spill] sm:$0xff] }
 0x190   : >> { %v2396_v38 = vsel %vm749_vm2, %v2393_v17, %v2395_v55  ;;  %v2402_v41 = vrot.slane %v2340_v45, 3  ;;  %v2403_v13 = vrot.slane %v2341_v1, 3  ;;  %v2405_v30 = vrot.slane %v2342_v2, 3  ;;  %v12774_v55 = vld [vmem:[#allocation24_spill] sm:$0xff] }
 0x191   : >> { %v2399_v4 = vsel %vm749_vm2, %v2397_v0, %v2398_v60  ;;  %v2401_v48 = vsel %vm749_vm2, %v2398_v60, %v2400_v39  ;;  %v8677_v51 = vadd.f32 %v2369_v43, %v8565_v24  ;;  %v8680_v57 = vadd.f32 %v2371_v53, %v8568_v20  ;;  %v12776_v60 = vld [vmem:[#allocation37_spill] sm:$0xff] }
 0x192   : >> { %v2404_v33 = vsel %vm749_vm2, %v2402_v41, %v2403_v13  ;;  %v2406_v14 = vsel %vm749_vm2, %v2403_v13, %v2405_v30  ;;  %v8685_v54 = vadd.f32 %v2374_v35, %v8573_v18  ;;  %v8688_v37 = vadd.f32 %v2376_v5, %v8576_v47  ;;  %v12767_v5 = vld [vmem:[#allocation18_spill] sm:$0xff]  ;;  %v12778_v13 = vld [vmem:[#allocation39_spill] sm:$0xff] }
 0x193   : >> { %v8691_v2 = vadd.f32 %v2379_v25, %v8579_v11  ;;  %v8694_v21 = vadd.f32 %v2381_v46, %v8582_v28  ;;  %v8697_v24 = vadd.f32 %v2384_v22, %v8585_v58  ;;  %v8700_v20 = vadd.f32 %v2386_v34, %v8588_v49  ;;  %v12768_v25 = vld [vmem:[#allocation17_spill] sm:$0xff]  ;;  %v12769_v46 = vld [vmem:[#allocation38_spill] sm:$0xff]  ;;  %v12771_v22 = vld [vmem:[#allocation20_spill] sm:$0xff] }
 0x194   : >> { %v8703_v43 = vadd.f32 %v2389_v59, %v8591_v31  ;;  %v8706_v18 = vadd.f32 %v2391_v27, %v8594_v61  ;;  %v8709_v47 = vadd.f32 %v2394_v56, %v8597_v6  ;;  %v8712_v11 = vadd.f32 %v2396_v38, %v8600_v3  ;;  %v12765_v61 = vld [vmem:[#allocation34_spill] sm:$0xff]  ;;  %v12773_v34 = vld [vmem:[#allocation23_spill] sm:$0xff]  ;;  %v12775_v27 = vld [vmem:[#allocation29_spill] sm:$0xff] }
 0x195   : >> { %v8715_v28 = vadd.f32 %v2399_v4, %v8603_v29  ;;  %v8718_v58 = vadd.f32 %v2401_v48, %v8606_v52  ;;  %v8721_v49 = vadd.f32 %v2404_v33, %v8609_v62  ;;  %v8724_v31 = vadd.f32 %v2406_v14, %v8612_v10  ;;  %v12777_v38 = vld [vmem:[#allocation35_spill] sm:$0xff]  ;;  %v12779_v4 = vld [vmem:[#allocation32_spill] sm:$0xff] }
 0x196   : >> { %v2443_v35 = vmul.f32 %v8233_v15, %v12765_v61  ;;  %v2444_v6 = vmul.f32 %v8240_v19, %v12765_v61  ;;  %v2445_v3 = vmul.f32 %v8343_v23, %v12765_v61  ;;  %v2446_v29 = vmul.f32 %v8243_v8, %v12765_v61  ;;  %v12780_v33 = vld [vmem:[#allocation27_spill] sm:$0xff] }
 0x197   : >> { %v2447_v52 = vmul.f32 %v8246_v50, %v12765_v61  ;;  %v2448_v62 = vmul.f32 %v8354_v9, %v12765_v61  ;;  %v2449_v10 = vmul.f32 %v8253_v63, %v12765_v61  ;;  %v2450_v53 = vmul.f32 %v12733_v7, %v12765_v61 }
 0x198   : >> { %v2451_v45 = vmul.f32 %v12766_v36, %v12765_v61  ;;  %v2452_v1 = vmul.f32 %v12767_v5, %v12765_v61  ;;  %v2453_v26 = vmul.f32 %v12768_v25, %v12765_v61  ;;  %v2454_v16 = vmul.f32 %v12769_v46, %v12765_v61 }
 0x199   : >> { %v2455_v32 = vmul.f32 %v12770_v42, %v12765_v61  ;;  %v2456_v40 = vmul.f32 %v12771_v22, %v12765_v61  ;;  %v2457_v17 = vmul.f32 %v12772_v12, %v12765_v61  ;;  %v2458_v59 = vmul.f32 %v12773_v34, %v12765_v61 }
 0x19a   : >> { %v2459_v0 = vmul.f32 %v12774_v55, %v12765_v61  ;;  %v2460_v56 = vmul.f32 %v12775_v27, %v12765_v61  ;;  %v2461_v39 = vmul.f32 %v12776_v60, %v12765_v61  ;;  %v2462_v41 = vmul.f32 %v12777_v38, %v12765_v61 }
 0x19b   : >> { %v2463_v30 = vmul.f32 %v12778_v13, %v12765_v61  ;;  %v2464_v48 = vmul.f32 %v12779_v4, %v12765_v61  ;;  %v2465_v14 = vmul.f32 %v12780_v33, %v12765_v61  ;;  %v2466_v55 = vmul.f32 %v8404_v44, %v12765_v61 }
 0x19c   : >> { %v2491_v34 = vrot.slane %v2443_v35, 4  ;;  %v2492_v27 = vrot.slane %v2444_v6, 4  ;;  %v2494_v12 = vrot.slane %v2445_v3, 4  ;;  %v2496_v22 = vrot.slane %v2446_v29, 4 }
 0x19d   : >> { %v2497_v60 = vrot.slane %v2447_v52, 4  ;;  %v2499_v42 = vrot.slane %v2448_v62, 4  ;;  %v2501_v46 = vrot.slane %v2449_v10, 4  ;;  %v2502_v38 = vrot.slane %v2450_v53, 4 }
 0x19e   : >> { %v2493_v25 = vsel %vm874_vm3, %v2491_v34, %v2492_v27  ;;  %v2495_v13 = vsel %vm874_vm3, %v2492_v27, %v2494_v12  ;;  %v2504_v5 = vrot.slane %v2451_v45, 4  ;;  %v2506_v4 = vrot.slane %v2452_v1, 4 }
 0x19f   : >> { %v2498_v36 = vsel %vm874_vm3, %v2496_v22, %v2497_v60  ;;  %v2500_v33 = vsel %vm874_vm3, %v2497_v60, %v2499_v42  ;;  %v2503_v61 = vsel %vm874_vm3, %v2501_v46, %v2502_v38  ;;  %v2507_v35 = vrot.slane %v2453_v26, 4 }
 0x1a0   : >> { %v2505_v6 = vsel %vm874_vm3, %v2502_v38, %v2504_v5  ;;  %v2509_v3 = vrot.slane %v2454_v16, 4  ;;  %v2511_v29 = vrot.slane %v2455_v32, 4  ;;  %v2512_v52 = vrot.slane %v2456_v40, 4 }
 0x1a1   : >> { %v2508_v62 = vsel %vm874_vm3, %v2506_v4, %v2507_v35  ;;  %v2514_v10 = vrot.slane %v2457_v17, 4  ;;  %v2516_v53 = vrot.slane %v2458_v59, 4  ;;  %v2517_v34 = vrot.slane %v2459_v0, 4  ;;  %v12782_v4 = vld [vmem:[#allocation28_spill] sm:$0xff] }
 0x1a2   : >> { %v2510_v45 = vsel %vm874_vm3, %v2507_v35, %v2509_v3  ;;  %v2513_v1 = vsel %vm874_vm3, %v2511_v29, %v2512_v52  ;;  %v2519_v22 = vrot.slane %v2460_v56, 4  ;;  %v2521_v12 = vrot.slane %v2461_v39, 4  ;;  %v12786_v29 = vld [vmem:[#allocation19_spill] sm:$0xff] }
 0x1a3   : >> { %v2515_v42 = vsel %vm874_vm3, %v2512_v52, %v2514_v10  ;;  %v2518_v26 = vsel %vm874_vm3, %v2516_v53, %v2517_v34  ;;  %v2522_v46 = vrot.slane %v2462_v41, 4  ;;  %v2524_v5 = vrot.slane %v2463_v30, 4  ;;  %v12788_v53 = vld [vmem:[#allocation36_spill] sm:$0xff] }
 0x1a4   : >> { %v2520_v16 = vsel %vm874_vm3, %v2517_v34, %v2519_v22  ;;  %v2526_v32 = vrot.slane %v2464_v48, 4  ;;  %v2527_v40 = vrot.slane %v2465_v14, 4  ;;  %v2529_v27 = vrot.slane %v2466_v55, 4  ;;  %v12790_v22 = vld [vmem:[#allocation24_spill] sm:$0xff] }
 0x1a5   : >> { %v2523_v17 = vsel %vm874_vm3, %v2521_v12, %v2522_v46  ;;  %v2525_v59 = vsel %vm874_vm3, %v2522_v46, %v2524_v5  ;;  %v8789_v0 = vadd.f32 %v2493_v25, %v8677_v51  ;;  %v8792_v56 = vadd.f32 %v2495_v13, %v8680_v57  ;;  %v12792_v46 = vld [vmem:[#allocation37_spill] sm:$0xff] }
 0x1a6   : >> { %v2528_v60 = vsel %vm874_vm3, %v2526_v32, %v2527_v40  ;;  %v2530_v39 = vsel %vm874_vm3, %v2527_v40, %v2529_v27  ;;  %v8797_v38 = vadd.f32 %v2498_v36, %v8685_v54  ;;  %v8800_v41 = vadd.f32 %v2500_v33, %v8688_v37  ;;  %v12783_v33 = vld [vmem:[#allocation18_spill] sm:$0xff]  ;;  %v12794_v40 = vld [vmem:[#allocation39_spill] sm:$0xff] }
 0x1a7   : >> { %v8803_v55 = vadd.f32 %v2503_v61, %v8691_v2  ;;  %v8806_v30 = vadd.f32 %v2505_v6, %v8694_v21  ;;  %v8809_v51 = vadd.f32 %v2508_v62, %v8697_v24  ;;  %v8812_v57 = vadd.f32 %v2510_v45, %v8700_v20  ;;  %v12784_v61 = vld [vmem:[#allocation17_spill] sm:$0xff]  ;;  %v12785_v6 = vld [vmem:[#allocation38_spill] sm:$0xff]  ;;  %v12787_v62 = vld [vmem:[#allocation20_spill] sm:$0xff] }
 0x1a8   : >> { %v8815_v25 = vadd.f32 %v2513_v1, %v8703_v43  ;;  %v8818_v54 = vadd.f32 %v2515_v42, %v8706_v18  ;;  %v8821_v37 = vadd.f32 %v2518_v26, %v8709_v47  ;;  %v8824_v2 = vadd.f32 %v2520_v16, %v8712_v11  ;;  %v12781_v18 = vld [vmem:[#allocation25_spill] sm:$0xff]  ;;  %v12789_v45 = vld [vmem:[#allocation23_spill] sm:$0xff] }
 0x1a9   : >> { %v8827_v21 = vadd.f32 %v2523_v17, %v8715_v28  ;;  %v8830_v24 = vadd.f32 %v2525_v59, %v8718_v58  ;;  %v8833_v20 = vadd.f32 %v2528_v60, %v8721_v49  ;;  %v8836_v43 = vadd.f32 %v2530_v39, %v8724_v31  ;;  %v12791_v42 = vld [vmem:[#allocation29_spill] sm:$0xff]  ;;  %v12793_v16 = vld [vmem:[#allocation35_spill] sm:$0xff]  ;;  %v12795_v17 = vld [vmem:[#allocation32_spill] sm:$0xff] }
 0x1aa   : >> { %v2567_v36 = vmul.f32 %v8233_v15, %v12781_v18  ;;  %v2568_v47 = vmul.f32 %v8240_v19, %v12781_v18  ;;  %v2569_v11 = vmul.f32 %v8343_v23, %v12781_v18  ;;  %v2570_v28 = vmul.f32 %v8243_v8, %v12781_v18  ;;  %v12796_v60 = vld [vmem:[#allocation27_spill] sm:$0xff] }
 0x1ab   : >> { %v2571_v58 = vmul.f32 %v8246_v50, %v12781_v18  ;;  %v2572_v49 = vmul.f32 %v8354_v9, %v12781_v18  ;;  %v2573_v31 = vmul.f32 %v8253_v63, %v12781_v18  ;;  %v2574_v13 = vmul.f32 %v12733_v7, %v12781_v18 }
 0x1ac   : >> { %v2575_v48 = vmul.f32 %v12782_v4, %v12781_v18  ;;  %v2576_v14 = vmul.f32 %v12783_v33, %v12781_v18  ;;  %v2577_v35 = vmul.f32 %v12784_v61, %v12781_v18  ;;  %v2578_v3 = vmul.f32 %v12785_v6, %v12781_v18 }
 0x1ad   : >> { %v2579_v52 = vmul.f32 %v12786_v29, %v12781_v18  ;;  %v2580_v10 = vmul.f32 %v12787_v62, %v12781_v18  ;;  %v2581_v34 = vmul.f32 %v12788_v53, %v12781_v18  ;;  %v2582_v1 = vmul.f32 %v12789_v45, %v12781_v18 }
 0x1ae   : >> { %v2583_v12 = vmul.f32 %v12790_v22, %v12781_v18  ;;  %v2584_v26 = vmul.f32 %v12791_v42, %v12781_v18  ;;  %v2585_v5 = vmul.f32 %v12792_v46, %v12781_v18  ;;  %v2586_v32 = vmul.f32 %v12793_v16, %v12781_v18 }
 0x1af   : >> { %v2587_v27 = vmul.f32 %v12794_v40, %v12781_v18  ;;  %v2588_v59 = vmul.f32 %v12795_v17, %v12781_v18  ;;  %v2589_v39 = vmul.f32 %v12796_v60, %v12781_v18  ;;  %v2590_v22 = vmul.f32 %v8404_v44, %v12781_v18 }
 0x1b0   : >> { %v2615_v45 = vrot.slane %v2567_v36, 5  ;;  %v2616_v42 = vrot.slane %v2568_v47, 5  ;;  %v2618_v53 = vrot.slane %v2569_v11, 5  ;;  %v2620_v62 = vrot.slane %v2570_v28, 5 }
 0x1b1   : >> { %v2621_v46 = vrot.slane %v2571_v58, 5  ;;  %v2623_v29 = vrot.slane %v2572_v49, 5  ;;  %v2625_v6 = vrot.slane %v2573_v31, 5  ;;  %v2626_v16 = vrot.slane %v2574_v13, 5 }
 0x1b2   : >> { %v2617_v61 = vsel %vm999_vm4, %v2615_v45, %v2616_v42  ;;  %v2619_v40 = vsel %vm999_vm4, %v2616_v42, %v2618_v53  ;;  %v2628_v33 = vrot.slane %v2575_v48, 5  ;;  %v2630_v17 = vrot.slane %v2576_v14, 5 }
 0x1b3   : >> { %v2622_v4 = vsel %vm999_vm4, %v2620_v62, %v2621_v46  ;;  %v2624_v60 = vsel %vm999_vm4, %v2621_v46, %v2623_v29  ;;  %v2627_v18 = vsel %vm999_vm4, %v2625_v6, %v2626_v16  ;;  %v2631_v36 = vrot.slane %v2577_v35, 5 }
 0x1b4   : >> { %v2629_v47 = vsel %vm999_vm4, %v2626_v16, %v2628_v33  ;;  %v2633_v11 = vrot.slane %v2578_v3, 5  ;;  %v2635_v28 = vrot.slane %v2579_v52, 5  ;;  %v2636_v58 = vrot.slane %v2580_v10, 5 }
 0x1b5   : >> { %v2632_v49 = vsel %vm999_vm4, %v2630_v17, %v2631_v36  ;;  %v2638_v31 = vrot.slane %v2581_v34, 5  ;;  %v2640_v13 = vrot.slane %v2582_v1, 5  ;;  %v2641_v45 = vrot.slane %v2583_v12, 5 }
 0x1b6   : >> { %v2634_v48 = vsel %vm999_vm4, %v2631_v36, %v2633_v11  ;;  %v2637_v14 = vsel %vm999_vm4, %v2635_v28, %v2636_v58  ;;  %v2643_v62 = vrot.slane %v2584_v26, 5  ;;  %v2645_v53 = vrot.slane %v2585_v5, 5  ;;  %v12806_v28 = vld [vmem:[#allocation24_spill] sm:$0xff] }
 0x1b7   : >> { %v2639_v29 = vsel %vm999_vm4, %v2636_v58, %v2638_v31  ;;  %v2642_v35 = vsel %vm999_vm4, %v2640_v13, %v2641_v45  ;;  %v2646_v6 = vrot.slane %v2586_v32, 5  ;;  %v2648_v33 = vrot.slane %v2587_v27, 5  ;;  %v12808_v13 = vld [vmem:[#allocation37_spill] sm:$0xff] }
 0x1b8   : >> { %v2644_v3 = vsel %vm999_vm4, %v2641_v45, %v2643_v62  ;;  %v2650_v52 = vrot.slane %v2588_v59, 5  ;;  %v2651_v10 = vrot.slane %v2589_v39, 5  ;;  %v2653_v42 = vrot.slane %v2590_v22, 5  ;;  %v12810_v62 = vld [vmem:[#allocation39_spill] sm:$0xff] }
 0x1b9   : >> { %v2647_v34 = vsel %vm999_vm4, %v2645_v53, %v2646_v6  ;;  %v2649_v1 = vsel %vm999_vm4, %v2646_v6, %v2648_v33  ;;  %v8901_v12 = vadd.f32 %v2617_v61, %v8789_v0  ;;  %v8904_v26 = vadd.f32 %v2619_v40, %v8792_v56  ;;  %v12812_v6 = vld [vmem:[#allocation27_spill] sm:$0xff] }
 0x1ba   : >> { %v2652_v46 = vsel %vm999_vm4, %v2650_v52, %v2651_v10  ;;  %v2654_v5 = vsel %vm999_vm4, %v2651_v10, %v2653_v42  ;;  %v8909_v16 = vadd.f32 %v2622_v4, %v8797_v38  ;;  %v8912_v32 = vadd.f32 %v2624_v60, %v8800_v41 }
 0x1bb   : >> { %v8915_v22 = vadd.f32 %v2627_v18, %v8803_v55  ;;  %v8918_v27 = vadd.f32 %v2629_v47, %v8806_v30  ;;  %v8921_v0 = vadd.f32 %v2632_v49, %v8809_v51  ;;  %v8924_v56 = vadd.f32 %v2634_v48, %v8812_v57  ;;  %v12805_v47 = vld [vmem:[#allocation23_spill] sm:$0xff]  ;;  %v12807_v49 = vld [vmem:[#allocation29_spill] sm:$0xff] }
 0x1bc   : >> { %v8927_v61 = vadd.f32 %v2637_v14, %v8815_v25  ;;  %v8930_v38 = vadd.f32 %v2639_v29, %v8818_v54  ;;  %v8933_v41 = vadd.f32 %v2642_v35, %v8821_v37  ;;  %v8936_v55 = vadd.f32 %v2644_v3, %v8824_v2  ;;  %v12797_v54 = vld [vmem:[#allocation31_spill] sm:$0xff]  ;;  %v12811_v29 = vld [vmem:[#allocation32_spill] sm:$0xff] }
 0x1bd   : >> { %v8939_v30 = vadd.f32 %v2647_v34, %v8827_v21  ;;  %v8942_v51 = vadd.f32 %v2649_v1, %v8830_v24  ;;  %v8945_v57 = vadd.f32 %v2652_v46, %v8833_v20  ;;  %v8948_v25 = vadd.f32 %v2654_v5, %v8836_v43  ;;  %v12809_v48 = vld [vmem:[#allocation35_spill] sm:$0xff] }
 0x1be   : >> { %v2691_v4 = vmul.f32 %v8233_v15, %v12797_v54  ;;  %v2692_v37 = vmul.f32 %v8240_v19, %v12797_v54  ;;  %v2693_v2 = vmul.f32 %v8343_v23, %v12797_v54  ;;  %v2694_v21 = vmul.f32 %v8243_v8, %v12797_v54  ;;  %v12798_v19 = vld [vmem:[#allocation28_spill] sm:$0xff]  ;;  %v12799_v23 = vld [vmem:[#allocation18_spill] sm:$0xff]  ;;  %v12800_v8 = vld [vmem:[#allocation17_spill] sm:$0xff] }
 0x1bf   : >> { %v2695_v24 = vmul.f32 %v8246_v50, %v12797_v54  ;;  %v2696_v20 = vmul.f32 %v8354_v9, %v12797_v54  ;;  %v2697_v43 = vmul.f32 %v8253_v63, %v12797_v54  ;;  %v2698_v15 = vmul.f32 %v12733_v7, %v12797_v54  ;;  %v12801_v50 = vld [vmem:[#allocation38_spill] sm:$0xff]  ;;  %v12802_v9 = vld [vmem:[#allocation19_spill] sm:$0xff]  ;;  %v12803_v63 = vld [vmem:[#allocation20_spill] sm:$0xff] }
 0x1c0   : >> { %v2699_v40 = vmul.f32 %v12798_v19, %v12797_v54  ;;  %v2700_v17 = vmul.f32 %v12799_v23, %v12797_v54  ;;  %v2701_v59 = vmul.f32 %v12800_v8, %v12797_v54  ;;  %v2702_v60 = vmul.f32 %v12801_v50, %v12797_v54  ;;  %v12804_v7 = vld [vmem:[#allocation36_spill] sm:$0xff] }
 0x1c1   : >> { %v2703_v39 = vmul.f32 %v12802_v9, %v12797_v54  ;;  %v2704_v18 = vmul.f32 %v12803_v63, %v12797_v54  ;;  %v2705_v36 = vmul.f32 %v12804_v7, %v12797_v54  ;;  %v2706_v11 = vmul.f32 %v12805_v47, %v12797_v54 }
 0x1c2   : >> { %v2707_v58 = vmul.f32 %v12806_v28, %v12797_v54  ;;  %v2708_v31 = vmul.f32 %v12807_v49, %v12797_v54  ;;  %v2709_v45 = vmul.f32 %v12808_v13, %v12797_v54  ;;  %v2710_v14 = vmul.f32 %v12809_v48, %v12797_v54 }
 0x1c3   : >> { %v2711_v53 = vmul.f32 %v12810_v62, %v12797_v54  ;;  %v2712_v35 = vmul.f32 %v12811_v29, %v12797_v54  ;;  %v2713_v33 = vmul.f32 %v12812_v6, %v12797_v54  ;;  %v2714_v3 = vmul.f32 %v8404_v44, %v12797_v54  ;;  %v9022_v6 = vld [vmem:[%s6650_s17 + $0x50] sm:$0xff] }
 0x1c4   : >> { %v2739_v52 = vrot.slane %v2691_v4, 6  ;;  %v2740_v10 = vrot.slane %v2692_v37, 6  ;;  %v2742_v42 = vrot.slane %v2693_v2, 6  ;;  %v2744_v34 = vrot.slane %v2694_v21, 6 }
 0x1c5   : >> { %v2745_v1 = vrot.slane %v2695_v24, 6  ;;  %v2747_v46 = vrot.slane %v2696_v20, 6  ;;  %v2749_v5 = vrot.slane %v2697_v43, 6  ;;  %v2750_v19 = vrot.slane %v2698_v15, 6 }
 0x1c6   : >> { %v2741_v23 = vsel %vm1124_vm5, %v2739_v52, %v2740_v10  ;;  %v2743_v8 = vsel %vm1124_vm5, %v2740_v10, %v2742_v42  ;;  %v2752_v50 = vrot.slane %v2699_v40, 6  ;;  %v2754_v9 = vrot.slane %v2700_v17, 6  ;;  %v9035_v10 = vld [vmem:[%s6650_s17 + $0x78] sm:$0xff]  ;;  %v9041_v42 = vld [vmem:[%s6650_s17 + $0x90] sm:$0xff] }
 0x1c7   : >> { %v2746_v63 = vsel %vm1124_vm5, %v2744_v34, %v2745_v1  ;;  %v2748_v7 = vsel %vm1124_vm5, %v2745_v1, %v2747_v46  ;;  %v2751_v44 = vsel %vm1124_vm5, %v2749_v5, %v2750_v19  ;;  %v2755_v54 = vrot.slane %v2701_v59, 6  ;;  %12814 = vst [vmem:[#allocation30_spill] sm:$0xff] %v9041_v42  ;;  %v9051_v1 = vld [vmem:[%s6650_s17 + $0xa8] sm:$0xff]  ;;  %v9054_v46 = vld [vmem:[%s6650_s17 + $0xb0] sm:$0xff] }
 0x1c8   : >> { %v2753_v4 = vsel %vm1124_vm5, %v2750_v19, %v2752_v50  ;;  %v2757_v37 = vrot.slane %v2702_v60, 6  ;;  %v2759_v2 = vrot.slane %v2703_v39, 6  ;;  %v2760_v21 = vrot.slane %v2704_v18, 6  ;;  %12816 = vst [vmem:[#allocation25_spill] sm:$0xff] %v9051_v1  ;;  %12817 = vst [vmem:[#allocation31_spill] sm:$0xff] %v9054_v46  ;;  %v9073_v50 = vld [vmem:[%s6650_s17 + $0xf0] sm:$0xff] }
 0x1c9   : >> { %v2756_v24 = vsel %vm1124_vm5, %v2754_v9, %v2755_v54  ;;  %v2762_v20 = vrot.slane %v2705_v36, 6  ;;  %v2764_v43 = vrot.slane %v2706_v11, 6  ;;  %v2765_v15 = vrot.slane %v2707_v58, 6  ;;  %12822 = vst [vmem:[#allocation19_spill] sm:$0xff] %v9073_v50  ;;  %v9076_v9 = vld [vmem:[%s6650_s17 + $0xf8] sm:$0xff] }
 0x1ca   : >> { %v2758_v40 = vsel %vm1124_vm5, %v2755_v54, %v2757_v37  ;;  %v2761_v17 = vsel %vm1124_vm5, %v2759_v2, %v2760_v21  ;;  %v2767_v47 = vrot.slane %v2708_v31, 6  ;;  %v2769_v28 = vrot.slane %v2709_v45, 6  ;;  %12823 = vst [vmem:[#allocation20_spill] sm:$0xff] %v9076_v9 }
 0x1cb   : >> { %v2763_v49 = vsel %vm1124_vm5, %v2760_v21, %v2762_v20  ;;  %v2766_v59 = vsel %vm1124_vm5, %v2764_v43, %v2765_v15  ;;  %v2770_v60 = vrot.slane %v2710_v14, 6  ;;  %v2772_v39 = vrot.slane %v2711_v53, 6  ;;  %v9015_v14 = vld [vmem:[%s6650_s17 + $0x48] sm:$0xff] }
 0x1cc   : >> { %v2768_v18 = vsel %vm1124_vm5, %v2765_v15, %v2767_v47  ;;  %v2774_v36 = vrot.slane %v2712_v35, 6  ;;  %v2775_v11 = vrot.slane %v2713_v33, 6  ;;  %v2777_v58 = vrot.slane %v2714_v3, 6  ;;  %v9025_v33 = vld [vmem:[%s6650_s17 + $0x60] sm:$0xff] }
 0x1cd   : >> { %v2771_v13 = vsel %vm1124_vm5, %v2769_v28, %v2770_v60  ;;  %v2773_v31 = vsel %vm1124_vm5, %v2770_v60, %v2772_v39  ;;  %v2795_v45 = vadd.f32 %v2741_v23, %v8901_v12  ;;  %v2796_v48 = vadd.f32 %v2743_v8, %v8904_v26  ;;  %v9028_v12 = vld [vmem:[%s6650_s17 + $0x68] sm:$0xff]  ;;  %v9061_v8 = vld [vmem:[%s6650_s17 + $0xc0] sm:$0xff] }
 0x1ce   : >> { %v2776_v62 = vsel %vm1124_vm5, %v2774_v36, %v2775_v11  ;;  %v2778_v53 = vsel %vm1124_vm5, %v2775_v11, %v2777_v58  ;;  %v2797_v29 = vadd.f32 %v2746_v63, %v8909_v16  ;;  %v2798_v35 = vadd.f32 %v2748_v7, %v8912_v32  ;;  %v9038_v32 = vld [vmem:[%s6650_s17 + $0x80] sm:$0xff]  ;;  %12818 = vst [vmem:[#allocation28_spill] sm:$0xff] %v9061_v8  ;;  %v12824_v63 = vld [vmem:[#allocation26_spill] sm:$0xff] }
 0x1cf   : >> { %v2799_v26 = vadd.f32 %v2751_v44, %v8915_v22  ;;  %v2800_v3 = vadd.f32 %v2753_v4, %v8918_v27  ;;  %v2801_v52 = vadd.f32 %v2756_v24, %v8921_v0  ;;  %v2802_v16 = vadd.f32 %v2758_v40, %v8924_v56  ;;  %12813 = vst [vmem:[#allocation33_spill] sm:$0xff] %v9038_v32  ;;  %v9048_v56 = vld [vmem:[%s6650_s17 + $0x98] sm:$0xff] }
 0x1d0   : >> { %v2803_v34 = vadd.f32 %v2761_v17, %v8927_v61  ;;  %v2804_v22 = vadd.f32 %v2763_v49, %v8930_v38  ;;  %v2805_v27 = vadd.f32 %v2766_v59, %v8933_v41  ;;  %v2806_v0 = vadd.f32 %v2768_v18, %v8936_v55  ;;  %12815 = vst [vmem:[#allocation34_spill] sm:$0xff] %v9048_v56  ;;  %v9064_v38 = vld [vmem:[%s6650_s17 + $0xc8] sm:$0xff]  ;;  %v9067_v41 = vld [vmem:[%s6650_s17 + $0xd8] sm:$0xff]  ;;  %v9070_v55 = vld [vmem:[%s6650_s17 + $0xe0] sm:$0xff] }
 0x1d1   : >> { %v2807_v5 = vadd.f32 %v2771_v13, %v8939_v30  ;;  %v2808_v19 = vadd.f32 %v2773_v31, %v8942_v51  ;;  %v2809_v23 = vadd.f32 %v2776_v62, %v8945_v57  ;;  %v2810_v61 = vadd.f32 %v2778_v53, %v8948_v25  ;;  %12819 = vst [vmem:[#allocation18_spill] sm:$0xff] %v9064_v38  ;;  %v9135_v31 = vld [vmem:[%s6650_s17 + $0x58] sm:$0x3f] }
 0x1d2   : >> { %12820 = vst [vmem:[#allocation17_spill] sm:$0xff] %v9067_v41  ;;  %12821 = vst [vmem:[#allocation38_spill] sm:$0xff] %v9070_v55  ;;  %v2842_v30 = vmul.f32 %v9015_v14, %v12824_v63  ;;  %v2843_v51 = vmul.f32 %v9022_v6, %v12824_v63  ;;  %v2844_v57 = vmul.f32 %v9025_v33, %v12824_v63 }
 0x1d3   : >> { %v2845_v25 = vmul.f32 %v9028_v12, %v12824_v63  ;;  %v2846_v7 = vmul.f32 %v9035_v10, %v12824_v63  ;;  %v2847_v44 = vmul.f32 %v9038_v32, %v12824_v63  ;;  %v2848_v54 = vmul.f32 %v9041_v42, %v12824_v63 }
 0x1d4   : >> { %v2849_v4 = vmul.f32 %v9048_v56, %v12824_v63  ;;  %v2850_v37 = vmul.f32 %v9051_v1, %v12824_v63  ;;  %v2851_v2 = vmul.f32 %v9054_v46, %v12824_v63  ;;  %v2852_v21 = vmul.f32 %v9061_v8, %v12824_v63 }
 0x1d5   : >> { %v2853_v24 = vmul.f32 %v9064_v38, %v12824_v63  ;;  %v2854_v20 = vmul.f32 %v9067_v41, %v12824_v63  ;;  %v2855_v43 = vmul.f32 %v9070_v55, %v12824_v63  ;;  %v2856_v15 = vmul.f32 %v9073_v50, %v12824_v63 }
 0x1d6   : >> { %v2857_v40 = vmul.f32 %v9076_v9, %v12824_v63  ;;  %v9110_v17 = vadd.f32 %v2842_v30, %v2795_v45  ;;  %v9112_v47 = vadd.f32 %v2843_v51, %v2796_v48  ;;  %v9114_v28 = vadd.f32 %v2844_v57, %v2797_v29  ;;  %v9146_v29 = vld [vmem:[%s6650_s17 + $0x70] sm:$0x3f]  ;;  %v12837_v30 = vld [vmem:[#allocation14_spill] sm:$0xff] }
 0x1d7   : >> { %v9116_v49 = vadd.f32 %v2845_v25, %v2798_v35  ;;  %v9118_v59 = vadd.f32 %v2846_v7, %v2799_v26  ;;  %v9120_v60 = vadd.f32 %v2847_v44, %v2800_v3  ;;  %v9122_v39 = vadd.f32 %v2848_v54, %v2801_v52  ;;  %v12825_v35 = vld [vmem:[#allocation21_spill] sm:$0xff]  ;;  %v12827_v52 = vld [vmem:[#allocation22_spill] sm:$0xff]  ;;  %v12839_v57 = vld [vmem:[#allocation15_spill] sm:$0xff] }
 0x1d8   : >> { %v9124_v18 = vadd.f32 %v2849_v4, %v2802_v16  ;;  %v9126_v36 = vadd.f32 %v2850_v37, %v2803_v34  ;;  %v9128_v11 = vadd.f32 %v2851_v2, %v2804_v22  ;;  %v9130_v58 = vadd.f32 %v2852_v21, %v2805_v27  ;;  %v12826_v26 = vld [vmem:[#allocation5_spill] sm:$0xff]  ;;  %v12828_v34 = vld [vmem:[#allocation11_spill] sm:$0xff]  ;;  %v12829_v22 = vld [vmem:[#allocation6_spill] sm:$0xff] }
 0x1d9   : >> { %v9132_v13 = vadd.f32 %v2853_v24, %v2806_v0  ;;  %v9137_v45 = vadd.f32 %v2854_v20, %v2807_v5  ;;  %v9139_v48 = vadd.f32 %v2855_v43, %v2808_v19  ;;  %v9141_v62 = vadd.f32 %v2856_v15, %v2809_v23  ;;  %v12831_v0 = vld [vmem:[#allocation12_spill] sm:$0xff]  ;;  %v9163_v19 = vld [vmem:[%s6650_s17 + $0x88] sm:$0x3f]  ;;  %v9166_v23 = vld [vmem:[%s6650_s17 + $0xa0] sm:$0x3f] }
 0x1da   : >> { %v9143_v53 = vadd.f32 %v2857_v40, %v2810_v61  ;;  %v2877_v3 = vrot.slane %v12826_v26, %v12825_v35  ;;  %v9152_v16 = vrot.slane %v12826_v26, %v12827_v52  ;;  %v9156_v27 = vrot.slane %v12829_v22, %v12828_v34  ;;  %12833 = vst [vmem:[#allocation24_spill] sm:$0xff] %v9163_v19  ;;  %v12835_v61 = vld [vmem:[#allocation13_spill] sm:$0xff]  ;;  %v12841_v7 = vld [vmem:[#allocation16_spill] sm:$0xff]  ;;  %v9192_v24 = vld [vmem:[%s6650_s17 + $0xd0] sm:$0x3f] }
 0x1db   : >> { %v9160_v5 = vrot.slane %v12829_v22, %v12831_v0  ;;  %12834 = vst [vmem:[#allocation29_spill] sm:$0xff] %v9166_v23  ;;  %v9170_v63 = vrot.slane %v12829_v22, %v12835_v61  ;;  %v9174_v51 = vrot.slane %v12829_v22, %v12837_v30  ;;  %v9178_v25 = vrot.slane %v12829_v22, %v12839_v57  ;;  %v9185_v54 = vld [vmem:[%s6650_s17 + $0xb8] sm:$0x3f]  ;;  %v9199_v26 = vld [vmem:[%s6650_s17 + $0xe8] sm:$0x3f] }
 0x1dc   : >> { %12830 = vst [vmem:[#allocation36_spill] sm:$0xff] %v9156_v27  ;;  %v9182_v44 = vrot.slane %v12829_v22, %v12841_v7  ;;  %12843 = vst [vmem:[#allocation27_spill] sm:$0xff] %v9185_v54  ;;  %v2878_v4 = vmul.f32 %v9015_v14, %v2877_v3  ;;  %v2879_v37 = vmul.f32 %v9022_v6, %v2877_v3  ;;  %v9202_v7 = vld [vmem:[%s6650_s17 + $0x100] sm:$0x3f] }
 0x1dd   : >> { %12832 = vst [vmem:[#allocation23_spill] sm:$0xff] %v9160_v5  ;;  %12836 = vst [vmem:[#allocation37_spill] sm:$0xff] %v9170_v63  ;;  %v2880_v2 = vmul.f32 %v9135_v31, %v2877_v3  ;;  %v2881_v21 = vmul.f32 %v9025_v33, %v2877_v3  ;;  %v2882_v20 = vmul.f32 %v9028_v12, %v2877_v3 }
 0x1de   : >> { %12838 = vst [vmem:[#allocation35_spill] sm:$0xff] %v9174_v51  ;;  %12840 = vst [vmem:[#allocation39_spill] sm:$0xff] %v9178_v25  ;;  %v2883_v43 = vmul.f32 %v9146_v29, %v2877_v3  ;;  %v2884_v15 = vmul.f32 %v9035_v10, %v2877_v3  ;;  %v2885_v40 = vmul.f32 %v9038_v32, %v2877_v3 }
 0x1df   : >> { %12842 = vst [vmem:[#allocation32_spill] sm:$0xff] %v9182_v44  ;;  %12844 = vst [vmem:[#allocation26_spill] sm:$0xff] %v9192_v24  ;;  %v2886_v57 = vmul.f32 %v9163_v19, %v2877_v3  ;;  %v2887_v30 = vmul.f32 %v9041_v42, %v2877_v3  ;;  %v2888_v61 = vmul.f32 %v9048_v56, %v2877_v3  ;;  %v2929_v56 = vrot.slane %v2880_v2, 1 }
 0x1e0   : >> { %12845 = vst [vmem:[#allocation40_spill] sm:$0xff] %v9199_v26  ;;  %v2889_v0 = vmul.f32 %v9166_v23, %v2877_v3  ;;  %v2890_v34 = vmul.f32 %v9051_v1, %v2877_v3  ;;  %v2891_v52 = vmul.f32 %v9054_v46, %v2877_v3  ;;  %v2892_v22 = vmul.f32 %v9185_v54, %v2877_v3 }
 0x1e1   : >> { %v2893_v35 = vmul.f32 %v9061_v8, %v2877_v3  ;;  %v2894_v44 = vmul.f32 %v9064_v38, %v2877_v3  ;;  %v2895_v25 = vmul.f32 %v9192_v24, %v2877_v3  ;;  %v2896_v51 = vmul.f32 %v9067_v41, %v2877_v3 }
 0x1e2   : >> { %v2897_v63 = vmul.f32 %v9070_v55, %v2877_v3  ;;  %v2898_v5 = vmul.f32 %v9199_v26, %v2877_v3  ;;  %v2899_v27 = vmul.f32 %v9073_v50, %v2877_v3  ;;  %v2900_v1 = vmul.f32 %v9076_v9, %v2877_v3 }
 0x1e3   : >> { %v2901_v46 = vmul.f32 %v9202_v7, %v2877_v3  ;;  %v2926_v23 = vrot.slane %v2878_v4, 1  ;;  %v2927_v54 = vrot.slane %v2879_v37, 1  ;;  %v2931_v8 = vrot.slane %v2881_v21, 1 }
 0x1e4   : >> { %v2932_v42 = vrot.slane %v2882_v20, 1  ;;  %v2934_v38 = vrot.slane %v2883_v43, 1  ;;  %v2936_v19 = vrot.slane %v2884_v15, 1  ;;  %v2937_v24 = vrot.slane %v2885_v40, 1 }
 0x1e5   : >> { %v2928_v41 = vsel %vm499_vm0, %v2926_v23, %v2927_v54  ;;  %v2930_v55 = vsel %vm499_vm0, %v2927_v54, %v2929_v56  ;;  %v2939_v32 = vrot.slane %v2886_v57, 1  ;;  %v2941_v26 = vrot.slane %v2887_v30, 1  ;;  %v12848_v54 = vld [vmem:[#allocation30_spill] sm:$0xff] }
 0x1e6   : >> { %v2933_v50 = vsel %vm499_vm0, %v2931_v8, %v2932_v42  ;;  %v2935_v9 = vsel %vm499_vm0, %v2932_v42, %v2934_v38  ;;  %v2938_v3 = vsel %vm499_vm0, %v2936_v19, %v2937_v24  ;;  %v2942_v4 = vrot.slane %v2888_v61, 1 }
 0x1e7   : >> { %v2940_v37 = vsel %vm499_vm0, %v2937_v24, %v2939_v32  ;;  %v2944_v2 = vrot.slane %v2889_v0, 1  ;;  %v2946_v21 = vrot.slane %v2890_v34, 1  ;;  %v2947_v20 = vrot.slane %v2891_v52, 1 }
 0x1e8   : >> { %v2943_v43 = vsel %vm499_vm0, %v2941_v26, %v2942_v4  ;;  %v2949_v15 = vrot.slane %v2892_v22, 1  ;;  %v2951_v23 = vrot.slane %v2893_v35, 1  ;;  %v2952_v40 = vrot.slane %v2894_v44, 1 }
 0x1e9   : >> { %v2945_v56 = vsel %vm499_vm0, %v2942_v4, %v2944_v2  ;;  %v2948_v30 = vsel %vm499_vm0, %v2946_v21, %v2947_v20  ;;  %v2954_v8 = vrot.slane %v2895_v25, 1  ;;  %v2956_v57 = vrot.slane %v2896_v51, 1  ;;  %v12851_v21 = vld [vmem:[#allocation25_spill] sm:$0xff] }
 0x1ea   : >> { %v2950_v42 = vsel %vm499_vm0, %v2947_v20, %v2949_v15  ;;  %v2953_v38 = vsel %vm499_vm0, %v2951_v23, %v2952_v40  ;;  %v2957_v19 = vrot.slane %v2897_v63, 1  ;;  %v2959_v32 = vrot.slane %v2898_v5, 1  ;;  %v12853_v23 = vld [vmem:[#allocation27_spill] sm:$0xff] }
 0x1eb   : >> { %v2955_v34 = vsel %vm499_vm0, %v2952_v40, %v2954_v8  ;;  %v2961_v52 = vrot.slane %v2899_v27, 1  ;;  %v2962_v0 = vrot.slane %v2900_v1, 1  ;;  %v2964_v26 = vrot.slane %v2901_v46, 1  ;;  %v12855_v8 = vld [vmem:[#allocation18_spill] sm:$0xff] }
 0x1ec   : >> { %v2958_v35 = vsel %vm499_vm0, %v2956_v57, %v2957_v19  ;;  %v2960_v22 = vsel %vm499_vm0, %v2957_v19, %v2959_v32  ;;  %v9235_v61 = vadd.f32 %v2928_v41, %v9110_v17  ;;  %v9238_v51 = vadd.f32 %v2930_v55, %v9112_v47  ;;  %v12857_v19 = vld [vmem:[#allocation17_spill] sm:$0xff] }
 0x1ed   : >> { %v2963_v25 = vsel %vm499_vm0, %v2961_v52, %v2962_v0  ;;  %v2965_v63 = vsel %vm499_vm0, %v2962_v0, %v2964_v26  ;;  %v9243_v5 = vadd.f32 %v2933_v50, %v9114_v28  ;;  %v9246_v1 = vadd.f32 %v2935_v9, %v9116_v49  ;;  %v12859_v0 = vld [vmem:[#allocation40_spill] sm:$0xff] }
 0x1ee   : >> { %v9249_v46 = vadd.f32 %v2938_v3, %v9118_v59  ;;  %v9252_v27 = vadd.f32 %v2940_v37, %v9120_v60  ;;  %v9255_v41 = vadd.f32 %v2943_v43, %v9122_v39  ;;  %v9258_v55 = vadd.f32 %v2945_v56, %v9124_v18  ;;  %v12849_v3 = vld [vmem:[#allocation34_spill] sm:$0xff]  ;;  %v12850_v37 = vld [vmem:[#allocation29_spill] sm:$0xff]  ;;  %v12852_v43 = vld [vmem:[#allocation31_spill] sm:$0xff] }
 0x1ef   : >> { %v9261_v17 = vadd.f32 %v2948_v30, %v9126_v36  ;;  %v9264_v50 = vadd.f32 %v2950_v42, %v9128_v11  ;;  %v9267_v9 = vadd.f32 %v2953_v38, %v9130_v58  ;;  %v9270_v47 = vadd.f32 %v2955_v34, %v9132_v13  ;;  %v12854_v56 = vld [vmem:[#allocation28_spill] sm:$0xff]  ;;  %v12856_v42 = vld [vmem:[#allocation26_spill] sm:$0xff] }
 0x1f0   : >> { %v9273_v28 = vadd.f32 %v2958_v35, %v9137_v45  ;;  %v9276_v49 = vadd.f32 %v2960_v22, %v9139_v48  ;;  %v9279_v59 = vadd.f32 %v2963_v25, %v9141_v62  ;;  %v9282_v60 = vadd.f32 %v2965_v63, %v9143_v53  ;;  %v12846_v48 = vld [vmem:[#allocation33_spill] sm:$0xff]  ;;  %v12847_v53 = vld [vmem:[#allocation24_spill] sm:$0xff]  ;;  %v12858_v34 = vld [vmem:[#allocation38_spill] sm:$0xff] }
 0x1f1   : >> { %v3002_v39 = vmul.f32 %v9015_v14, %v9152_v16  ;;  %v3003_v18 = vmul.f32 %v9022_v6, %v9152_v16  ;;  %v3004_v36 = vmul.f32 %v9135_v31, %v9152_v16  ;;  %v3005_v11 = vmul.f32 %v9025_v33, %v9152_v16  ;;  %v12860_v35 = vld [vmem:[#allocation19_spill] sm:$0xff]  ;;  %v12861_v25 = vld [vmem:[#allocation20_spill] sm:$0xff] }
 0x1f2   : >> { %v3006_v58 = vmul.f32 %v9028_v12, %v9152_v16  ;;  %v3007_v13 = vmul.f32 %v9146_v29, %v9152_v16  ;;  %v3008_v45 = vmul.f32 %v9035_v10, %v9152_v16  ;;  %v3009_v62 = vmul.f32 %v12846_v48, %v9152_v16 }
 0x1f3   : >> { %v3010_v44 = vmul.f32 %v12847_v53, %v9152_v16  ;;  %v3011_v24 = vmul.f32 %v12848_v54, %v9152_v16  ;;  %v3012_v4 = vmul.f32 %v12849_v3, %v9152_v16  ;;  %v3013_v2 = vmul.f32 %v12850_v37, %v9152_v16 }
 0x1f4   : >> { %v3014_v20 = vmul.f32 %v12851_v21, %v9152_v16  ;;  %v3015_v15 = vmul.f32 %v12852_v43, %v9152_v16  ;;  %v3016_v40 = vmul.f32 %v12853_v23, %v9152_v16  ;;  %v3017_v30 = vmul.f32 %v12854_v56, %v9152_v16 }
 0x1f5   : >> { %v3018_v57 = vmul.f32 %v12855_v8, %v9152_v16  ;;  %v3019_v38 = vmul.f32 %v12856_v42, %v9152_v16  ;;  %v3020_v32 = vmul.f32 %v12857_v19, %v9152_v16  ;;  %v3021_v52 = vmul.f32 %v12858_v34, %v9152_v16 }
 0x1f6   : >> { %v3022_v26 = vmul.f32 %v12859_v0, %v9152_v16  ;;  %v3023_v22 = vmul.f32 %v12860_v35, %v9152_v16  ;;  %v3024_v63 = vmul.f32 %v12861_v25, %v9152_v16  ;;  %v3025_v8 = vmul.f32 %v9202_v7, %v9152_v16 }
 0x1f7   : >> { %v3050_v56 = vrot.slane %v3002_v39, 2  ;;  %v3051_v42 = vrot.slane %v3003_v18, 2  ;;  %v3053_v23 = vrot.slane %v3004_v36, 2  ;;  %v3055_v43 = vrot.slane %v3005_v11, 2 }
 0x1f8   : >> { %v3056_v19 = vrot.slane %v3006_v58, 2  ;;  %v3058_v21 = vrot.slane %v3007_v13, 2  ;;  %v3060_v37 = vrot.slane %v3008_v45, 2  ;;  %v3061_v34 = vrot.slane %v3009_v62, 2 }
 0x1f9   : >> { %v3052_v3 = vsel %vm624_vm1, %v3050_v56, %v3051_v42  ;;  %v3054_v0 = vsel %vm624_vm1, %v3051_v42, %v3053_v23  ;;  %v3063_v54 = vrot.slane %v3010_v44, 2  ;;  %v3065_v35 = vrot.slane %v3011_v24, 2 }
 0x1fa   : >> { %v3057_v53 = vsel %vm624_vm1, %v3055_v43, %v3056_v19  ;;  %v3059_v25 = vsel %vm624_vm1, %v3056_v19, %v3058_v21  ;;  %v3062_v16 = vsel %vm624_vm1, %v3060_v37, %v3061_v34  ;;  %v3066_v39 = vrot.slane %v3012_v4, 2 }
 0x1fb   : >> { %v3064_v18 = vsel %vm624_vm1, %v3061_v34, %v3063_v54  ;;  %v3068_v36 = vrot.slane %v3013_v2, 2  ;;  %v3070_v11 = vrot.slane %v3014_v20, 2  ;;  %v3071_v58 = vrot.slane %v3015_v15, 2 }
 0x1fc   : >> { %v3067_v13 = vsel %vm624_vm1, %v3065_v35, %v3066_v39  ;;  %v3073_v45 = vrot.slane %v3016_v40, 2  ;;  %v3075_v62 = vrot.slane %v3017_v30, 2  ;;  %v3076_v56 = vrot.slane %v3018_v57, 2  ;;  %v12863_v35 = vld [vmem:[#allocation24_spill] sm:$0xff] }
 0x1fd   : >> { %v3069_v44 = vsel %vm624_vm1, %v3066_v39, %v3068_v36  ;;  %v3072_v24 = vsel %vm624_vm1, %v3070_v11, %v3071_v58  ;;  %v3078_v43 = vrot.slane %v3019_v38, 2  ;;  %v3080_v23 = vrot.slane %v3020_v32, 2  ;;  %v12867_v11 = vld [vmem:[#allocation25_spill] sm:$0xff] }
 0x1fe   : >> { %v3074_v21 = vsel %vm624_vm1, %v3071_v58, %v3073_v45  ;;  %v3077_v4 = vsel %vm624_vm1, %v3075_v62, %v3076_v56  ;;  %v3081_v37 = vrot.slane %v3021_v52, 2  ;;  %v3083_v54 = vrot.slane %v3022_v26, 2  ;;  %v12869_v62 = vld [vmem:[#allocation27_spill] sm:$0xff] }
 0x1ff   : >> { %v3079_v2 = vsel %vm624_vm1, %v3076_v56, %v3078_v43  ;;  %v3085_v20 = vrot.slane %v3023_v22, 2  ;;  %v3086_v15 = vrot.slane %v3024_v63, 2  ;;  %v3088_v42 = vrot.slane %v3025_v8, 2  ;;  %v12871_v43 = vld [vmem:[#allocation18_spill] sm:$0xff] }
 0x200   : >> { %v3082_v40 = vsel %vm624_vm1, %v3080_v23, %v3081_v37  ;;  %v3084_v30 = vsel %vm624_vm1, %v3081_v37, %v3083_v54  ;;  %v9347_v57 = vadd.f32 %v3052_v3, %v9235_v61  ;;  %v9350_v38 = vadd.f32 %v3054_v0, %v9238_v51  ;;  %v12873_v37 = vld [vmem:[#allocation17_spill] sm:$0xff] }
 0x201   : >> { %v3087_v19 = vsel %vm624_vm1, %v3085_v20, %v3086_v15  ;;  %v3089_v32 = vsel %vm624_vm1, %v3086_v15, %v3088_v42  ;;  %v9355_v34 = vadd.f32 %v3057_v53, %v9243_v5  ;;  %v9358_v52 = vadd.f32 %v3059_v25, %v9246_v1  ;;  %v12864_v25 = vld [vmem:[#allocation30_spill] sm:$0xff]  ;;  %v12875_v15 = vld [vmem:[#allocation40_spill] sm:$0xff] }
 0x202   : >> { %v9361_v8 = vadd.f32 %v3062_v16, %v9249_v46  ;;  %v9364_v26 = vadd.f32 %v3064_v18, %v9252_v27  ;;  %v9367_v61 = vadd.f32 %v3067_v13, %v9255_v41  ;;  %v9370_v51 = vadd.f32 %v3069_v44, %v9258_v55  ;;  %v12865_v16 = vld [vmem:[#allocation34_spill] sm:$0xff]  ;;  %v12866_v18 = vld [vmem:[#allocation29_spill] sm:$0xff]  ;;  %v12868_v13 = vld [vmem:[#allocation31_spill] sm:$0xff] }
 0x203   : >> { %v9373_v3 = vadd.f32 %v3072_v24, %v9261_v17  ;;  %v9376_v5 = vadd.f32 %v3074_v21, %v9264_v50  ;;  %v9379_v1 = vadd.f32 %v3077_v4, %v9267_v9  ;;  %v9382_v46 = vadd.f32 %v3079_v2, %v9270_v47  ;;  %v12862_v50 = vld [vmem:[#allocation36_spill] sm:$0xff]  ;;  %v12872_v21 = vld [vmem:[#allocation26_spill] sm:$0xff] }
 0x204   : >> { %v9385_v27 = vadd.f32 %v3082_v40, %v9273_v28  ;;  %v9388_v41 = vadd.f32 %v3084_v30, %v9276_v49  ;;  %v9391_v55 = vadd.f32 %v3087_v19, %v9279_v59  ;;  %v9394_v17 = vadd.f32 %v3089_v32, %v9282_v60  ;;  %v12870_v44 = vld [vmem:[#allocation28_spill] sm:$0xff]  ;;  %v12874_v2 = vld [vmem:[#allocation38_spill] sm:$0xff]  ;;  %v12876_v40 = vld [vmem:[#allocation19_spill] sm:$0xff] }
 0x205   : >> { %v3126_v53 = vmul.f32 %v9015_v14, %v12862_v50  ;;  %v3127_v9 = vmul.f32 %v9022_v6, %v12862_v50  ;;  %v3128_v47 = vmul.f32 %v9135_v31, %v12862_v50  ;;  %v3129_v28 = vmul.f32 %v9025_v33, %v12862_v50  ;;  %v12877_v19 = vld [vmem:[#allocation20_spill] sm:$0xff] }
 0x206   : >> { %v3130_v49 = vmul.f32 %v9028_v12, %v12862_v50  ;;  %v3131_v59 = vmul.f32 %v9146_v29, %v12862_v50  ;;  %v3132_v60 = vmul.f32 %v9035_v10, %v12862_v50  ;;  %v3133_v0 = vmul.f32 %v12846_v48, %v12862_v50 }
 0x207   : >> { %v3134_v22 = vmul.f32 %v12863_v35, %v12862_v50  ;;  %v3135_v63 = vmul.f32 %v12864_v25, %v12862_v50  ;;  %v3136_v39 = vmul.f32 %v12865_v16, %v12862_v50  ;;  %v3137_v36 = vmul.f32 %v12866_v18, %v12862_v50 }
 0x208   : >> { %v3138_v58 = vmul.f32 %v12867_v11, %v12862_v50  ;;  %v3139_v45 = vmul.f32 %v12868_v13, %v12862_v50  ;;  %v3140_v56 = vmul.f32 %v12869_v62, %v12862_v50  ;;  %v3141_v24 = vmul.f32 %v12870_v44, %v12862_v50 }
 0x209   : >> { %v3142_v23 = vmul.f32 %v12871_v43, %v12862_v50  ;;  %v3143_v4 = vmul.f32 %v12872_v21, %v12862_v50  ;;  %v3144_v54 = vmul.f32 %v12873_v37, %v12862_v50  ;;  %v3145_v20 = vmul.f32 %v12874_v2, %v12862_v50 }
 0x20a   : >> { %v3146_v42 = vmul.f32 %v12875_v15, %v12862_v50  ;;  %v3147_v30 = vmul.f32 %v12876_v40, %v12862_v50  ;;  %v3148_v32 = vmul.f32 %v12877_v19, %v12862_v50  ;;  %v3149_v43 = vmul.f32 %v9202_v7, %v12862_v50 }
 0x20b   : >> { %v3174_v44 = vrot.slane %v3126_v53, 3  ;;  %v3175_v21 = vrot.slane %v3127_v9, 3  ;;  %v3177_v62 = vrot.slane %v3128_v47, 3  ;;  %v3179_v13 = vrot.slane %v3129_v28, 3 }
 0x20c   : >> { %v3180_v37 = vrot.slane %v3130_v49, 3  ;;  %v3182_v11 = vrot.slane %v3131_v59, 3  ;;  %v3184_v18 = vrot.slane %v3132_v60, 3  ;;  %v3185_v2 = vrot.slane %v3133_v0, 3 }
 0x20d   : >> { %v3176_v16 = vsel %vm749_vm2, %v3174_v44, %v3175_v21  ;;  %v3178_v15 = vsel %vm749_vm2, %v3175_v21, %v3177_v62  ;;  %v3187_v25 = vrot.slane %v3134_v22, 3  ;;  %v3189_v40 = vrot.slane %v3135_v63, 3 }
 0x20e   : >> { %v3181_v35 = vsel %vm749_vm2, %v3179_v13, %v3180_v37  ;;  %v3183_v19 = vsel %vm749_vm2, %v3180_v37, %v3182_v11  ;;  %v3186_v50 = vsel %vm749_vm2, %v3184_v18, %v3185_v2  ;;  %v3190_v53 = vrot.slane %v3136_v39, 3 }
 0x20f   : >> { %v3188_v9 = vsel %vm749_vm2, %v3185_v2, %v3187_v25  ;;  %v3192_v47 = vrot.slane %v3137_v36, 3  ;;  %v3194_v28 = vrot.slane %v3138_v58, 3  ;;  %v3195_v49 = vrot.slane %v3139_v45, 3 }
 0x210   : >> { %v3191_v59 = vsel %vm749_vm2, %v3189_v40, %v3190_v53  ;;  %v3197_v60 = vrot.slane %v3140_v56, 3  ;;  %v3199_v0 = vrot.slane %v3141_v24, 3  ;;  %v3200_v44 = vrot.slane %v3142_v23, 3  ;;  %v12879_v40 = vld [vmem:[#allocation24_spill] sm:$0xff] }
 0x211   : >> { %v3193_v22 = vsel %vm749_vm2, %v3190_v53, %v3192_v47  ;;  %v3196_v63 = vsel %vm749_vm2, %v3194_v28, %v3195_v49  ;;  %v3202_v13 = vrot.slane %v3143_v4, 3  ;;  %v3204_v62 = vrot.slane %v3144_v54, 3  ;;  %v12883_v28 = vld [vmem:[#allocation25_spill] sm:$0xff] }
 0x212   : >> { %v3198_v11 = vsel %vm749_vm2, %v3195_v49, %v3197_v60  ;;  %v3201_v39 = vsel %vm749_vm2, %v3199_v0, %v3200_v44  ;;  %v3205_v18 = vrot.slane %v3145_v20, 3  ;;  %v3207_v25 = vrot.slane %v3146_v42, 3  ;;  %v12885_v0 = vld [vmem:[#allocation27_spill] sm:$0xff] }
 0x213   : >> { %v3203_v36 = vsel %vm749_vm2, %v3200_v44, %v3202_v13  ;;  %v3209_v58 = vrot.slane %v3147_v30, 3  ;;  %v3210_v45 = vrot.slane %v3148_v32, 3  ;;  %v3212_v21 = vrot.slane %v3149_v43, 3  ;;  %v12887_v13 = vld [vmem:[#allocation18_spill] sm:$0xff] }
 0x214   : >> { %v3206_v56 = vsel %vm749_vm2, %v3204_v62, %v3205_v18  ;;  %v3208_v24 = vsel %vm749_vm2, %v3205_v18, %v3207_v25  ;;  %v9459_v23 = vadd.f32 %v3176_v16, %v9347_v57  ;;  %v9462_v4 = vadd.f32 %v3178_v15, %v9350_v38  ;;  %v12889_v18 = vld [vmem:[#allocation17_spill] sm:$0xff] }
 0x215   : >> { %v3211_v37 = vsel %vm749_vm2, %v3209_v58, %v3210_v45  ;;  %v3213_v54 = vsel %vm749_vm2, %v3210_v45, %v3212_v21  ;;  %v9467_v2 = vadd.f32 %v3181_v35, %v9355_v34  ;;  %v9470_v20 = vadd.f32 %v3183_v19, %v9358_v52  ;;  %v12880_v19 = vld [vmem:[#allocation30_spill] sm:$0xff]  ;;  %v12891_v45 = vld [vmem:[#allocation40_spill] sm:$0xff] }
 0x216   : >> { %v9473_v43 = vadd.f32 %v3186_v50, %v9361_v8  ;;  %v9476_v42 = vadd.f32 %v3188_v9, %v9364_v26  ;;  %v9479_v57 = vadd.f32 %v3191_v59, %v9367_v61  ;;  %v9482_v38 = vadd.f32 %v3193_v22, %v9370_v51  ;;  %v12881_v50 = vld [vmem:[#allocation34_spill] sm:$0xff]  ;;  %v12882_v9 = vld [vmem:[#allocation29_spill] sm:$0xff]  ;;  %v12884_v59 = vld [vmem:[#allocation31_spill] sm:$0xff] }
 0x217   : >> { %v9485_v16 = vadd.f32 %v3196_v63, %v9373_v3  ;;  %v9488_v34 = vadd.f32 %v3198_v11, %v9376_v5  ;;  %v9491_v52 = vadd.f32 %v3201_v39, %v9379_v1  ;;  %v9494_v8 = vadd.f32 %v3203_v36, %v9382_v46  ;;  %v12878_v5 = vld [vmem:[#allocation23_spill] sm:$0xff]  ;;  %v12886_v22 = vld [vmem:[#allocation28_spill] sm:$0xff]  ;;  %v12888_v11 = vld [vmem:[#allocation26_spill] sm:$0xff] }
 0x218   : >> { %v9497_v26 = vadd.f32 %v3206_v56, %v9385_v27  ;;  %v9500_v61 = vadd.f32 %v3208_v24, %v9388_v41  ;;  %v9503_v51 = vadd.f32 %v3211_v37, %v9391_v55  ;;  %v9506_v3 = vadd.f32 %v3213_v54, %v9394_v17  ;;  %v12890_v36 = vld [vmem:[#allocation38_spill] sm:$0xff]  ;;  %v12892_v56 = vld [vmem:[#allocation19_spill] sm:$0xff]  ;;  %v12893_v37 = vld [vmem:[#allocation20_spill] sm:$0xff] }
 0x219   : >> { %v3250_v35 = vmul.f32 %v9015_v14, %v12878_v5  ;;  %v3251_v1 = vmul.f32 %v9022_v6, %v12878_v5  ;;  %v3252_v46 = vmul.f32 %v9135_v31, %v12878_v5  ;;  %v3253_v27 = vmul.f32 %v9025_v33, %v12878_v5 }
 0x21a   : >> { %v3254_v41 = vmul.f32 %v9028_v12, %v12878_v5  ;;  %v3255_v55 = vmul.f32 %v9146_v29, %v12878_v5  ;;  %v3256_v17 = vmul.f32 %v9035_v10, %v12878_v5  ;;  %v3257_v15 = vmul.f32 %v12846_v48, %v12878_v5 }
 0x21b   : >> { %v3258_v30 = vmul.f32 %v12879_v40, %v12878_v5  ;;  %v3259_v32 = vmul.f32 %v12880_v19, %v12878_v5  ;;  %v3260_v53 = vmul.f32 %v12881_v50, %v12878_v5  ;;  %v3261_v47 = vmul.f32 %v12882_v9, %v12878_v5 }
 0x21c   : >> { %v3262_v49 = vmul.f32 %v12883_v28, %v12878_v5  ;;  %v3263_v60 = vmul.f32 %v12884_v59, %v12878_v5  ;;  %v3264_v44 = vmul.f32 %v12885_v0, %v12878_v5  ;;  %v3265_v63 = vmul.f32 %v12886_v22, %v12878_v5 }
 0x21d   : >> { %v3266_v62 = vmul.f32 %v12887_v13, %v12878_v5  ;;  %v3267_v39 = vmul.f32 %v12888_v11, %v12878_v5  ;;  %v3268_v25 = vmul.f32 %v12889_v18, %v12878_v5  ;;  %v3269_v58 = vmul.f32 %v12890_v36, %v12878_v5 }
 0x21e   : >> { %v3270_v21 = vmul.f32 %v12891_v45, %v12878_v5  ;;  %v3271_v24 = vmul.f32 %v12892_v56, %v12878_v5  ;;  %v3272_v54 = vmul.f32 %v12893_v37, %v12878_v5  ;;  %v3273_v13 = vmul.f32 %v9202_v7, %v12878_v5 }
 0x21f   : >> { %v3298_v22 = vrot.slane %v3250_v35, 4  ;;  %v3299_v11 = vrot.slane %v3251_v1, 4  ;;  %v3301_v0 = vrot.slane %v3252_v46, 4  ;;  %v3303_v59 = vrot.slane %v3253_v27, 4 }
 0x220   : >> { %v3304_v18 = vrot.slane %v3254_v41, 4  ;;  %v3306_v28 = vrot.slane %v3255_v55, 4  ;;  %v3308_v9 = vrot.slane %v3256_v17, 4  ;;  %v3309_v36 = vrot.slane %v3257_v15, 4 }
 0x221   : >> { %v3300_v50 = vsel %vm874_vm3, %v3298_v22, %v3299_v11  ;;  %v3302_v45 = vsel %vm874_vm3, %v3299_v11, %v3301_v0  ;;  %v3311_v19 = vrot.slane %v3258_v30, 4  ;;  %v3313_v56 = vrot.slane %v3259_v32, 4 }
 0x222   : >> { %v3305_v40 = vsel %vm874_vm3, %v3303_v59, %v3304_v18  ;;  %v3307_v37 = vsel %vm874_vm3, %v3304_v18, %v3306_v28  ;;  %v3310_v5 = vsel %vm874_vm3, %v3308_v9, %v3309_v36  ;;  %v3314_v35 = vrot.slane %v3260_v53, 4 }
 0x223   : >> { %v3312_v1 = vsel %vm874_vm3, %v3309_v36, %v3311_v19  ;;  %v3316_v46 = vrot.slane %v3261_v47, 4  ;;  %v3318_v27 = vrot.slane %v3262_v49, 4  ;;  %v3319_v41 = vrot.slane %v3263_v60, 4 }
 0x224   : >> { %v3315_v55 = vsel %vm874_vm3, %v3313_v56, %v3314_v35  ;;  %v3321_v17 = vrot.slane %v3264_v44, 4  ;;  %v3323_v15 = vrot.slane %v3265_v63, 4  ;;  %v3324_v22 = vrot.slane %v3266_v62, 4  ;;  %v12895_v56 = vld [vmem:[#allocation24_spill] sm:$0xff] }
 0x225   : >> { %v3317_v30 = vsel %vm874_vm3, %v3314_v35, %v3316_v46  ;;  %v3320_v32 = vsel %vm874_vm3, %v3318_v27, %v3319_v41  ;;  %v3326_v59 = vrot.slane %v3267_v39, 4  ;;  %v3328_v0 = vrot.slane %v3268_v25, 4  ;;  %v12899_v27 = vld [vmem:[#allocation25_spill] sm:$0xff] }
 0x226   : >> { %v3322_v28 = vsel %vm874_vm3, %v3319_v41, %v3321_v17  ;;  %v3325_v53 = vsel %vm874_vm3, %v3323_v15, %v3324_v22  ;;  %v3329_v9 = vrot.slane %v3269_v58, 4  ;;  %v3331_v19 = vrot.slane %v3270_v21, 4  ;;  %v12901_v15 = vld [vmem:[#allocation27_spill] sm:$0xff] }
 0x227   : >> { %v3327_v47 = vsel %vm874_vm3, %v3324_v22, %v3326_v59  ;;  %v3333_v49 = vrot.slane %v3271_v24, 4  ;;  %v3334_v60 = vrot.slane %v3272_v54, 4  ;;  %v3336_v11 = vrot.slane %v3273_v13, 4  ;;  %v12903_v59 = vld [vmem:[#allocation18_spill] sm:$0xff] }
 0x228   : >> { %v3330_v44 = vsel %vm874_vm3, %v3328_v0, %v3329_v9  ;;  %v3332_v63 = vsel %vm874_vm3, %v3329_v9, %v3331_v19  ;;  %v9571_v62 = vadd.f32 %v3300_v50, %v9459_v23  ;;  %v9574_v39 = vadd.f32 %v3302_v45, %v9462_v4  ;;  %v12905_v9 = vld [vmem:[#allocation17_spill] sm:$0xff] }
 0x229   : >> { %v3335_v18 = vsel %vm874_vm3, %v3333_v49, %v3334_v60  ;;  %v3337_v25 = vsel %vm874_vm3, %v3334_v60, %v3336_v11  ;;  %v9579_v36 = vadd.f32 %v3305_v40, %v9467_v2  ;;  %v9582_v58 = vadd.f32 %v3307_v37, %v9470_v20  ;;  %v12896_v37 = vld [vmem:[#allocation30_spill] sm:$0xff]  ;;  %v12907_v60 = vld [vmem:[#allocation40_spill] sm:$0xff] }
 0x22a   : >> { %v9585_v13 = vadd.f32 %v3310_v5, %v9473_v43  ;;  %v9588_v21 = vadd.f32 %v3312_v1, %v9476_v42  ;;  %v9591_v23 = vadd.f32 %v3315_v55, %v9479_v57  ;;  %v9594_v4 = vadd.f32 %v3317_v30, %v9482_v38  ;;  %v12897_v5 = vld [vmem:[#allocation34_spill] sm:$0xff]  ;;  %v12898_v1 = vld [vmem:[#allocation29_spill] sm:$0xff]  ;;  %v12900_v55 = vld [vmem:[#allocation31_spill] sm:$0xff] }
 0x22b   : >> { %v9597_v50 = vadd.f32 %v3320_v32, %v9485_v16  ;;  %v9600_v2 = vadd.f32 %v3322_v28, %v9488_v34  ;;  %v9603_v20 = vadd.f32 %v3325_v53, %v9491_v52  ;;  %v9606_v43 = vadd.f32 %v3327_v47, %v9494_v8  ;;  %v12894_v34 = vld [vmem:[#allocation37_spill] sm:$0xff]  ;;  %v12902_v30 = vld [vmem:[#allocation28_spill] sm:$0xff]  ;;  %v12904_v28 = vld [vmem:[#allocation26_spill] sm:$0xff] }
 0x22c   : >> { %v9609_v42 = vadd.f32 %v3330_v44, %v9497_v26  ;;  %v9612_v57 = vadd.f32 %v3332_v63, %v9500_v61  ;;  %v9615_v38 = vadd.f32 %v3335_v18, %v9503_v51  ;;  %v9618_v16 = vadd.f32 %v3337_v25, %v9506_v3  ;;  %v12906_v47 = vld [vmem:[#allocation38_spill] sm:$0xff]  ;;  %v12908_v44 = vld [vmem:[#allocation19_spill] sm:$0xff]  ;;  %v12909_v18 = vld [vmem:[#allocation20_spill] sm:$0xff] }
 0x22d   : >> { %v3374_v40 = vmul.f32 %v9015_v14, %v12894_v34  ;;  %v3375_v52 = vmul.f32 %v9022_v6, %v12894_v34  ;;  %v3376_v8 = vmul.f32 %v9135_v31, %v12894_v34  ;;  %v3377_v26 = vmul.f32 %v9025_v33, %v12894_v34 }
 0x22e   : >> { %v3378_v61 = vmul.f32 %v9028_v12, %v12894_v34  ;;  %v3379_v51 = vmul.f32 %v9146_v29, %v12894_v34  ;;  %v3380_v3 = vmul.f32 %v9035_v10, %v12894_v34  ;;  %v3381_v45 = vmul.f32 %v12846_v48, %v12894_v34 }
 0x22f   : >> { %v3382_v24 = vmul.f32 %v12895_v56, %v12894_v34  ;;  %v3383_v54 = vmul.f32 %v12896_v37, %v12894_v34  ;;  %v3384_v35 = vmul.f32 %v12897_v5, %v12894_v34  ;;  %v3385_v46 = vmul.f32 %v12898_v1, %v12894_v34 }
 0x230   : >> { %v3386_v41 = vmul.f32 %v12899_v27, %v12894_v34  ;;  %v3387_v17 = vmul.f32 %v12900_v55, %v12894_v34  ;;  %v3388_v22 = vmul.f32 %v12901_v15, %v12894_v34  ;;  %v3389_v32 = vmul.f32 %v12902_v30, %v12894_v34 }
 0x231   : >> { %v3390_v0 = vmul.f32 %v12903_v59, %v12894_v34  ;;  %v3391_v53 = vmul.f32 %v12904_v28, %v12894_v34  ;;  %v3392_v19 = vmul.f32 %v12905_v9, %v12894_v34  ;;  %v3393_v49 = vmul.f32 %v12906_v47, %v12894_v34 }
 0x232   : >> { %v3394_v11 = vmul.f32 %v12907_v60, %v12894_v34  ;;  %v3395_v63 = vmul.f32 %v12908_v44, %v12894_v34  ;;  %v3396_v25 = vmul.f32 %v12909_v18, %v12894_v34  ;;  %v3397_v59 = vmul.f32 %v9202_v7, %v12894_v34 }
 0x233   : >> { %v3422_v30 = vrot.slane %v3374_v40, 5  ;;  %v3423_v28 = vrot.slane %v3375_v52, 5  ;;  %v3425_v15 = vrot.slane %v3376_v8, 5  ;;  %v3427_v55 = vrot.slane %v3377_v26, 5 }
 0x234   : >> { %v3428_v9 = vrot.slane %v3378_v61, 5  ;;  %v3430_v27 = vrot.slane %v3379_v51, 5  ;;  %v3432_v1 = vrot.slane %v3380_v3, 5  ;;  %v3433_v47 = vrot.slane %v3381_v45, 5 }
 0x235   : >> { %v3424_v5 = vsel %vm999_vm4, %v3422_v30, %v3423_v28  ;;  %v3426_v60 = vsel %vm999_vm4, %v3423_v28, %v3425_v15  ;;  %v3435_v37 = vrot.slane %v3382_v24, 5  ;;  %v3437_v44 = vrot.slane %v3383_v54, 5 }
 0x236   : >> { %v3429_v56 = vsel %vm999_vm4, %v3427_v55, %v3428_v9  ;;  %v3431_v18 = vsel %vm999_vm4, %v3428_v9, %v3430_v27  ;;  %v3434_v34 = vsel %vm999_vm4, %v3432_v1, %v3433_v47  ;;  %v3438_v40 = vrot.slane %v3384_v35, 5 }
 0x237   : >> { %v3436_v52 = vsel %vm999_vm4, %v3433_v47, %v3435_v37  ;;  %v3440_v8 = vrot.slane %v3385_v46, 5  ;;  %v3442_v26 = vrot.slane %v3386_v41, 5  ;;  %v3443_v61 = vrot.slane %v3387_v17, 5 }
 0x238   : >> { %v3439_v51 = vsel %vm999_vm4, %v3437_v44, %v3438_v40  ;;  %v3445_v3 = vrot.slane %v3388_v22, 5  ;;  %v3447_v45 = vrot.slane %v3389_v32, 5  ;;  %v3448_v30 = vrot.slane %v3390_v0, 5 }
 0x239   : >> { %v3441_v24 = vsel %vm999_vm4, %v3438_v40, %v3440_v8  ;;  %v3444_v54 = vsel %vm999_vm4, %v3442_v26, %v3443_v61  ;;  %v3450_v55 = vrot.slane %v3391_v53, 5  ;;  %v3452_v15 = vrot.slane %v3392_v19, 5  ;;  %v12919_v26 = vld [vmem:[#allocation18_spill] sm:$0xff] }
 0x23a   : >> { %v3446_v27 = vsel %vm999_vm4, %v3443_v61, %v3445_v3  ;;  %v3449_v35 = vsel %vm999_vm4, %v3447_v45, %v3448_v30  ;;  %v3453_v1 = vrot.slane %v3393_v49, 5  ;;  %v3455_v37 = vrot.slane %v3394_v11, 5  ;;  %v12921_v45 = vld [vmem:[#allocation17_spill] sm:$0xff] }
 0x23b   : >> { %v3451_v46 = vsel %vm999_vm4, %v3448_v30, %v3450_v55  ;;  %v3457_v41 = vrot.slane %v3395_v63, 5  ;;  %v3458_v17 = vrot.slane %v3396_v25, 5  ;;  %v3460_v28 = vrot.slane %v3397_v59, 5  ;;  %v12923_v55 = vld [vmem:[#allocation40_spill] sm:$0xff] }
 0x23c   : >> { %v3454_v22 = vsel %vm999_vm4, %v3452_v15, %v3453_v1  ;;  %v3456_v32 = vsel %vm999_vm4, %v3453_v1, %v3455_v37  ;;  %v9683_v0 = vadd.f32 %v3424_v5, %v9571_v62  ;;  %v9686_v53 = vadd.f32 %v3426_v60, %v9574_v39  ;;  %v12925_v1 = vld [vmem:[#allocation20_spill] sm:$0xff] }
 0x23d   : >> { %v3459_v9 = vsel %vm999_vm4, %v3457_v41, %v3458_v17  ;;  %v3461_v19 = vsel %vm999_vm4, %v3458_v17, %v3460_v28  ;;  %v9691_v47 = vadd.f32 %v3429_v56, %v9579_v36  ;;  %v9694_v49 = vadd.f32 %v3431_v18, %v9582_v58 }
 0x23e   : >> { %v9697_v59 = vadd.f32 %v3434_v34, %v9585_v13  ;;  %v9700_v11 = vadd.f32 %v3436_v52, %v9588_v21  ;;  %v9703_v62 = vadd.f32 %v3439_v51, %v9591_v23  ;;  %v9706_v39 = vadd.f32 %v3441_v24, %v9594_v4  ;;  %v12918_v52 = vld [vmem:[#allocation28_spill] sm:$0xff]  ;;  %v12920_v51 = vld [vmem:[#allocation26_spill] sm:$0xff] }
 0x23f   : >> { %v9709_v5 = vadd.f32 %v3444_v54, %v9597_v50  ;;  %v9712_v36 = vadd.f32 %v3446_v27, %v9600_v2  ;;  %v9715_v58 = vadd.f32 %v3449_v35, %v9603_v20  ;;  %v9718_v13 = vadd.f32 %v3451_v46, %v9606_v43  ;;  %v12910_v2 = vld [vmem:[#allocation35_spill] sm:$0xff]  ;;  %v12922_v24 = vld [vmem:[#allocation38_spill] sm:$0xff] }
 0x240   : >> { %v9721_v21 = vadd.f32 %v3454_v22, %v9609_v42  ;;  %v9724_v23 = vadd.f32 %v3456_v32, %v9612_v57  ;;  %v9727_v4 = vadd.f32 %v3459_v9, %v9615_v38  ;;  %v9730_v50 = vadd.f32 %v3461_v19, %v9618_v16  ;;  %v12924_v27 = vld [vmem:[#allocation19_spill] sm:$0xff] }
 0x241   : >> { %v3498_v56 = vmul.f32 %v9015_v14, %v12910_v2  ;;  %v3499_v20 = vmul.f32 %v9022_v6, %v12910_v2  ;;  %v3500_v43 = vmul.f32 %v9135_v31, %v12910_v2  ;;  %v3501_v42 = vmul.f32 %v9025_v33, %v12910_v2  ;;  %v12911_v6 = vld [vmem:[#allocation24_spill] sm:$0xff]  ;;  %v12912_v31 = vld [vmem:[#allocation30_spill] sm:$0xff] }
 0x242   : >> { %v3502_v57 = vmul.f32 %v9028_v12, %v12910_v2  ;;  %v3503_v38 = vmul.f32 %v9146_v29, %v12910_v2  ;;  %v3504_v16 = vmul.f32 %v9035_v10, %v12910_v2  ;;  %v3505_v14 = vmul.f32 %v12846_v48, %v12910_v2  ;;  %v12913_v33 = vld [vmem:[#allocation34_spill] sm:$0xff]  ;;  %v12914_v12 = vld [vmem:[#allocation29_spill] sm:$0xff]  ;;  %v12916_v10 = vld [vmem:[#allocation31_spill] sm:$0xff] }
 0x243   : >> { %v3506_v60 = vmul.f32 %v12911_v6, %v12910_v2  ;;  %v3507_v44 = vmul.f32 %v12912_v31, %v12910_v2  ;;  %v3508_v63 = vmul.f32 %v12913_v33, %v12910_v2  ;;  %v3509_v18 = vmul.f32 %v12914_v12, %v12910_v2  ;;  %v12915_v29 = vld [vmem:[#allocation25_spill] sm:$0xff]  ;;  %v12917_v48 = vld [vmem:[#allocation27_spill] sm:$0xff] }
 0x244   : >> { %v3510_v25 = vmul.f32 %v12915_v29, %v12910_v2  ;;  %v3511_v34 = vmul.f32 %v12916_v10, %v12910_v2  ;;  %v3512_v40 = vmul.f32 %v12917_v48, %v12910_v2  ;;  %v3513_v8 = vmul.f32 %v12918_v52, %v12910_v2 }
 0x245   : >> { %v3514_v61 = vmul.f32 %v12919_v26, %v12910_v2  ;;  %v3515_v3 = vmul.f32 %v12920_v51, %v12910_v2  ;;  %v3516_v30 = vmul.f32 %v12921_v45, %v12910_v2  ;;  %v3517_v54 = vmul.f32 %v12922_v24, %v12910_v2 }
 0x246   : >> { %v3518_v15 = vmul.f32 %v12923_v55, %v12910_v2  ;;  %v3519_v35 = vmul.f32 %v12924_v27, %v12910_v2  ;;  %v3520_v37 = vmul.f32 %v12925_v1, %v12910_v2  ;;  %v3521_v46 = vmul.f32 %v9202_v7, %v12910_v2  ;;  %v9804_v1 = vld [vmem:[%s6650_s17 + $0x68] sm:$0xff] }
 0x247   : >> { %v3546_v41 = vrot.slane %v3498_v56, 6  ;;  %v3547_v17 = vrot.slane %v3499_v20, 6  ;;  %v3549_v28 = vrot.slane %v3500_v43, 6  ;;  %v3551_v22 = vrot.slane %v3501_v42, 6 }
 0x248   : >> { %v3552_v32 = vrot.slane %v3502_v57, 6  ;;  %v3554_v9 = vrot.slane %v3503_v38, 6  ;;  %v3556_v19 = vrot.slane %v3504_v16, 6  ;;  %v3557_v6 = vrot.slane %v3505_v14, 6 }
 0x249   : >> { %v3548_v31 = vsel %vm1124_vm5, %v3546_v41, %v3547_v17  ;;  %v3550_v33 = vsel %vm1124_vm5, %v3547_v17, %v3549_v28  ;;  %v3559_v12 = vrot.slane %v3506_v60, 6  ;;  %v3561_v29 = vrot.slane %v3507_v44, 6  ;;  %v9817_v17 = vld [vmem:[%s6650_s17 + $0x90] sm:$0xff]  ;;  %v9823_v28 = vld [vmem:[%s6650_s17 + $0xa8] sm:$0xff] }
 0x24a   : >> { %v3553_v10 = vsel %vm1124_vm5, %v3551_v22, %v3552_v32  ;;  %v3555_v48 = vsel %vm1124_vm5, %v3552_v32, %v3554_v9  ;;  %v3558_v7 = vsel %vm1124_vm5, %v3556_v19, %v3557_v6  ;;  %v3562_v2 = vrot.slane %v3508_v63, 6  ;;  %12927 = vst [vmem:[#allocation36_spill] sm:$0xff] %v9823_v28  ;;  %v9833_v32 = vld [vmem:[%s6650_s17 + $0xc0] sm:$0xff]  ;;  %v9836_v9 = vld [vmem:[%s6650_s17 + $0xc8] sm:$0xff] }
 0x24b   : >> { %v3560_v56 = vsel %vm1124_vm5, %v3557_v6, %v3559_v12  ;;  %v3564_v20 = vrot.slane %v3509_v18, 6  ;;  %v3566_v43 = vrot.slane %v3510_v25, 6  ;;  %v3567_v42 = vrot.slane %v3511_v34, 6  ;;  %12929 = vst [vmem:[#allocation37_spill] sm:$0xff] %v9833_v32  ;;  %12930 = vst [vmem:[#allocation35_spill] sm:$0xff] %v9836_v9  ;;  %v9855_v12 = vld [vmem:[%s6650_s17 + $0x108] sm:$0xff] }
 0x24c   : >> { %v3563_v57 = vsel %vm1124_vm5, %v3561_v29, %v3562_v2  ;;  %v3569_v38 = vrot.slane %v3512_v40, 6  ;;  %v3571_v16 = vrot.slane %v3513_v8, 6  ;;  %v3572_v14 = vrot.slane %v3514_v61, 6  ;;  %12935 = vst [vmem:[#allocation25_spill] sm:$0xff] %v9855_v12  ;;  %v9858_v29 = vld [vmem:[%s6650_s17 + $0x110] sm:$0xff] }
 0x24d   : >> { %v3565_v60 = vsel %vm1124_vm5, %v3562_v2, %v3564_v20  ;;  %v3568_v44 = vsel %vm1124_vm5, %v3566_v43, %v3567_v42  ;;  %v3574_v52 = vrot.slane %v3515_v3, 6  ;;  %v3576_v26 = vrot.slane %v3516_v30, 6  ;;  %12936 = vst [vmem:[#allocation31_spill] sm:$0xff] %v9858_v29 }
 0x24e   : >> { %v3570_v51 = vsel %vm1124_vm5, %v3567_v42, %v3569_v38  ;;  %v3573_v63 = vsel %vm1124_vm5, %v3571_v16, %v3572_v14  ;;  %v3577_v18 = vrot.slane %v3517_v54, 6  ;;  %v3579_v25 = vrot.slane %v3518_v15, 6  ;;  %v9797_v54 = vld [vmem:[%s6650_s17 + $0x60] sm:$0xff] }
 0x24f   : >> { %v3575_v34 = vsel %vm1124_vm5, %v3572_v14, %v3574_v52  ;;  %v3581_v40 = vrot.slane %v3519_v35, 6  ;;  %v3582_v8 = vrot.slane %v3520_v37, 6  ;;  %v3584_v61 = vrot.slane %v3521_v46, 6  ;;  %v9807_v37 = vld [vmem:[%s6650_s17 + $0x78] sm:$0xff] }
 0x250   : >> { %v3578_v45 = vsel %vm1124_vm5, %v3576_v26, %v3577_v18  ;;  %v3580_v3 = vsel %vm1124_vm5, %v3577_v18, %v3579_v25  ;;  %v3602_v30 = vadd.f32 %v3548_v31, %v9683_v0  ;;  %v3603_v24 = vadd.f32 %v3550_v33, %v9686_v53  ;;  %v9810_v0 = vld [vmem:[%s6650_s17 + $0x80] sm:$0xff]  ;;  %v9843_v33 = vld [vmem:[%s6650_s17 + $0xd8] sm:$0xff] }
 0x251   : >> { %v3583_v55 = vsel %vm1124_vm5, %v3581_v40, %v3582_v8  ;;  %v3585_v15 = vsel %vm1124_vm5, %v3582_v8, %v3584_v61  ;;  %v3604_v27 = vadd.f32 %v3553_v10, %v9691_v47  ;;  %v3605_v35 = vadd.f32 %v3555_v48, %v9694_v49  ;;  %v9820_v49 = vld [vmem:[%s6650_s17 + $0x98] sm:$0xff]  ;;  %12931 = vst [vmem:[#allocation24_spill] sm:$0xff] %v9843_v33  ;;  %v12937_v10 = vld [vmem:[#allocation39_spill] sm:$0xff]  ;;  %v9912_v8 = vld [vmem:[%s6650_s17 + $0x88] sm:$0x3f] }
 0x252   : >> { %v3606_v53 = vadd.f32 %v3558_v7, %v9697_v59  ;;  %v3607_v46 = vadd.f32 %v3560_v56, %v9700_v11  ;;  %v3608_v41 = vadd.f32 %v3563_v57, %v9703_v62  ;;  %v3609_v47 = vadd.f32 %v3565_v60, %v9706_v39  ;;  %12926 = vst [vmem:[#allocation33_spill] sm:$0xff] %v9820_v49  ;;  %v9830_v39 = vld [vmem:[%s6650_s17 + $0xb0] sm:$0xff] }
 0x253   : >> { %v3610_v22 = vadd.f32 %v3568_v44, %v9709_v5  ;;  %v3611_v59 = vadd.f32 %v3570_v51, %v9712_v36  ;;  %v3612_v11 = vadd.f32 %v3573_v63, %v9715_v58  ;;  %v3613_v62 = vadd.f32 %v3575_v34, %v9718_v13  ;;  %12928 = vst [vmem:[#allocation23_spill] sm:$0xff] %v9830_v39  ;;  %v9846_v36 = vld [vmem:[%s6650_s17 + $0xe0] sm:$0xff]  ;;  %v9849_v58 = vld [vmem:[%s6650_s17 + $0xf0] sm:$0xff]  ;;  %v9852_v13 = vld [vmem:[%s6650_s17 + $0xf8] sm:$0xff] }
 0x254   : >> { %v3614_v19 = vadd.f32 %v3578_v45, %v9721_v21  ;;  %v3615_v6 = vadd.f32 %v3580_v3, %v9724_v23  ;;  %v3616_v31 = vadd.f32 %v3583_v55, %v9727_v4  ;;  %v3617_v5 = vadd.f32 %v3585_v15, %v9730_v50  ;;  %12932 = vst [vmem:[#allocation30_spill] sm:$0xff] %v9846_v36  ;;  %v9901_v63 = vld [vmem:[%s6650_s17 + $0x70] sm:$0x3f]  ;;  %v9926_v55 = vld [vmem:[%s6650_s17 + $0xb8] sm:$0x3f] }
 0x255   : >> { %12933 = vst [vmem:[#allocation34_spill] sm:$0xff] %v9849_v58  ;;  %12934 = vst [vmem:[#allocation29_spill] sm:$0xff] %v9852_v13  ;;  %v3649_v21 = vmul.f32 %v9797_v54, %v12937_v10  ;;  %v3650_v23 = vmul.f32 %v9804_v1, %v12937_v10  ;;  %v3651_v4 = vmul.f32 %v9807_v37, %v12937_v10 }
 0x256   : >> { %v3652_v50 = vmul.f32 %v9810_v0, %v12937_v10  ;;  %v3653_v48 = vmul.f32 %v9817_v17, %v12937_v10  ;;  %v3654_v7 = vmul.f32 %v9820_v49, %v12937_v10  ;;  %v3655_v2 = vmul.f32 %v9823_v28, %v12937_v10  ;;  %12939 = vst [vmem:[#allocation28_spill] sm:$0xff] %v9926_v55 }
 0x257   : >> { %v3656_v56 = vmul.f32 %v9830_v39, %v12937_v10  ;;  %v3657_v20 = vmul.f32 %v9833_v32, %v12937_v10  ;;  %v3658_v43 = vmul.f32 %v9836_v9, %v12937_v10  ;;  %v3659_v42 = vmul.f32 %v9843_v33, %v12937_v10 }
 0x258   : >> { %v3660_v57 = vmul.f32 %v9846_v36, %v12937_v10  ;;  %v3661_v38 = vmul.f32 %v9849_v58, %v12937_v10  ;;  %v3662_v16 = vmul.f32 %v9852_v13, %v12937_v10  ;;  %v3663_v14 = vmul.f32 %v9855_v12, %v12937_v10 }
 0x259   : >> { %v3664_v60 = vmul.f32 %v9858_v29, %v12937_v10  ;;  %v9892_v44 = vadd.f32 %v3649_v21, %v3602_v30  ;;  %v9894_v52 = vadd.f32 %v3650_v23, %v3603_v24  ;;  %v9896_v26 = vadd.f32 %v3651_v4, %v3604_v27  ;;  %v9923_v24 = vld [vmem:[%s6650_s17 + $0xa0] sm:$0x3f]  ;;  %v9962_v21 = vld [vmem:[%s6650_s17 + $0x118] sm:$0x3f] }
 0x25a   : >> { %v9898_v51 = vadd.f32 %v3652_v50, %v3605_v35  ;;  %v9903_v18 = vadd.f32 %v3653_v48, %v3606_v53  ;;  %v9905_v25 = vadd.f32 %v3654_v7, %v3607_v46  ;;  %v9907_v34 = vadd.f32 %v3655_v2, %v3608_v41  ;;  %12938 = vst [vmem:[#allocation27_spill] sm:$0xff] %v9923_v24  ;;  %v9937_v46 = vld [vmem:[%s6650_s17 + $0xd0] sm:$0x3f]  ;;  %v12941_v41 = vld [vmem:[#allocation32_spill] sm:$0xff]  ;;  %v9959_v10 = vld [vmem:[%s6650_s17 + $0x100] sm:$0x3f] }
 0x25b   : >> { %v9909_v40 = vadd.f32 %v3656_v56, %v3609_v47  ;;  %v9914_v61 = vadd.f32 %v3657_v20, %v3610_v22  ;;  %v9916_v45 = vadd.f32 %v3658_v43, %v3611_v59  ;;  %v9918_v3 = vadd.f32 %v3659_v42, %v3612_v11  ;;  %12940 = vst [vmem:[#allocation18_spill] sm:$0xff] %v9937_v46 }
 0x25c   : >> { %v9920_v30 = vadd.f32 %v3660_v57, %v3613_v62  ;;  %v9928_v15 = vadd.f32 %v3661_v38, %v3614_v19  ;;  %v9930_v27 = vadd.f32 %v3662_v16, %v3615_v6  ;;  %v9932_v35 = vadd.f32 %v3663_v14, %v3616_v31  ;;  %v9948_v62 = vld [vmem:[%s6650_s17 + $0xe8] sm:$0x3f]  ;;  %12943 = vst [vmem:[#allocation17_spill] sm:$0xff] %v9959_v10 }
 0x25d   : >> { %v9934_v53 = vadd.f32 %v3664_v60, %v3617_v5  ;;  %v3685_v47 = vmul.f32 %v9797_v54, %v12941_v41  ;;  %v3686_v22 = vmul.f32 %v9804_v1, %v12941_v41  ;;  %v3687_v59 = vmul.f32 %v9901_v63, %v12941_v41  ;;  %12942 = vst [vmem:[#allocation26_spill] sm:$0xff] %v9948_v62 }
 0x25e   : >> { %v3688_v11 = vmul.f32 %v9807_v37, %v12941_v41  ;;  %v3689_v19 = vmul.f32 %v9810_v0, %v12941_v41  ;;  %v3690_v6 = vmul.f32 %v9912_v8, %v12941_v41  ;;  %v3691_v31 = vmul.f32 %v9817_v17, %v12941_v41 }
 0x25f   : >> { %v3692_v5 = vmul.f32 %v9820_v49, %v12941_v41  ;;  %v3693_v23 = vmul.f32 %v9923_v24, %v12941_v41  ;;  %v3694_v4 = vmul.f32 %v9823_v28, %v12941_v41  ;;  %v3695_v50 = vmul.f32 %v9830_v39, %v12941_v41 }
 0x260   : >> { %v3696_v48 = vmul.f32 %v9926_v55, %v12941_v41  ;;  %v3697_v7 = vmul.f32 %v9833_v32, %v12941_v41  ;;  %v3698_v2 = vmul.f32 %v9836_v9, %v12941_v41  ;;  %v3699_v56 = vmul.f32 %v9937_v46, %v12941_v41 }
 0x261   : >> { %v3700_v20 = vmul.f32 %v9843_v33, %v12941_v41  ;;  %v3701_v43 = vmul.f32 %v9846_v36, %v12941_v41  ;;  %v3702_v42 = vmul.f32 %v9948_v62, %v12941_v41  ;;  %v3703_v57 = vmul.f32 %v9849_v58, %v12941_v41 }
 0x262   : >> { %v3704_v38 = vmul.f32 %v9852_v13, %v12941_v41  ;;  %v3705_v16 = vmul.f32 %v9959_v10, %v12941_v41  ;;  %v3706_v14 = vmul.f32 %v9855_v12, %v12941_v41  ;;  %v3707_v60 = vmul.f32 %v9858_v29, %v12941_v41 }
 0x263   : >> { %v3708_v36 = vmul.f32 %v9962_v21, %v12941_v41  ;;  %v3733_v33 = vrot.slane %v3685_v47, 1  ;;  %v3734_v62 = vrot.slane %v3686_v22, 1  ;;  %v3736_v46 = vrot.slane %v3687_v59, 1 }
 0x264   : >> { %v3738_v9 = vrot.slane %v3688_v11, 1  ;;  %v3739_v58 = vrot.slane %v3689_v19, 1  ;;  %v3741_v32 = vrot.slane %v3690_v6, 1  ;;  %v3743_v55 = vrot.slane %v3691_v31, 1 }
 0x265   : >> { %v3744_v13 = vrot.slane %v3692_v5, 1  ;;  %v3735_v39 = vsel %vm499_vm0, %v3733_v33, %v3734_v62  ;;  %v3737_v10 = vsel %vm499_vm0, %v3734_v62, %v3736_v46  ;;  %v3746_v28 = vrot.slane %v3693_v23, 1 }
 0x266   : >> { %v3748_v12 = vrot.slane %v3694_v4, 1  ;;  %v3740_v24 = vsel %vm499_vm0, %v3738_v9, %v3739_v58  ;;  %v3742_v29 = vsel %vm499_vm0, %v3739_v58, %v3741_v32  ;;  %v3749_v47 = vrot.slane %v3695_v50, 1 }
 0x267   : >> { %v3745_v41 = vsel %vm499_vm0, %v3743_v55, %v3744_v13  ;;  %v3747_v22 = vsel %vm499_vm0, %v3744_v13, %v3746_v28  ;;  %v3751_v59 = vrot.slane %v3696_v48, 1  ;;  %v3753_v11 = vrot.slane %v3697_v7, 1 }
 0x268   : >> { %v3754_v19 = vrot.slane %v3698_v2, 1  ;;  %v3750_v6 = vsel %vm499_vm0, %v3748_v12, %v3749_v47  ;;  %v3756_v31 = vrot.slane %v3699_v56, 1  ;;  %v3758_v33 = vrot.slane %v3700_v20, 1 }
 0x269   : >> { %v3759_v5 = vrot.slane %v3701_v43, 1  ;;  %v3752_v46 = vsel %vm499_vm0, %v3749_v47, %v3751_v59  ;;  %v3761_v9 = vrot.slane %v3702_v42, 1  ;;  %v3763_v23 = vrot.slane %v3703_v57, 1  ;;  %v12956_v47 = vld [vmem:[#allocation15_spill] sm:$0xff]  ;;  %v12958_v59 = vld [vmem:[#allocation16_spill] sm:$0xff] }
 0x26a   : >> { %v3755_v62 = vsel %vm499_vm0, %v3753_v11, %v3754_v19  ;;  %v3757_v32 = vsel %vm499_vm0, %v3754_v19, %v3756_v31  ;;  %v3764_v55 = vrot.slane %v3704_v38, 1  ;;  %v3766_v28 = vrot.slane %v3705_v16, 1  ;;  %v12948_v16 = vld [vmem:[#allocation7_spill] sm:$0xff] }
 0x26b   : >> { %v3760_v58 = vsel %vm499_vm0, %v3758_v33, %v3759_v5  ;;  %v3762_v13 = vsel %vm499_vm0, %v3759_v5, %v3761_v9  ;;  %v3768_v4 = vrot.slane %v3706_v14, 1  ;;  %v3769_v50 = vrot.slane %v3707_v60, 1  ;;  %v12950_v14 = vld [vmem:[#allocation12_spill] sm:$0xff] }
 0x26c   : >> { %v3771_v12 = vrot.slane %v3708_v36, 1  ;;  %v3765_v48 = vsel %vm499_vm0, %v3763_v23, %v3764_v55  ;;  %v3767_v7 = vsel %vm499_vm0, %v3764_v55, %v3766_v28  ;;  %v10011_v2 = vadd.f32 %v3735_v39, %v9892_v44  ;;  %v12960_v23 = vld [vmem:[#allocation27_spill] sm:$0xff] }
 0x26d   : >> { %v10014_v56 = vadd.f32 %v3737_v10, %v9894_v52  ;;  %v3770_v20 = vsel %vm499_vm0, %v3768_v4, %v3769_v50  ;;  %v10019_v42 = vadd.f32 %v3740_v24, %v9896_v26  ;;  %v10022_v57 = vadd.f32 %v3742_v29, %v9898_v51  ;;  %v12962_v28 = vld [vmem:[#allocation23_spill] sm:$0xff]  ;;  %v12963_v4 = vld [vmem:[#allocation28_spill] sm:$0xff] }
 0x26e   : >> { %v3772_v43 = vsel %vm499_vm0, %v3769_v50, %v3771_v12  ;;  %v10025_v36 = vadd.f32 %v3745_v41, %v9903_v18  ;;  %v10028_v38 = vadd.f32 %v3747_v22, %v9905_v25  ;;  %v10031_v39 = vadd.f32 %v3750_v6, %v9907_v34  ;;  %v12964_v12 = vld [vmem:[#allocation37_spill] sm:$0xff] }
 0x26f   : >> { %v10034_v44 = vadd.f32 %v3752_v46, %v9909_v40  ;;  %v10037_v52 = vadd.f32 %v3755_v62, %v9914_v61  ;;  %v10040_v26 = vadd.f32 %v3757_v32, %v9916_v45  ;;  %v10043_v29 = vadd.f32 %v3760_v58, %v9918_v3  ;;  %v12944_v61 = vld [vmem:[#allocation21_spill] sm:$0xff]  ;;  %v12945_v45 = vld [vmem:[#allocation6_spill] sm:$0xff]  ;;  %v12961_v58 = vld [vmem:[#allocation36_spill] sm:$0xff] }
 0x270   : >> { %v10046_v51 = vadd.f32 %v3762_v13, %v9920_v30  ;;  %v10049_v18 = vadd.f32 %v3765_v48, %v9928_v15  ;;  %v10052_v25 = vadd.f32 %v3767_v7, %v9930_v27  ;;  %v10055_v34 = vadd.f32 %v3770_v20, %v9932_v35  ;;  %v12946_v3 = vld [vmem:[#allocation22_spill] sm:$0xff]  ;;  %v12947_v30 = vld [vmem:[#allocation11_spill] sm:$0xff]  ;;  %v12952_v35 = vld [vmem:[#allocation13_spill] sm:$0xff] }
 0x271   : >> { %v10058_v40 = vadd.f32 %v3772_v43, %v9934_v53  ;;  %v3808_v24 = vrot.slane %v12945_v45, %v12944_v61  ;;  %v10064_v10 = vrot.slane %v12945_v45, %v12946_v3  ;;  %v10068_v15 = vrot.slane %v12948_v16, %v12947_v30  ;;  %v12954_v53 = vld [vmem:[#allocation14_spill] sm:$0xff]  ;;  %v12965_v7 = vld [vmem:[#allocation35_spill] sm:$0xff]  ;;  %v12971_v61 = vld [vmem:[#allocation29_spill] sm:$0xff] }
 0x272   : >> { %v10072_v27 = vrot.slane %v12948_v16, %v12950_v14  ;;  %v10076_v60 = vrot.slane %v12948_v16, %v12952_v35  ;;  %v10080_v41 = vrot.slane %v12948_v16, %v12954_v53  ;;  %v10084_v22 = vrot.slane %v12948_v16, %v12956_v47  ;;  %v12966_v43 = vld [vmem:[#allocation18_spill] sm:$0xff] }
 0x273   : >> { %12949 = vst [vmem:[#allocation38_spill] sm:$0xff] %v10068_v15  ;;  %v10088_v11 = vrot.slane %v12948_v16, %v12958_v59  ;;  %v3809_v19 = vmul.f32 %v9797_v54, %v3808_v24  ;;  %v3810_v6 = vmul.f32 %v9804_v1, %v3808_v24  ;;  %v3811_v31 = vmul.f32 %v9901_v63, %v3808_v24  ;;  %v12967_v59 = vld [vmem:[#allocation24_spill] sm:$0xff]  ;;  %v12968_v53 = vld [vmem:[#allocation30_spill] sm:$0xff]  ;;  %v12974_v15 = vld [vmem:[#allocation31_spill] sm:$0xff] }
 0x274   : >> { %12951 = vst [vmem:[#allocation40_spill] sm:$0xff] %v10072_v27  ;;  %12953 = vst [vmem:[#allocation19_spill] sm:$0xff] %v10076_v60  ;;  %v3812_v33 = vmul.f32 %v9807_v37, %v3808_v24  ;;  %v3813_v5 = vmul.f32 %v9810_v0, %v3808_v24  ;;  %v3814_v46 = vmul.f32 %v9912_v8, %v3808_v24  ;;  %v12969_v14 = vld [vmem:[#allocation26_spill] sm:$0xff]  ;;  %v12973_v60 = vld [vmem:[#allocation25_spill] sm:$0xff] }
 0x275   : >> { %12955 = vst [vmem:[#allocation20_spill] sm:$0xff] %v10080_v41  ;;  %12957 = vst [vmem:[#allocation39_spill] sm:$0xff] %v10084_v22  ;;  %v3815_v62 = vmul.f32 %v9817_v17, %v3808_v24  ;;  %v3816_v9 = vmul.f32 %v9820_v49, %v3808_v24  ;;  %v3817_v32 = vmul.f32 %v12960_v23, %v3808_v24  ;;  %v12970_v3 = vld [vmem:[#allocation34_spill] sm:$0xff]  ;;  %v12972_v22 = vld [vmem:[#allocation17_spill] sm:$0xff] }
 0x276   : >> { %12959 = vst [vmem:[#allocation32_spill] sm:$0xff] %v10088_v11  ;;  %v3818_v55 = vmul.f32 %v12961_v58, %v3808_v24  ;;  %v3819_v13 = vmul.f32 %v12962_v28, %v3808_v24  ;;  %v3820_v50 = vmul.f32 %v12963_v4, %v3808_v24  ;;  %v3821_v48 = vmul.f32 %v12964_v12, %v3808_v24 }
 0x277   : >> { %v3822_v20 = vmul.f32 %v12965_v7, %v3808_v24  ;;  %v3823_v45 = vmul.f32 %v12966_v43, %v3808_v24  ;;  %v3824_v47 = vmul.f32 %v12967_v59, %v3808_v24  ;;  %v3825_v35 = vmul.f32 %v12968_v53, %v3808_v24 }
 0x278   : >> { %v3826_v30 = vmul.f32 %v12969_v14, %v3808_v24  ;;  %v3827_v16 = vmul.f32 %v12970_v3, %v3808_v24  ;;  %v3828_v11 = vmul.f32 %v12971_v61, %v3808_v24  ;;  %v3829_v41 = vmul.f32 %v12972_v22, %v3808_v24 }
 0x279   : >> { %v3830_v27 = vmul.f32 %v12973_v60, %v3808_v24  ;;  %v3831_v12 = vmul.f32 %v12974_v15, %v3808_v24  ;;  %v3832_v7 = vmul.f32 %v9962_v21, %v3808_v24  ;;  %v3857_v4 = vrot.slane %v3809_v19, 2 }
 0x27a   : >> { %v3858_v43 = vrot.slane %v3810_v6, 2  ;;  %v3860_v28 = vrot.slane %v3811_v31, 2  ;;  %v3862_v59 = vrot.slane %v3812_v33, 2  ;;  %v3863_v58 = vrot.slane %v3813_v5, 2 }
 0x27b   : >> { %v3865_v53 = vrot.slane %v3814_v46, 2  ;;  %v3867_v23 = vrot.slane %v3815_v62, 2  ;;  %v3868_v14 = vrot.slane %v3816_v9, 2  ;;  %v3870_v49 = vrot.slane %v3817_v32, 2 }
 0x27c   : >> { %v3859_v3 = vsel %vm624_vm1, %v3857_v4, %v3858_v43  ;;  %v3861_v61 = vsel %vm624_vm1, %v3858_v43, %v3860_v28  ;;  %v3872_v22 = vrot.slane %v3818_v55, 2  ;;  %v3864_v60 = vsel %vm624_vm1, %v3862_v59, %v3863_v58 }
 0x27d   : >> { %v3866_v15 = vsel %vm624_vm1, %v3863_v58, %v3865_v53  ;;  %v3869_v24 = vsel %vm624_vm1, %v3867_v23, %v3868_v14  ;;  %v3873_v19 = vrot.slane %v3819_v13, 2  ;;  %v3871_v6 = vsel %vm624_vm1, %v3868_v14, %v3870_v49 }
 0x27e   : >> { %v3875_v31 = vrot.slane %v3820_v50, 2  ;;  %v3877_v33 = vrot.slane %v3821_v48, 2  ;;  %v3878_v5 = vrot.slane %v3822_v20, 2  ;;  %v3880_v62 = vrot.slane %v3823_v45, 2  ;;  %v12977_v20 = vld [vmem:[#allocation36_spill] sm:$0xff] }
 0x27f   : >> { %v3874_v46 = vsel %vm624_vm1, %v3872_v22, %v3873_v19  ;;  %v3882_v9 = vrot.slane %v3824_v47, 2  ;;  %v3883_v4 = vrot.slane %v3825_v35, 2  ;;  %v3885_v59 = vrot.slane %v3826_v30, 2 }
 0x280   : >> { %v3876_v32 = vsel %vm624_vm1, %v3873_v19, %v3875_v31  ;;  %v3879_v55 = vsel %vm624_vm1, %v3877_v33, %v3878_v5  ;;  %v3887_v28 = vrot.slane %v3827_v16, 2  ;;  %v3881_v53 = vsel %vm624_vm1, %v3878_v5, %v3880_v62  ;;  %v12980_v33 = vld [vmem:[#allocation37_spill] sm:$0xff] }
 0x281   : >> { %v3884_v23 = vsel %vm624_vm1, %v3882_v9, %v3883_v4  ;;  %v3888_v58 = vrot.slane %v3828_v11, 2  ;;  %v3890_v49 = vrot.slane %v3829_v41, 2  ;;  %v3886_v14 = vsel %vm624_vm1, %v3883_v4, %v3885_v59  ;;  %v12982_v9 = vld [vmem:[#allocation18_spill] sm:$0xff] }
 0x282   : >> { %v3892_v13 = vrot.slane %v3830_v27, 2  ;;  %v3893_v50 = vrot.slane %v3831_v12, 2  ;;  %v3895_v22 = vrot.slane %v3832_v7, 2  ;;  %v10129_v47 = vadd.f32 %v3859_v3, %v10011_v2  ;;  %v12975_v3 = vld [vmem:[#allocation33_spill] sm:$0xff]  ;;  %v12984_v59 = vld [vmem:[#allocation30_spill] sm:$0xff] }
 0x283   : >> { %v3889_v45 = vsel %vm624_vm1, %v3887_v28, %v3888_v58  ;;  %v3891_v35 = vsel %vm624_vm1, %v3888_v58, %v3890_v49  ;;  %v10132_v30 = vadd.f32 %v3861_v61, %v10014_v56  ;;  %v10137_v41 = vadd.f32 %v3864_v60, %v10019_v42  ;;  %v12976_v60 = vld [vmem:[#allocation27_spill] sm:$0xff]  ;;  %v12986_v58 = vld [vmem:[#allocation34_spill] sm:$0xff] }
 0x284   : >> { %v3894_v16 = vsel %vm624_vm1, %v3892_v13, %v3893_v50  ;;  %v3896_v11 = vsel %vm624_vm1, %v3893_v50, %v3895_v22  ;;  %v10140_v27 = vadd.f32 %v3866_v15, %v10022_v57  ;;  %v10143_v12 = vadd.f32 %v3869_v24, %v10025_v36  ;;  %v12978_v24 = vld [vmem:[#allocation23_spill] sm:$0xff]  ;;  %v12988_v50 = vld [vmem:[#allocation17_spill] sm:$0xff] }
 0x285   : >> { %v10146_v48 = vadd.f32 %v3871_v6, %v10028_v38  ;;  %v10149_v2 = vadd.f32 %v3874_v46, %v10031_v39  ;;  %v10152_v56 = vadd.f32 %v3876_v32, %v10034_v44  ;;  %v10155_v61 = vadd.f32 %v3879_v55, %v10037_v52  ;;  %v12979_v6 = vld [vmem:[#allocation28_spill] sm:$0xff]  ;;  %v12981_v46 = vld [vmem:[#allocation35_spill] sm:$0xff] }
 0x286   : >> { %v10158_v42 = vadd.f32 %v3881_v53, %v10040_v26  ;;  %v10161_v57 = vadd.f32 %v3884_v23, %v10043_v29  ;;  %v10164_v36 = vadd.f32 %v3886_v14, %v10046_v51  ;;  %v10167_v38 = vadd.f32 %v3889_v45, %v10049_v18  ;;  %v12983_v32 = vld [vmem:[#allocation24_spill] sm:$0xff]  ;;  %v12985_v53 = vld [vmem:[#allocation26_spill] sm:$0xff]  ;;  %v12987_v14 = vld [vmem:[#allocation29_spill] sm:$0xff] }
 0x287   : >> { %v10170_v39 = vadd.f32 %v3891_v35, %v10052_v25  ;;  %v10173_v44 = vadd.f32 %v3894_v16, %v10055_v34  ;;  %v10176_v52 = vadd.f32 %v3896_v11, %v10058_v40  ;;  %v3933_v26 = vmul.f32 %v9797_v54, %v10064_v10  ;;  %v12989_v45 = vld [vmem:[#allocation25_spill] sm:$0xff]  ;;  %v12990_v16 = vld [vmem:[#allocation31_spill] sm:$0xff] }
 0x288   : >> { %v3934_v29 = vmul.f32 %v9804_v1, %v10064_v10  ;;  %v3935_v51 = vmul.f32 %v9901_v63, %v10064_v10  ;;  %v3936_v18 = vmul.f32 %v9807_v37, %v10064_v10  ;;  %v3937_v25 = vmul.f32 %v9810_v0, %v10064_v10 }
 0x289   : >> { %v3938_v34 = vmul.f32 %v9912_v8, %v10064_v10  ;;  %v3939_v40 = vmul.f32 %v9817_v17, %v10064_v10  ;;  %v3940_v15 = vmul.f32 %v12975_v3, %v10064_v10  ;;  %v3941_v7 = vmul.f32 %v12976_v60, %v10064_v10 }
 0x28a   : >> { %v3942_v43 = vmul.f32 %v12977_v20, %v10064_v10  ;;  %v3943_v19 = vmul.f32 %v12978_v24, %v10064_v10  ;;  %v3944_v31 = vmul.f32 %v12979_v6, %v10064_v10  ;;  %v3945_v5 = vmul.f32 %v12980_v33, %v10064_v10 }
 0x28b   : >> { %v3946_v62 = vmul.f32 %v12981_v46, %v10064_v10  ;;  %v3947_v4 = vmul.f32 %v12982_v9, %v10064_v10  ;;  %v3948_v55 = vmul.f32 %v12983_v32, %v10064_v10  ;;  %v3949_v28 = vmul.f32 %v12984_v59, %v10064_v10 }
 0x28c   : >> { %v3950_v23 = vmul.f32 %v12985_v53, %v10064_v10  ;;  %v3951_v49 = vmul.f32 %v12986_v58, %v10064_v10  ;;  %v3952_v13 = vmul.f32 %v12987_v14, %v10064_v10  ;;  %v3953_v22 = vmul.f32 %v12988_v50, %v10064_v10 }
 0x28d   : >> { %v3954_v35 = vmul.f32 %v12989_v45, %v10064_v10  ;;  %v3955_v11 = vmul.f32 %v12990_v16, %v10064_v10  ;;  %v3956_v59 = vmul.f32 %v9962_v21, %v10064_v10  ;;  %v3981_v32 = vrot.slane %v3933_v26, 3 }
 0x28e   : >> { %v3982_v53 = vrot.slane %v3934_v29, 3  ;;  %v3984_v9 = vrot.slane %v3935_v51, 3  ;;  %v3986_v46 = vrot.slane %v3936_v18, 3  ;;  %v3987_v58 = vrot.slane %v3937_v25, 3 }
 0x28f   : >> { %v3989_v33 = vrot.slane %v3938_v34, 3  ;;  %v3991_v6 = vrot.slane %v3939_v40, 3  ;;  %v3992_v14 = vrot.slane %v3940_v15, 3  ;;  %v3994_v20 = vrot.slane %v3941_v7, 3 }
 0x290   : >> { %v3983_v24 = vsel %vm749_vm2, %v3981_v32, %v3982_v53  ;;  %v3985_v50 = vsel %vm749_vm2, %v3982_v53, %v3984_v9  ;;  %v3996_v45 = vrot.slane %v3942_v43, 3  ;;  %v3988_v60 = vsel %vm749_vm2, %v3986_v46, %v3987_v58 }
 0x291   : >> { %v3990_v16 = vsel %vm749_vm2, %v3987_v58, %v3989_v33  ;;  %v3993_v10 = vsel %vm749_vm2, %v3991_v6, %v3992_v14  ;;  %v3997_v26 = vrot.slane %v3943_v19, 3  ;;  %v3995_v29 = vsel %vm749_vm2, %v3992_v14, %v3994_v20 }
 0x292   : >> { %v3999_v51 = vrot.slane %v3944_v31, 3  ;;  %v4001_v18 = vrot.slane %v3945_v5, 3  ;;  %v4002_v25 = vrot.slane %v3946_v62, 3  ;;  %v4004_v40 = vrot.slane %v3947_v4, 3 }
 0x293   : >> { %v3998_v34 = vsel %vm749_vm2, %v3996_v45, %v3997_v26  ;;  %v4006_v15 = vrot.slane %v3948_v55, 3  ;;  %v4007_v32 = vrot.slane %v3949_v28, 3  ;;  %v4009_v46 = vrot.slane %v3950_v23, 3  ;;  %v12992_v45 = vld [vmem:[#allocation27_spill] sm:$0xff] }
 0x294   : >> { %v4000_v7 = vsel %vm749_vm2, %v3997_v26, %v3999_v51  ;;  %v4003_v43 = vsel %vm749_vm2, %v4001_v18, %v4002_v25  ;;  %v4011_v9 = vrot.slane %v3951_v49, 3  ;;  %v4005_v33 = vsel %vm749_vm2, %v4002_v25, %v4004_v40  ;;  %v12996_v18 = vld [vmem:[#allocation37_spill] sm:$0xff] }
 0x295   : >> { %v4008_v19 = vsel %vm749_vm2, %v4006_v15, %v4007_v32  ;;  %v4012_v6 = vrot.slane %v3952_v13, 3  ;;  %v4014_v20 = vrot.slane %v3953_v22, 3  ;;  %v4010_v31 = vsel %vm749_vm2, %v4007_v32, %v4009_v46  ;;  %v12998_v15 = vld [vmem:[#allocation18_spill] sm:$0xff] }
 0x296   : >> { %v4016_v5 = vrot.slane %v3954_v35, 3  ;;  %v4017_v62 = vrot.slane %v3955_v11, 3  ;;  %v4019_v53 = vrot.slane %v3956_v59, 3  ;;  %v10241_v28 = vadd.f32 %v3983_v24, %v10129_v47  ;;  %v13000_v46 = vld [vmem:[#allocation30_spill] sm:$0xff] }
 0x297   : >> { %v4013_v4 = vsel %vm749_vm2, %v4011_v9, %v4012_v6  ;;  %v4015_v55 = vsel %vm749_vm2, %v4012_v6, %v4014_v20  ;;  %v10244_v23 = vadd.f32 %v3985_v50, %v10132_v30  ;;  %v10249_v14 = vadd.f32 %v3988_v60, %v10137_v41  ;;  %v13002_v6 = vld [vmem:[#allocation34_spill] sm:$0xff] }
 0x298   : >> { %v4018_v58 = vsel %vm749_vm2, %v4016_v5, %v4017_v62  ;;  %v4020_v49 = vsel %vm749_vm2, %v4017_v62, %v4019_v53  ;;  %v10252_v13 = vadd.f32 %v3990_v16, %v10140_v27  ;;  %v10255_v59 = vadd.f32 %v3993_v10, %v10143_v12  ;;  %v12993_v16 = vld [vmem:[#allocation36_spill] sm:$0xff]  ;;  %v12994_v10 = vld [vmem:[#allocation23_spill] sm:$0xff]  ;;  %v13004_v62 = vld [vmem:[#allocation17_spill] sm:$0xff] }
 0x299   : >> { %v10258_v22 = vadd.f32 %v3995_v29, %v10146_v48  ;;  %v10261_v47 = vadd.f32 %v3998_v34, %v10149_v2  ;;  %v10264_v30 = vadd.f32 %v4000_v7, %v10152_v56  ;;  %v10267_v24 = vadd.f32 %v4003_v43, %v10155_v61  ;;  %v12995_v29 = vld [vmem:[#allocation28_spill] sm:$0xff]  ;;  %v12997_v34 = vld [vmem:[#allocation35_spill] sm:$0xff] }
 0x29a   : >> { %v10270_v41 = vadd.f32 %v4005_v33, %v10158_v42  ;;  %v10273_v27 = vadd.f32 %v4008_v19, %v10161_v57  ;;  %v10276_v12 = vadd.f32 %v4010_v31, %v10164_v36  ;;  %v10279_v48 = vadd.f32 %v4013_v4, %v10167_v38  ;;  %v12991_v42 = vld [vmem:[#allocation38_spill] sm:$0xff]  ;;  %v12999_v7 = vld [vmem:[#allocation24_spill] sm:$0xff]  ;;  %v13003_v31 = vld [vmem:[#allocation29_spill] sm:$0xff] }
 0x29b   : >> { %v10282_v2 = vadd.f32 %v4015_v55, %v10170_v39  ;;  %v10285_v56 = vadd.f32 %v4018_v58, %v10173_v44  ;;  %v10288_v61 = vadd.f32 %v4020_v49, %v10176_v52  ;;  %v4057_v60 = vmul.f32 %v9797_v54, %v12991_v42  ;;  %v13001_v33 = vld [vmem:[#allocation26_spill] sm:$0xff]  ;;  %v13005_v4 = vld [vmem:[#allocation25_spill] sm:$0xff]  ;;  %v13006_v58 = vld [vmem:[#allocation31_spill] sm:$0xff] }
 0x29c   : >> { %v4058_v57 = vmul.f32 %v9804_v1, %v12991_v42  ;;  %v4059_v36 = vmul.f32 %v9901_v63, %v12991_v42  ;;  %v4060_v38 = vmul.f32 %v9807_v37, %v12991_v42  ;;  %v4061_v39 = vmul.f32 %v9810_v0, %v12991_v42 }
 0x29d   : >> { %v4062_v44 = vmul.f32 %v9912_v8, %v12991_v42  ;;  %v4063_v52 = vmul.f32 %v9817_v17, %v12991_v42  ;;  %v4064_v50 = vmul.f32 %v12975_v3, %v12991_v42  ;;  %v4065_v35 = vmul.f32 %v12992_v45, %v12991_v42 }
 0x29e   : >> { %v4066_v11 = vmul.f32 %v12993_v16, %v12991_v42  ;;  %v4067_v26 = vmul.f32 %v12994_v10, %v12991_v42  ;;  %v4068_v51 = vmul.f32 %v12995_v29, %v12991_v42  ;;  %v4069_v25 = vmul.f32 %v12996_v18, %v12991_v42 }
 0x29f   : >> { %v4070_v40 = vmul.f32 %v12997_v34, %v12991_v42  ;;  %v4071_v32 = vmul.f32 %v12998_v15, %v12991_v42  ;;  %v4072_v43 = vmul.f32 %v12999_v7, %v12991_v42  ;;  %v4073_v9 = vmul.f32 %v13000_v46, %v12991_v42 }
 0x2a0   : >> { %v4074_v19 = vmul.f32 %v13001_v33, %v12991_v42  ;;  %v4075_v20 = vmul.f32 %v13002_v6, %v12991_v42  ;;  %v4076_v5 = vmul.f32 %v13003_v31, %v12991_v42  ;;  %v4077_v53 = vmul.f32 %v13004_v62, %v12991_v42 }
 0x2a1   : >> { %v4078_v55 = vmul.f32 %v13005_v4, %v12991_v42  ;;  %v4079_v49 = vmul.f32 %v13006_v58, %v12991_v42  ;;  %v4080_v46 = vmul.f32 %v9962_v21, %v12991_v42  ;;  %v4105_v7 = vrot.slane %v4057_v60, 4 }
 0x2a2   : >> { %v4106_v33 = vrot.slane %v4058_v57, 4  ;;  %v4108_v15 = vrot.slane %v4059_v36, 4  ;;  %v4110_v34 = vrot.slane %v4060_v38, 4  ;;  %v4111_v6 = vrot.slane %v4061_v39, 4 }
 0x2a3   : >> { %v4113_v18 = vrot.slane %v4062_v44, 4  ;;  %v4115_v29 = vrot.slane %v4063_v52, 4  ;;  %v4116_v31 = vrot.slane %v4064_v50, 4  ;;  %v4118_v16 = vrot.slane %v4065_v35, 4 }
 0x2a4   : >> { %v4107_v10 = vsel %vm874_vm3, %v4105_v7, %v4106_v33  ;;  %v4109_v62 = vsel %vm874_vm3, %v4106_v33, %v4108_v15  ;;  %v4120_v4 = vrot.slane %v4066_v11, 4  ;;  %v4112_v45 = vsel %vm874_vm3, %v4110_v34, %v4111_v6 }
 0x2a5   : >> { %v4114_v58 = vsel %vm874_vm3, %v4111_v6, %v4113_v18  ;;  %v4117_v42 = vsel %vm874_vm3, %v4115_v29, %v4116_v31  ;;  %v4121_v60 = vrot.slane %v4067_v26, 4  ;;  %v4119_v57 = vsel %vm874_vm3, %v4116_v31, %v4118_v16 }
 0x2a6   : >> { %v4123_v36 = vrot.slane %v4068_v51, 4  ;;  %v4125_v38 = vrot.slane %v4069_v25, 4  ;;  %v4126_v39 = vrot.slane %v4070_v40, 4  ;;  %v4128_v52 = vrot.slane %v4071_v32, 4 }
 0x2a7   : >> { %v4122_v44 = vsel %vm874_vm3, %v4120_v4, %v4121_v60  ;;  %v4130_v50 = vrot.slane %v4072_v43, 4  ;;  %v4131_v7 = vrot.slane %v4073_v9, 4  ;;  %v4133_v34 = vrot.slane %v4074_v19, 4  ;;  %v13008_v4 = vld [vmem:[#allocation27_spill] sm:$0xff] }
 0x2a8   : >> { %v4124_v35 = vsel %vm874_vm3, %v4121_v60, %v4123_v36  ;;  %v4127_v11 = vsel %vm874_vm3, %v4125_v38, %v4126_v39  ;;  %v4135_v15 = vrot.slane %v4075_v20, 4  ;;  %v4129_v18 = vsel %vm874_vm3, %v4126_v39, %v4128_v52  ;;  %v13012_v38 = vld [vmem:[#allocation37_spill] sm:$0xff] }
 0x2a9   : >> { %v4132_v26 = vsel %vm874_vm3, %v4130_v50, %v4131_v7  ;;  %v4136_v29 = vrot.slane %v4076_v5, 4  ;;  %v4138_v16 = vrot.slane %v4077_v53, 4  ;;  %v4134_v51 = vsel %vm874_vm3, %v4131_v7, %v4133_v34  ;;  %v13014_v50 = vld [vmem:[#allocation18_spill] sm:$0xff] }
 0x2aa   : >> { %v4140_v25 = vrot.slane %v4078_v55, 4  ;;  %v4141_v40 = vrot.slane %v4079_v49, 4  ;;  %v4143_v33 = vrot.slane %v4080_v46, 4  ;;  %v10353_v9 = vadd.f32 %v4107_v10, %v10241_v28  ;;  %v13016_v34 = vld [vmem:[#allocation30_spill] sm:$0xff] }
 0x2ab   : >> { %v4137_v32 = vsel %vm874_vm3, %v4135_v15, %v4136_v29  ;;  %v4139_v43 = vsel %vm874_vm3, %v4136_v29, %v4138_v16  ;;  %v10356_v19 = vadd.f32 %v4109_v62, %v10244_v23  ;;  %v10361_v31 = vadd.f32 %v4112_v45, %v10249_v14  ;;  %v13018_v29 = vld [vmem:[#allocation34_spill] sm:$0xff] }
 0x2ac   : >> { %v4142_v6 = vsel %vm874_vm3, %v4140_v25, %v4141_v40  ;;  %v4144_v20 = vsel %vm874_vm3, %v4141_v40, %v4143_v33  ;;  %v10364_v5 = vadd.f32 %v4114_v58, %v10252_v13  ;;  %v10367_v46 = vadd.f32 %v4117_v42, %v10255_v59  ;;  %v13009_v58 = vld [vmem:[#allocation36_spill] sm:$0xff]  ;;  %v13010_v42 = vld [vmem:[#allocation23_spill] sm:$0xff]  ;;  %v13020_v40 = vld [vmem:[#allocation17_spill] sm:$0xff] }
 0x2ad   : >> { %v10370_v53 = vadd.f32 %v4119_v57, %v10258_v22  ;;  %v10373_v28 = vadd.f32 %v4122_v44, %v10261_v47  ;;  %v10376_v23 = vadd.f32 %v4124_v35, %v10264_v30  ;;  %v10379_v10 = vadd.f32 %v4127_v11, %v10267_v24  ;;  %v13011_v57 = vld [vmem:[#allocation28_spill] sm:$0xff]  ;;  %v13013_v44 = vld [vmem:[#allocation35_spill] sm:$0xff] }
 0x2ae   : >> { %v10382_v14 = vadd.f32 %v4129_v18, %v10270_v41  ;;  %v10385_v13 = vadd.f32 %v4132_v26, %v10273_v27  ;;  %v10388_v59 = vadd.f32 %v4134_v51, %v10276_v12  ;;  %v10391_v22 = vadd.f32 %v4137_v32, %v10279_v48  ;;  %v13007_v41 = vld [vmem:[#allocation40_spill] sm:$0xff]  ;;  %v13017_v18 = vld [vmem:[#allocation26_spill] sm:$0xff]  ;;  %v13019_v51 = vld [vmem:[#allocation29_spill] sm:$0xff] }
 0x2af   : >> { %v10394_v47 = vadd.f32 %v4139_v43, %v10282_v2  ;;  %v10397_v30 = vadd.f32 %v4142_v6, %v10285_v56  ;;  %v10400_v24 = vadd.f32 %v4144_v20, %v10288_v61  ;;  %v4181_v45 = vmul.f32 %v9797_v54, %v13007_v41  ;;  %v13015_v35 = vld [vmem:[#allocation24_spill] sm:$0xff]  ;;  %v13021_v32 = vld [vmem:[#allocation25_spill] sm:$0xff]  ;;  %v13022_v6 = vld [vmem:[#allocation31_spill] sm:$0xff] }
 0x2b0   : >> { %v4182_v27 = vmul.f32 %v9804_v1, %v13007_v41  ;;  %v4183_v12 = vmul.f32 %v9901_v63, %v13007_v41  ;;  %v4184_v48 = vmul.f32 %v9807_v37, %v13007_v41  ;;  %v4185_v2 = vmul.f32 %v9810_v0, %v13007_v41 }
 0x2b1   : >> { %v4186_v56 = vmul.f32 %v9912_v8, %v13007_v41  ;;  %v4187_v61 = vmul.f32 %v9817_v17, %v13007_v41  ;;  %v4188_v62 = vmul.f32 %v12975_v3, %v13007_v41  ;;  %v4189_v55 = vmul.f32 %v13008_v4, %v13007_v41 }
 0x2b2   : >> { %v4190_v49 = vmul.f32 %v13009_v58, %v13007_v41  ;;  %v4191_v60 = vmul.f32 %v13010_v42, %v13007_v41  ;;  %v4192_v36 = vmul.f32 %v13011_v57, %v13007_v41  ;;  %v4193_v39 = vmul.f32 %v13012_v38, %v13007_v41 }
 0x2b3   : >> { %v4194_v52 = vmul.f32 %v13013_v44, %v13007_v41  ;;  %v4195_v7 = vmul.f32 %v13014_v50, %v13007_v41  ;;  %v4196_v11 = vmul.f32 %v13015_v35, %v13007_v41  ;;  %v4197_v15 = vmul.f32 %v13016_v34, %v13007_v41 }
 0x2b4   : >> { %v4198_v26 = vmul.f32 %v13017_v18, %v13007_v41  ;;  %v4199_v16 = vmul.f32 %v13018_v29, %v13007_v41  ;;  %v4200_v25 = vmul.f32 %v13019_v51, %v13007_v41  ;;  %v4201_v33 = vmul.f32 %v13020_v40, %v13007_v41 }
 0x2b5   : >> { %v4202_v43 = vmul.f32 %v13021_v32, %v13007_v41  ;;  %v4203_v20 = vmul.f32 %v13022_v6, %v13007_v41  ;;  %v4204_v34 = vmul.f32 %v9962_v21, %v13007_v41  ;;  %v4229_v35 = vrot.slane %v4181_v45, 5 }
 0x2b6   : >> { %v4230_v18 = vrot.slane %v4182_v27, 5  ;;  %v4232_v50 = vrot.slane %v4183_v12, 5  ;;  %v4234_v44 = vrot.slane %v4184_v48, 5  ;;  %v4235_v29 = vrot.slane %v4185_v2, 5 }
 0x2b7   : >> { %v4237_v38 = vrot.slane %v4186_v56, 5  ;;  %v4239_v57 = vrot.slane %v4187_v61, 5  ;;  %v4240_v51 = vrot.slane %v4188_v62, 5  ;;  %v4242_v58 = vrot.slane %v4189_v55, 5 }
 0x2b8   : >> { %v4231_v42 = vsel %vm999_vm4, %v4229_v35, %v4230_v18  ;;  %v4233_v40 = vsel %vm999_vm4, %v4230_v18, %v4232_v50  ;;  %v4244_v32 = vrot.slane %v4190_v49, 5  ;;  %v4236_v4 = vsel %vm999_vm4, %v4234_v44, %v4235_v29 }
 0x2b9   : >> { %v4238_v6 = vsel %vm999_vm4, %v4235_v29, %v4237_v38  ;;  %v4241_v41 = vsel %vm999_vm4, %v4239_v57, %v4240_v51  ;;  %v4245_v45 = vrot.slane %v4191_v60, 5  ;;  %v4243_v27 = vsel %vm999_vm4, %v4240_v51, %v4242_v58 }
 0x2ba   : >> { %v4247_v12 = vrot.slane %v4192_v36, 5  ;;  %v4249_v48 = vrot.slane %v4193_v39, 5  ;;  %v4250_v2 = vrot.slane %v4194_v52, 5  ;;  %v4252_v61 = vrot.slane %v4195_v7, 5 }
 0x2bb   : >> { %v4246_v56 = vsel %vm999_vm4, %v4244_v32, %v4245_v45  ;;  %v4254_v62 = vrot.slane %v4196_v11, 5  ;;  %v4255_v35 = vrot.slane %v4197_v15, 5  ;;  %v4257_v44 = vrot.slane %v4198_v26, 5 }
 0x2bc   : >> { %v4248_v55 = vsel %vm999_vm4, %v4245_v45, %v4247_v12  ;;  %v4251_v49 = vsel %vm999_vm4, %v4249_v48, %v4250_v2  ;;  %v4259_v50 = vrot.slane %v4199_v16, 5  ;;  %v4253_v38 = vsel %vm999_vm4, %v4250_v2, %v4252_v61  ;;  %v13032_v48 = vld [vmem:[#allocation30_spill] sm:$0xff] }
 0x2bd   : >> { %v4256_v60 = vsel %vm999_vm4, %v4254_v62, %v4255_v35  ;;  %v4260_v57 = vrot.slane %v4200_v25, 5  ;;  %v4262_v58 = vrot.slane %v4201_v33, 5  ;;  %v4258_v36 = vsel %vm999_vm4, %v4255_v35, %v4257_v44  ;;  %v13034_v62 = vld [vmem:[#allocation34_spill] sm:$0xff]  ;;  %v13036_v44 = vld [vmem:[#allocation17_spill] sm:$0xff] }
 0x2be   : >> { %v4264_v39 = vrot.slane %v4202_v43, 5  ;;  %v4265_v52 = vrot.slane %v4203_v20, 5  ;;  %v4267_v18 = vrot.slane %v4204_v34, 5  ;;  %v10465_v15 = vadd.f32 %v4231_v42, %v10353_v9 }
 0x2bf   : >> { %v4261_v7 = vsel %vm999_vm4, %v4259_v50, %v4260_v57  ;;  %v4263_v11 = vsel %vm999_vm4, %v4260_v57, %v4262_v58  ;;  %v10468_v26 = vadd.f32 %v4233_v40, %v10356_v19  ;;  %v10473_v51 = vadd.f32 %v4236_v4, %v10361_v31  ;;  %v13038_v57 = vld [vmem:[#allocation31_spill] sm:$0xff] }
 0x2c0   : >> { %v4266_v29 = vsel %vm999_vm4, %v4264_v39, %v4265_v52  ;;  %v4268_v16 = vsel %vm999_vm4, %v4265_v52, %v4267_v18  ;;  %v10476_v25 = vadd.f32 %v4238_v6, %v10364_v5  ;;  %v10479_v34 = vadd.f32 %v4241_v41, %v10367_v46 }
 0x2c1   : >> { %v10482_v33 = vadd.f32 %v4243_v27, %v10370_v53  ;;  %v10485_v9 = vadd.f32 %v4246_v56, %v10373_v28  ;;  %v10488_v19 = vadd.f32 %v4248_v55, %v10376_v23  ;;  %v10491_v42 = vadd.f32 %v4251_v49, %v10379_v10  ;;  %v13031_v27 = vld [vmem:[#allocation24_spill] sm:$0xff]  ;;  %v13033_v56 = vld [vmem:[#allocation26_spill] sm:$0xff]  ;;  %v13035_v55 = vld [vmem:[#allocation29_spill] sm:$0xff] }
 0x2c2   : >> { %v10494_v31 = vadd.f32 %v4253_v38, %v10382_v14  ;;  %v10497_v5 = vadd.f32 %v4256_v60, %v10385_v13  ;;  %v10500_v46 = vadd.f32 %v4258_v36, %v10388_v59  ;;  %v10503_v53 = vadd.f32 %v4261_v7, %v10391_v22  ;;  %v13023_v14 = vld [vmem:[#allocation19_spill] sm:$0xff]  ;;  %v13037_v38 = vld [vmem:[#allocation25_spill] sm:$0xff] }
 0x2c3   : >> { %v10506_v28 = vadd.f32 %v4263_v11, %v10394_v47  ;;  %v10509_v23 = vadd.f32 %v4266_v29, %v10397_v30  ;;  %v10512_v10 = vadd.f32 %v4268_v16, %v10400_v24  ;;  %v4305_v4 = vmul.f32 %v9797_v54, %v13023_v14 }
 0x2c4   : >> { %v4306_v13 = vmul.f32 %v9804_v1, %v13023_v14  ;;  %v4307_v59 = vmul.f32 %v9901_v63, %v13023_v14  ;;  %v4308_v22 = vmul.f32 %v9807_v37, %v13023_v14  ;;  %v4309_v47 = vmul.f32 %v9810_v0, %v13023_v14  ;;  %v13024_v1 = vld [vmem:[#allocation27_spill] sm:$0xff]  ;;  %v13025_v63 = vld [vmem:[#allocation36_spill] sm:$0xff] }
 0x2c5   : >> { %v4310_v30 = vmul.f32 %v9912_v8, %v13023_v14  ;;  %v4311_v24 = vmul.f32 %v9817_v17, %v13023_v14  ;;  %v4312_v54 = vmul.f32 %v12975_v3, %v13023_v14  ;;  %v4313_v40 = vmul.f32 %v13024_v1, %v13023_v14  ;;  %v13026_v37 = vld [vmem:[#allocation23_spill] sm:$0xff]  ;;  %v13027_v0 = vld [vmem:[#allocation28_spill] sm:$0xff]  ;;  %v13028_v8 = vld [vmem:[#allocation37_spill] sm:$0xff] }
 0x2c6   : >> { %v4314_v32 = vmul.f32 %v13025_v63, %v13023_v14  ;;  %v4315_v43 = vmul.f32 %v13026_v37, %v13023_v14  ;;  %v4316_v6 = vmul.f32 %v13027_v0, %v13023_v14  ;;  %v4317_v20 = vmul.f32 %v13028_v8, %v13023_v14  ;;  %v13029_v17 = vld [vmem:[#allocation35_spill] sm:$0xff]  ;;  %v13030_v3 = vld [vmem:[#allocation18_spill] sm:$0xff] }
 0x2c7   : >> { %v4318_v41 = vmul.f32 %v13029_v17, %v13023_v14  ;;  %v4319_v45 = vmul.f32 %v13030_v3, %v13023_v14  ;;  %v4320_v12 = vmul.f32 %v13031_v27, %v13023_v14  ;;  %v4321_v2 = vmul.f32 %v13032_v48, %v13023_v14 }
 0x2c8   : >> { %v4322_v61 = vmul.f32 %v13033_v56, %v13023_v14  ;;  %v4323_v35 = vmul.f32 %v13034_v62, %v13023_v14  ;;  %v4324_v49 = vmul.f32 %v13035_v55, %v13023_v14  ;;  %v4325_v50 = vmul.f32 %v13036_v44, %v13023_v14 }
 0x2c9   : >> { %v4326_v60 = vmul.f32 %v13037_v38, %v13023_v14  ;;  %v4327_v58 = vmul.f32 %v13038_v57, %v13023_v14  ;;  %v4328_v36 = vmul.f32 %v9962_v21, %v13023_v14  ;;  %v4353_v39 = vrot.slane %v4305_v4, 6  ;;  %v10586_v57 = vld [vmem:[%s6650_s17 + $0x80] sm:$0xff] }
 0x2ca   : >> { %v4354_v52 = vrot.slane %v4306_v13, 6  ;;  %v4356_v18 = vrot.slane %v4307_v59, 6  ;;  %v4358_v7 = vrot.slane %v4308_v22, 6  ;;  %v4359_v11 = vrot.slane %v4309_v47, 6 }
 0x2cb   : >> { %v4361_v29 = vrot.slane %v4310_v30, 6  ;;  %v4363_v16 = vrot.slane %v4311_v24, 6  ;;  %v4364_v1 = vrot.slane %v4312_v54, 6  ;;  %v4366_v0 = vrot.slane %v4313_v40, 6 }
 0x2cc   : >> { %v4355_v63 = vsel %vm1124_vm5, %v4353_v39, %v4354_v52  ;;  %v4357_v37 = vsel %vm1124_vm5, %v4354_v52, %v4356_v18  ;;  %v4368_v8 = vrot.slane %v4314_v32, 6  ;;  %v4360_v17 = vsel %vm1124_vm5, %v4358_v7, %v4359_v11  ;;  %v10599_v52 = vld [vmem:[%s6650_s17 + $0xa8] sm:$0xff]  ;;  %v10605_v18 = vld [vmem:[%s6650_s17 + $0xc0] sm:$0xff] }
 0x2cd   : >> { %v4362_v3 = vsel %vm1124_vm5, %v4359_v11, %v4361_v29  ;;  %v4365_v21 = vsel %vm1124_vm5, %v4363_v16, %v4364_v1  ;;  %v4369_v14 = vrot.slane %v4315_v43, 6  ;;  %v4367_v4 = vsel %vm1124_vm5, %v4364_v1, %v4366_v0  ;;  %13040 = vst [vmem:[#allocation38_spill] sm:$0xff] %v10605_v18  ;;  %v10615_v11 = vld [vmem:[%s6650_s17 + $0xd8] sm:$0xff]  ;;  %v10618_v29 = vld [vmem:[%s6650_s17 + $0xe0] sm:$0xff] }
 0x2ce   : >> { %v4371_v13 = vrot.slane %v4316_v6, 6  ;;  %v4373_v59 = vrot.slane %v4317_v20, 6  ;;  %v4374_v22 = vrot.slane %v4318_v41, 6  ;;  %v4376_v30 = vrot.slane %v4319_v45, 6  ;;  %13042 = vst [vmem:[#allocation19_spill] sm:$0xff] %v10615_v11  ;;  %13043 = vst [vmem:[#allocation27_spill] sm:$0xff] %v10618_v29 }
 0x2cf   : >> { %v4370_v47 = vsel %vm1124_vm5, %v4368_v8, %v4369_v14  ;;  %v4378_v24 = vrot.slane %v4320_v12, 6  ;;  %v4379_v54 = vrot.slane %v4321_v2, 6  ;;  %v4381_v27 = vrot.slane %v4322_v61, 6  ;;  %v10637_v0 = vld [vmem:[%s6650_s17 + $0x120] sm:$0xff]  ;;  %v10640_v8 = vld [vmem:[%s6650_s17 + $0x128] sm:$0xff] }
 0x2d0   : >> { %v4372_v40 = vsel %vm1124_vm5, %v4369_v14, %v4371_v13  ;;  %v4375_v32 = vsel %vm1124_vm5, %v4373_v59, %v4374_v22  ;;  %v4383_v48 = vrot.slane %v4323_v35, 6  ;;  %v4377_v56 = vsel %vm1124_vm5, %v4374_v22, %v4376_v30  ;;  %13048 = vst [vmem:[#allocation35_spill] sm:$0xff] %v10637_v0  ;;  %13049 = vst [vmem:[#allocation18_spill] sm:$0xff] %v10640_v8 }
 0x2d1   : >> { %v4380_v43 = vsel %vm1124_vm5, %v4378_v24, %v4379_v54  ;;  %v4384_v6 = vrot.slane %v4324_v49, 6  ;;  %v4386_v20 = vrot.slane %v4325_v50, 6  ;;  %v4382_v41 = vsel %vm1124_vm5, %v4379_v54, %v4381_v27  ;;  %v10579_v49 = vld [vmem:[%s6650_s17 + $0x78] sm:$0xff] }
 0x2d2   : >> { %v4388_v45 = vrot.slane %v4326_v60, 6  ;;  %v4389_v12 = vrot.slane %v4327_v58, 6  ;;  %v4391_v2 = vrot.slane %v4328_v36, 6  ;;  %v4409_v35 = vadd.f32 %v4355_v63, %v10465_v15  ;;  %v10589_v58 = vld [vmem:[%s6650_s17 + $0x90] sm:$0xff]  ;;  %v10592_v15 = vld [vmem:[%s6650_s17 + $0x98] sm:$0xff] }
 0x2d3   : >> { %v4385_v62 = vsel %vm1124_vm5, %v4383_v48, %v4384_v6  ;;  %v4387_v61 = vsel %vm1124_vm5, %v4384_v6, %v4386_v20  ;;  %v4410_v55 = vadd.f32 %v4357_v37, %v10468_v26  ;;  %v4411_v38 = vadd.f32 %v4360_v17, %v10473_v51  ;;  %v10625_v37 = vld [vmem:[%s6650_s17 + $0xf0] sm:$0xff]  ;;  %v13050_v17 = vld [vmem:[#allocation20_spill] sm:$0xff] }
 0x2d4   : >> { %v4390_v44 = vsel %vm1124_vm5, %v4388_v45, %v4389_v12  ;;  %v4392_v50 = vsel %vm1124_vm5, %v4389_v12, %v4391_v2  ;;  %v4412_v60 = vadd.f32 %v4362_v3, %v10476_v25  ;;  %v4413_v26 = vadd.f32 %v4365_v21, %v10479_v34  ;;  %v10602_v25 = vld [vmem:[%s6650_s17 + $0xb0] sm:$0xff]  ;;  %13044 = vst [vmem:[#allocation36_spill] sm:$0xff] %v10625_v37  ;;  %v10694_v12 = vld [vmem:[%s6650_s17 + $0xa0] sm:$0x3f] }
 0x2d5   : >> { %v4414_v36 = vadd.f32 %v4367_v4, %v10482_v33  ;;  %v4415_v39 = vadd.f32 %v4370_v47, %v10485_v9  ;;  %v4416_v51 = vadd.f32 %v4372_v40, %v10488_v19  ;;  %13039 = vst [vmem:[#allocation33_spill] sm:$0xff] %v10602_v25  ;;  %v4417_v7 = vadd.f32 %v4375_v32, %v10491_v42  ;;  %v10612_v19 = vld [vmem:[%s6650_s17 + $0xc8] sm:$0xff] }
 0x2d6   : >> { %v4418_v34 = vadd.f32 %v4377_v56, %v10494_v31  ;;  %v4419_v33 = vadd.f32 %v4380_v43, %v10497_v5  ;;  %v4420_v9 = vadd.f32 %v4382_v41, %v10500_v46  ;;  %13041 = vst [vmem:[#allocation40_spill] sm:$0xff] %v10612_v19  ;;  %v4421_v16 = vadd.f32 %v4385_v62, %v10503_v53  ;;  %v10628_v31 = vld [vmem:[%s6650_s17 + $0xf8] sm:$0xff]  ;;  %v10631_v5 = vld [vmem:[%s6650_s17 + $0x108] sm:$0xff]  ;;  %v10634_v46 = vld [vmem:[%s6650_s17 + $0x110] sm:$0xff] }
 0x2d7   : >> { %v4422_v1 = vadd.f32 %v4387_v61, %v10506_v28  ;;  %v4423_v63 = vadd.f32 %v4390_v44, %v10509_v23  ;;  %v4424_v42 = vadd.f32 %v4392_v50, %v10512_v10  ;;  %13045 = vst [vmem:[#allocation23_spill] sm:$0xff] %v10628_v31  ;;  %13046 = vst [vmem:[#allocation28_spill] sm:$0xff] %v10631_v5  ;;  %v10683_v43 = vld [vmem:[%s6650_s17 + $0x88] sm:$0x3f]  ;;  %v10708_v44 = vld [vmem:[%s6650_s17 + $0xd0] sm:$0x3f] }
 0x2d8   : >> { %13047 = vst [vmem:[#allocation37_spill] sm:$0xff] %v10634_v46  ;;  %v4456_v53 = vmul.f32 %v10579_v49, %v13050_v17  ;;  %v4457_v28 = vmul.f32 %v10586_v57, %v13050_v17  ;;  %v4458_v23 = vmul.f32 %v10589_v58, %v13050_v17  ;;  %v4459_v10 = vmul.f32 %v10592_v15, %v13050_v17 }
 0x2d9   : >> { %v4460_v3 = vmul.f32 %v10599_v52, %v13050_v17  ;;  %v4461_v21 = vmul.f32 %v10602_v25, %v13050_v17  ;;  %v4462_v14 = vmul.f32 %v10605_v18, %v13050_v17  ;;  %v4463_v4 = vmul.f32 %v10612_v19, %v13050_v17  ;;  %13052 = vst [vmem:[#allocation30_spill] sm:$0xff] %v10708_v44 }
 0x2da   : >> { %v4464_v13 = vmul.f32 %v10615_v11, %v13050_v17  ;;  %v4465_v59 = vmul.f32 %v10618_v29, %v13050_v17  ;;  %v4466_v22 = vmul.f32 %v10625_v37, %v13050_v17  ;;  %v4467_v47 = vmul.f32 %v10628_v31, %v13050_v17 }
 0x2db   : >> { %v4468_v30 = vmul.f32 %v10631_v5, %v13050_v17  ;;  %v4469_v24 = vmul.f32 %v10634_v46, %v13050_v17  ;;  %v4470_v54 = vmul.f32 %v10637_v0, %v13050_v17  ;;  %v4471_v40 = vmul.f32 %v10640_v8, %v13050_v17  ;;  %v10741_v17 = vld [vmem:[%s6650_s17 + $0x118] sm:$0x3f] }
 0x2dc   : >> { %v10674_v32 = vadd.f32 %v4456_v53, %v4409_v35  ;;  %v10676_v27 = vadd.f32 %v4457_v28, %v4410_v55  ;;  %v10678_v48 = vadd.f32 %v4458_v23, %v4411_v38  ;;  %v10680_v56 = vadd.f32 %v4459_v10, %v4412_v60  ;;  %v10705_v55 = vld [vmem:[%s6650_s17 + $0xb8] sm:$0x3f]  ;;  %13056 = vst [vmem:[#allocation29_spill] sm:$0xff] %v10741_v17  ;;  %v10744_v53 = vld [vmem:[%s6650_s17 + $0x130] sm:$0x3f] }
 0x2dd   : >> { %v10685_v6 = vadd.f32 %v4460_v3, %v4413_v26  ;;  %v10687_v20 = vadd.f32 %v4461_v21, %v4414_v36  ;;  %v10689_v41 = vadd.f32 %v4462_v14, %v4415_v39  ;;  %v10691_v45 = vadd.f32 %v4463_v4, %v4416_v51  ;;  %13051 = vst [vmem:[#allocation24_spill] sm:$0xff] %v10705_v55  ;;  %v10719_v36 = vld [vmem:[%s6650_s17 + $0xe8] sm:$0x3f]  ;;  %v13054_v39 = vld [vmem:[#allocation39_spill] sm:$0xff] }
 0x2de   : >> { %v10696_v2 = vadd.f32 %v4464_v13, %v4417_v7  ;;  %v10698_v62 = vadd.f32 %v4465_v59, %v4418_v34  ;;  %v10700_v61 = vadd.f32 %v4466_v22, %v4419_v33  ;;  %v10702_v35 = vadd.f32 %v4467_v47, %v4420_v9  ;;  %13053 = vst [vmem:[#allocation26_spill] sm:$0xff] %v10719_v36  ;;  %v10730_v9 = vld [vmem:[%s6650_s17 + $0x100] sm:$0x3f] }
 0x2df   : >> { %v10710_v50 = vadd.f32 %v4468_v30, %v4421_v16  ;;  %v10712_v38 = vadd.f32 %v4469_v24, %v4422_v1  ;;  %v10714_v60 = vadd.f32 %v4470_v54, %v4423_v63  ;;  %v10716_v26 = vadd.f32 %v4471_v40, %v4424_v42  ;;  %13055 = vst [vmem:[#allocation34_spill] sm:$0xff] %v10730_v9 }
 0x2e0   : >> { %v4492_v51 = vmul.f32 %v10579_v49, %v13054_v39  ;;  %v4493_v7 = vmul.f32 %v10586_v57, %v13054_v39  ;;  %v4494_v34 = vmul.f32 %v10683_v43, %v13054_v39  ;;  %v4495_v33 = vmul.f32 %v10589_v58, %v13054_v39 }
 0x2e1   : >> { %v4496_v16 = vmul.f32 %v10592_v15, %v13054_v39  ;;  %v4497_v1 = vmul.f32 %v10694_v12, %v13054_v39  ;;  %v4498_v63 = vmul.f32 %v10599_v52, %v13054_v39  ;;  %v4499_v42 = vmul.f32 %v10602_v25, %v13054_v39 }
 0x2e2   : >> { %v4500_v28 = vmul.f32 %v10705_v55, %v13054_v39  ;;  %v4501_v23 = vmul.f32 %v10605_v18, %v13054_v39  ;;  %v4502_v10 = vmul.f32 %v10612_v19, %v13054_v39  ;;  %v4503_v3 = vmul.f32 %v10708_v44, %v13054_v39 }
 0x2e3   : >> { %v4504_v21 = vmul.f32 %v10615_v11, %v13054_v39  ;;  %v4505_v14 = vmul.f32 %v10618_v29, %v13054_v39  ;;  %v4506_v4 = vmul.f32 %v10719_v36, %v13054_v39  ;;  %v4507_v13 = vmul.f32 %v10625_v37, %v13054_v39 }
 0x2e4   : >> { %v4508_v59 = vmul.f32 %v10628_v31, %v13054_v39  ;;  %v4509_v22 = vmul.f32 %v10730_v9, %v13054_v39  ;;  %v4510_v47 = vmul.f32 %v10631_v5, %v13054_v39  ;;  %v4511_v30 = vmul.f32 %v10634_v46, %v13054_v39 }
 0x2e5   : >> { %v4512_v24 = vmul.f32 %v10741_v17, %v13054_v39  ;;  %v4513_v54 = vmul.f32 %v10637_v0, %v13054_v39  ;;  %v4514_v40 = vmul.f32 %v10640_v8, %v13054_v39  ;;  %v4515_v31 = vmul.f32 %v10744_v53, %v13054_v39 }
 0x2e6   : >> { %v4540_v37 = vrot.slane %v4492_v51, 1  ;;  %v4541_v9 = vrot.slane %v4493_v7, 1  ;;  %v4543_v36 = vrot.slane %v4494_v34, 1  ;;  %v4545_v29 = vrot.slane %v4495_v33, 1 }
 0x2e7   : >> { %v4546_v5 = vrot.slane %v4496_v16, 1  ;;  %v4548_v11 = vrot.slane %v4497_v1, 1  ;;  %v4550_v44 = vrot.slane %v4498_v63, 1  ;;  %v4551_v46 = vrot.slane %v4499_v42, 1 }
 0x2e8   : >> { %v4542_v19 = vsel %vm499_vm0, %v4540_v37, %v4541_v9  ;;  %v4544_v17 = vsel %vm499_vm0, %v4541_v9, %v4543_v36  ;;  %v4553_v18 = vrot.slane %v4500_v28, 1  ;;  %v4555_v0 = vrot.slane %v4501_v23, 1 }
 0x2e9   : >> { %v4547_v55 = vsel %vm499_vm0, %v4545_v29, %v4546_v5  ;;  %v4549_v8 = vsel %vm499_vm0, %v4546_v5, %v4548_v11  ;;  %v4552_v39 = vsel %vm499_vm0, %v4550_v44, %v4551_v46  ;;  %v4556_v51 = vrot.slane %v4502_v10, 1 }
 0x2ea   : >> { %v4554_v7 = vsel %vm499_vm0, %v4551_v46, %v4553_v18  ;;  %v4558_v34 = vrot.slane %v4503_v3, 1  ;;  %v4560_v33 = vrot.slane %v4504_v21, 1  ;;  %v4561_v16 = vrot.slane %v4505_v14, 1 }
 0x2eb   : >> { %v4557_v1 = vsel %vm499_vm0, %v4555_v0, %v4556_v51  ;;  %v4563_v63 = vrot.slane %v4506_v4, 1  ;;  %v4565_v37 = vrot.slane %v4507_v13, 1  ;;  %v4566_v42 = vrot.slane %v4508_v59, 1 }
 0x2ec   : >> { %v4559_v36 = vsel %vm499_vm0, %v4556_v51, %v4558_v34  ;;  %v4562_v9 = vsel %vm499_vm0, %v4560_v33, %v4561_v16  ;;  %v4568_v29 = vrot.slane %v4509_v22, 1  ;;  %v4570_v28 = vrot.slane %v4510_v47, 1  ;;  %v13062_v33 = vld [vmem:[#allocation19_spill] sm:$0xff] }
 0x2ed   : >> { %v4564_v11 = vsel %vm499_vm0, %v4561_v16, %v4563_v63  ;;  %v4567_v5 = vsel %vm499_vm0, %v4565_v37, %v4566_v42  ;;  %v4571_v44 = vrot.slane %v4511_v30, 1  ;;  %v4573_v18 = vrot.slane %v4512_v24, 1  ;;  %v13064_v37 = vld [vmem:[#allocation26_spill] sm:$0xff] }
 0x2ee   : >> { %v4569_v46 = vsel %vm499_vm0, %v4566_v42, %v4568_v29  ;;  %v4575_v23 = vrot.slane %v4513_v54, 1  ;;  %v4576_v10 = vrot.slane %v4514_v40, 1  ;;  %v4578_v0 = vrot.slane %v4515_v31, 1  ;;  %v13059_v54 = vld [vmem:[#allocation38_spill] sm:$0xff]  ;;  %v13066_v29 = vld [vmem:[#allocation23_spill] sm:$0xff] }
 0x2ef   : >> { %v4572_v3 = vsel %vm499_vm0, %v4570_v28, %v4571_v44  ;;  %v4574_v21 = vsel %vm499_vm0, %v4571_v44, %v4573_v18  ;;  %v10793_v14 = vadd.f32 %v4542_v19, %v10674_v32  ;;  %v10796_v4 = vadd.f32 %v4544_v17, %v10676_v27  ;;  %v13058_v17 = vld [vmem:[#allocation24_spill] sm:$0xff] }
 0x2f0   : >> { %v4577_v13 = vsel %vm499_vm0, %v4575_v23, %v4576_v10  ;;  %v4579_v59 = vsel %vm499_vm0, %v4576_v10, %v4578_v0  ;;  %v10801_v22 = vadd.f32 %v4547_v55, %v10678_v48  ;;  %v10804_v47 = vadd.f32 %v4549_v8, %v10680_v56  ;;  %v13068_v44 = vld [vmem:[#allocation28_spill] sm:$0xff]  ;;  %v13070_v10 = vld [vmem:[#allocation29_spill] sm:$0xff] }
 0x2f1   : >> { %v10807_v31 = vadd.f32 %v4552_v39, %v10685_v6  ;;  %v10810_v30 = vadd.f32 %v4554_v7, %v10687_v20  ;;  %v10813_v19 = vadd.f32 %v4557_v1, %v10689_v41  ;;  %v10816_v32 = vadd.f32 %v4559_v36, %v10691_v45  ;;  %v13060_v39 = vld [vmem:[#allocation40_spill] sm:$0xff]  ;;  %v13061_v7 = vld [vmem:[#allocation30_spill] sm:$0xff]  ;;  %v13063_v1 = vld [vmem:[#allocation27_spill] sm:$0xff] }
 0x2f2   : >> { %v10819_v27 = vadd.f32 %v4562_v9, %v10696_v2  ;;  %v10822_v48 = vadd.f32 %v4564_v11, %v10698_v62  ;;  %v10825_v8 = vadd.f32 %v4567_v5, %v10700_v61  ;;  %v10828_v56 = vadd.f32 %v4569_v46, %v10702_v35  ;;  %v13057_v2 = vld [vmem:[#allocation32_spill] sm:$0xff]  ;;  %v13067_v11 = vld [vmem:[#allocation34_spill] sm:$0xff]  ;;  %v13069_v46 = vld [vmem:[#allocation37_spill] sm:$0xff] }
 0x2f3   : >> { %v10831_v6 = vadd.f32 %v4572_v3, %v10710_v50  ;;  %v10834_v20 = vadd.f32 %v4574_v21, %v10712_v38  ;;  %v10837_v41 = vadd.f32 %v4577_v13, %v10714_v60  ;;  %v10840_v45 = vadd.f32 %v4579_v59, %v10716_v26  ;;  %v13065_v36 = vld [vmem:[#allocation36_spill] sm:$0xff]  ;;  %v13071_v3 = vld [vmem:[#allocation35_spill] sm:$0xff]  ;;  %v13072_v13 = vld [vmem:[#allocation18_spill] sm:$0xff] }
 0x2f4   : >> { %v4616_v62 = vmul.f32 %v10579_v49, %v13057_v2  ;;  %v4617_v61 = vmul.f32 %v10586_v57, %v13057_v2  ;;  %v4618_v35 = vmul.f32 %v10683_v43, %v13057_v2  ;;  %v4619_v55 = vmul.f32 %v10589_v58, %v13057_v2 }
 0x2f5   : >> { %v4620_v50 = vmul.f32 %v10592_v15, %v13057_v2  ;;  %v4621_v38 = vmul.f32 %v10694_v12, %v13057_v2  ;;  %v4622_v60 = vmul.f32 %v10599_v52, %v13057_v2  ;;  %v4623_v26 = vmul.f32 %v10602_v25, %v13057_v2 }
 0x2f6   : >> { %v4624_v24 = vmul.f32 %v13058_v17, %v13057_v2  ;;  %v4625_v40 = vmul.f32 %v13059_v54, %v13057_v2  ;;  %v4626_v51 = vmul.f32 %v13060_v39, %v13057_v2  ;;  %v4627_v34 = vmul.f32 %v13061_v7, %v13057_v2 }
 0x2f7   : >> { %v4628_v16 = vmul.f32 %v13062_v33, %v13057_v2  ;;  %v4629_v63 = vmul.f32 %v13063_v1, %v13057_v2  ;;  %v4630_v42 = vmul.f32 %v13064_v37, %v13057_v2  ;;  %v4631_v9 = vmul.f32 %v13065_v36, %v13057_v2 }
 0x2f8   : >> { %v4632_v28 = vmul.f32 %v13066_v29, %v13057_v2  ;;  %v4633_v5 = vmul.f32 %v13067_v11, %v13057_v2  ;;  %v4634_v18 = vmul.f32 %v13068_v44, %v13057_v2  ;;  %v4635_v23 = vmul.f32 %v13069_v46, %v13057_v2 }
 0x2f9   : >> { %v4636_v0 = vmul.f32 %v13070_v10, %v13057_v2  ;;  %v4637_v21 = vmul.f32 %v13071_v3, %v13057_v2  ;;  %v4638_v59 = vmul.f32 %v13072_v13, %v13057_v2  ;;  %v4639_v29 = vmul.f32 %v10744_v53, %v13057_v2 }
 0x2fa   : >> { %v4664_v36 = vrot.slane %v4616_v62, 2  ;;  %v4665_v11 = vrot.slane %v4617_v61, 2  ;;  %v4667_v37 = vrot.slane %v4618_v35, 2  ;;  %v4669_v1 = vrot.slane %v4619_v55, 2 }
 0x2fb   : >> { %v4670_v44 = vrot.slane %v4620_v50, 2  ;;  %v4672_v33 = vrot.slane %v4621_v38, 2  ;;  %v4674_v7 = vrot.slane %v4622_v60, 2  ;;  %v4675_v46 = vrot.slane %v4623_v26, 2 }
 0x2fc   : >> { %v4666_v39 = vsel %vm624_vm1, %v4664_v36, %v4665_v11  ;;  %v4668_v10 = vsel %vm624_vm1, %v4665_v11, %v4667_v37  ;;  %v4677_v54 = vrot.slane %v4624_v24, 2  ;;  %v4679_v3 = vrot.slane %v4625_v40, 2 }
 0x2fd   : >> { %v4671_v17 = vsel %vm624_vm1, %v4669_v1, %v4670_v44  ;;  %v4673_v13 = vsel %vm624_vm1, %v4670_v44, %v4672_v33  ;;  %v4676_v2 = vsel %vm624_vm1, %v4674_v7, %v4675_v46  ;;  %v4680_v62 = vrot.slane %v4626_v51, 2 }
 0x2fe   : >> { %v4678_v61 = vsel %vm624_vm1, %v4675_v46, %v4677_v54  ;;  %v4682_v35 = vrot.slane %v4627_v34, 2  ;;  %v4684_v55 = vrot.slane %v4628_v16, 2  ;;  %v4685_v50 = vrot.slane %v4629_v63, 2 }
 0x2ff   : >> { %v4681_v38 = vsel %vm624_vm1, %v4679_v3, %v4680_v62  ;;  %v4687_v60 = vrot.slane %v4630_v42, 2  ;;  %v4689_v26 = vrot.slane %v4631_v9, 2  ;;  %v4690_v36 = vrot.slane %v4632_v28, 2 }
 0x300   : >> { %v4683_v24 = vsel %vm624_vm1, %v4680_v62, %v4682_v35  ;;  %v4686_v40 = vsel %vm624_vm1, %v4684_v55, %v4685_v50  ;;  %v4692_v1 = vrot.slane %v4633_v5, 2  ;;  %v4694_v37 = vrot.slane %v4634_v18, 2  ;;  %v13085_v62 = vld [vmem:[#allocation15_spill] sm:$0xff]  ;;  %v13087_v35 = vld [vmem:[#allocation16_spill] sm:$0xff] }
 0x301   : >> { %v4688_v33 = vsel %vm624_vm1, %v4685_v50, %v4687_v60  ;;  %v4691_v51 = vsel %vm624_vm1, %v4689_v26, %v4690_v36  ;;  %v4695_v7 = vrot.slane %v4635_v23, 2  ;;  %v4697_v54 = vrot.slane %v4636_v0, 2 }
 0x302   : >> { %v4693_v34 = vsel %vm624_vm1, %v4690_v36, %v4692_v1  ;;  %v4699_v16 = vrot.slane %v4637_v21, 2  ;;  %v4700_v63 = vrot.slane %v4638_v59, 2  ;;  %v4702_v11 = vrot.slane %v4639_v29, 2  ;;  %v13077_v21 = vld [vmem:[#allocation8_spill] sm:$0xff] }
 0x303   : >> { %v4696_v42 = vsel %vm624_vm1, %v4694_v37, %v4695_v7  ;;  %v4698_v9 = vsel %vm624_vm1, %v4695_v7, %v4697_v54  ;;  %v10905_v28 = vadd.f32 %v4666_v39, %v10793_v14  ;;  %v10908_v5 = vadd.f32 %v4668_v10, %v10796_v4  ;;  %v13089_v37 = vld [vmem:[#allocation24_spill] sm:$0xff] }
 0x304   : >> { %v4701_v44 = vsel %vm624_vm1, %v4699_v16, %v4700_v63  ;;  %v4703_v18 = vsel %vm624_vm1, %v4700_v63, %v4702_v11  ;;  %v10913_v46 = vadd.f32 %v4671_v17, %v10801_v22  ;;  %v10916_v23 = vadd.f32 %v4673_v13, %v10804_v47  ;;  %v13074_v17 = vld [vmem:[#allocation7_spill] sm:$0xff]  ;;  %v13079_v13 = vld [vmem:[#allocation12_spill] sm:$0xff]  ;;  %v13092_v16 = vld [vmem:[#allocation30_spill] sm:$0xff] }
 0x305   : >> { %v10919_v29 = vadd.f32 %v4676_v2, %v10807_v31  ;;  %v10922_v0 = vadd.f32 %v4678_v61, %v10810_v30  ;;  %v10925_v14 = vadd.f32 %v4681_v38, %v10813_v19  ;;  %v10928_v4 = vadd.f32 %v4683_v24, %v10816_v32  ;;  %v13091_v54 = vld [vmem:[#allocation40_spill] sm:$0xff]  ;;  %v13093_v11 = vld [vmem:[#allocation19_spill] sm:$0xff] }
 0x306   : >> { %v10931_v39 = vadd.f32 %v4686_v40, %v10819_v27  ;;  %v10934_v22 = vadd.f32 %v4688_v33, %v10822_v48  ;;  %v10937_v47 = vadd.f32 %v4691_v51, %v10825_v8  ;;  %v10940_v31 = vadd.f32 %v4693_v34, %v10828_v56  ;;  %v13073_v48 = vld [vmem:[#allocation21_spill] sm:$0xff]  ;;  %v13075_v8 = vld [vmem:[#allocation22_spill] sm:$0xff]  ;;  %v13076_v56 = vld [vmem:[#allocation11_spill] sm:$0xff] }
 0x307   : >> { %v10943_v30 = vadd.f32 %v4696_v42, %v10831_v6  ;;  %v10946_v19 = vadd.f32 %v4698_v9, %v10834_v20  ;;  %v10949_v32 = vadd.f32 %v4701_v44, %v10837_v41  ;;  %v10952_v27 = vadd.f32 %v4703_v18, %v10840_v45  ;;  %v13081_v41 = vld [vmem:[#allocation13_spill] sm:$0xff]  ;;  %v13083_v45 = vld [vmem:[#allocation14_spill] sm:$0xff]  ;;  %v13094_v9 = vld [vmem:[#allocation27_spill] sm:$0xff] }
 0x308   : >> { %v4739_v10 = vrot.slane %v13074_v17, %v13073_v48  ;;  %v10958_v3 = vrot.slane %v13074_v17, %v13075_v8  ;;  %v10962_v6 = vrot.slane %v13077_v21, %v13076_v56  ;;  %v10966_v20 = vrot.slane %v13077_v21, %v13079_v13  ;;  %v13090_v51 = vld [vmem:[#allocation38_spill] sm:$0xff]  ;;  %v13096_v13 = vld [vmem:[#allocation36_spill] sm:$0xff]  ;;  %v13100_v48 = vld [vmem:[#allocation37_spill] sm:$0xff] }
 0x309   : >> { %v10970_v59 = vrot.slane %v13077_v21, %v13081_v41  ;;  %v10974_v2 = vrot.slane %v13077_v21, %v13083_v45  ;;  %v10978_v61 = vrot.slane %v13077_v21, %v13085_v62  ;;  %v10982_v55 = vrot.slane %v13077_v21, %v13087_v35  ;;  %v13095_v18 = vld [vmem:[#allocation26_spill] sm:$0xff]  ;;  %v13097_v45 = vld [vmem:[#allocation23_spill] sm:$0xff]  ;;  %v13099_v8 = vld [vmem:[#allocation28_spill] sm:$0xff] }
 0x30a   : >> { %13078 = vst [vmem:[#allocation17_spill] sm:$0xff] %v10962_v6  ;;  %13080 = vst [vmem:[#allocation25_spill] sm:$0xff] %v10966_v20  ;;  %v4740_v50 = vmul.f32 %v10579_v49, %v4739_v10  ;;  %v4741_v38 = vmul.f32 %v10586_v57, %v4739_v10  ;;  %v4742_v60 = vmul.f32 %v10683_v43, %v4739_v10  ;;  %v13098_v35 = vld [vmem:[#allocation34_spill] sm:$0xff] }
 0x30b   : >> { %13082 = vst [vmem:[#allocation31_spill] sm:$0xff] %v10970_v59  ;;  %13084 = vst [vmem:[#allocation20_spill] sm:$0xff] %v10974_v2  ;;  %v4743_v26 = vmul.f32 %v10589_v58, %v4739_v10  ;;  %v4744_v36 = vmul.f32 %v10592_v15, %v4739_v10  ;;  %v4745_v24 = vmul.f32 %v10694_v12, %v4739_v10  ;;  %v13102_v59 = vld [vmem:[#allocation35_spill] sm:$0xff]  ;;  %v13103_v6 = vld [vmem:[#allocation18_spill] sm:$0xff] }
 0x30c   : >> { %13086 = vst [vmem:[#allocation39_spill] sm:$0xff] %v10978_v61  ;;  %13088 = vst [vmem:[#allocation32_spill] sm:$0xff] %v10982_v55  ;;  %v4746_v40 = vmul.f32 %v10599_v52, %v4739_v10  ;;  %v4747_v1 = vmul.f32 %v10602_v25, %v4739_v10  ;;  %v4748_v33 = vmul.f32 %v13089_v37, %v4739_v10  ;;  %v13101_v61 = vld [vmem:[#allocation29_spill] sm:$0xff] }
 0x30d   : >> { %v4749_v7 = vmul.f32 %v13090_v51, %v4739_v10  ;;  %v4750_v34 = vmul.f32 %v13091_v54, %v4739_v10  ;;  %v4751_v63 = vmul.f32 %v13092_v16, %v4739_v10  ;;  %v4752_v42 = vmul.f32 %v13093_v11, %v4739_v10 }
 0x30e   : >> { %v4753_v44 = vmul.f32 %v13094_v9, %v4739_v10  ;;  %v4754_v56 = vmul.f32 %v13095_v18, %v4739_v10  ;;  %v4755_v41 = vmul.f32 %v13096_v13, %v4739_v10  ;;  %v4756_v62 = vmul.f32 %v13097_v45, %v4739_v10 }
 0x30f   : >> { %v4757_v17 = vmul.f32 %v13098_v35, %v4739_v10  ;;  %v4758_v21 = vmul.f32 %v13099_v8, %v4739_v10  ;;  %v4759_v55 = vmul.f32 %v13100_v48, %v4739_v10  ;;  %v4760_v2 = vmul.f32 %v13101_v61, %v4739_v10 }
 0x310   : >> { %v4761_v20 = vmul.f32 %v13102_v59, %v4739_v10  ;;  %v4762_v11 = vmul.f32 %v13103_v6, %v4739_v10  ;;  %v4763_v9 = vmul.f32 %v10744_v53, %v4739_v10  ;;  %v4788_v16 = vrot.slane %v4740_v50, 3 }
 0x311   : >> { %v4789_v18 = vrot.slane %v4741_v38, 3  ;;  %v4791_v54 = vrot.slane %v4742_v60, 3  ;;  %v4793_v13 = vrot.slane %v4743_v26, 3  ;;  %v4794_v51 = vrot.slane %v4744_v36, 3 }
 0x312   : >> { %v4796_v45 = vrot.slane %v4745_v24, 3  ;;  %v4798_v37 = vrot.slane %v4746_v40, 3  ;;  %v4799_v35 = vrot.slane %v4747_v1, 3  ;;  %v4801_v25 = vrot.slane %v4748_v33, 3 }
 0x313   : >> { %v4790_v8 = vsel %vm749_vm2, %v4788_v16, %v4789_v18  ;;  %v4792_v48 = vsel %vm749_vm2, %v4789_v18, %v4791_v54  ;;  %v4803_v61 = vrot.slane %v4749_v7, 3  ;;  %v4795_v59 = vsel %vm749_vm2, %v4793_v13, %v4794_v51 }
 0x314   : >> { %v4797_v6 = vsel %vm749_vm2, %v4794_v51, %v4796_v45  ;;  %v4800_v10 = vsel %vm749_vm2, %v4798_v37, %v4799_v35  ;;  %v4804_v50 = vrot.slane %v4750_v34, 3  ;;  %v4802_v38 = vsel %vm749_vm2, %v4799_v35, %v4801_v25 }
 0x315   : >> { %v4806_v60 = vrot.slane %v4751_v63, 3  ;;  %v4808_v26 = vrot.slane %v4752_v42, 3  ;;  %v4809_v36 = vrot.slane %v4753_v44, 3  ;;  %v4811_v40 = vrot.slane %v4754_v56, 3 }
 0x316   : >> { %v4805_v24 = vsel %vm749_vm2, %v4803_v61, %v4804_v50  ;;  %v4813_v1 = vrot.slane %v4755_v41, 3  ;;  %v4814_v16 = vrot.slane %v4756_v62, 3  ;;  %v4816_v54 = vrot.slane %v4757_v17, 3  ;;  %v13106_v62 = vld [vmem:[#allocation38_spill] sm:$0xff] }
 0x317   : >> { %v4807_v33 = vsel %vm749_vm2, %v4804_v50, %v4806_v60  ;;  %v4810_v7 = vsel %vm749_vm2, %v4808_v26, %v4809_v36  ;;  %v4818_v18 = vrot.slane %v4758_v21, 3  ;;  %v4812_v51 = vsel %vm749_vm2, %v4809_v36, %v4811_v40  ;;  %v13109_v26 = vld [vmem:[#allocation19_spill] sm:$0xff] }
 0x318   : >> { %v4815_v37 = vsel %vm749_vm2, %v4813_v1, %v4814_v16  ;;  %v4819_v34 = vrot.slane %v4759_v55, 3  ;;  %v4821_v25 = vrot.slane %v4760_v2, 3  ;;  %v4817_v63 = vsel %vm749_vm2, %v4814_v16, %v4816_v54  ;;  %v13111_v1 = vld [vmem:[#allocation26_spill] sm:$0xff]  ;;  %v13113_v54 = vld [vmem:[#allocation23_spill] sm:$0xff] }
 0x319   : >> { %v4823_v42 = vrot.slane %v4761_v20, 3  ;;  %v4824_v44 = vrot.slane %v4762_v11, 3  ;;  %v4826_v61 = vrot.slane %v4763_v9, 3  ;;  %v11023_v41 = vadd.f32 %v4790_v8, %v10905_v28  ;;  %v13104_v8 = vld [vmem:[#allocation33_spill] sm:$0xff] }
 0x31a   : >> { %v4820_v56 = vsel %vm749_vm2, %v4818_v18, %v4819_v34  ;;  %v4822_v13 = vsel %vm749_vm2, %v4819_v34, %v4821_v25  ;;  %v11026_v17 = vadd.f32 %v4792_v48, %v10908_v5  ;;  %v11031_v2 = vadd.f32 %v4795_v59, %v10913_v46  ;;  %v13105_v59 = vld [vmem:[#allocation24_spill] sm:$0xff] }
 0x31b   : >> { %v4825_v21 = vsel %vm749_vm2, %v4823_v42, %v4824_v44  ;;  %v4827_v55 = vsel %vm749_vm2, %v4824_v44, %v4826_v61  ;;  %v11034_v20 = vadd.f32 %v4797_v6, %v10916_v23  ;;  %v11037_v11 = vadd.f32 %v4800_v10, %v10919_v29  ;;  %v13107_v10 = vld [vmem:[#allocation40_spill] sm:$0xff]  ;;  %v13117_v44 = vld [vmem:[#allocation29_spill] sm:$0xff] }
 0x31c   : >> { %v11040_v9 = vadd.f32 %v4802_v38, %v10922_v0  ;;  %v11043_v28 = vadd.f32 %v4805_v24, %v10925_v14  ;;  %v11046_v5 = vadd.f32 %v4807_v33, %v10928_v4  ;;  %v11049_v48 = vadd.f32 %v4810_v7, %v10931_v39  ;;  %v13108_v38 = vld [vmem:[#allocation30_spill] sm:$0xff]  ;;  %v13110_v24 = vld [vmem:[#allocation27_spill] sm:$0xff]  ;;  %v13112_v33 = vld [vmem:[#allocation36_spill] sm:$0xff] }
 0x31d   : >> { %v11052_v46 = vadd.f32 %v4812_v51, %v10934_v22  ;;  %v11055_v23 = vadd.f32 %v4815_v37, %v10937_v47  ;;  %v11058_v29 = vadd.f32 %v4817_v63, %v10940_v31  ;;  %v11061_v0 = vadd.f32 %v4820_v56, %v10943_v30  ;;  %v13114_v51 = vld [vmem:[#allocation34_spill] sm:$0xff]  ;;  %v13115_v34 = vld [vmem:[#allocation28_spill] sm:$0xff]  ;;  %v13116_v63 = vld [vmem:[#allocation37_spill] sm:$0xff] }
 0x31e   : >> { %v11064_v14 = vadd.f32 %v4822_v13, %v10946_v19  ;;  %v11067_v4 = vadd.f32 %v4825_v21, %v10949_v32  ;;  %v11070_v39 = vadd.f32 %v4827_v55, %v10952_v27  ;;  %v4864_v22 = vmul.f32 %v10579_v49, %v10958_v3  ;;  %v13118_v56 = vld [vmem:[#allocation35_spill] sm:$0xff]  ;;  %v13119_v21 = vld [vmem:[#allocation18_spill] sm:$0xff] }
 0x31f   : >> { %v4865_v47 = vmul.f32 %v10586_v57, %v10958_v3  ;;  %v4866_v31 = vmul.f32 %v10683_v43, %v10958_v3  ;;  %v4867_v30 = vmul.f32 %v10589_v58, %v10958_v3  ;;  %v4868_v19 = vmul.f32 %v10592_v15, %v10958_v3 }
 0x320   : >> { %v4869_v32 = vmul.f32 %v10694_v12, %v10958_v3  ;;  %v4870_v27 = vmul.f32 %v10599_v52, %v10958_v3  ;;  %v4871_v6 = vmul.f32 %v13104_v8, %v10958_v3  ;;  %v4872_v45 = vmul.f32 %v13105_v59, %v10958_v3 }
 0x321   : >> { %v4873_v35 = vmul.f32 %v13106_v62, %v10958_v3  ;;  %v4874_v50 = vmul.f32 %v13107_v10, %v10958_v3  ;;  %v4875_v60 = vmul.f32 %v13108_v38, %v10958_v3  ;;  %v4876_v36 = vmul.f32 %v13109_v26, %v10958_v3 }
 0x322   : >> { %v4877_v40 = vmul.f32 %v13110_v24, %v10958_v3  ;;  %v4878_v16 = vmul.f32 %v13111_v1, %v10958_v3  ;;  %v4879_v7 = vmul.f32 %v13112_v33, %v10958_v3  ;;  %v4880_v18 = vmul.f32 %v13113_v54, %v10958_v3 }
 0x323   : >> { %v4881_v37 = vmul.f32 %v13114_v51, %v10958_v3  ;;  %v4882_v25 = vmul.f32 %v13115_v34, %v10958_v3  ;;  %v4883_v42 = vmul.f32 %v13116_v63, %v10958_v3  ;;  %v4884_v61 = vmul.f32 %v13117_v44, %v10958_v3 }
 0x324   : >> { %v4885_v13 = vmul.f32 %v13118_v56, %v10958_v3  ;;  %v4886_v55 = vmul.f32 %v13119_v21, %v10958_v3  ;;  %v4887_v54 = vmul.f32 %v10744_v53, %v10958_v3  ;;  %v4912_v33 = vrot.slane %v4864_v22, 4 }
 0x325   : >> { %v4913_v51 = vrot.slane %v4865_v47, 4  ;;  %v4915_v1 = vrot.slane %v4866_v31, 4  ;;  %v4917_v24 = vrot.slane %v4867_v30, 4  ;;  %v4918_v34 = vrot.slane %v4868_v19, 4 }
 0x326   : >> { %v4920_v26 = vrot.slane %v4869_v32, 4  ;;  %v4922_v38 = vrot.slane %v4870_v27, 4  ;;  %v4923_v63 = vrot.slane %v4871_v6, 4  ;;  %v4925_v62 = vrot.slane %v4872_v45, 4 }
 0x327   : >> { %v4914_v10 = vsel %vm874_vm3, %v4912_v33, %v4913_v51  ;;  %v4916_v44 = vsel %vm874_vm3, %v4913_v51, %v4915_v1  ;;  %v4927_v56 = vrot.slane %v4873_v35, 4  ;;  %v4919_v59 = vsel %vm874_vm3, %v4917_v24, %v4918_v34 }
 0x328   : >> { %v4921_v21 = vsel %vm874_vm3, %v4918_v34, %v4920_v26  ;;  %v4924_v3 = vsel %vm874_vm3, %v4922_v38, %v4923_v63  ;;  %v4928_v22 = vrot.slane %v4874_v50, 4  ;;  %v4926_v47 = vsel %vm874_vm3, %v4923_v63, %v4925_v62 }
 0x329   : >> { %v4930_v31 = vrot.slane %v4875_v60, 4  ;;  %v4932_v30 = vrot.slane %v4876_v36, 4  ;;  %v4933_v19 = vrot.slane %v4877_v40, 4  ;;  %v4935_v27 = vrot.slane %v4878_v16, 4 }
 0x32a   : >> { %v4929_v32 = vsel %vm874_vm3, %v4927_v56, %v4928_v22  ;;  %v4937_v6 = vrot.slane %v4879_v7, 4  ;;  %v4938_v33 = vrot.slane %v4880_v18, 4  ;;  %v4940_v24 = vrot.slane %v4881_v37, 4  ;;  %v13121_v56 = vld [vmem:[#allocation24_spill] sm:$0xff] }
 0x32b   : >> { %v4931_v45 = vsel %vm874_vm3, %v4928_v22, %v4930_v31  ;;  %v4934_v35 = vsel %vm874_vm3, %v4932_v30, %v4933_v19  ;;  %v4942_v1 = vrot.slane %v4882_v25, 4  ;;  %v4936_v26 = vsel %vm874_vm3, %v4933_v19, %v4935_v27  ;;  %v13125_v30 = vld [vmem:[#allocation19_spill] sm:$0xff] }
 0x32c   : >> { %v4939_v50 = vsel %vm874_vm3, %v4937_v6, %v4938_v33  ;;  %v4943_v38 = vrot.slane %v4883_v42, 4  ;;  %v4945_v62 = vrot.slane %v4884_v61, 4  ;;  %v4941_v60 = vsel %vm874_vm3, %v4938_v33, %v4940_v24  ;;  %v13127_v6 = vld [vmem:[#allocation26_spill] sm:$0xff]  ;;  %v13129_v24 = vld [vmem:[#allocation23_spill] sm:$0xff] }
 0x32d   : >> { %v4947_v36 = vrot.slane %v4885_v13, 4  ;;  %v4948_v40 = vrot.slane %v4886_v55, 4  ;;  %v4950_v51 = vrot.slane %v4887_v54, 4  ;;  %v11135_v18 = vadd.f32 %v4914_v10, %v11023_v41 }
 0x32e   : >> { %v4944_v16 = vsel %vm874_vm3, %v4942_v1, %v4943_v38  ;;  %v4946_v7 = vsel %vm874_vm3, %v4943_v38, %v4945_v62  ;;  %v11138_v37 = vadd.f32 %v4916_v44, %v11026_v17  ;;  %v11143_v63 = vadd.f32 %v4919_v59, %v11031_v2  ;;  %v13131_v38 = vld [vmem:[#allocation28_spill] sm:$0xff] }
 0x32f   : >> { %v4949_v34 = vsel %vm874_vm3, %v4947_v36, %v4948_v40  ;;  %v4951_v25 = vsel %vm874_vm3, %v4948_v40, %v4950_v51  ;;  %v11146_v42 = vadd.f32 %v4921_v21, %v11034_v20  ;;  %v11149_v54 = vadd.f32 %v4924_v3, %v11037_v11  ;;  %v13122_v21 = vld [vmem:[#allocation38_spill] sm:$0xff]  ;;  %v13123_v3 = vld [vmem:[#allocation40_spill] sm:$0xff]  ;;  %v13133_v40 = vld [vmem:[#allocation29_spill] sm:$0xff] }
 0x330   : >> { %v11152_v61 = vadd.f32 %v4926_v47, %v11040_v9  ;;  %v11155_v41 = vadd.f32 %v4929_v32, %v11043_v28  ;;  %v11158_v17 = vadd.f32 %v4931_v45, %v11046_v5  ;;  %v11161_v10 = vadd.f32 %v4934_v35, %v11049_v48  ;;  %v13124_v47 = vld [vmem:[#allocation30_spill] sm:$0xff]  ;;  %v13126_v32 = vld [vmem:[#allocation27_spill] sm:$0xff]  ;;  %v13128_v45 = vld [vmem:[#allocation36_spill] sm:$0xff] }
 0x331   : >> { %v11164_v2 = vadd.f32 %v4936_v26, %v11052_v46  ;;  %v11167_v20 = vadd.f32 %v4939_v50, %v11055_v23  ;;  %v11170_v11 = vadd.f32 %v4941_v60, %v11058_v29  ;;  %v11173_v9 = vadd.f32 %v4944_v16, %v11061_v0  ;;  %v13120_v46 = vld [vmem:[#allocation17_spill] sm:$0xff]  ;;  %v13130_v26 = vld [vmem:[#allocation34_spill] sm:$0xff]  ;;  %v13134_v16 = vld [vmem:[#allocation35_spill] sm:$0xff] }
 0x332   : >> { %v11176_v28 = vadd.f32 %v4946_v7, %v11064_v14  ;;  %v11179_v5 = vadd.f32 %v4949_v34, %v11067_v4  ;;  %v11182_v48 = vadd.f32 %v4951_v25, %v11070_v39  ;;  %v4988_v59 = vmul.f32 %v10579_v49, %v13120_v46  ;;  %v13132_v60 = vld [vmem:[#allocation37_spill] sm:$0xff]  ;;  %v13135_v34 = vld [vmem:[#allocation18_spill] sm:$0xff] }
 0x333   : >> { %v4989_v23 = vmul.f32 %v10586_v57, %v13120_v46  ;;  %v4990_v29 = vmul.f32 %v10683_v43, %v13120_v46  ;;  %v4991_v0 = vmul.f32 %v10589_v58, %v13120_v46  ;;  %v4992_v14 = vmul.f32 %v10592_v15, %v13120_v46 }
 0x334   : >> { %v4993_v4 = vmul.f32 %v10694_v12, %v13120_v46  ;;  %v4994_v39 = vmul.f32 %v10599_v52, %v13120_v46  ;;  %v4995_v44 = vmul.f32 %v13104_v8, %v13120_v46  ;;  %v4996_v13 = vmul.f32 %v13121_v56, %v13120_v46 }
 0x335   : >> { %v4997_v55 = vmul.f32 %v13122_v21, %v13120_v46  ;;  %v4998_v22 = vmul.f32 %v13123_v3, %v13120_v46  ;;  %v4999_v31 = vmul.f32 %v13124_v47, %v13120_v46  ;;  %v5000_v19 = vmul.f32 %v13125_v30, %v13120_v46 }
 0x336   : >> { %v5001_v27 = vmul.f32 %v13126_v32, %v13120_v46  ;;  %v5002_v33 = vmul.f32 %v13127_v6, %v13120_v46  ;;  %v5003_v35 = vmul.f32 %v13128_v45, %v13120_v46  ;;  %v5004_v1 = vmul.f32 %v13129_v24, %v13120_v46 }
 0x337   : >> { %v5005_v50 = vmul.f32 %v13130_v26, %v13120_v46  ;;  %v5006_v62 = vmul.f32 %v13131_v38, %v13120_v46  ;;  %v5007_v36 = vmul.f32 %v13132_v60, %v13120_v46  ;;  %v5008_v51 = vmul.f32 %v13133_v40, %v13120_v46 }
 0x338   : >> { %v5009_v7 = vmul.f32 %v13134_v16, %v13120_v46  ;;  %v5010_v25 = vmul.f32 %v13135_v34, %v13120_v46  ;;  %v5011_v24 = vmul.f32 %v10744_v53, %v13120_v46  ;;  %v5036_v45 = vrot.slane %v4988_v59, 5 }
 0x339   : >> { %v5037_v26 = vrot.slane %v4989_v23, 5  ;;  %v5039_v6 = vrot.slane %v4990_v29, 5  ;;  %v5041_v32 = vrot.slane %v4991_v0, 5  ;;  %v5042_v38 = vrot.slane %v4992_v14, 5 }
 0x33a   : >> { %v5044_v30 = vrot.slane %v4993_v4, 5  ;;  %v5046_v47 = vrot.slane %v4994_v39, 5  ;;  %v5047_v60 = vrot.slane %v4995_v44, 5  ;;  %v5049_v21 = vrot.slane %v4996_v13, 5 }
 0x33b   : >> { %v5038_v3 = vsel %vm999_vm4, %v5036_v45, %v5037_v26  ;;  %v5040_v40 = vsel %vm999_vm4, %v5037_v26, %v5039_v6  ;;  %v5051_v16 = vrot.slane %v4997_v55, 5  ;;  %v5043_v56 = vsel %vm999_vm4, %v5041_v32, %v5042_v38 }
 0x33c   : >> { %v5045_v34 = vsel %vm999_vm4, %v5042_v38, %v5044_v30  ;;  %v5048_v46 = vsel %vm999_vm4, %v5046_v47, %v5047_v60  ;;  %v5052_v59 = vrot.slane %v4998_v22, 5  ;;  %v5050_v23 = vsel %vm999_vm4, %v5047_v60, %v5049_v21 }
 0x33d   : >> { %v5054_v29 = vrot.slane %v4999_v31, 5  ;;  %v5056_v0 = vrot.slane %v5000_v19, 5  ;;  %v5057_v14 = vrot.slane %v5001_v27, 5  ;;  %v5059_v39 = vrot.slane %v5002_v33, 5 }
 0x33e   : >> { %v5053_v4 = vsel %vm999_vm4, %v5051_v16, %v5052_v59  ;;  %v5061_v44 = vrot.slane %v5003_v35, 5  ;;  %v5062_v45 = vrot.slane %v5004_v1, 5  ;;  %v5064_v32 = vrot.slane %v5005_v50, 5 }
 0x33f   : >> { %v5055_v13 = vsel %vm999_vm4, %v5052_v59, %v5054_v29  ;;  %v5058_v55 = vsel %vm999_vm4, %v5056_v0, %v5057_v14  ;;  %v5066_v6 = vrot.slane %v5006_v62, 5  ;;  %v5060_v30 = vsel %vm999_vm4, %v5057_v14, %v5059_v39  ;;  %v13145_v0 = vld [vmem:[#allocation23_spill] sm:$0xff] }
 0x340   : >> { %v5063_v22 = vsel %vm999_vm4, %v5061_v44, %v5062_v45  ;;  %v5067_v47 = vrot.slane %v5007_v36, 5  ;;  %v5069_v21 = vrot.slane %v5008_v51, 5  ;;  %v5065_v31 = vsel %vm999_vm4, %v5062_v45, %v5064_v32  ;;  %v13147_v44 = vld [vmem:[#allocation28_spill] sm:$0xff]  ;;  %v13149_v32 = vld [vmem:[#allocation29_spill] sm:$0xff] }
 0x341   : >> { %v5071_v19 = vrot.slane %v5009_v7, 5  ;;  %v5072_v27 = vrot.slane %v5010_v25, 5  ;;  %v5074_v26 = vrot.slane %v5011_v24, 5  ;;  %v11247_v1 = vadd.f32 %v5038_v3, %v11135_v18 }
 0x342   : >> { %v5068_v33 = vsel %vm999_vm4, %v5066_v6, %v5067_v47  ;;  %v5070_v35 = vsel %vm999_vm4, %v5067_v47, %v5069_v21  ;;  %v11250_v50 = vadd.f32 %v5040_v40, %v11138_v37  ;;  %v11255_v60 = vadd.f32 %v5043_v56, %v11143_v63  ;;  %v13151_v47 = vld [vmem:[#allocation18_spill] sm:$0xff] }
 0x343   : >> { %v5073_v38 = vsel %vm999_vm4, %v5071_v19, %v5072_v27  ;;  %v5075_v62 = vsel %vm999_vm4, %v5072_v27, %v5074_v26  ;;  %v11258_v36 = vadd.f32 %v5045_v34, %v11146_v42  ;;  %v11261_v24 = vadd.f32 %v5048_v46, %v11149_v54 }
 0x344   : >> { %v11264_v51 = vadd.f32 %v5050_v23, %v11152_v61  ;;  %v11267_v18 = vadd.f32 %v5053_v4, %v11155_v41  ;;  %v11270_v37 = vadd.f32 %v5055_v13, %v11158_v17  ;;  %v11273_v3 = vadd.f32 %v5058_v55, %v11161_v10  ;;  %v13144_v23 = vld [vmem:[#allocation36_spill] sm:$0xff]  ;;  %v13146_v4 = vld [vmem:[#allocation34_spill] sm:$0xff]  ;;  %v13148_v13 = vld [vmem:[#allocation37_spill] sm:$0xff] }
 0x345   : >> { %v11276_v63 = vadd.f32 %v5060_v30, %v11164_v2  ;;  %v11279_v42 = vadd.f32 %v5063_v22, %v11167_v20  ;;  %v11282_v54 = vadd.f32 %v5065_v31, %v11170_v11  ;;  %v11285_v61 = vadd.f32 %v5068_v33, %v11173_v9  ;;  %v13136_v2 = vld [vmem:[#allocation25_spill] sm:$0xff]  ;;  %v13150_v30 = vld [vmem:[#allocation35_spill] sm:$0xff] }
 0x346   : >> { %v11288_v41 = vadd.f32 %v5070_v35, %v11176_v28  ;;  %v11291_v17 = vadd.f32 %v5073_v38, %v11179_v5  ;;  %v11294_v10 = vadd.f32 %v5075_v62, %v11182_v48  ;;  %v5112_v56 = vmul.f32 %v10579_v49, %v13136_v2 }
 0x347   : >> { %v5113_v20 = vmul.f32 %v10586_v57, %v13136_v2  ;;  %v5114_v11 = vmul.f32 %v10683_v43, %v13136_v2  ;;  %v5115_v9 = vmul.f32 %v10589_v58, %v13136_v2  ;;  %v5116_v28 = vmul.f32 %v10592_v15, %v13136_v2  ;;  %v13137_v57 = vld [vmem:[#allocation24_spill] sm:$0xff]  ;;  %v13138_v43 = vld [vmem:[#allocation38_spill] sm:$0xff] }
 0x348   : >> { %v5117_v5 = vmul.f32 %v10694_v12, %v13136_v2  ;;  %v5118_v48 = vmul.f32 %v10599_v52, %v13136_v2  ;;  %v5119_v49 = vmul.f32 %v13104_v8, %v13136_v2  ;;  %v5120_v40 = vmul.f32 %v13137_v57, %v13136_v2  ;;  %v13139_v58 = vld [vmem:[#allocation40_spill] sm:$0xff]  ;;  %v13140_v15 = vld [vmem:[#allocation30_spill] sm:$0xff]  ;;  %v13141_v12 = vld [vmem:[#allocation19_spill] sm:$0xff] }
 0x349   : >> { %v5121_v16 = vmul.f32 %v13138_v43, %v13136_v2  ;;  %v5122_v7 = vmul.f32 %v13139_v58, %v13136_v2  ;;  %v5123_v34 = vmul.f32 %v13140_v15, %v13136_v2  ;;  %v5124_v25 = vmul.f32 %v13141_v12, %v13136_v2  ;;  %v13142_v52 = vld [vmem:[#allocation27_spill] sm:$0xff]  ;;  %v13143_v8 = vld [vmem:[#allocation26_spill] sm:$0xff] }
 0x34a   : >> { %v5125_v46 = vmul.f32 %v13142_v52, %v13136_v2  ;;  %v5126_v59 = vmul.f32 %v13143_v8, %v13136_v2  ;;  %v5127_v29 = vmul.f32 %v13144_v23, %v13136_v2  ;;  %v5128_v14 = vmul.f32 %v13145_v0, %v13136_v2 }
 0x34b   : >> { %v5129_v39 = vmul.f32 %v13146_v4, %v13136_v2  ;;  %v5130_v45 = vmul.f32 %v13147_v44, %v13136_v2  ;;  %v5131_v55 = vmul.f32 %v13148_v13, %v13136_v2  ;;  %v5132_v6 = vmul.f32 %v13149_v32, %v13136_v2 }
 0x34c   : >> { %v5133_v22 = vmul.f32 %v13150_v30, %v13136_v2  ;;  %v5134_v21 = vmul.f32 %v13151_v47, %v13136_v2  ;;  %v5135_v31 = vmul.f32 %v10744_v53, %v13136_v2  ;;  %v5160_v19 = vrot.slane %v5112_v56, 6  ;;  %v11368_v47 = vld [vmem:[%s6650_s17 + $0x98] sm:$0xff] }
 0x34d   : >> { %v5161_v27 = vrot.slane %v5113_v20, 6  ;;  %v5163_v26 = vrot.slane %v5114_v11, 6  ;;  %v5165_v33 = vrot.slane %v5115_v9, 6  ;;  %v5166_v35 = vrot.slane %v5116_v28, 6 }
 0x34e   : >> { %v5168_v38 = vrot.slane %v5117_v5, 6  ;;  %v5170_v62 = vrot.slane %v5118_v48, 6  ;;  %v5171_v57 = vrot.slane %v5119_v49, 6  ;;  %v5173_v15 = vrot.slane %v5120_v40, 6 }
 0x34f   : >> { %v5162_v43 = vsel %vm1124_vm5, %v5160_v19, %v5161_v27  ;;  %v5164_v58 = vsel %vm1124_vm5, %v5161_v27, %v5163_v26  ;;  %v5175_v12 = vrot.slane %v5121_v16, 6  ;;  %v5167_v52 = vsel %vm1124_vm5, %v5165_v33, %v5166_v35  ;;  %v11381_v27 = vld [vmem:[%s6650_s17 + $0xc0] sm:$0xff]  ;;  %v11387_v26 = vld [vmem:[%s6650_s17 + $0xd8] sm:$0xff] }
 0x350   : >> { %v5169_v8 = vsel %vm1124_vm5, %v5166_v35, %v5168_v38  ;;  %v5172_v53 = vsel %vm1124_vm5, %v5170_v62, %v5171_v57  ;;  %v5176_v2 = vrot.slane %v5122_v7, 6  ;;  %v5174_v56 = vsel %vm1124_vm5, %v5171_v57, %v5173_v15  ;;  %13153 = vst [vmem:[#allocation12_spill] sm:$0xff] %v11387_v26  ;;  %v11397_v35 = vld [vmem:[%s6650_s17 + $0xf0] sm:$0xff]  ;;  %v11400_v38 = vld [vmem:[%s6650_s17 + $0xf8] sm:$0xff] }
 0x351   : >> { %v5178_v20 = vrot.slane %v5123_v34, 6  ;;  %v5180_v11 = vrot.slane %v5124_v25, 6  ;;  %v5181_v9 = vrot.slane %v5125_v46, 6  ;;  %v5183_v5 = vrot.slane %v5126_v59, 6  ;;  %13155 = vst [vmem:[#allocation14_spill] sm:$0xff] %v11397_v35  ;;  %13156 = vst [vmem:[#allocation15_spill] sm:$0xff] %v11400_v38 }
 0x352   : >> { %v5177_v28 = vsel %vm1124_vm5, %v5175_v12, %v5176_v2  ;;  %v5185_v48 = vrot.slane %v5127_v29, 6  ;;  %v5186_v49 = vrot.slane %v5128_v14, 6  ;;  %v5188_v23 = vrot.slane %v5129_v39, 6  ;;  %v11419_v15 = vld [vmem:[%s6650_s17 + $0x138] sm:$0xff]  ;;  %v11422_v12 = vld [vmem:[%s6650_s17 + $0x140] sm:$0xff] }
 0x353   : >> { %v5179_v40 = vsel %vm1124_vm5, %v5176_v2, %v5178_v20  ;;  %v5182_v16 = vsel %vm1124_vm5, %v5180_v11, %v5181_v9  ;;  %v5190_v0 = vrot.slane %v5130_v45, 6  ;;  %v5184_v4 = vsel %vm1124_vm5, %v5181_v9, %v5183_v5  ;;  %13161 = vst [vmem:[#allocation24_spill] sm:$0xff] %v11419_v15  ;;  %13162 = vst [vmem:[#allocation38_spill] sm:$0xff] %v11422_v12 }
 0x354   : >> { %v5187_v7 = vsel %vm1124_vm5, %v5185_v48, %v5186_v49  ;;  %v5191_v34 = vrot.slane %v5131_v55, 6  ;;  %v5193_v25 = vrot.slane %v5132_v6, 6  ;;  %v5189_v46 = vsel %vm1124_vm5, %v5186_v49, %v5188_v23  ;;  %v11361_v55 = vld [vmem:[%s6650_s17 + $0x90] sm:$0xff] }
 0x355   : >> { %v5195_v59 = vrot.slane %v5133_v22, 6  ;;  %v5196_v29 = vrot.slane %v5134_v21, 6  ;;  %v5198_v14 = vrot.slane %v5135_v31, 6  ;;  %v5216_v45 = vadd.f32 %v5162_v43, %v11247_v1  ;;  %v11371_v21 = vld [vmem:[%s6650_s17 + $0xa8] sm:$0xff]  ;;  %v11374_v1 = vld [vmem:[%s6650_s17 + $0xb0] sm:$0xff] }
 0x356   : >> { %v5192_v44 = vsel %vm1124_vm5, %v5190_v0, %v5191_v34  ;;  %v5194_v39 = vsel %vm1124_vm5, %v5191_v34, %v5193_v25  ;;  %v5217_v13 = vadd.f32 %v5164_v58, %v11250_v50  ;;  %v5218_v30 = vadd.f32 %v5167_v52, %v11255_v60  ;;  %v11407_v58 = vld [vmem:[%s6650_s17 + $0x108] sm:$0xff]  ;;  %v13163_v52 = vld [vmem:[#allocation31_spill] sm:$0xff] }
 0x357   : >> { %v5197_v32 = vsel %vm1124_vm5, %v5195_v59, %v5196_v29  ;;  %v5199_v6 = vsel %vm1124_vm5, %v5196_v29, %v5198_v14  ;;  %v5219_v22 = vadd.f32 %v5169_v8, %v11258_v36  ;;  %v5220_v50 = vadd.f32 %v5172_v53, %v11261_v24  ;;  %v11384_v36 = vld [vmem:[%s6650_s17 + $0xc8] sm:$0xff]  ;;  %13157 = vst [vmem:[#allocation16_spill] sm:$0xff] %v11407_v58  ;;  %v11476_v29 = vld [vmem:[%s6650_s17 + $0xb8] sm:$0x3f] }
 0x358   : >> { %v5221_v31 = vadd.f32 %v5174_v56, %v11264_v51  ;;  %v5222_v19 = vadd.f32 %v5177_v28, %v11267_v18  ;;  %v5223_v60 = vadd.f32 %v5179_v40, %v11270_v37  ;;  %13152 = vst [vmem:[#allocation11_spill] sm:$0xff] %v11384_v36  ;;  %v5224_v33 = vadd.f32 %v5182_v16, %v11273_v3  ;;  %v11394_v37 = vld [vmem:[%s6650_s17 + $0xe0] sm:$0xff] }
 0x359   : >> { %v5225_v24 = vadd.f32 %v5184_v4, %v11276_v63  ;;  %v5226_v51 = vadd.f32 %v5187_v7, %v11279_v42  ;;  %v5227_v18 = vadd.f32 %v5189_v46, %v11282_v54  ;;  %13154 = vst [vmem:[#allocation13_spill] sm:$0xff] %v11394_v37  ;;  %v5228_v62 = vadd.f32 %v5192_v44, %v11285_v61  ;;  %v11410_v63 = vld [vmem:[%s6650_s17 + $0x110] sm:$0xff]  ;;  %v11413_v42 = vld [vmem:[%s6650_s17 + $0x120] sm:$0xff]  ;;  %v11416_v54 = vld [vmem:[%s6650_s17 + $0x128] sm:$0xff] }
 0x35a   : >> { %v5229_v57 = vadd.f32 %v5194_v39, %v11288_v41  ;;  %v5230_v43 = vadd.f32 %v5197_v32, %v11291_v17  ;;  %v5231_v3 = vadd.f32 %v5199_v6, %v11294_v10  ;;  %13158 = vst [vmem:[#allocation33_spill] sm:$0xff] %v11410_v63  ;;  %13159 = vst [vmem:[#allocation17_spill] sm:$0xff] %v11413_v42  ;;  %v11465_v7 = vld [vmem:[%s6650_s17 + $0xa0] sm:$0x3f]  ;;  %v11490_v32 = vld [vmem:[%s6650_s17 + $0xe8] sm:$0x3f] }
 0x35b   : >> { %13160 = vst [vmem:[#allocation25_spill] sm:$0xff] %v11416_v54  ;;  %v5263_v61 = vmul.f32 %v11361_v55, %v13163_v52  ;;  %v5264_v41 = vmul.f32 %v11368_v47, %v13163_v52  ;;  %v5265_v17 = vmul.f32 %v11371_v21, %v13163_v52  ;;  %v5266_v10 = vmul.f32 %v11374_v1, %v13163_v52 }
 0x35c   : >> { %v5267_v8 = vmul.f32 %v11381_v27, %v13163_v52  ;;  %v5268_v53 = vmul.f32 %v11384_v36, %v13163_v52  ;;  %v5269_v2 = vmul.f32 %v11387_v26, %v13163_v52  ;;  %v5270_v56 = vmul.f32 %v11394_v37, %v13163_v52  ;;  %13165 = vst [vmem:[#allocation30_spill] sm:$0xff] %v11490_v32 }
 0x35d   : >> { %v5271_v20 = vmul.f32 %v11397_v35, %v13163_v52  ;;  %v5272_v11 = vmul.f32 %v11400_v38, %v13163_v52  ;;  %v5273_v9 = vmul.f32 %v11407_v58, %v13163_v52  ;;  %v5274_v28 = vmul.f32 %v11410_v63, %v13163_v52 }
 0x35e   : >> { %v5275_v5 = vmul.f32 %v11413_v42, %v13163_v52  ;;  %v5276_v48 = vmul.f32 %v11416_v54, %v13163_v52  ;;  %v5277_v49 = vmul.f32 %v11419_v15, %v13163_v52  ;;  %v5278_v40 = vmul.f32 %v11422_v12, %v13163_v52  ;;  %v11523_v52 = vld [vmem:[%s6650_s17 + $0x130] sm:$0x3f] }
 0x35f   : >> { %v11456_v16 = vadd.f32 %v5263_v61, %v5216_v45  ;;  %v11458_v23 = vadd.f32 %v5264_v41, %v5217_v13  ;;  %v11460_v0 = vadd.f32 %v5265_v17, %v5218_v30  ;;  %v11462_v4 = vadd.f32 %v5266_v10, %v5219_v22  ;;  %v11487_v13 = vld [vmem:[%s6650_s17 + $0xd0] sm:$0x3f]  ;;  %13169 = vst [vmem:[#allocation26_spill] sm:$0xff] %v11523_v52  ;;  %v11526_v61 = vld [vmem:[%s6650_s17 + $0x148] sm:$0x3f] }
 0x360   : >> { %v11467_v34 = vadd.f32 %v5267_v8, %v5220_v50  ;;  %v11469_v25 = vadd.f32 %v5268_v53, %v5221_v31  ;;  %v11471_v46 = vadd.f32 %v5269_v2, %v5222_v19  ;;  %v11473_v59 = vadd.f32 %v5270_v56, %v5223_v60  ;;  %13164 = vst [vmem:[#allocation40_spill] sm:$0xff] %v11487_v13  ;;  %v11501_v31 = vld [vmem:[%s6650_s17 + $0x100] sm:$0x3f]  ;;  %v13167_v19 = vld [vmem:[#allocation20_spill] sm:$0xff] }
 0x361   : >> { %v11478_v14 = vadd.f32 %v5271_v20, %v5224_v33  ;;  %v11480_v44 = vadd.f32 %v5272_v11, %v5225_v24  ;;  %v11482_v39 = vadd.f32 %v5273_v9, %v5226_v51  ;;  %v11484_v45 = vadd.f32 %v5274_v28, %v5227_v18  ;;  %13166 = vst [vmem:[#allocation19_spill] sm:$0xff] %v11501_v31  ;;  %v11512_v18 = vld [vmem:[%s6650_s17 + $0x118] sm:$0x3f] }
 0x362   : >> { %v11492_v6 = vadd.f32 %v5275_v5, %v5228_v62  ;;  %v11494_v30 = vadd.f32 %v5276_v48, %v5229_v57  ;;  %v11496_v22 = vadd.f32 %v5277_v49, %v5230_v43  ;;  %v11498_v50 = vadd.f32 %v5278_v40, %v5231_v3  ;;  %13168 = vst [vmem:[#allocation27_spill] sm:$0xff] %v11512_v18 }
 0x363   : >> { %v5299_v60 = vmul.f32 %v11361_v55, %v13167_v19  ;;  %v5300_v33 = vmul.f32 %v11368_v47, %v13167_v19  ;;  %v5301_v24 = vmul.f32 %v11465_v7, %v13167_v19  ;;  %v5302_v51 = vmul.f32 %v11371_v21, %v13167_v19 }
 0x364   : >> { %v5303_v62 = vmul.f32 %v11374_v1, %v13167_v19  ;;  %v5304_v57 = vmul.f32 %v11476_v29, %v13167_v19  ;;  %v5305_v43 = vmul.f32 %v11381_v27, %v13167_v19  ;;  %v5306_v3 = vmul.f32 %v11384_v36, %v13167_v19 }
 0x365   : >> { %v5307_v41 = vmul.f32 %v11487_v13, %v13167_v19  ;;  %v5308_v17 = vmul.f32 %v11387_v26, %v13167_v19  ;;  %v5309_v10 = vmul.f32 %v11394_v37, %v13167_v19  ;;  %v5310_v8 = vmul.f32 %v11490_v32, %v13167_v19 }
 0x366   : >> { %v5311_v53 = vmul.f32 %v11397_v35, %v13167_v19  ;;  %v5312_v2 = vmul.f32 %v11400_v38, %v13167_v19  ;;  %v5313_v56 = vmul.f32 %v11501_v31, %v13167_v19  ;;  %v5314_v20 = vmul.f32 %v11407_v58, %v13167_v19 }
 0x367   : >> { %v5315_v11 = vmul.f32 %v11410_v63, %v13167_v19  ;;  %v5316_v9 = vmul.f32 %v11512_v18, %v13167_v19  ;;  %v5317_v28 = vmul.f32 %v11413_v42, %v13167_v19  ;;  %v5318_v5 = vmul.f32 %v11416_v54, %v13167_v19 }
 0x368   : >> { %v5319_v48 = vmul.f32 %v11523_v52, %v13167_v19  ;;  %v5320_v49 = vmul.f32 %v11419_v15, %v13167_v19  ;;  %v5321_v40 = vmul.f32 %v11422_v12, %v13167_v19  ;;  %v5322_v63 = vmul.f32 %v11526_v61, %v13167_v19 }
 0x369   : >> { %v5347_v58 = vrot.slane %v5299_v60, 1  ;;  %v5348_v18 = vrot.slane %v5300_v33, 1  ;;  %v5350_v31 = vrot.slane %v5301_v24, 1  ;;  %v5352_v38 = vrot.slane %v5302_v51, 1 }
 0x36a   : >> { %v5353_v42 = vrot.slane %v5303_v62, 1  ;;  %v5355_v35 = vrot.slane %v5304_v57, 1  ;;  %v5357_v32 = vrot.slane %v5305_v43, 1  ;;  %v5358_v54 = vrot.slane %v5306_v3, 1 }
 0x36b   : >> { %v5349_v37 = vsel %vm499_vm0, %v5347_v58, %v5348_v18  ;;  %v5351_v52 = vsel %vm499_vm0, %v5348_v18, %v5350_v31  ;;  %v5360_v26 = vrot.slane %v5307_v41, 1  ;;  %v5362_v15 = vrot.slane %v5308_v17, 1 }
 0x36c   : >> { %v5354_v13 = vsel %vm499_vm0, %v5352_v38, %v5353_v42  ;;  %v5356_v12 = vsel %vm499_vm0, %v5353_v42, %v5355_v35  ;;  %v5359_v19 = vsel %vm499_vm0, %v5357_v32, %v5358_v54  ;;  %v5363_v60 = vrot.slane %v5309_v10, 1 }
 0x36d   : >> { %v5361_v33 = vsel %vm499_vm0, %v5358_v54, %v5360_v26  ;;  %v5365_v24 = vrot.slane %v5310_v8, 1  ;;  %v5367_v51 = vrot.slane %v5311_v53, 1  ;;  %v5368_v62 = vrot.slane %v5312_v2, 1 }
 0x36e   : >> { %v5364_v57 = vsel %vm499_vm0, %v5362_v15, %v5363_v60  ;;  %v5370_v43 = vrot.slane %v5313_v56, 1  ;;  %v5372_v58 = vrot.slane %v5314_v20, 1  ;;  %v5373_v3 = vrot.slane %v5315_v11, 1 }
 0x36f   : >> { %v5366_v31 = vsel %vm499_vm0, %v5363_v60, %v5365_v24  ;;  %v5369_v18 = vsel %vm499_vm0, %v5367_v51, %v5368_v62  ;;  %v5375_v38 = vrot.slane %v5316_v9, 1  ;;  %v5377_v41 = vrot.slane %v5317_v28, 1  ;;  %v13175_v51 = vld [vmem:[#allocation14_spill] sm:$0xff] }
 0x370   : >> { %v5371_v35 = vsel %vm499_vm0, %v5368_v62, %v5370_v43  ;;  %v5374_v42 = vsel %vm499_vm0, %v5372_v58, %v5373_v3  ;;  %v5378_v32 = vrot.slane %v5318_v5, 1  ;;  %v5380_v26 = vrot.slane %v5319_v48, 1  ;;  %v13177_v58 = vld [vmem:[#allocation19_spill] sm:$0xff] }
 0x371   : >> { %v5376_v54 = vsel %vm499_vm0, %v5373_v3, %v5375_v38  ;;  %v5382_v17 = vrot.slane %v5320_v49, 1  ;;  %v5383_v10 = vrot.slane %v5321_v40, 1  ;;  %v5385_v15 = vrot.slane %v5322_v63, 1  ;;  %v13172_v49 = vld [vmem:[#allocation12_spill] sm:$0xff]  ;;  %v13179_v38 = vld [vmem:[#allocation33_spill] sm:$0xff] }
 0x372   : >> { %v5379_v8 = vsel %vm499_vm0, %v5377_v41, %v5378_v32  ;;  %v5381_v53 = vsel %vm499_vm0, %v5378_v32, %v5380_v26  ;;  %v11575_v2 = vadd.f32 %v5349_v37, %v11456_v16  ;;  %v11578_v56 = vadd.f32 %v5351_v52, %v11458_v23  ;;  %v13171_v52 = vld [vmem:[#allocation40_spill] sm:$0xff]  ;;  %v13181_v32 = vld [vmem:[#allocation17_spill] sm:$0xff] }
 0x373   : >> { %v5384_v20 = vsel %vm499_vm0, %v5382_v17, %v5383_v10  ;;  %v5386_v11 = vsel %vm499_vm0, %v5383_v10, %v5385_v15  ;;  %v11583_v9 = vadd.f32 %v5354_v13, %v11460_v0  ;;  %v11586_v28 = vadd.f32 %v5356_v12, %v11462_v4  ;;  %v13183_v10 = vld [vmem:[#allocation26_spill] sm:$0xff] }
 0x374   : >> { %v11589_v63 = vadd.f32 %v5359_v19, %v11467_v34  ;;  %v11592_v5 = vadd.f32 %v5361_v33, %v11469_v25  ;;  %v11595_v37 = vadd.f32 %v5364_v57, %v11471_v46  ;;  %v11598_v16 = vadd.f32 %v5366_v31, %v11473_v59  ;;  %v13173_v19 = vld [vmem:[#allocation13_spill] sm:$0xff]  ;;  %v13174_v33 = vld [vmem:[#allocation30_spill] sm:$0xff]  ;;  %v13176_v57 = vld [vmem:[#allocation15_spill] sm:$0xff] }
 0x375   : >> { %v11601_v23 = vadd.f32 %v5369_v18, %v11478_v14  ;;  %v11604_v0 = vadd.f32 %v5371_v35, %v11480_v44  ;;  %v11607_v12 = vadd.f32 %v5374_v42, %v11482_v39  ;;  %v11610_v4 = vadd.f32 %v5376_v54, %v11484_v45  ;;  %v13170_v14 = vld [vmem:[#allocation39_spill] sm:$0xff]  ;;  %v13178_v31 = vld [vmem:[#allocation16_spill] sm:$0xff]  ;;  %v13182_v54 = vld [vmem:[#allocation25_spill] sm:$0xff] }
 0x376   : >> { %v11613_v34 = vadd.f32 %v5379_v8, %v11492_v6  ;;  %v11616_v25 = vadd.f32 %v5381_v53, %v11494_v30  ;;  %v11619_v46 = vadd.f32 %v5384_v20, %v11496_v22  ;;  %v11622_v59 = vadd.f32 %v5386_v11, %v11498_v50  ;;  %v13180_v35 = vld [vmem:[#allocation27_spill] sm:$0xff]  ;;  %v13184_v8 = vld [vmem:[#allocation24_spill] sm:$0xff]  ;;  %v13185_v20 = vld [vmem:[#allocation38_spill] sm:$0xff] }
 0x377   : >> { %v5423_v44 = vmul.f32 %v11361_v55, %v13170_v14  ;;  %v5424_v39 = vmul.f32 %v11368_v47, %v13170_v14  ;;  %v5425_v45 = vmul.f32 %v11465_v7, %v13170_v14  ;;  %v5426_v13 = vmul.f32 %v11371_v21, %v13170_v14 }
 0x378   : >> { %v5427_v6 = vmul.f32 %v11374_v1, %v13170_v14  ;;  %v5428_v30 = vmul.f32 %v11476_v29, %v13170_v14  ;;  %v5429_v22 = vmul.f32 %v11381_v27, %v13170_v14  ;;  %v5430_v50 = vmul.f32 %v11384_v36, %v13170_v14 }
 0x379   : >> { %v5431_v48 = vmul.f32 %v13171_v52, %v13170_v14  ;;  %v5432_v40 = vmul.f32 %v13172_v49, %v13170_v14  ;;  %v5433_v60 = vmul.f32 %v13173_v19, %v13170_v14  ;;  %v5434_v24 = vmul.f32 %v13174_v33, %v13170_v14 }
 0x37a   : >> { %v5435_v62 = vmul.f32 %v13175_v51, %v13170_v14  ;;  %v5436_v43 = vmul.f32 %v13176_v57, %v13170_v14  ;;  %v5437_v3 = vmul.f32 %v13177_v58, %v13170_v14  ;;  %v5438_v18 = vmul.f32 %v13178_v31, %v13170_v14 }
 0x37b   : >> { %v5439_v41 = vmul.f32 %v13179_v38, %v13170_v14  ;;  %v5440_v42 = vmul.f32 %v13180_v35, %v13170_v14  ;;  %v5441_v26 = vmul.f32 %v13181_v32, %v13170_v14  ;;  %v5442_v17 = vmul.f32 %v13182_v54, %v13170_v14 }
 0x37c   : >> { %v5443_v15 = vmul.f32 %v13183_v10, %v13170_v14  ;;  %v5444_v53 = vmul.f32 %v13184_v8, %v13170_v14  ;;  %v5445_v11 = vmul.f32 %v13185_v20, %v13170_v14  ;;  %v5446_v38 = vmul.f32 %v11526_v61, %v13170_v14 }
 0x37d   : >> { %v5471_v31 = vrot.slane %v5423_v44, 2  ;;  %v5472_v35 = vrot.slane %v5424_v39, 2  ;;  %v5474_v58 = vrot.slane %v5425_v45, 2  ;;  %v5476_v57 = vrot.slane %v5426_v13, 2 }
 0x37e   : >> { %v5477_v32 = vrot.slane %v5427_v6, 2  ;;  %v5479_v51 = vrot.slane %v5428_v30, 2  ;;  %v5481_v33 = vrot.slane %v5429_v22, 2  ;;  %v5482_v54 = vrot.slane %v5430_v50, 2 }
 0x37f   : >> { %v5473_v19 = vsel %vm624_vm1, %v5471_v31, %v5472_v35  ;;  %v5475_v10 = vsel %vm624_vm1, %v5472_v35, %v5474_v58  ;;  %v5484_v49 = vrot.slane %v5431_v48, 2  ;;  %v5486_v8 = vrot.slane %v5432_v40, 2 }
 0x380   : >> { %v5478_v52 = vsel %vm624_vm1, %v5476_v57, %v5477_v32  ;;  %v5480_v20 = vsel %vm624_vm1, %v5477_v32, %v5479_v51  ;;  %v5483_v14 = vsel %vm624_vm1, %v5481_v33, %v5482_v54  ;;  %v5487_v44 = vrot.slane %v5433_v60, 2 }
 0x381   : >> { %v5485_v39 = vsel %vm624_vm1, %v5482_v54, %v5484_v49  ;;  %v5489_v45 = vrot.slane %v5434_v24, 2  ;;  %v5491_v13 = vrot.slane %v5435_v62, 2  ;;  %v5492_v6 = vrot.slane %v5436_v43, 2 }
 0x382   : >> { %v5488_v30 = vsel %vm624_vm1, %v5486_v8, %v5487_v44  ;;  %v5494_v22 = vrot.slane %v5437_v3, 2  ;;  %v5496_v50 = vrot.slane %v5438_v18, 2  ;;  %v5497_v31 = vrot.slane %v5439_v41, 2  ;;  %v13187_v8 = vld [vmem:[#allocation40_spill] sm:$0xff] }
 0x383   : >> { %v5490_v48 = vsel %vm624_vm1, %v5487_v44, %v5489_v45  ;;  %v5493_v40 = vsel %vm624_vm1, %v5491_v13, %v5492_v6  ;;  %v5499_v57 = vrot.slane %v5440_v42, 2  ;;  %v5501_v58 = vrot.slane %v5441_v26, 2  ;;  %v13191_v13 = vld [vmem:[#allocation14_spill] sm:$0xff] }
 0x384   : >> { %v5495_v51 = vsel %vm624_vm1, %v5492_v6, %v5494_v22  ;;  %v5498_v60 = vsel %vm624_vm1, %v5496_v50, %v5497_v31  ;;  %v5502_v33 = vrot.slane %v5442_v17, 2  ;;  %v5504_v49 = vrot.slane %v5443_v15, 2  ;;  %v13193_v50 = vld [vmem:[#allocation19_spill] sm:$0xff] }
 0x385   : >> { %v5500_v24 = vsel %vm624_vm1, %v5497_v31, %v5499_v57  ;;  %v5506_v62 = vrot.slane %v5444_v53, 2  ;;  %v5507_v43 = vrot.slane %v5445_v11, 2  ;;  %v5509_v35 = vrot.slane %v5446_v38, 2  ;;  %v13195_v57 = vld [vmem:[#allocation33_spill] sm:$0xff] }
 0x386   : >> { %v5503_v3 = vsel %vm624_vm1, %v5501_v58, %v5502_v33  ;;  %v5505_v18 = vsel %vm624_vm1, %v5502_v33, %v5504_v49  ;;  %v11687_v41 = vadd.f32 %v5473_v19, %v11575_v2  ;;  %v11690_v42 = vadd.f32 %v5475_v10, %v11578_v56  ;;  %v13197_v33 = vld [vmem:[#allocation17_spill] sm:$0xff] }
 0x387   : >> { %v5508_v32 = vsel %vm624_vm1, %v5506_v62, %v5507_v43  ;;  %v5510_v26 = vsel %vm624_vm1, %v5507_v43, %v5509_v35  ;;  %v11695_v54 = vadd.f32 %v5478_v52, %v11583_v9  ;;  %v11698_v17 = vadd.f32 %v5480_v20, %v11586_v28  ;;  %v13188_v20 = vld [vmem:[#allocation12_spill] sm:$0xff]  ;;  %v13199_v43 = vld [vmem:[#allocation26_spill] sm:$0xff] }
 0x388   : >> { %v11701_v38 = vadd.f32 %v5483_v14, %v11589_v63  ;;  %v11704_v15 = vadd.f32 %v5485_v39, %v11592_v5  ;;  %v11707_v2 = vadd.f32 %v5488_v30, %v11595_v37  ;;  %v11710_v56 = vadd.f32 %v5490_v48, %v11598_v16  ;;  %v13189_v14 = vld [vmem:[#allocation13_spill] sm:$0xff]  ;;  %v13190_v39 = vld [vmem:[#allocation30_spill] sm:$0xff]  ;;  %v13192_v30 = vld [vmem:[#allocation15_spill] sm:$0xff] }
 0x389   : >> { %v11713_v19 = vadd.f32 %v5493_v40, %v11601_v23  ;;  %v11716_v9 = vadd.f32 %v5495_v51, %v11604_v0  ;;  %v11719_v28 = vadd.f32 %v5498_v60, %v11607_v12  ;;  %v11722_v63 = vadd.f32 %v5500_v24, %v11610_v4  ;;  %v13186_v0 = vld [vmem:[#allocation32_spill] sm:$0xff]  ;;  %v13196_v51 = vld [vmem:[#allocation27_spill] sm:$0xff]  ;;  %v13198_v24 = vld [vmem:[#allocation25_spill] sm:$0xff] }
 0x38a   : >> { %v11725_v5 = vadd.f32 %v5503_v3, %v11613_v34  ;;  %v11728_v37 = vadd.f32 %v5505_v18, %v11616_v25  ;;  %v11731_v16 = vadd.f32 %v5508_v32, %v11619_v46  ;;  %v11734_v23 = vadd.f32 %v5510_v26, %v11622_v59  ;;  %v13194_v48 = vld [vmem:[#allocation16_spill] sm:$0xff]  ;;  %v13201_v32 = vld [vmem:[#allocation38_spill] sm:$0xff] }
 0x38b   : >> { %v5547_v52 = vmul.f32 %v11361_v55, %v13186_v0  ;;  %v5548_v12 = vmul.f32 %v11368_v47, %v13186_v0  ;;  %v5549_v4 = vmul.f32 %v11465_v7, %v13186_v0  ;;  %v5550_v34 = vmul.f32 %v11371_v21, %v13186_v0  ;;  %v13200_v3 = vld [vmem:[#allocation24_spill] sm:$0xff] }
 0x38c   : >> { %v5551_v25 = vmul.f32 %v11374_v1, %v13186_v0  ;;  %v5552_v46 = vmul.f32 %v11476_v29, %v13186_v0  ;;  %v5553_v59 = vmul.f32 %v11381_v27, %v13186_v0  ;;  %v5554_v10 = vmul.f32 %v11384_v36, %v13186_v0 }
 0x38d   : >> { %v5555_v53 = vmul.f32 %v13187_v8, %v13186_v0  ;;  %v5556_v11 = vmul.f32 %v13188_v20, %v13186_v0  ;;  %v5557_v44 = vmul.f32 %v13189_v14, %v13186_v0  ;;  %v5558_v45 = vmul.f32 %v13190_v39, %v13186_v0 }
 0x38e   : >> { %v5559_v6 = vmul.f32 %v13191_v13, %v13186_v0  ;;  %v5560_v22 = vmul.f32 %v13192_v30, %v13186_v0  ;;  %v5561_v31 = vmul.f32 %v13193_v50, %v13186_v0  ;;  %v5562_v40 = vmul.f32 %v13194_v48, %v13186_v0 }
 0x38f   : >> { %v5563_v58 = vmul.f32 %v13195_v57, %v13186_v0  ;;  %v5564_v60 = vmul.f32 %v13196_v51, %v13186_v0  ;;  %v5565_v49 = vmul.f32 %v13197_v33, %v13186_v0  ;;  %v5566_v62 = vmul.f32 %v13198_v24, %v13186_v0 }
 0x390   : >> { %v5567_v35 = vmul.f32 %v13199_v43, %v13186_v0  ;;  %v5568_v18 = vmul.f32 %v13200_v3, %v13186_v0  ;;  %v5569_v26 = vmul.f32 %v13201_v32, %v13186_v0  ;;  %v5570_v57 = vmul.f32 %v11526_v61, %v13186_v0 }
 0x391   : >> { %v5595_v48 = vrot.slane %v5547_v52, 3  ;;  %v5596_v51 = vrot.slane %v5548_v12, 3  ;;  %v5598_v50 = vrot.slane %v5549_v4, 3  ;;  %v5600_v30 = vrot.slane %v5550_v34, 3 }
 0x392   : >> { %v5601_v33 = vrot.slane %v5551_v25, 3  ;;  %v5603_v13 = vrot.slane %v5552_v46, 3  ;;  %v5605_v39 = vrot.slane %v5553_v59, 3  ;;  %v5606_v24 = vrot.slane %v5554_v10, 3 }
 0x393   : >> { %v5597_v14 = vsel %vm749_vm2, %v5595_v48, %v5596_v51  ;;  %v5599_v43 = vsel %vm749_vm2, %v5596_v51, %v5598_v50  ;;  %v5608_v20 = vrot.slane %v5555_v53, 3  ;;  %v5610_v3 = vrot.slane %v5556_v11, 3 }
 0x394   : >> { %v5602_v8 = vsel %vm749_vm2, %v5600_v30, %v5601_v33  ;;  %v5604_v32 = vsel %vm749_vm2, %v5601_v33, %v5603_v13  ;;  %v5607_v0 = vsel %vm749_vm2, %v5605_v39, %v5606_v24  ;;  %v5611_v52 = vrot.slane %v5557_v44, 3 }
 0x395   : >> { %v5609_v12 = vsel %vm749_vm2, %v5606_v24, %v5608_v20  ;;  %v5613_v4 = vrot.slane %v5558_v45, 3  ;;  %v5615_v34 = vrot.slane %v5559_v6, 3  ;;  %v5616_v25 = vrot.slane %v5560_v22, 3 }
 0x396   : >> { %v5612_v46 = vsel %vm749_vm2, %v5610_v3, %v5611_v52  ;;  %v5618_v59 = vrot.slane %v5561_v31, 3  ;;  %v5620_v10 = vrot.slane %v5562_v40, 3  ;;  %v5621_v48 = vrot.slane %v5563_v58, 3 }
 0x397   : >> { %v5614_v53 = vsel %vm749_vm2, %v5611_v52, %v5613_v4  ;;  %v5617_v11 = vsel %vm749_vm2, %v5615_v34, %v5616_v25  ;;  %v5623_v30 = vrot.slane %v5564_v60, 3  ;;  %v5625_v50 = vrot.slane %v5565_v49, 3 }
 0x398   : >> { %v5619_v13 = vsel %vm749_vm2, %v5616_v25, %v5618_v59  ;;  %v5622_v44 = vsel %vm749_vm2, %v5620_v10, %v5621_v48  ;;  %v5626_v39 = vrot.slane %v5566_v62, 3  ;;  %v5628_v20 = vrot.slane %v5567_v35, 3  ;;  %v13212_v59 = vld [vmem:[#allocation40_spill] sm:$0xff] }
 0x399   : >> { %v5624_v45 = vsel %vm749_vm2, %v5621_v48, %v5623_v30  ;;  %v5630_v6 = vrot.slane %v5568_v18, 3  ;;  %v5631_v22 = vrot.slane %v5569_v26, 3  ;;  %v5633_v51 = vrot.slane %v5570_v57, 3  ;;  %v13213_v48 = vld [vmem:[#allocation12_spill] sm:$0xff] }
 0x39a   : >> { %v5627_v31 = vsel %vm749_vm2, %v5625_v50, %v5626_v39  ;;  %v5629_v40 = vsel %vm749_vm2, %v5626_v39, %v5628_v20  ;;  %v11799_v58 = vadd.f32 %v5597_v14, %v11687_v41  ;;  %v11802_v60 = vadd.f32 %v5599_v43, %v11690_v42  ;;  %v13215_v50 = vld [vmem:[#allocation30_spill] sm:$0xff]  ;;  %v13217_v20 = vld [vmem:[#allocation15_spill] sm:$0xff] }
 0x39b   : >> { %v5632_v33 = vsel %vm749_vm2, %v5630_v6, %v5631_v22  ;;  %v5634_v49 = vsel %vm749_vm2, %v5631_v22, %v5633_v51  ;;  %v11807_v24 = vadd.f32 %v5602_v8, %v11695_v54  ;;  %v11810_v62 = vadd.f32 %v5604_v32, %v11698_v17  ;;  %v13203_v8 = vld [vmem:[#allocation8_spill] sm:$0xff]  ;;  %v13218_v6 = vld [vmem:[#allocation19_spill] sm:$0xff] }
 0x39c   : >> { %v11813_v57 = vadd.f32 %v5607_v0, %v11701_v38  ;;  %v11816_v35 = vadd.f32 %v5609_v12, %v11704_v15  ;;  %v11819_v41 = vadd.f32 %v5612_v46, %v11707_v2  ;;  %v11822_v42 = vadd.f32 %v5614_v53, %v11710_v56  ;;  %v13219_v51 = vld [vmem:[#allocation16_spill] sm:$0xff] }
 0x39d   : >> { %v11825_v14 = vadd.f32 %v5617_v11, %v11713_v19  ;;  %v11828_v54 = vadd.f32 %v5619_v13, %v11716_v9  ;;  %v11831_v17 = vadd.f32 %v5622_v44, %v11719_v28  ;;  %v11834_v38 = vadd.f32 %v5624_v45, %v11722_v63  ;;  %v13202_v9 = vld [vmem:[#allocation21_spill] sm:$0xff]  ;;  %v13204_v28 = vld [vmem:[#allocation22_spill] sm:$0xff] }
 0x39e   : >> { %v11837_v15 = vadd.f32 %v5627_v31, %v11725_v5  ;;  %v11840_v2 = vadd.f32 %v5629_v40, %v11728_v37  ;;  %v11843_v56 = vadd.f32 %v5632_v33, %v11731_v16  ;;  %v11846_v19 = vadd.f32 %v5634_v49, %v11734_v23  ;;  %v13205_v63 = vld [vmem:[#allocation9_spill] sm:$0xff]  ;;  %v13216_v44 = vld [vmem:[#allocation14_spill] sm:$0xff]  ;;  %v13221_v49 = vld [vmem:[#allocation27_spill] sm:$0xff] }
 0x39f   : >> { %v5670_v43 = vrot.slane %v13203_v8, %v13202_v9  ;;  %v11852_v3 = vrot.slane %v13203_v8, %v13204_v28  ;;  %v11856_v5 = vmul.f32 %v13205_v63, %v11361_v55  ;;  %v11860_v37 = vmul.f32 %v13205_v63, %v11368_v47  ;;  %v13214_v11 = vld [vmem:[#allocation13_spill] sm:$0xff] }
 0x3a0   : >> { %v11864_v16 = vmul.f32 %v13205_v63, %v11465_v7  ;;  %v11868_v23 = vmul.f32 %v13205_v63, %v11371_v21  ;;  %v11872_v18 = vmul.f32 %v13205_v63, %v11374_v1  ;;  %v11876_v32 = vmul.f32 %v13205_v63, %v11476_v29  ;;  %v13220_v40 = vld [vmem:[#allocation33_spill] sm:$0xff]  ;;  %v13226_v63 = vld [vmem:[#allocation38_spill] sm:$0xff] }
 0x3a1   : >> { %13206 = vst [vmem:[#allocation36_spill] sm:$0xff] %v11856_v5  ;;  %13207 = vst [vmem:[#allocation23_spill] sm:$0xff] %v11860_v37  ;;  %v5671_v26 = vmul.f32 %v11361_v55, %v5670_v43  ;;  %v5672_v0 = vmul.f32 %v11368_v47, %v5670_v43  ;;  %v5673_v52 = vmul.f32 %v11465_v7, %v5670_v43  ;;  %v13222_v28 = vld [vmem:[#allocation17_spill] sm:$0xff]  ;;  %v13225_v37 = vld [vmem:[#allocation24_spill] sm:$0xff] }
 0x3a2   : >> { %13208 = vst [vmem:[#allocation34_spill] sm:$0xff] %v11864_v16  ;;  %13209 = vst [vmem:[#allocation28_spill] sm:$0xff] %v11868_v23  ;;  %v5674_v12 = vmul.f32 %v11371_v21, %v5670_v43  ;;  %v5675_v4 = vmul.f32 %v11374_v1, %v5670_v43  ;;  %v5676_v34 = vmul.f32 %v11476_v29, %v5670_v43  ;;  %v13224_v23 = vld [vmem:[#allocation26_spill] sm:$0xff] }
 0x3a3   : >> { %13210 = vst [vmem:[#allocation37_spill] sm:$0xff] %v11872_v18  ;;  %13211 = vst [vmem:[#allocation29_spill] sm:$0xff] %v11876_v32  ;;  %v5677_v25 = vmul.f32 %v11381_v27, %v5670_v43  ;;  %v5678_v46 = vmul.f32 %v11384_v36, %v5670_v43  ;;  %v5679_v10 = vmul.f32 %v13212_v59, %v5670_v43  ;;  %v13223_v32 = vld [vmem:[#allocation25_spill] sm:$0xff] }
 0x3a4   : >> { %v5680_v53 = vmul.f32 %v13213_v48, %v5670_v43  ;;  %v5681_v30 = vmul.f32 %v13214_v11, %v5670_v43  ;;  %v5682_v13 = vmul.f32 %v13215_v50, %v5670_v43  ;;  %v5683_v39 = vmul.f32 %v13216_v44, %v5670_v43 }
 0x3a5   : >> { %v5684_v45 = vmul.f32 %v13217_v20, %v5670_v43  ;;  %v5685_v22 = vmul.f32 %v13218_v6, %v5670_v43  ;;  %v5686_v31 = vmul.f32 %v13219_v51, %v5670_v43  ;;  %v5687_v33 = vmul.f32 %v13220_v40, %v5670_v43 }
 0x3a6   : >> { %v5688_v9 = vmul.f32 %v13221_v49, %v5670_v43  ;;  %v5689_v8 = vmul.f32 %v13222_v28, %v5670_v43  ;;  %v5690_v18 = vmul.f32 %v13223_v32, %v5670_v43  ;;  %v5691_v16 = vmul.f32 %v13224_v23, %v5670_v43 }
 0x3a7   : >> { %v5692_v5 = vmul.f32 %v13225_v37, %v5670_v43  ;;  %v5693_v44 = vmul.f32 %v13226_v63, %v5670_v43  ;;  %v5694_v20 = vmul.f32 %v11526_v61, %v5670_v43  ;;  %v5719_v50 = vrot.slane %v5671_v26, 4 }
 0x3a8   : >> { %v5720_v6 = vrot.slane %v5672_v0, 4  ;;  %v5722_v11 = vrot.slane %v5673_v52, 4  ;;  %v5724_v51 = vrot.slane %v5674_v12, 4  ;;  %v5725_v48 = vrot.slane %v5675_v4, 4 }
 0x3a9   : >> { %v5727_v40 = vrot.slane %v5676_v34, 4  ;;  %v5729_v59 = vrot.slane %v5677_v25, 4  ;;  %v5730_v49 = vrot.slane %v5678_v46, 4  ;;  %v5732_v36 = vrot.slane %v5679_v10, 4 }
 0x3aa   : >> { %v5721_v28 = vsel %vm874_vm3, %v5719_v50, %v5720_v6  ;;  %v5723_v32 = vsel %vm874_vm3, %v5720_v6, %v5722_v11  ;;  %v5734_v23 = vrot.slane %v5680_v53, 4  ;;  %v5726_v37 = vsel %vm874_vm3, %v5724_v51, %v5725_v48 }
 0x3ab   : >> { %v5728_v63 = vsel %vm874_vm3, %v5725_v48, %v5727_v40  ;;  %v5731_v43 = vsel %vm874_vm3, %v5729_v59, %v5730_v49  ;;  %v5735_v26 = vrot.slane %v5681_v30, 4  ;;  %v5733_v0 = vsel %vm874_vm3, %v5730_v49, %v5732_v36 }
 0x3ac   : >> { %v5737_v52 = vrot.slane %v5682_v13, 4  ;;  %v5739_v12 = vrot.slane %v5683_v39, 4  ;;  %v5740_v4 = vrot.slane %v5684_v45, 4  ;;  %v5742_v25 = vrot.slane %v5685_v22, 4 }
 0x3ad   : >> { %v5736_v34 = vsel %vm874_vm3, %v5734_v23, %v5735_v26  ;;  %v5744_v46 = vrot.slane %v5686_v31, 4  ;;  %v5745_v50 = vrot.slane %v5687_v33, 4  ;;  %v5747_v11 = vrot.slane %v5688_v9, 4 }
 0x3ae   : >> { %v5738_v10 = vsel %vm874_vm3, %v5735_v26, %v5737_v52  ;;  %v5741_v53 = vsel %vm874_vm3, %v5739_v12, %v5740_v4  ;;  %v5749_v6 = vrot.slane %v5689_v8, 4  ;;  %v5743_v48 = vsel %vm874_vm3, %v5740_v4, %v5742_v25  ;;  %v13235_v12 = vld [vmem:[#allocation16_spill] sm:$0xff] }
 0x3af   : >> { %v5746_v59 = vsel %vm874_vm3, %v5744_v46, %v5745_v50  ;;  %v5750_v30 = vrot.slane %v5690_v18, 4  ;;  %v5752_v36 = vrot.slane %v5691_v16, 4  ;;  %v5748_v13 = vsel %vm874_vm3, %v5745_v50, %v5747_v11  ;;  %v13237_v46 = vld [vmem:[#allocation27_spill] sm:$0xff]  ;;  %v13239_v11 = vld [vmem:[#allocation25_spill] sm:$0xff] }
 0x3b0   : >> { %v5754_v39 = vrot.slane %v5692_v5, 4  ;;  %v5755_v45 = vrot.slane %v5693_v44, 4  ;;  %v5757_v23 = vrot.slane %v5694_v20, 4  ;;  %v11917_v31 = vadd.f32 %v5721_v28, %v11799_v58 }
 0x3b1   : >> { %v5751_v22 = vsel %vm874_vm3, %v5749_v6, %v5750_v30  ;;  %v5753_v51 = vsel %vm874_vm3, %v5750_v30, %v5752_v36  ;;  %v11920_v8 = vadd.f32 %v5723_v32, %v11802_v60  ;;  %v11925_v16 = vadd.f32 %v5726_v37, %v11807_v24  ;;  %v13241_v30 = vld [vmem:[#allocation24_spill] sm:$0xff] }
 0x3b2   : >> { %v5756_v40 = vsel %vm874_vm3, %v5754_v39, %v5755_v45  ;;  %v5758_v18 = vsel %vm874_vm3, %v5755_v45, %v5757_v23  ;;  %v11928_v5 = vadd.f32 %v5728_v63, %v11810_v62  ;;  %v11931_v44 = vadd.f32 %v5731_v43, %v11813_v57  ;;  %v13233_v43 = vld [vmem:[#allocation15_spill] sm:$0xff] }
 0x3b3   : >> { %v11934_v20 = vadd.f32 %v5733_v0, %v11816_v35  ;;  %v11937_v58 = vadd.f32 %v5736_v34, %v11819_v41  ;;  %v11940_v60 = vadd.f32 %v5738_v10, %v11822_v42  ;;  %v11943_v32 = vadd.f32 %v5741_v53, %v11825_v14  ;;  %v13234_v0 = vld [vmem:[#allocation19_spill] sm:$0xff]  ;;  %v13236_v34 = vld [vmem:[#allocation33_spill] sm:$0xff] }
 0x3b4   : >> { %v11946_v24 = vadd.f32 %v5743_v48, %v11828_v54  ;;  %v11949_v62 = vadd.f32 %v5746_v59, %v11831_v17  ;;  %v11952_v57 = vadd.f32 %v5748_v13, %v11834_v38  ;;  %v11955_v35 = vadd.f32 %v5751_v22, %v11837_v15  ;;  %v13238_v10 = vld [vmem:[#allocation17_spill] sm:$0xff]  ;;  %v13240_v48 = vld [vmem:[#allocation26_spill] sm:$0xff] }
 0x3b5   : >> { %v11958_v41 = vadd.f32 %v5753_v51, %v11840_v2  ;;  %v11961_v42 = vadd.f32 %v5756_v40, %v11843_v56  ;;  %v11964_v14 = vadd.f32 %v5758_v18, %v11846_v19  ;;  %v5795_v54 = vmul.f32 %v11361_v55, %v11852_v3  ;;  %v13227_v55 = vld [vmem:[#allocation11_spill] sm:$0xff]  ;;  %v13242_v13 = vld [vmem:[#allocation38_spill] sm:$0xff] }
 0x3b6   : >> { %v5796_v17 = vmul.f32 %v11368_v47, %v11852_v3  ;;  %v5797_v38 = vmul.f32 %v11465_v7, %v11852_v3  ;;  %v5798_v15 = vmul.f32 %v11371_v21, %v11852_v3  ;;  %v5799_v2 = vmul.f32 %v11374_v1, %v11852_v3  ;;  %v13228_v47 = vld [vmem:[#allocation40_spill] sm:$0xff]  ;;  %v13230_v21 = vld [vmem:[#allocation13_spill] sm:$0xff]  ;;  %v13231_v1 = vld [vmem:[#allocation30_spill] sm:$0xff] }
 0x3b7   : >> { %v5800_v56 = vmul.f32 %v11476_v29, %v11852_v3  ;;  %v5801_v19 = vmul.f32 %v11381_v27, %v11852_v3  ;;  %v5802_v63 = vmul.f32 %v13227_v55, %v11852_v3  ;;  %v5803_v37 = vmul.f32 %v13228_v47, %v11852_v3  ;;  %v13229_v7 = vld [vmem:[#allocation12_spill] sm:$0xff]  ;;  %v13232_v29 = vld [vmem:[#allocation14_spill] sm:$0xff] }
 0x3b8   : >> { %v5804_v33 = vmul.f32 %v13229_v7, %v11852_v3  ;;  %v5805_v49 = vmul.f32 %v13230_v21, %v11852_v3  ;;  %v5806_v9 = vmul.f32 %v13231_v1, %v11852_v3  ;;  %v5807_v28 = vmul.f32 %v13232_v29, %v11852_v3 }
 0x3b9   : >> { %v5808_v26 = vmul.f32 %v13233_v43, %v11852_v3  ;;  %v5809_v52 = vmul.f32 %v13234_v0, %v11852_v3  ;;  %v5810_v4 = vmul.f32 %v13235_v12, %v11852_v3  ;;  %v5811_v25 = vmul.f32 %v13236_v34, %v11852_v3 }
 0x3ba   : >> { %v5812_v50 = vmul.f32 %v13237_v46, %v11852_v3  ;;  %v5813_v53 = vmul.f32 %v13238_v10, %v11852_v3  ;;  %v5814_v6 = vmul.f32 %v13239_v11, %v11852_v3  ;;  %v5815_v59 = vmul.f32 %v13240_v48, %v11852_v3 }
 0x3bb   : >> { %v5816_v36 = vmul.f32 %v13241_v30, %v11852_v3  ;;  %v5817_v39 = vmul.f32 %v13242_v13, %v11852_v3  ;;  %v5818_v45 = vmul.f32 %v11526_v61, %v11852_v3  ;;  %v5843_v23 = vrot.slane %v5795_v54, 5 }
 0x3bc   : >> { %v5844_v22 = vrot.slane %v5796_v17, 5  ;;  %v5846_v51 = vrot.slane %v5797_v38, 5  ;;  %v5848_v40 = vrot.slane %v5798_v15, 5  ;;  %v5849_v18 = vrot.slane %v5799_v2, 5 }
 0x3bd   : >> { %v5851_v10 = vrot.slane %v5800_v56, 5  ;;  %v5853_v46 = vrot.slane %v5801_v19, 5  ;;  %v5854_v11 = vrot.slane %v5802_v63, 5  ;;  %v5856_v12 = vrot.slane %v5803_v37, 5 }
 0x3be   : >> { %v5845_v34 = vsel %vm999_vm4, %v5843_v23, %v5844_v22  ;;  %v5847_v48 = vsel %vm999_vm4, %v5844_v22, %v5846_v51  ;;  %v5858_v30 = vrot.slane %v5804_v33, 5  ;;  %v5850_v0 = vsel %vm999_vm4, %v5848_v40, %v5849_v18  ;;  %v13247_v40 = vld [vmem:[#allocation27_spill] sm:$0xff] }
 0x3bf   : >> { %v5852_v13 = vsel %vm999_vm4, %v5849_v18, %v5851_v10  ;;  %v5855_v3 = vsel %vm999_vm4, %v5853_v46, %v5854_v11  ;;  %v5859_v54 = vrot.slane %v5805_v49, 5  ;;  %v5857_v17 = vsel %vm999_vm4, %v5854_v11, %v5856_v12  ;;  %v13248_v18 = vld [vmem:[#allocation17_spill] sm:$0xff] }
 0x3c0   : >> { %v5861_v38 = vrot.slane %v5806_v9, 5  ;;  %v5863_v15 = vrot.slane %v5807_v28, 5  ;;  %v5864_v2 = vrot.slane %v5808_v26, 5  ;;  %v5866_v19 = vrot.slane %v5809_v52, 5 }
 0x3c1   : >> { %v5860_v56 = vsel %vm999_vm4, %v5858_v30, %v5859_v54  ;;  %v5868_v63 = vrot.slane %v5810_v4, 5  ;;  %v5869_v23 = vrot.slane %v5811_v25, 5  ;;  %v5871_v22 = vrot.slane %v5812_v50, 5 }
 0x3c2   : >> { %v5862_v37 = vsel %vm999_vm4, %v5859_v54, %v5861_v38  ;;  %v5865_v33 = vsel %vm999_vm4, %v5863_v15, %v5864_v2  ;;  %v5873_v51 = vrot.slane %v5813_v53, 5  ;;  %v5867_v10 = vsel %vm999_vm4, %v5864_v2, %v5866_v19  ;;  %v13250_v54 = vld [vmem:[#allocation26_spill] sm:$0xff]  ;;  %v13253_v19 = vld [vmem:[#allocation36_spill] sm:$0xff] }
 0x3c3   : >> { %v5870_v49 = vsel %vm999_vm4, %v5868_v63, %v5869_v23  ;;  %v5874_v46 = vrot.slane %v5814_v6, 5  ;;  %v5876_v12 = vrot.slane %v5815_v59, 5  ;;  %v5872_v9 = vsel %vm999_vm4, %v5869_v23, %v5871_v22  ;;  %v13252_v15 = vld [vmem:[#allocation38_spill] sm:$0xff]  ;;  %v13254_v23 = vld [vmem:[#allocation23_spill] sm:$0xff] }
 0x3c4   : >> { %v5878_v28 = vrot.slane %v5816_v36, 5  ;;  %v5879_v26 = vrot.slane %v5817_v39, 5  ;;  %v5881_v11 = vrot.slane %v5818_v45, 5  ;;  %v12029_v25 = vadd.f32 %v5845_v34, %v11917_v31  ;;  %v13246_v45 = vld [vmem:[#allocation33_spill] sm:$0xff] }
 0x3c5   : >> { %v5875_v52 = vsel %vm999_vm4, %v5873_v51, %v5874_v46  ;;  %v5877_v4 = vsel %vm999_vm4, %v5874_v46, %v5876_v12  ;;  %v12032_v50 = vadd.f32 %v5847_v48, %v11920_v8  ;;  %v12037_v59 = vadd.f32 %v5850_v0, %v11925_v16  ;;  %v13244_v48 = vld [vmem:[#allocation19_spill] sm:$0xff]  ;;  %v13256_v51 = vld [vmem:[#allocation28_spill] sm:$0xff]  ;;  %v13258_v12 = vld [vmem:[#allocation29_spill] sm:$0xff] }
 0x3c6   : >> { %v5880_v53 = vsel %vm999_vm4, %v5878_v28, %v5879_v26  ;;  %v5882_v6 = vsel %vm999_vm4, %v5879_v26, %v5881_v11  ;;  %v12040_v30 = vadd.f32 %v5852_v13, %v11928_v5  ;;  %v12043_v36 = vadd.f32 %v5855_v3, %v11931_v44  ;;  %v13245_v13 = vld [vmem:[#allocation16_spill] sm:$0xff]  ;;  %v13249_v3 = vld [vmem:[#allocation25_spill] sm:$0xff] }
 0x3c7   : >> { %v12046_v39 = vadd.f32 %v5857_v17, %v11934_v20  ;;  %v12049_v31 = vadd.f32 %v5860_v56, %v11937_v58  ;;  %v12052_v8 = vadd.f32 %v5862_v37, %v11940_v60  ;;  %v12055_v34 = vadd.f32 %v5865_v33, %v11943_v32  ;;  %v13251_v17 = vld [vmem:[#allocation24_spill] sm:$0xff]  ;;  %v13255_v33 = vld [vmem:[#allocation34_spill] sm:$0xff] }
 0x3c8   : >> { %v12058_v16 = vadd.f32 %v5867_v10, %v11946_v24  ;;  %v12061_v5 = vadd.f32 %v5870_v49, %v11949_v62  ;;  %v12064_v44 = vadd.f32 %v5872_v9, %v11952_v57  ;;  %v12067_v20 = vadd.f32 %v5875_v52, %v11955_v35  ;;  %v13243_v24 = vld [vmem:[#allocation9_spill] sm:$0xff] }
 0x3c9   : >> { %v12070_v58 = vadd.f32 %v5877_v4, %v11958_v41  ;;  %v12073_v60 = vadd.f32 %v5880_v53, %v11961_v42  ;;  %v12076_v32 = vadd.f32 %v5882_v6, %v11964_v14  ;;  %v5925_v0 = vmul.f32 %v13243_v24, %v11381_v27  ;;  %v13257_v49 = vld [vmem:[#allocation37_spill] sm:$0xff] }
 0x3ca   : >> { %v5926_v62 = vmul.f32 %v13243_v24, %v13227_v55  ;;  %v5927_v57 = vmul.f32 %v13243_v24, %v13228_v47  ;;  %v5928_v35 = vmul.f32 %v13243_v24, %v13229_v7  ;;  %v5929_v41 = vmul.f32 %v13243_v24, %v13230_v21 }
 0x3cb   : >> { %v5930_v42 = vmul.f32 %v13243_v24, %v13231_v1  ;;  %v5931_v14 = vmul.f32 %v13243_v24, %v13232_v29  ;;  %v5932_v27 = vmul.f32 %v13243_v24, %v13233_v43  ;;  %v5933_v55 = vmul.f32 %v13243_v24, %v13244_v48 }
 0x3cc   : >> { %v5934_v47 = vmul.f32 %v13243_v24, %v13245_v13  ;;  %v5935_v7 = vmul.f32 %v13243_v24, %v13246_v45  ;;  %v5936_v21 = vmul.f32 %v13243_v24, %v13247_v40  ;;  %v5937_v1 = vmul.f32 %v13243_v24, %v13248_v18 }
 0x3cd   : >> { %v5938_v29 = vmul.f32 %v13243_v24, %v13249_v3  ;;  %v5939_v43 = vmul.f32 %v13243_v24, %v13250_v54  ;;  %v5940_v38 = vmul.f32 %v13243_v24, %v13251_v17  ;;  %v5941_v2 = vmul.f32 %v13243_v24, %v13252_v15 }
 0x3ce   : >> { %v5942_v56 = vmul.f32 %v13243_v24, %v11526_v61  ;;  %v5967_v63 = vrot.slane %v13253_v19, 6  ;;  %v5968_v37 = vrot.slane %v13254_v23, 6  ;;  %v5970_v22 = vrot.slane %v13255_v33, 6 }
 0x3cf   : >> { %v5972_v10 = vrot.slane %v13256_v51, 6  ;;  %v5973_v46 = vrot.slane %v13257_v49, 6  ;;  %v5975_v9 = vrot.slane %v13258_v12, 6  ;;  %v5977_v26 = vrot.slane %v5925_v0, 6 }
 0x3d0   : >> { %v5969_v28 = vsel %vm1124_vm5, %v5967_v63, %v5968_v37  ;;  %v5978_v11 = vrot.slane %v5926_v62, 6  ;;  %v5980_v52 = vrot.slane %v5927_v57, 6  ;;  %v5971_v61 = vsel %vm1124_vm5, %v5968_v37, %v5970_v22 }
 0x3d1   : >> { %v5974_v4 = vsel %vm1124_vm5, %v5972_v10, %v5973_v46  ;;  %v5976_v53 = vsel %vm1124_vm5, %v5973_v46, %v5975_v9  ;;  %v5982_v6 = vrot.slane %v5928_v35, 6  ;;  %v5983_v45 = vrot.slane %v5929_v41, 6 }
 0x3d2   : >> { %v5979_v48 = vsel %vm1124_vm5, %v5977_v26, %v5978_v11  ;;  %v5981_v13 = vsel %vm1124_vm5, %v5978_v11, %v5980_v52  ;;  %v5985_v40 = vrot.slane %v5930_v42, 6  ;;  %v5987_v18 = vrot.slane %v5931_v14, 6 }
 0x3d3   : >> { %v5988_v3 = vrot.slane %v5932_v27, 6  ;;  %v5990_v54 = vrot.slane %v5933_v55, 6  ;;  %v5992_v0 = vrot.slane %v5934_v47, 6  ;;  %v5984_v62 = vsel %vm1124_vm5, %v5982_v6, %v5983_v45 }
 0x3d4   : >> { %v5986_v57 = vsel %vm1124_vm5, %v5983_v45, %v5985_v40  ;;  %v5993_v17 = vrot.slane %v5935_v7, 6  ;;  %v5995_v15 = vrot.slane %v5936_v21, 6  ;;  %v5997_v63 = vrot.slane %v5937_v1, 6 }
 0x3d5   : >> { %v5989_v35 = vsel %vm1124_vm5, %v5987_v18, %v5988_v3  ;;  %v5991_v19 = vsel %vm1124_vm5, %v5988_v3, %v5990_v54  ;;  %v5998_v23 = vrot.slane %v5938_v29, 6  ;;  %v6000_v14 = vrot.slane %v5939_v43, 6 }
 0x3d6   : >> { %v5994_v41 = vsel %vm1124_vm5, %v5992_v0, %v5993_v17  ;;  %v5996_v42 = vsel %vm1124_vm5, %v5993_v17, %v5995_v15  ;;  %v6002_v27 = vrot.slane %v5940_v38, 6  ;;  %v6003_v47 = vrot.slane %v5941_v2, 6 }
 0x3d7   : >> { %v5999_v55 = vsel %vm1124_vm5, %v5997_v63, %v5998_v23  ;;  %v6005_v7 = vrot.slane %v5942_v56, 6  ;;  %v6023_v21 = vadd.f32 %v5969_v28, %v12029_v25  ;;  %v6001_v1 = vsel %vm1124_vm5, %v5998_v23, %v6000_v14 }
 0x3d8   : >> { %v6024_v29 = vadd.f32 %v5971_v61, %v12032_v50  ;;  %v6025_v37 = vadd.f32 %v5974_v4, %v12037_v59  ;;  %v6026_v43 = vadd.f32 %v5976_v53, %v12040_v30  ;;  %v6004_v38 = vsel %vm1124_vm5, %v6002_v27, %v6003_v47 }
 0x3d9   : >> { %v6006_v33 = vsel %vm1124_vm5, %v6003_v47, %v6005_v7  ;;  %v6027_v2 = vadd.f32 %v5979_v48, %v12043_v36  ;;  %v6028_v56 = vadd.f32 %v5981_v13, %v12046_v39  ;;  %6041 = vst [vmem:[%s12134_s19] sm:$0xff] %v6023_v21  ;;  %v6029_v25 = vadd.f32 %v5984_v62, %v12049_v31 }
 0x3da   : >> { %v6030_v50 = vadd.f32 %v5986_v57, %v12052_v8  ;;  %v6031_v59 = vadd.f32 %v5989_v35, %v12055_v34  ;;  %v6032_v30 = vadd.f32 %v5991_v19, %v12058_v16  ;;  %6042 = vst [vmem:[%s12134_s19 + $0x8] sm:$0xff] %v6024_v29  ;;  %6043 = vst [vmem:[%s12134_s19 + $0x10] sm:$0xff] %v6025_v37 }
 0x3db   : >> { %6044 = vst [vmem:[%s12134_s19 + $0x18] sm:$0xff] %v6026_v43  ;;  %v6033_v36 = vadd.f32 %v5994_v41, %v12061_v5  ;;  %v6034_v39 = vadd.f32 %v5996_v42, %v12064_v44  ;;  %v6035_v31 = vadd.f32 %v5999_v55, %v12067_v20  ;;  %v6036_v8 = vadd.f32 %v6001_v1, %v12070_v58 }
 0x3dc   : >> { %6045 = vst [vmem:[%s12134_s19 + $0x20] sm:$0xff] %v6027_v2  ;;  %6046 = vst [vmem:[%s12134_s19 + $0x28] sm:$0xff] %v6028_v56  ;;  %v6037_v34 = vadd.f32 %v6004_v38, %v12073_v60  ;;  %v6038_v16 = vadd.f32 %v6006_v33, %v12076_v32 }
 0x3dd   : >> { %6047 = vst [vmem:[%s12134_s19 + $0x30] sm:$0xff] %v6029_v25  ;;  %6048 = vst [vmem:[%s12134_s19 + $0x38] sm:$0xff] %v6030_v50  ;;  %382 = sbr.rel (!%p380_p5) target bundleno = 66 (0x42), region = 84 }
 0x3de   : >> { %6049 = vst [vmem:[%s12134_s19 + $0x40] sm:$0xff] %v6031_v59  ;;  %6050 = vst [vmem:[%s12134_s19 + $0x48] sm:$0xff] %v6032_v30 }
 0x3df   : >> { %6051 = vst [vmem:[%s12134_s19 + $0x50] sm:$0xff] %v6033_v36  ;;  %6052 = vst [vmem:[%s12134_s19 + $0x58] sm:$0xff] %v6034_v39 }
 0x3e0   : >> { %6053 = vst [vmem:[%s12134_s19 + $0x60] sm:$0xff] %v6035_v31  ;;  %6054 = vst [vmem:[%s12134_s19 + $0x68] sm:$0xff] %v6036_v8 }
 0x3e1   : >> { %6055 = vst [vmem:[%s12134_s19 + $0x70] sm:$0xff] %v6037_v34  ;;  %6056 = vst [vmem:[%s12134_s19 + $0x78] sm:$0xff] %v6038_v16 }
 0x3e2 PF: > { %s13_s14 = sadd.s32 1, %s6437_s14   ;;  %s13259_s12 = smov %s6433_s13 }
 0x3e3   : > { %p10_p6 = scmp.ge.s32.totalorder %s13_s14, 4   ;;  %s13260_s13 = smov %s13262_s15 }
 0x3e5   :  { %12 = sbr.rel (!%p10_p6) target bundleno = 2 (0x2), region = 95 }

</bundles_post_ra>
